<compile_context>
chip_gen: v7x
topology: tpu7x:2x2x1
jax: 0.10.0
libtpu: 0.0.40
codegen_flags: <defaults>
</compile_context>

<pallas_src>
import functools

import jax
import jax.numpy as jnp
from jax.experimental import pallas as pl
from jax.experimental.pallas import tpu as pltpu

# Explicit scoped-VMEM cap (review item).  Actual per-step footprint at tb=128,
# K=8, H=32 is ~1.5 MiB (double-buffered gathered tile 256 KiB + padded [tb,8,128]
# relu intermediates ~1 MiB); 32 MiB leaves wide headroom and stays under v7x's
# 64 MiB physical per-TC VMEM and within v5e/v6e physical limits.
_VMEM_LIMIT_BYTES = 32 * 1024 * 1024


def _round_up(x, m):
    return ((x + m - 1) // m) * m


def _pgnn_kernel(dmax_ref, gath_ref, selfp_ref,
                 w1_ref, b1_ref, w2_ref, b2_ref, bh_ref, wp_ref, bp_ref,
                 pos_ref, struct_ref):
    """Fused dist_compute MLP + message scaling + hidden bias/ReLU + both heads.

    All matmul work is folded into the pre-projected inputs, so this kernel is
    pure element-wise / small-reduction work of size O(TB * K * H).
    """
    # ---- dist_compute: Nonlinear(1, H, 1) applied elementwise to dists_max ----
    d = dmax_ref[...]                                                   # [TB, K]
    hid = jnp.maximum(d[:, :, None] * w1_ref[...][None, :, :]
                      + b1_ref[...][None, :, :], 0.0)                   # [TB, K, H]
    dnew = jnp.sum(hid * w2_ref[...][None, :, :], axis=-1) + b2_ref[0, 0]  # [TB, K]

    # ---- hidden layer with the weight folded into the gathered projection ----
    # linear_hidden(cat(messages, self)) == dnew * feat_whm[argmax] + feat_whs + bh
    h = jnp.maximum(dnew[:, :, None] * gath_ref[...]
                    + selfp_ref[...][:, None, :]
                    + bh_ref[...][None, :, :], 0.0)                     # [TB, K, H]

    # ---- heads: one whole-block store per output (no masked offset sub-stores) ----
    pos_ref[...] = jnp.sum(h * wp_ref[...][None, :, :], axis=-1) + bp_ref[0, 0]
    struct_ref[...] = jnp.mean(h, axis=1)


@functools.partial(jax.jit, static_argnames=("tb",))
def pgnn_layer(feature, dists_max, dists_argmax, params, *, tb=128):
    N, F = feature.shape
    K = dists_max.shape[1]
    H = params["bh"].shape[-1]

    # Row tile: large enough to amortize the ~0.35us per-grid-step overhead, small
    # enough that N // tb >= 2 on realistic sizes so the "parallel" grid axis can
    # feed both TensorCores on v7x.  Remainder rows are handled by zero-padding.
    tb = max(8, min(tb, _round_up(N, 8)))
    Np = _round_up(N, tb)
    pad = Np - N
    if pad:
        feature = jnp.pad(feature, ((0, pad), (0, 0)))
        dists_max = jnp.pad(dists_max, ((0, pad), (0, 0)))
        dists_argmax = jnp.pad(dists_argmax, ((0, pad), (0, 0)))

    # ---- per-node projections of the node features (done ONCE per node, not per
    # (node, anchor) pair), then the row gather of the message projection.
    hi = jax.lax.Precision.HIGHEST
    feat_whm = jnp.dot(feature, params["whm_T"], precision=hi)          # [Np, H]
    feat_whs = jnp.dot(feature, params["whs_T"], precision=hi)          # [Np, H]
    # TODO(synk): replace with an in-kernel scalar-prefetch DMA gather for very
    # large N; Pallas TPU's gather lowering only covers take_along_axis patterns.
    gathered = feat_whm[dists_argmax]                                   # [Np, K, H]

    grid = (Np // tb,)
    row2 = lambda i: (i, 0)
    row3 = lambda i: (i, 0, 0)
    rep2 = lambda i: (0, 0)
    smem = pl.BlockSpec(memory_space=pltpu.MemorySpace.SMEM)

    pos, struct = pl.pallas_call(
        _pgnn_kernel,
        out_shape=(jax.ShapeDtypeStruct((Np, K), jnp.float32),
                   jax.ShapeDtypeStruct((Np, H), jnp.float32)),
        grid=grid,
        in_specs=[
            pl.BlockSpec((tb, K), row2),      # dists_max tile
            pl.BlockSpec((tb, K, H), row3),   # gathered feature @ Wh[:, :F]^T tile
            pl.BlockSpec((tb, H), row2),      # self rows of feature @ Wh[:, F:]^T
            pl.BlockSpec((1, H), rep2),       # dist_compute.linear1.weight^T
            pl.BlockSpec((1, H), rep2),       # dist_compute.linear1.bias
            pl.BlockSpec((1, H), rep2),       # dist_compute.linear2.weight
            smem,                             # dist_compute.linear2.bias (scalar)
            pl.BlockSpec((1, H), rep2),       # linear_hidden.bias
            pl.BlockSpec((1, H), rep2),       # linear_out_position.weight
            smem,                             # linear_out_position.bias (scalar)
        ],
        out_specs=(pl.BlockSpec((tb, K), row2),
                   pl.BlockSpec((tb, H), row2)),
        compiler_params=pltpu.CompilerParams(
            dimension_semantics=("parallel",),
            vmem_limit_bytes=_VMEM_LIMIT_BYTES),
    )(dists_max, gathered, feat_whs,
      params["w1"], params["b1"], params["w2"], params["b2"],
      params["bh"], params["wp"], params["bp"])

    return pos[:N], struct[:N]


def pgnn_ref(feature, dists_max, dists_argmax, params):
    """Pure-JAX reference mirroring the PyTorch forward (un-fused, un-folded)."""
    hid = jnp.maximum(dists_max[..., None] * params["w1"][0] + params["b1"][0], 0.0)
    dnew = jnp.sum(hid * params["w2"][0], axis=-1) + params["b2"][0, 0]
    N, K = dists_argmax.shape
    subset = feature[dists_argmax.reshape(-1)].reshape(N, K, feature.shape[1])
    messages = subset * dnew[..., None]
    self_feat = jnp.broadcast_to(feature[:, None, :], messages.shape)
    cat = jnp.concatenate([messages, self_feat], axis=-1)
    Wh = jnp.concatenate([params["whm_T"], params["whs_T"]], axis=0)     # (2F, H)
    h = jnp.maximum(jnp.dot(cat, Wh, precision=jax.lax.Precision.HIGHEST)
                    + params["bh"][0], 0.0)
    pos = jnp.sum(h * params["wp"][0], axis=-1) + params["bp"][0, 0]
    struct = jnp.mean(h, axis=1)
    return pos, struct


def xavier_uniform(key, shape, gain):
    # torch Linear weight layout: (fan_out, fan_in)
    fan_out, fan_in = shape
    bound = gain * (6.0 / (fan_in + fan_out)) ** 0.5
    return jax.random.uniform(key, shape, jnp.float32, -bound, bound)


def make_params(key, input_dim, output_dim):
    gain = 2.0 ** 0.5  # calculate_gain('relu')
    k1, k2, k3, k4 = jax.random.split(key, 4)
    F, H = input_dim, output_dim
    w1_t = xavier_uniform(k1, (H, 1), gain)       # dist_compute.linear1.weight
    w2_t = xavier_uniform(k2, (1, H), gain)       # dist_compute.linear2.weight
    wh_t = xavier_uniform(k3, (H, 2 * F), gain)   # linear_hidden.weight
    wp_t = xavier_uniform(k4, (1, H), gain)       # linear_out_position.weight
    return {
        "w1": w1_t.T,                                # (1, H)
        "b1": jnp.zeros((1, H), jnp.float32),        # init.constant_(0.0)
        "w2": w2_t,                                  # (1, H)
        "b2": jnp.zeros((1, 1), jnp.float32),
        "whm_T": wh_t[:, :F].T,                      # (F, H)  message half
        "whs_T": wh_t[:, F:].T,                      # (F, H)  self half
        "bh": jnp.zeros((1, H), jnp.float32),
        "wp": wp_t,                                  # (1, H)
        "bp": jnp.zeros((1, 1), jnp.float32),
    }


if __name__ == "__main__":
    N, F, K, H = 256, 16, 8, 32   # nodes, input_dim, anchor-set count, output_dim
    key = jax.random.PRNGKey(0)
    kp, kf, kd, ka = jax.random.split(key, 4)

    params = make_params(kp, F, H)
    feature = jax.random.normal(kf, (N, F), jnp.float32)
    dists_max = jax.random.uniform(kd, (N, K), jnp.float32)
    dists_argmax = jax.random.randint(ka, (N, K), 0, N, jnp.int32)

    pos, struct = pgnn_layer(feature, dists_max, dists_argmax, params, tb=128)
    jax.block_until_ready((pos, struct))

    pos_ref, struct_ref = pgnn_ref(feature, dists_max, dists_argmax, params)
    assert jnp.allclose(pos, pos_ref, atol=1e-4, rtol=1e-4), \
        float(jnp.max(jnp.abs(pos - pos_ref)))
    assert jnp.allclose(struct, struct_ref, atol=1e-4, rtol=1e-4), \
        float(jnp.max(jnp.abs(struct - struct_ref)))

    print("KERNEL_OK")
</pallas_src>

<mosaic_0001>
module attributes {stable_mosaic.version = 11 : i64} {
  func.func @_pgnn_kernel(%arg0: i32, %arg1: memref<128x8xf32, #tpu.memory_space<vmem>>, %arg2: memref<128x8x32xf32, #tpu.memory_space<vmem>>, %arg3: memref<128x32xf32, #tpu.memory_space<vmem>>, %arg4: memref<1x32xf32, #tpu.memory_space<vmem>>, %arg5: memref<1x32xf32, #tpu.memory_space<vmem>>, %arg6: memref<1x32xf32, #tpu.memory_space<vmem>>, %arg7: memref<1x1xf32, #tpu.memory_space<smem>>, %arg8: memref<1x32xf32, #tpu.memory_space<vmem>>, %arg9: memref<1x32xf32, #tpu.memory_space<vmem>>, %arg10: memref<1x1xf32, #tpu.memory_space<smem>>, %arg11: memref<128x8xf32, #tpu.memory_space<vmem>>, %arg12: memref<128x32xf32, #tpu.memory_space<vmem>>) attributes {dimension_semantics = [#tpu.dimension_semantics<parallel>], iteration_bounds = array<i64: 2>, scalar_prefetch = 0 : i64, scratch_operands = 0 : i64, tpu.core_type = #tpu.core_type<tc>, window_params = [{transform_indices = @transform_0, window_bounds = array<i64: 128, 8>}, {transform_indices = @transform_1, window_bounds = array<i64: 128, 8, 32>}, {transform_indices = @transform_2, window_bounds = array<i64: 128, 32>}, {pipeline_mode = #tpu.pipeline_mode<synchronous>, transform_indices = @transform_3, window_bounds = array<i64: 1, 32>}, {pipeline_mode = #tpu.pipeline_mode<synchronous>, transform_indices = @transform_4, window_bounds = array<i64: 1, 32>}, {pipeline_mode = #tpu.pipeline_mode<synchronous>, transform_indices = @transform_5, window_bounds = array<i64: 1, 32>}, {transform_indices = @transform_6, window_bounds = array<i64: 1, 1>}, {pipeline_mode = #tpu.pipeline_mode<synchronous>, transform_indices = @transform_7, window_bounds = array<i64: 1, 32>}, {pipeline_mode = #tpu.pipeline_mode<synchronous>, transform_indices = @transform_8, window_bounds = array<i64: 1, 32>}, {transform_indices = @transform_9, window_bounds = array<i64: 1, 1>}, {transform_indices = @transform_10, window_bounds = array<i64: 128, 8>}, {transform_indices = @transform_11, window_bounds = array<i64: 128, 32>}]} {
    %c0 = arith.constant 0 : index
    %c0_0 = arith.constant 0 : index
    %0 = vector.load %arg1[%c0, %c0_0] : memref<128x8xf32, #tpu.memory_space<vmem>>, vector<128x8xf32>
    %1 = vector.shape_cast %0 : vector<128x8xf32> to vector<128x8x1xf32>
    %c0_1 = arith.constant 0 : index
    %c0_2 = arith.constant 0 : index
    %2 = vector.load %arg4[%c0_1, %c0_2] : memref<1x32xf32, #tpu.memory_space<vmem>>, vector<1x32xf32>
    %3 = vector.shape_cast %2 : vector<1x32xf32> to vector<1x1x32xf32>
    %4 = vector.broadcast %1 : vector<128x8x1xf32> to vector<128x8x32xf32>
    %5 = vector.broadcast %3 : vector<1x1x32xf32> to vector<128x8x32xf32>
    %6 = arith.mulf %4, %5 : vector<128x8x32xf32>
    %c0_3 = arith.constant 0 : index
    %c0_4 = arith.constant 0 : index
    %7 = vector.load %arg5[%c0_3, %c0_4] : memref<1x32xf32, #tpu.memory_space<vmem>>, vector<1x32xf32>
    %8 = vector.shape_cast %7 : vector<1x32xf32> to vector<1x1x32xf32>
    %9 = vector.broadcast %8 : vector<1x1x32xf32> to vector<128x8x32xf32>
    %10 = arith.addf %6, %9 : vector<128x8x32xf32>
    %cst = arith.constant 0.000000e+00 : f32
    %11 = vector.broadcast %cst : f32 to vector<128x8x32xf32>
    %12 = arith.maximumf %10, %11 : vector<128x8x32xf32>
    %c0_5 = arith.constant 0 : index
    %c0_6 = arith.constant 0 : index
    %13 = vector.load %arg6[%c0_5, %c0_6] : memref<1x32xf32, #tpu.memory_space<vmem>>, vector<1x32xf32>
    %14 = vector.shape_cast %13 : vector<1x32xf32> to vector<1x1x32xf32>
    %15 = vector.broadcast %14 : vector<1x1x32xf32> to vector<128x8x32xf32>
    %16 = arith.mulf %12, %15 : vector<128x8x32xf32>
    %cst_7 = arith.constant dense<0.000000e+00> : vector<128x8xf32>
    %17 = vector.multi_reduction <add>, %16, %cst_7 [2] : vector<128x8x32xf32> to vector<128x8xf32>
    %c0_8 = arith.constant 0 : index
    %c0_9 = arith.constant 0 : index
    %18 = memref.load %arg7[%c0_8, %c0_9] : memref<1x1xf32, #tpu.memory_space<smem>>
    %19 = vector.broadcast %18 : f32 to vector<128x8xf32>
    %20 = arith.addf %17, %19 : vector<128x8xf32>
    %21 = vector.shape_cast %20 : vector<128x8xf32> to vector<128x8x1xf32>
    %c0_10 = arith.constant 0 : index
    %c0_11 = arith.constant 0 : index
    %c0_12 = arith.constant 0 : index
    %22 = vector.load %arg2[%c0_10, %c0_11, %c0_12] : memref<128x8x32xf32, #tpu.memory_space<vmem>>, vector<128x8x32xf32>
    %23 = vector.broadcast %21 : vector<128x8x1xf32> to vector<128x8x32xf32>
    %24 = arith.mulf %23, %22 : vector<128x8x32xf32>
    %c0_13 = arith.constant 0 : index
    %c0_14 = arith.constant 0 : index
    %25 = vector.load %arg3[%c0_13, %c0_14] : memref<128x32xf32, #tpu.memory_space<vmem>>, vector<128x32xf32>
    %26 = vector.shape_cast %25 : vector<128x32xf32> to vector<128x1x32xf32>
    %27 = vector.broadcast %26 : vector<128x1x32xf32> to vector<128x8x32xf32>
    %28 = arith.addf %24, %27 : vector<128x8x32xf32>
    %c0_15 = arith.constant 0 : index
    %c0_16 = arith.constant 0 : index
    %29 = vector.load %arg8[%c0_15, %c0_16] : memref<1x32xf32, #tpu.memory_space<vmem>>, vector<1x32xf32>
    %30 = vector.shape_cast %29 : vector<1x32xf32> to vector<1x1x32xf32>
    %31 = vector.broadcast %30 : vector<1x1x32xf32> to vector<128x8x32xf32>
    %32 = arith.addf %28, %31 : vector<128x8x32xf32>
    %cst_17 = arith.constant 0.000000e+00 : f32
    %33 = vector.broadcast %cst_17 : f32 to vector<128x8x32xf32>
    %34 = arith.maximumf %32, %33 : vector<128x8x32xf32>
    %c0_18 = arith.constant 0 : index
    %c0_19 = arith.constant 0 : index
    %35 = vector.load %arg9[%c0_18, %c0_19] : memref<1x32xf32, #tpu.memory_space<vmem>>, vector<1x32xf32>
    %36 = vector.shape_cast %35 : vector<1x32xf32> to vector<1x1x32xf32>
    %37 = vector.broadcast %36 : vector<1x1x32xf32> to vector<128x8x32xf32>
    %38 = arith.mulf %34, %37 : vector<128x8x32xf32>
    %cst_20 = arith.constant dense<0.000000e+00> : vector<128x8xf32>
    %39 = vector.multi_reduction <add>, %38, %cst_20 [2] : vector<128x8x32xf32> to vector<128x8xf32>
    %c0_21 = arith.constant 0 : index
    %c0_22 = arith.constant 0 : index
    %40 = memref.load %arg10[%c0_21, %c0_22] : memref<1x1xf32, #tpu.memory_space<smem>>
    %41 = vector.broadcast %40 : f32 to vector<128x8xf32>
    %42 = arith.addf %39, %41 : vector<128x8xf32>
    %c0_23 = arith.constant 0 : index
    %c0_24 = arith.constant 0 : index
    %43 = vector.load %arg11[%c0_23, %c0_24] : memref<128x8xf32, #tpu.memory_space<vmem>>, vector<128x8xf32>
    tpu.vector_store %arg11[%c0_23, %c0_24], %42 {strides = array<i32>} : memref<128x8xf32, #tpu.memory_space<vmem>>, vector<128x8xf32>,
    %cst_25 = arith.constant dense<0.000000e+00> : vector<128x32xf32>
    %44 = vector.multi_reduction <add>, %34, %cst_25 [1] : vector<128x8x32xf32> to vector<128x32xf32>
    %cst_26 = arith.constant 8.000000e+00 : f32
    %45 = vector.broadcast %cst_26 : f32 to vector<128x32xf32>
    %46 = arith.divf %44, %45 : vector<128x32xf32>
    %c0_27 = arith.constant 0 : index
    %c0_28 = arith.constant 0 : index
    %47 = vector.load %arg12[%c0_27, %c0_28] : memref<128x32xf32, #tpu.memory_space<vmem>>, vector<128x32xf32>
    tpu.vector_store %arg12[%c0_27, %c0_28], %46 {strides = array<i32>} : memref<128x32xf32, #tpu.memory_space<vmem>>, vector<128x32xf32>,
    return
  }
  func.func @transform_0(%arg0: i32) -> (i32, i32) {
    %c0_i32 = arith.constant 0 : i32
    %c0_i32_0 = arith.constant 0 : i32
    return %arg0, %c0_i32 : i32, i32
  }
  func.func @transform_1(%arg0: i32) -> (i32, i32, i32) {
    %c0_i32 = arith.constant 0 : i32
    %c0_i32_0 = arith.constant 0 : i32
    %c0_i32_1 = arith.constant 0 : i32
    return %arg0, %c0_i32, %c0_i32_0 : i32, i32, i32
  }
  func.func @transform_2(%arg0: i32) -> (i32, i32) {
    %c0_i32 = arith.constant 0 : i32
    %c0_i32_0 = arith.constant 0 : i32
    return %arg0, %c0_i32 : i32, i32
  }
  func.func @transform_3(%arg0: i32) -> (i32, i32) {
    %c0_i32 = arith.constant 0 : i32
    %c0_i32_0 = arith.constant 0 : i32
    %c0_i32_1 = arith.constant 0 : i32
    return %c0_i32, %c0_i32_0 : i32, i32
  }
  func.func @transform_4(%arg0: i32) -> (i32, i32) {
    %c0_i32 = arith.constant 0 : i32
    %c0_i32_0 = arith.constant 0 : i32
    %c0_i32_1 = arith.constant 0 : i32
    return %c0_i32, %c0_i32_0 : i32, i32
  }
  func.func @transform_5(%arg0: i32) -> (i32, i32) {
    %c0_i32 = arith.constant 0 : i32
    %c0_i32_0 = arith.constant 0 : i32
    %c0_i32_1 = arith.constant 0 : i32
    return %c0_i32, %c0_i32_0 : i32, i32
  }
  func.func @transform_6(%arg0: i32) -> (i32, i32) {
    %c0_i32 = arith.constant 0 : i32
    %c0_i32_0 = arith.constant 0 : i32
    %c0_i32_1 = arith.constant 0 : i32
    return %c0_i32, %c0_i32_0 : i32, i32
  }
  func.func @transform_7(%arg0: i32) -> (i32, i32) {
    %c0_i32 = arith.constant 0 : i32
    %c0_i32_0 = arith.constant 0 : i32
    %c0_i32_1 = arith.constant 0 : i32
    return %c0_i32, %c0_i32_0 : i32, i32
  }
  func.func @transform_8(%arg0: i32) -> (i32, i32) {
    %c0_i32 = arith.constant 0 : i32
    %c0_i32_0 = arith.constant 0 : i32
    %c0_i32_1 = arith.constant 0 : i32
    return %c0_i32, %c0_i32_0 : i32, i32
  }
  func.func @transform_9(%arg0: i32) -> (i32, i32) {
    %c0_i32 = arith.constant 0 : i32
    %c0_i32_0 = arith.constant 0 : i32
    %c0_i32_1 = arith.constant 0 : i32
    return %c0_i32, %c0_i32_0 : i32, i32
  }
  func.func @transform_10(%arg0: i32) -> (i32, i32) {
    %c0_i32 = arith.constant 0 : i32
    %c0_i32_0 = arith.constant 0 : i32
    return %arg0, %c0_i32 : i32, i32
  }
  func.func @transform_11(%arg0: i32) -> (i32, i32) {
    %c0_i32 = arith.constant 0 : i32
    %c0_i32_0 = arith.constant 0 : i32
    return %arg0, %c0_i32 : i32, i32
  }
}

</mosaic_0001>

<bundles_post_ra>
// kernel: pgnn_layer.1
= control target key start
LH: loop header
LB: loop body
LE: loop exit
PB: predicated region body
PF: predicated region fallthrough
CT: control target
= control target key end

     0   :  { %s7494_s21 = smov 0   ;;  %s12067_s0 = inlined_call_operand.vmem [shape: f32[256,8], index: 0, kind: input, shape index: {}]   ;;  %s12068_s1 = inlined_call_operand.vmem [shape: f32[256,8,32], index: 1, kind: input, shape index: {}]   ;;  %s12069_s2 = inlined_call_operand.vmem [shape: f32[256,32], index: 2, kind: input, shape index: {}]   ;;  %s12070_s3 = inlined_call_operand.vmem [shape: f32[1,32], index: 3, kind: input, shape index: {}]   ;;  %s12071_s4 = inlined_call_operand.vmem [shape: f32[1,32], index: 4, kind: input, shape index: {}]   ;;  %s12072_s5 = inlined_call_operand.vmem [shape: f32[1,32], index: 5, kind: input, shape index: {}]   ;;  %s12073_s6 = inlined_call_operand.<no memory space> [shape: f32[1,1], index: 6, kind: input, shape index: {}]   ;;  %s12074_s7 = inlined_call_operand.vmem [shape: f32[1,32], index: 7, kind: input, shape index: {}]   ;;  %s12075_s8 = inlined_call_operand.vmem [shape: f32[1,32], index: 8, kind: input, shape index: {}]   ;;  %s12076_s9 = inlined_call_operand.<no memory space> [shape: f32[1,1], index: 9, kind: input, shape index: {}]   ;;  %s12077_s10 = inlined_call_operand.vmem [shape: f32[256,8], index: 10, kind: output, shape index: {0}]   ;;  %s12078_s11 = inlined_call_operand.vmem [shape: f32[256,32], index: 11, kind: output, shape index: {1}]  }
   0x1   :  { %17 = sst [smem:[#allocation2]] %s12073_s6 }
   0x2   :  { %18 = sst [smem:[#allocation3]] %s12076_s9 }
   0x3 LB: > { %s7367_s22 = sadd.s32 4294967295, %s7425_s21   ;;  %p7371_p0 = scmp.ge.s32.totalorder %s7425_s21, 1  ;;  %s7425_s21 = sphi %s7494_s21, %s24_s21  }
   0x4   : > { %p365_p1 = scmp.lt.s32.totalorder %s7425_s21, 3 }
   0x6   : > { %p366_p2 = pnand %p7371_p0, %p365_p1 }
   0x8   : > { %369 = sbr.rel (%p366_p2) target bundleno = 1203 (0x4b3), region = 60 }
   0xf   : > { %s7372_s6 = sshll.u32 %s7367_s22, 4  ;;  %v466_v0 = vlaneseq  ;;  %vm1895_vm0 = vcmask 261120   ;;  %s8605_s20 = sld [smem:[#allocation2]]  ;;  %vm5804_vm1 = vcmask 1041409   ;;  %vm5806_vm2 = vcmask 1042434  }
  0x10   : > { %p421_p3 = scmp.lt.s32.totalorder %s7372_s6, 31  ;;  %s9100_s24 = sshll.u32 %s7367_s22, 7  ;;  %vm5808_vm3 = vcmask 1043459   ;;  %vm5810_vm4 = vcmask 1044484   ;;  %vm5812_vm5 = vcmask 1045509   ;;  %vm5814_vm6 = vcmask 1046534  }
  0x11   : > { %v7504_v1 = vshrl.u32 %v466_v0, 7  ;;  %v5291_v2 = vand.u32 127, %v466_v0  ;;  %p427_p4 = scmp.lt.s32.totalorder %s9100_s24, 255  ;;  %vm5816_vm7 = vcmask 1047559   ;;  %vm5939_vm8 = vcmask 64512  }
  0x12   : > { %s12606_s6 = smov (!%p421_p3, %s7372_s6), 31 }
  0x13   : > { %v7507_v3 = vsub.s32 0, %v7504_v1  ;;  %v7510_v4 = vsub.s32 2, %v7504_v1  ;;  %v7513_v5 = vsub.s32 %v5291_v2, %v7504_v1  ;;  %s7515_s9 = sshll.u32 %s12606_s6, 3  ;;  %v7524_v6 = vsub.s32 3, %v7504_v1  ;;  %s12608_s24 = smov (!%p427_p4, %s9100_s24), 255 }
  0x14   : > { %s7521_s25 = scalar_lea.vmem %s12067_s0, %s7515_s9  ;;  %v7527_v7 = vsub.s32 1, %v7504_v1  ;;  %v7535_v13 = vsub.s32 5, %v7504_v1  ;;  %v7538_v14 = vsub.s32 4, %v7504_v1  ;;  %v7543_v17 = vsub.s32 7, %v7504_v1  ;;  %s8562_s19 = scalar_lea.vmem %s12069_s2, %s7515_s9 }
  0x15   : > { %12103 = vst [vmem:[#allocation4_spill] sm:$0xff] %v7507_v3  ;;  %12104 = vst [vmem:[#allocation5_spill] sm:$0xff] %v7513_v5  ;;  %v450_v8 = vld [vmem:[%s7521_s25] sm:$0xff]  ;;  %v7546_v18 = vsub.s32 6, %v7504_v1  ;;  %v451_v21 = vld [vmem:[%s7521_s25 + $0x8] sm:$0xff]  ;;  %s7375_s22 = sshll.u32 %s12608_s24, 3  ;;  %s9613_s15 = scalar_lea.vmem %s12078_s11, %s7515_s9 }
  0x16   : > { %v483_v9 = vrot.slane %v450_v8, %v7510_v4  ;;  %v469_v10 = vrot.slane %v450_v8, %v7507_v3  ;;  %v490_v11 = vrot.slane %v450_v8, %v7524_v6  ;;  %v476_v12 = vrot.slane %v450_v8, %v7527_v7  ;;  %v452_v30 = vld [vmem:[%s7521_s25 + $0x10] sm:$0xff]  ;;  %v453_v39 = vld [vmem:[%s7521_s25 + $0x18] sm:$0xff]  ;;  %v454_v48 = vld [vmem:[%s7521_s25 + $0x20] sm:$0xff]  ;;  %s9224_s27 = scalar_lea.vmem %s12068_s1, %s7375_s22  ;;  %s10992_s12 = scalar_lea.vmem %s12077_s10, %s7515_s9 }
  0x17   : > { %v504_v15 = vrot.slane %v450_v8, %v7535_v13  ;;  %v497_v16 = vrot.slane %v450_v8, %v7538_v14  ;;  %v518_v19 = vrot.slane %v450_v8, %v7543_v17  ;;  %v511_v20 = vrot.slane %v450_v8, %v7546_v18  ;;  %v455_v57 = vld [vmem:[%s7521_s25 + $0x28] sm:$0xff]  ;;  %v456_v8 = vld [vmem:[%s7521_s25 + $0x30] sm:$0xff] }
  0x18   : > { %485 = vbcast.lane.b32.xlu1 %v483_v9, 256  ;;  %471 = vbcast.lane.b32.xlu0 %v469_v10, 256  ;;  %v532_v22 = vrot.slane %v451_v21, %v7527_v7  ;;  %v525_v23 = vrot.slane %v451_v21, %v7507_v3  ;;  %v546_v24 = vrot.slane %v451_v21, %v7524_v6 }
  0x19   : > { %v539_v25 = vrot.slane %v451_v21, %v7510_v4  ;;  %v560_v26 = vrot.slane %v451_v21, %v7535_v13  ;;  %v553_v27 = vrot.slane %v451_v21, %v7538_v14  ;;  %v574_v28 = vrot.slane %v451_v21, %v7543_v17 }
  0x1a   : > { %v567_v29 = vrot.slane %v451_v21, %v7546_v18  ;;  %v588_v31 = vrot.slane %v452_v30, %v7527_v7  ;;  %v581_v32 = vrot.slane %v452_v30, %v7507_v3  ;;  %v602_v33 = vrot.slane %v452_v30, %v7524_v6  ;;  %v457_v21 = vld [vmem:[%s7521_s25 + $0x38] sm:$0xff] }
  0x1b   : > { %v595_v34 = vrot.slane %v452_v30, %v7510_v4  ;;  %v616_v35 = vrot.slane %v452_v30, %v7535_v13  ;;  %v609_v36 = vrot.slane %v452_v30, %v7538_v14  ;;  %v630_v37 = vrot.slane %v452_v30, %v7543_v17 }
  0x1c   : > { %492 = vbcast.lane.b32.xlu1 %v490_v11, 256  ;;  %478 = vbcast.lane.b32.xlu0 %v476_v12, 256  ;;  %v623_v38 = vrot.slane %v452_v30, %v7546_v18  ;;  %v644_v40 = vrot.slane %v453_v39, %v7527_v7  ;;  %v637_v41 = vrot.slane %v453_v39, %v7507_v3 }
  0x1d   : > { %v658_v42 = vrot.slane %v453_v39, %v7524_v6  ;;  %v651_v43 = vrot.slane %v453_v39, %v7510_v4  ;;  %v672_v44 = vrot.slane %v453_v39, %v7535_v13  ;;  %v665_v45 = vrot.slane %v453_v39, %v7538_v14 }
  0x1e   : > { %v686_v46 = vrot.slane %v453_v39, %v7543_v17  ;;  %v679_v47 = vrot.slane %v453_v39, %v7546_v18  ;;  %v700_v49 = vrot.slane %v454_v48, %v7527_v7  ;;  %v693_v50 = vrot.slane %v454_v48, %v7507_v3 }
  0x1f   : > { %v714_v51 = vrot.slane %v454_v48, %v7524_v6  ;;  %v707_v52 = vrot.slane %v454_v48, %v7510_v4  ;;  %v728_v53 = vrot.slane %v454_v48, %v7535_v13  ;;  %v721_v54 = vrot.slane %v454_v48, %v7538_v14 }
  0x20   : > { %506 = vbcast.lane.b32.xlu1 %v504_v15, 256  ;;  %499 = vbcast.lane.b32.xlu0 %v497_v16, 256  ;;  %v742_v55 = vrot.slane %v454_v48, %v7543_v17  ;;  %v735_v56 = vrot.slane %v454_v48, %v7546_v18  ;;  %v756_v58 = vrot.slane %v455_v57, %v7527_v7 }
  0x21   : > { %v749_v59 = vrot.slane %v455_v57, %v7507_v3  ;;  %v770_v60 = vrot.slane %v455_v57, %v7524_v6  ;;  %v763_v61 = vrot.slane %v455_v57, %v7510_v4  ;;  %v784_v62 = vrot.slane %v455_v57, %v7535_v13 }
  0x22   : > { %v777_v63 = vrot.slane %v455_v57, %v7538_v14  ;;  %v798_v0 = vrot.slane %v455_v57, %v7543_v17  ;;  %v791_v2 = vrot.slane %v455_v57, %v7546_v18  ;;  %v812_v9 = vrot.slane %v456_v8, %v7527_v7 }
  0x23   : > { %v805_v10 = vrot.slane %v456_v8, %v7507_v3  ;;  %v826_v11 = vrot.slane %v456_v8, %v7524_v6  ;;  %v819_v12 = vrot.slane %v456_v8, %v7510_v4  ;;  %v840_v15 = vrot.slane %v456_v8, %v7535_v13 }
  0x24   : > { %520 = vbcast.lane.b32.xlu1 %v518_v19, 256  ;;  %513 = vbcast.lane.b32.xlu0 %v511_v20, 256  ;;  %v833_v16 = vrot.slane %v456_v8, %v7538_v14  ;;  %v854_v19 = vrot.slane %v456_v8, %v7543_v17  ;;  %v847_v20 = vrot.slane %v456_v8, %v7546_v18 }
  0x28   : > { %534 = vbcast.lane.b32.xlu1 %v532_v22, 256  ;;  %527 = vbcast.lane.b32.xlu0 %v525_v23, 256  ;;  %v868_v22 = vrot.slane %v457_v21, %v7527_v7  ;;  %v861_v23 = vrot.slane %v457_v21, %v7507_v3 }
  0x2c   : > { %548 = vbcast.lane.b32.xlu1 %v546_v24, 256  ;;  %541 = vbcast.lane.b32.xlu0 %v539_v25, 256  ;;  %v882_v24 = vrot.slane %v457_v21, %v7524_v6  ;;  %v875_v25 = vrot.slane %v457_v21, %v7510_v4 }
  0x30   : > { %562 = vbcast.lane.b32.xlu1 %v560_v26, 256  ;;  %555 = vbcast.lane.b32.xlu0 %v553_v27, 256 }
  0x34   : > { %576 = vbcast.lane.b32.xlu1 %v574_v28, 256  ;;  %569 = vbcast.lane.b32.xlu0 %v567_v29, 256  ;;  %v896_v28 = vrot.slane %v457_v21, %v7535_v13  ;;  %v889_v29 = vrot.slane %v457_v21, %v7538_v14 }
  0x38   : > { %590 = vbcast.lane.b32.xlu1 %v588_v31, 256  ;;  %583 = vbcast.lane.b32.xlu0 %v581_v32, 256  ;;  %v910_v32 = vrot.slane %v457_v21, %v7543_v17 }
  0x3c   : > { %604 = vbcast.lane.b32.xlu1 %v602_v33, 256  ;;  %597 = vbcast.lane.b32.xlu0 %v595_v34, 256  ;;  %v903_v33 = vrot.slane %v457_v21, %v7546_v18  ;;  %v458_v34 = vld [vmem:[%s7521_s25 + $0x40] sm:$0xff] }
  0x40   : > { %618 = vbcast.lane.b32.xlu1 %v616_v35, 256  ;;  %611 = vbcast.lane.b32.xlu0 %v609_v36, 256 }
  0x44   : > { %632 = vbcast.lane.b32.xlu1 %v630_v37, 256  ;;  %625 = vbcast.lane.b32.xlu0 %v623_v38, 256  ;;  %v924_v37 = vrot.slane %v458_v34, %v7527_v7  ;;  %v917_v38 = vrot.slane %v458_v34, %v7507_v3 }
  0x48   : > { %646 = vbcast.lane.b32.xlu1 %v644_v40, 256  ;;  %639 = vbcast.lane.b32.xlu0 %v637_v41, 256  ;;  %v938_v41 = vrot.slane %v458_v34, %v7524_v6 }
  0x4c   : > { %660 = vbcast.lane.b32.xlu1 %v658_v42, 256  ;;  %653 = vbcast.lane.b32.xlu0 %v651_v43, 256  ;;  %v931_v42 = vrot.slane %v458_v34, %v7510_v4 }
  0x50   : > { %674 = vbcast.lane.b32.xlu1 %v672_v44, 256  ;;  %667 = vbcast.lane.b32.xlu0 %v665_v45, 256  ;;  %v952_v45 = vrot.slane %v458_v34, %v7535_v13 }
  0x54   : > { %688 = vbcast.lane.b32.xlu1 %v686_v46, 256  ;;  %681 = vbcast.lane.b32.xlu0 %v679_v47, 256  ;;  %v945_v46 = vrot.slane %v458_v34, %v7538_v14 }
  0x58   : > { %702 = vbcast.lane.b32.xlu1 %v700_v49, 256  ;;  %695 = vbcast.lane.b32.xlu0 %v693_v50, 256  ;;  %v966_v49 = vrot.slane %v458_v34, %v7543_v17  ;;  %v959_v50 = vrot.slane %v458_v34, %v7546_v18 }
  0x5c   : > { %716 = vbcast.lane.b32.xlu1 %v714_v51, 256  ;;  %709 = vbcast.lane.b32.xlu0 %v707_v52, 256  ;;  %v459_v51 = vld [vmem:[%s7521_s25 + $0x48] sm:$0xff] }
  0x5d   : > { %v1022_v8 = vrot.slane %v459_v51, %v7543_v17 }
  0x60   : > { %730 = vbcast.lane.b32.xlu1 %v728_v53, 256  ;;  %723 = vbcast.lane.b32.xlu0 %v721_v54, 256  ;;  %v980_v54 = vrot.slane %v459_v51, %v7527_v7 }
  0x64   : > { %744 = vbcast.lane.b32.xlu1 %v742_v55, 256  ;;  %737 = vbcast.lane.b32.xlu0 %v735_v56, 256  ;;  %v973_v55 = vrot.slane %v459_v51, %v7507_v3 }
  0x68   : > { %758 = vbcast.lane.b32.xlu1 %v756_v58, 256  ;;  %751 = vbcast.lane.b32.xlu0 %v749_v59, 256  ;;  %v994_v58 = vrot.slane %v459_v51, %v7524_v6  ;;  %v987_v59 = vrot.slane %v459_v51, %v7510_v4 }
  0x6c   : > { %772 = vbcast.lane.b32.xlu1 %v770_v60, 256  ;;  %765 = vbcast.lane.b32.xlu0 %v763_v61, 256 }
  0x70   : > { %786 = vbcast.lane.b32.xlu1 %v784_v62, 256  ;;  %779 = vbcast.lane.b32.xlu0 %v777_v63, 256  ;;  %v1008_v62 = vrot.slane %v459_v51, %v7535_v13  ;;  %v1001_v63 = vrot.slane %v459_v51, %v7538_v14 }
  0x74   : > { %800 = vbcast.lane.b32.xlu1 %v798_v0, 256  ;;  %793 = vbcast.lane.b32.xlu0 %v791_v2, 256 }
  0x78   : > { %814 = vbcast.lane.b32.xlu1 %v812_v9, 256  ;;  %807 = vbcast.lane.b32.xlu0 %v805_v10, 256  ;;  %v1015_v9 = vrot.slane %v459_v51, %v7546_v18  ;;  %v460_v10 = vld [vmem:[%s7521_s25 + $0x50] sm:$0xff] }
  0x79   : > { %v1050_v21 = vrot.slane %v460_v10, %v7524_v6  ;;  %v1071_v34 = vrot.slane %v460_v10, %v7546_v18 }
  0x7c   : > { %828 = vbcast.lane.b32.xlu1 %v826_v11, 256  ;;  %821 = vbcast.lane.b32.xlu0 %v819_v12, 256 }
  0x80   : > { %842 = vbcast.lane.b32.xlu1 %v840_v15, 256  ;;  %835 = vbcast.lane.b32.xlu0 %v833_v16, 256  ;;  %v1036_v15 = vrot.slane %v460_v10, %v7527_v7  ;;  %v1029_v16 = vrot.slane %v460_v10, %v7507_v3 }
  0x84   : > { %856 = vbcast.lane.b32.xlu1 %v854_v19, 256  ;;  %849 = vbcast.lane.b32.xlu0 %v847_v20, 256 }
  0x88   : > { %870 = vbcast.lane.b32.xlu1 %v868_v22, 256  ;;  %863 = vbcast.lane.b32.xlu0 %v861_v23, 256  ;;  %v1043_v22 = vrot.slane %v460_v10, %v7510_v4 }
  0x8a   : > { %v7609_v26 = vpop.permute.xlu0 %471  ;;  %v7611_v27 = vpop.permute.xlu1 %485 }
  0x8c   : > { %884 = vbcast.lane.b32.xlu1 %v882_v24, 256  ;;  %877 = vbcast.lane.b32.xlu0 %v875_v25, 256  ;;  %v1064_v25 = vrot.slane %v460_v10, %v7535_v13 }
  0x8e   : > { %v7615_v30 = vpop.permute.xlu0 %478  ;;  %v7617_v31 = vpop.permute.xlu1 %492 }
  0x90   : > { %898 = vbcast.lane.b32.xlu1 %v896_v28, 256  ;;  %891 = vbcast.lane.b32.xlu0 %v889_v29, 256  ;;  %v1057_v28 = vrot.slane %v460_v10, %v7538_v14 }
  0x92   : > { %v7622_v35 = vpop.permute.xlu0 %499  ;;  %v7624_v36 = vpop.permute.xlu1 %506 }
  0x94   : > { %912 = vbcast.lane.b32.xlu1 %v910_v32, 256  ;;  %905 = vbcast.lane.b32.xlu0 %v903_v33, 256  ;;  %v1078_v33 = vrot.slane %v460_v10, %v7543_v17  ;;  %v462_v10 = vld [vmem:[%s7521_s25 + $0x60] sm:$0xff] }
  0x96   : > { %v7628_v39 = vpop.permute.xlu0 %513  ;;  %v7630_v40 = vpop.permute.xlu1 %520 }
  0x98   : > { %926 = vbcast.lane.b32.xlu1 %v924_v37, 256  ;;  %919 = vbcast.lane.b32.xlu0 %v917_v38, 256  ;;  %v461_v37 = vld [vmem:[%s7521_s25 + $0x58] sm:$0xff] }
  0x99   : > { %v1099_v51 = vrot.slane %v461_v37, %v7510_v4 }
  0x9a   : > { %v7634_v43 = vpop.permute.xlu0 %527  ;;  %v7636_v44 = vpop.permute.xlu1 %534 }
  0x9c   : > { %940 = vbcast.lane.b32.xlu1 %v938_v41, 256  ;;  %933 = vbcast.lane.b32.xlu0 %v931_v42, 256  ;;  %v1092_v42 = vrot.slane %v461_v37, %v7527_v7 }
  0x9e   : > { %v7640_v47 = vpop.permute.xlu0 %541  ;;  %v7642_v48 = vpop.permute.xlu1 %548 }
  0xa0   : > { %954 = vbcast.lane.b32.xlu1 %v952_v45, 256  ;;  %947 = vbcast.lane.b32.xlu0 %v945_v46, 256  ;;  %v1085_v45 = vrot.slane %v461_v37, %v7507_v3 }
  0xa2   : > { %v7647_v52 = vpop.permute.xlu0 %555  ;;  %v7649_v53 = vpop.permute.xlu1 %562 }
  0xa4   : > { %968 = vbcast.lane.b32.xlu1 %v966_v49, 256  ;;  %961 = vbcast.lane.b32.xlu0 %v959_v50, 256  ;;  %v1106_v50 = vrot.slane %v461_v37, %v7524_v6 }
  0xa6   : > { %v7653_v56 = vpop.permute.xlu0 %569  ;;  %v7655_v57 = vpop.permute.xlu1 %576 }
  0xa8   : > { %982 = vbcast.lane.b32.xlu1 %v980_v54, 256  ;;  %975 = vbcast.lane.b32.xlu0 %v973_v55, 256 }
  0xaa   : > { %v7659_v60 = vpop.permute.xlu0 %583  ;;  %v7661_v61 = vpop.permute.xlu1 %590 }
  0xac   : > { %996 = vbcast.lane.b32.xlu1 %v994_v58, 256  ;;  %989 = vbcast.lane.b32.xlu0 %v987_v59, 256  ;;  %v1120_v58 = vrot.slane %v461_v37, %v7535_v13  ;;  %v1113_v59 = vrot.slane %v461_v37, %v7538_v14 }
  0xae   : > { %v7665_v0 = vpop.permute.xlu0 %597  ;;  %v7667_v2 = vpop.permute.xlu1 %604 }
  0xb0   : > { %1010 = vbcast.lane.b32.xlu1 %v1008_v62, 256  ;;  %1003 = vbcast.lane.b32.xlu0 %v1001_v63, 256 }
  0xb2   : > { %v7672_v11 = vpop.permute.xlu0 %611  ;;  %v7674_v12 = vpop.permute.xlu1 %618 }
  0xb4   : > { %1024 = vbcast.lane.b32.xlu1 %v1022_v8, 256  ;;  %1017 = vbcast.lane.b32.xlu0 %v1015_v9, 256  ;;  %v1134_v8 = vrot.slane %v461_v37, %v7543_v17  ;;  %v1127_v9 = vrot.slane %v461_v37, %v7546_v18 }
  0xb6   : > { %v7678_v19 = vpop.permute.xlu0 %625  ;;  %v7680_v20 = vpop.permute.xlu1 %632 }
  0xb8   : > { %1038 = vbcast.lane.b32.xlu1 %v1036_v15, 256  ;;  %1031 = vbcast.lane.b32.xlu0 %v1029_v16, 256 }
  0xba   : > { %v7684_v23 = vpop.permute.xlu0 %639  ;;  %v7686_v24 = vpop.permute.xlu1 %646 }
  0xbc   : > { %1052 = vbcast.lane.b32.xlu1 %v1050_v21, 256  ;;  %1045 = vbcast.lane.b32.xlu0 %v1043_v22, 256  ;;  %v1148_v21 = vrot.slane %v462_v10, %v7527_v7  ;;  %v1141_v22 = vrot.slane %v462_v10, %v7507_v3 }
  0xbe   : > { %v7690_v29 = vpop.permute.xlu0 %653  ;;  %v7692_v32 = vpop.permute.xlu1 %660 }
  0xc0   : > { %1066 = vbcast.lane.b32.xlu1 %v1064_v25, 256  ;;  %1059 = vbcast.lane.b32.xlu0 %v1057_v28, 256 }
  0xc2   : > { %v7697_v38 = vpop.permute.xlu0 %667  ;;  %v7699_v41 = vpop.permute.xlu1 %674 }
  0xc4   : > { %1080 = vbcast.lane.b32.xlu1 %v1078_v33, 256  ;;  %1073 = vbcast.lane.b32.xlu0 %v1071_v34, 256  ;;  %v1162_v33 = vrot.slane %v462_v10, %v7524_v6  ;;  %v1155_v34 = vrot.slane %v462_v10, %v7510_v4 }
  0xc6   : > { %v7703_v46 = vpop.permute.xlu0 %681  ;;  %v7705_v49 = vpop.permute.xlu1 %688 }
  0xc8   : > { %1094 = vbcast.lane.b32.xlu1 %v1092_v42, 256  ;;  %1087 = vbcast.lane.b32.xlu0 %v1085_v45, 256  ;;  %v1176_v45 = vrot.slane %v462_v10, %v7535_v13 }
  0xca   : > { %v7709_v54 = vpop.permute.xlu0 %695  ;;  %v7711_v55 = vpop.permute.xlu1 %702 }
  0xcc   : > { %1108 = vbcast.lane.b32.xlu1 %v1106_v50, 256  ;;  %1101 = vbcast.lane.b32.xlu0 %v1099_v51, 256  ;;  %v1169_v50 = vrot.slane %v462_v10, %v7538_v14 }
  0xce   : > { %v7715_v62 = vpop.permute.xlu0 %709  ;;  %v7717_v63 = vpop.permute.xlu1 %716 }
  0xd0   : > { %1122 = vbcast.lane.b32.xlu1 %v1120_v58, 256  ;;  %1115 = vbcast.lane.b32.xlu0 %v1113_v59, 256  ;;  %v1190_v59 = vrot.slane %v462_v10, %v7543_v17 }
  0xd2   : > { %v7722_v15 = vpop.permute.xlu0 %723  ;;  %v7724_v16 = vpop.permute.xlu1 %730 }
  0xd4   : > { %1136 = vbcast.lane.b32.xlu1 %v1134_v8, 256  ;;  %1129 = vbcast.lane.b32.xlu0 %v1127_v9, 256  ;;  %v1183_v8 = vrot.slane %v462_v10, %v7546_v18  ;;  %v463_v9 = vld [vmem:[%s7521_s25 + $0x68] sm:$0xff] }
  0xd5   : > { %v1218_v10 = vrot.slane %v463_v9, %v7524_v6 }
  0xd6   : > { %v7728_v25 = vpop.permute.xlu0 %737  ;;  %v7730_v28 = vpop.permute.xlu1 %744 }
  0xd7   : > { %12105 = vst [vmem:[#allocation6_spill] sm:$0xff] %v7730_v28 }
  0xd8   : > { %1150 = vbcast.lane.b32.xlu1 %v1148_v21, 256  ;;  %1143 = vbcast.lane.b32.xlu0 %v1141_v22, 256 }
  0xda   : > { %v7734_v37 = vpop.permute.xlu0 %751  ;;  %v7736_v42 = vpop.permute.xlu1 %758 }
  0xdb   : > { %12106 = vst [vmem:[#allocation7_spill] sm:$0xff] %v7734_v37  ;;  %12107 = vst [vmem:[#allocation8_spill] sm:$0xff] %v7736_v42  ;;  %v7827_v37 = vld [vmem:[%s7521_s25 + $0x78] sm:$0xff] }
  0xdc   : > { %1164 = vbcast.lane.b32.xlu1 %v1162_v33, 256  ;;  %1157 = vbcast.lane.b32.xlu0 %v1155_v34, 256  ;;  %v1204_v33 = vrot.slane %v463_v9, %v7527_v7  ;;  %v1197_v34 = vrot.slane %v463_v9, %v7507_v3 }
  0xde   : > { %v7740_v51 = vpop.permute.xlu0 %765  ;;  %v7742_v58 = vpop.permute.xlu1 %772 }
  0xdf   : > { %12108 = vst [vmem:[#allocation9_spill] sm:$0xff] %v7740_v51  ;;  %12109 = vst [vmem:[#allocation10_spill] sm:$0xff] %v7742_v58 }
  0xe0   : > { %1178 = vbcast.lane.b32.xlu1 %v1176_v45, 256  ;;  %1171 = vbcast.lane.b32.xlu0 %v1169_v50, 256  ;;  %v1211_v45 = vrot.slane %v463_v9, %v7510_v4 }
  0xe2   : > { %v7747_v21 = vpop.permute.xlu0 %779  ;;  %v7749_v22 = vpop.permute.xlu1 %786 }
  0xe3   : > { %12110 = vst [vmem:[#allocation11_spill] sm:$0xff] %v7747_v21  ;;  %12111 = vst [vmem:[#allocation12_spill] sm:$0xff] %v7749_v22  ;;  %v7772_v21 = vld [vmem:[%s7521_s25 + $0x70] sm:$0xff] }
  0xe4   : > { %1192 = vbcast.lane.b32.xlu1 %v1190_v59, 256  ;;  %1185 = vbcast.lane.b32.xlu0 %v1183_v8, 256  ;;  %v1232_v59 = vrot.slane %v463_v9, %v7535_v13  ;;  %v1225_v8 = vrot.slane %v463_v9, %v7538_v14  ;;  %v1267_v51 = vrot.slane %v7772_v21, %v7510_v4 }
  0xe6   : > { %v7753_v5 = vpop.permute.xlu0 %793  ;;  %v7755_v58 = vpop.permute.xlu1 %800 }
  0xe7   : > { %12112 = vst [vmem:[#allocation13_spill] sm:$0xff] %v7753_v5  ;;  %12113 = vst [vmem:[#allocation14_spill] sm:$0xff] %v7755_v58 }
  0xe8   : > { %1206 = vbcast.lane.b32.xlu1 %v1204_v33, 256  ;;  %1199 = vbcast.lane.b32.xlu0 %v1197_v34, 256  ;;  %v1246_v33 = vrot.slane %v463_v9, %v7543_v17  ;;  %v1239_v34 = vrot.slane %v463_v9, %v7546_v18  ;;  %v1253_v9 = vrot.slane %v7772_v21, %v7507_v3 }
  0xea   : > { %v7759_v50 = vpop.permute.xlu0 %807  ;;  %v7761_v22 = vpop.permute.xlu1 %814 }
  0xeb   : > { %12114 = vst [vmem:[#allocation15_spill] sm:$0xff] %v7759_v50  ;;  %12115 = vst [vmem:[#allocation16_spill] sm:$0xff] %v7761_v22 }
  0xec   : > { %1220 = vbcast.lane.b32.xlu1 %v1218_v10, 256  ;;  %1213 = vbcast.lane.b32.xlu0 %v1211_v45, 256  ;;  %v7777_v10 = vld [vmem:[%s12070_s3] ss:$0 sm:$0xff] }
  0xee   : > { %v7765_v5 = vpop.permute.xlu0 %821  ;;  %v7767_v58 = vpop.permute.xlu1 %828 }
  0xef   : > { %12116 = vst [vmem:[#allocation17_spill] sm:$0xff] %v7765_v5  ;;  %12117 = vst [vmem:[#allocation18_spill] sm:$0xff] %v7767_v58  ;;  %v7427_v5 = vmov 1966171168   ;;  %v1371_v58 = vmul.f32 %v7777_v10, %v7611_v27  ;;  %v1274_v27 = vrot.slane %v7772_v21, %v7524_v6 }
  0xf0   : > { %1234 = vbcast.lane.b32.xlu1 %v1232_v59, 256  ;;  %1227 = vbcast.lane.b32.xlu0 %v1225_v8, 256  ;;  %v2700_v50 = vunpack.c.l.s4 %v7427_v5  ;;  %v1260_v59 = vrot.slane %v7772_v21, %v7527_v7  ;;  %v1369_v8 = vmul.f32 %v7777_v10, %v7609_v26  ;;  %v1372_v26 = vmul.f32 %v7777_v10, %v7617_v31 }
  0xf2   : > { %v7779_v45 = vpop.permute.xlu0 %835  ;;  %v7781_v22 = vpop.permute.xlu1 %842 }
  0xf3   : > { %12118 = vst [vmem:[#allocation19_spill] sm:$0xff] %v7779_v45  ;;  %12119 = vst [vmem:[#allocation20_spill] sm:$0xff] %v7781_v22  ;;  %v7794_v22 = vld [vmem:[%s12071_s4] ss:$0 sm:$0xff]  ;;  %v1370_v45 = vmul.f32 %v7777_v10, %v7615_v30  ;;  %v1374_v30 = vmul.f32 %v7777_v10, %v7624_v36  ;;  %v1376_v36 = vmul.f32 %v7777_v10, %v7630_v40 }
  0xf4   : > { %1248 = vbcast.lane.b32.xlu1 %v1246_v33, 256  ;;  %1241 = vbcast.lane.b32.xlu0 %v1239_v34, 256  ;;  %v2701_v34 = vunpack.c.0.s8 %v2700_v50  ;;  %v1373_v50 = vmul.f32 %v7777_v10, %v7622_v35  ;;  %v1507_v35 = vadd.f32 %v7794_v22, %v1372_v26 }
  0xf5   : > { %v1509_v26 = vadd.f32 %v7794_v22, %v1374_v30 }
  0xf6   : > { %v7796_v5 = vpop.permute.xlu0 %849  ;;  %v7798_v33 = vpop.permute.xlu1 %856 }
  0xf7   : > { %12120 = vst [vmem:[#allocation21_spill] sm:$0xff] %v7796_v5  ;;  %12121 = vst [vmem:[#allocation22_spill] sm:$0xff] %v7798_v33  ;;  %v1504_v5 = vadd.f32 %v7794_v22, %v1369_v8  ;;  %v1506_v33 = vadd.f32 %v7794_v22, %v1371_v58  ;;  %v1375_v8 = vmul.f32 %v7777_v10, %v7628_v39 }
  0xf8   : > { %1262 = vbcast.lane.b32.xlu1 %v1260_v59, 256  ;;  %1255 = vbcast.lane.b32.xlu0 %v1253_v9, 256  ;;  %v7819_v59 = vsub.s32 %v2701_v34, %v7504_v1  ;;  %v1505_v9 = vadd.f32 %v7794_v22, %v1370_v45  ;;  %v1288_v58 = vrot.slane %v7772_v21, %v7535_v13 }
  0xf9   : > { %v1281_v1 = vrot.slane %v7772_v21, %v7538_v14  ;;  %v1632_v45 = vmax.f32 %v1504_v5, 0.0  ;;  %v1634_v34 = vmax.f32 %v1506_v33, 0.0  ;;  %v1302_v39 = vrot.slane %v7772_v21, %v7543_v17  ;;  %v7851_v33 = vld [vmem:[%s12072_s5] ss:$0 sm:$0xff] }
  0xfa   : > { %v7814_v42 = vpop.permute.xlu0 %863  ;;  %v7816_v31 = vpop.permute.xlu1 %870  ;;  %12124 = vst [vmem:[#allocation25_spill] sm:$0xff] %v7819_v59  ;;  %v1295_v59 = vrot.slane %v7772_v21, %v7546_v18  ;;  %v1309_v5 = vrot.slane %v7827_v37, %v7507_v3  ;;  %v1633_v21 = vmax.f32 %v1505_v9, 0.0  ;;  %v1378_v3 = vmul.f32 %v7777_v10, %v7636_v44 }
  0xfb   : > { %12122 = vst [vmem:[#allocation23_spill] sm:$0xff] %v7814_v42  ;;  %12123 = vst [vmem:[#allocation24_spill] sm:$0xff] %v7816_v31  ;;  %v1508_v31 = vadd.f32 %v7794_v22, %v1373_v50  ;;  %v1377_v50 = vmul.f32 %v7777_v10, %v7634_v43  ;;  %v1379_v9 = vmul.f32 %v7777_v10, %v7640_v47 }
  0xfc   : > { %1276 = vbcast.lane.b32.xlu1 %v1274_v27, 256  ;;  %1269 = vbcast.lane.b32.xlu0 %v1267_v51, 256  ;;  %v1316_v51 = vrot.slane %v7827_v37, %v7527_v7  ;;  %v1510_v27 = vadd.f32 %v7794_v22, %v1375_v8  ;;  %v1511_v7 = vadd.f32 %v7794_v22, %v1376_v36  ;;  %v1637_v36 = vmax.f32 %v1509_v26, 0.0 }
  0xfd   : > { %v1767_v8 = vmul.f32 %v7851_v33, %v1632_v45  ;;  %v1636_v30 = vmax.f32 %v1508_v31, 0.0  ;;  %v1380_v45 = vmul.f32 %v7777_v10, %v7642_v48  ;;  %v1513_v26 = vadd.f32 %v7794_v22, %v1378_v3 }
  0xfe   : > { %v7840_v42 = vpop.permute.xlu0 %877  ;;  %v7842_v40 = vpop.permute.xlu1 %884  ;;  %v1638_v47 = vmax.f32 %v1510_v27, 0.0  ;;  %v1639_v31 = vmax.f32 %v1511_v7, 0.0  ;;  %v1381_v27 = vmul.f32 %v7777_v10, %v7647_v52  ;;  %v1382_v3 = vmul.f32 %v7777_v10, %v7649_v53 }
  0xff   : > { %12125 = vst [vmem:[#allocation26_spill] sm:$0xff] %v7840_v42  ;;  %12126 = vst [vmem:[#allocation27_spill] sm:$0xff] %v7842_v40  ;;  %v1635_v40 = vmax.f32 %v1507_v35, 0.0  ;;  %v1323_v42 = vrot.slane %v7827_v37, %v7510_v4  ;;  %v1769_v35 = vmul.f32 %v7851_v33, %v1634_v34  ;;  %v1768_v34 = vmul.f32 %v7851_v33, %v1633_v21 }
 0x100   : > { %1290 = vbcast.lane.b32.xlu1 %v1288_v58, 256  ;;  %1283 = vbcast.lane.b32.xlu0 %v1281_v1, 256  ;;  %v1512_v1 = vadd.f32 %v7794_v22, %v1377_v50  ;;  %v1514_v4 = vadd.f32 %v7794_v22, %v1379_v9  ;;  %v7889_v50 = vsel %vm1895_vm0, %v1767_v8, 0.0  ;;  %v1771_v21 = vmul.f32 %v7851_v33, %v1636_v30 }
 0x101   : > { %v1770_v58 = vmul.f32 %v7851_v33, %v1635_v40  ;;  %v7892_v48 = vsel %vm1895_vm0, %v1769_v35, 0.0  ;;  %v1772_v52 = vmul.f32 %v7851_v33, %v1637_v36  ;;  %v1515_v9 = vadd.f32 %v7794_v22, %v1380_v45 }
 0x102   : > { %v7869_v28 = vpop.permute.xlu0 %891  ;;  %v7871_v44 = vpop.permute.xlu1 %898  ;;  %v1640_v7 = vmax.f32 %v1512_v1, 0.0  ;;  %v7906_v8 = vsel %vm1895_vm0, %v1768_v34, 0.0  ;;  %v1773_v35 = vmul.f32 %v7851_v33, %v1638_v47  ;;  %v1641_v53 = vmax.f32 %v1513_v26, 0.0 }
 0x103   : > { %v7912_v43 = vsel %vm1895_vm0, %v1770_v58, 0.0  ;;  %v1774_v30 = vmul.f32 %v7851_v33, %v1639_v31  ;;  %v1642_v36 = vmax.f32 %v1514_v4, 0.0  ;;  %v1516_v1 = vadd.f32 %v7794_v22, %v1381_v27 }
 0x104   : > { %1304 = vbcast.lane.b32.xlu1 %v1302_v39, 256  ;;  %1297 = vbcast.lane.b32.xlu0 %v1295_v59, 256  ;;  %v1383_v59 = vmul.f32 %v7777_v10, %v7653_v56  ;;  %v1384_v56 = vmul.f32 %v7777_v10, %v7655_v57  ;;  %v1385_v45 = vmul.f32 %v7777_v10, %v7659_v60  ;;  %v7927_v58 = vsel %vm1895_vm0, %v1771_v21, 0.0 }
 0x105   : > { %v1386_v47 = vmul.f32 %v7777_v10, %v7661_v61  ;;  %v1517_v34 = vadd.f32 %v7794_v22, %v1382_v3  ;;  %v7930_v4 = vsel %vm1895_vm0, %v1772_v52, 0.0  ;;  %v1643_v31 = vmax.f32 %v1515_v9, 0.0 }
 0x106   : > { %v7898_v39 = vpop.permute.xlu0 %905  ;;  %v7900_v40 = vpop.permute.xlu1 %912  ;;  %v1518_v57 = vadd.f32 %v7794_v22, %v1383_v59  ;;  %v1387_v60 = vmul.f32 %v7777_v10, %v7665_v0  ;;  %v7935_v61 = vsel %vm1895_vm0, %v1773_v35, 0.0  ;;  %v1775_v26 = vmul.f32 %v7851_v33, %v1640_v7 }
 0x107   : > { %v1519_v27 = vadd.f32 %v7794_v22, %v1384_v56  ;;  %v1388_v3 = vmul.f32 %v7777_v10, %v7667_v2  ;;  %v12128_v59 = vrot.slane %v7827_v37, %v7524_v6  ;;  %v7945_v21 = vsel %vm1895_vm0, %v1774_v30, 0.0 }
 0x108   : > { %1318 = vbcast.lane.b32.xlu1 %v1316_v51, 256  ;;  %1311 = vbcast.lane.b32.xlu0 %v1309_v5, 256  ;;  %v1776_v0 = vmul.f32 %v7851_v33, %v1641_v53  ;;  %v1644_v52 = vmax.f32 %v1516_v1, 0.0  ;;  %v1520_v9 = vadd.f32 %v7794_v22, %v1385_v45  ;;  %v1521_v7 = vadd.f32 %v7794_v22, %v1386_v47 }
 0x109   : > { %v1777_v35 = vmul.f32 %v7851_v33, %v1642_v36  ;;  %v1645_v56 = vmax.f32 %v1517_v34, 0.0  ;;  %v1389_v2 = vmul.f32 %v7777_v10, %v7672_v11  ;;  %v1390_v6 = vmul.f32 %v7777_v10, %v7674_v12 }
 0x10a   : > { %v7922_v51 = vpop.permute.xlu0 %919  ;;  %v7924_v5 = vpop.permute.xlu1 %926  ;;  %v1522_v53 = vadd.f32 %v7794_v22, %v1387_v60  ;;  %v1391_v1 = vmul.f32 %v7777_v10, %v7678_v19  ;;  %v7963_v45 = vsel %vm1895_vm0, %v1775_v26, 0.0  ;;  %v1778_v36 = vmul.f32 %v7851_v33, %v1643_v31 }
 0x10b   : > { %12127 = vst [vmem:[#allocation28_spill] sm:$0xff] %v7924_v5  ;;  %v1646_v5 = vmax.f32 %v1518_v57, 0.0  ;;  %v1647_v47 = vmax.f32 %v1519_v27, 0.0  ;;  %v1523_v11 = vadd.f32 %v7794_v22, %v1388_v3  ;;  %v1392_v12 = vmul.f32 %v7777_v10, %v7680_v20 }
 0x10c   : > { %1332 = vbcast.lane.b32.xlu1 %v12128_v59, 256  ;;  %1325 = vbcast.lane.b32.xlu0 %v1323_v42, 256  ;;  %v12129_v34 = vrot.slane %v7827_v37, %v7535_v13  ;;  %v12130_v57 = vrot.slane %v7827_v37, %v7538_v14  ;;  %v7976_v19 = vsel %vm1895_vm0, %v1776_v0, 0.0  ;;  %v1648_v60 = vmax.f32 %v1520_v9, 0.0 }
 0x10d   : > { %v1649_v26 = vmax.f32 %v1521_v7, 0.0  ;;  %v7979_v31 = vsel %vm1895_vm0, %v1777_v35, 0.0  ;;  %v1779_v27 = vmul.f32 %v7851_v33, %v1644_v52  ;;  %v1524_v20 = vadd.f32 %v7794_v22, %v1389_v2 }
 0x10e   : > { %v7955_v42 = vpop.permute.xlu0 %933  ;;  %v7957_v30 = vpop.permute.xlu1 %940  ;;  %v1525_v3 = vadd.f32 %v7794_v22, %v1390_v6  ;;  %v1780_v14 = vmul.f32 %v7851_v33, %v1645_v56  ;;  %v1781_v0 = vmul.f32 %v7851_v33, %v1646_v5  ;;  %v1526_v9 = vadd.f32 %v7794_v22, %v1391_v1 }
 0x10f   : > { %v1393_v7 = vmul.f32 %v7777_v10, %v7684_v23  ;;  %v7994_v52 = vsel %vm1895_vm0, %v1778_v36, 0.0  ;;  %v1651_v35 = vmax.f32 %v1523_v11, 0.0  ;;  %v1527_v2 = vadd.f32 %v7794_v22, %v1392_v12 }
 0x110   : > { %1346 = vbcast.lane.b32.xlu1 %v12129_v34, 256  ;;  %1339 = vbcast.lane.b32.xlu0 %v12130_v57, 256  ;;  %v1650_v34 = vmax.f32 %v1522_v53, 0.0  ;;  %v1394_v6 = vmul.f32 %v7777_v10, %v7686_v24  ;;  %v12131_v56 = vrot.slane %v7827_v37, %v7543_v17  ;;  %v12132_v5 = vrot.slane %v7827_v37, %v7546_v18 }
 0x111   : > { %v1782_v53 = vmul.f32 %v7851_v33, %v1647_v47  ;;  %v1395_v23 = vmul.f32 %v7777_v10, %v7690_v29  ;;  %v8009_v1 = vsel %vm1895_vm0, %v1779_v27, 0.0  ;;  %v1783_v36 = vmul.f32 %v7851_v33, %v1648_v60 }
 0x112   : > { %v7984_v13 = vpop.permute.xlu0 %947  ;;  %v7986_v59 = vpop.permute.xlu1 %954  ;;  %v1784_v24 = vmul.f32 %v7851_v33, %v1649_v26  ;;  %v1652_v11 = vmax.f32 %v1524_v20, 0.0  ;;  %v1653_v12 = vmax.f32 %v1525_v3, 0.0  ;;  %v8018_v18 = vsel %vm1895_vm0, %v1780_v14, 0.0 }
 0x113   : > { %v8021_v37 = vsel %vm1895_vm0, %v1781_v0, 0.0  ;;  %v1654_v29 = vmax.f32 %v1526_v9, 0.0  ;;  %v1528_v47 = vadd.f32 %v7794_v22, %v1393_v7  ;;  %v1396_v60 = vmul.f32 %v7777_v10, %v7692_v32 }
 0x114   : > { %1360 = vbcast.lane.b32.xlu1 %v12131_v56, 256  ;;  %1353 = vbcast.lane.b32.xlu0 %v12132_v5, 256  ;;  %v1785_v26 = vmul.f32 %v7851_v33, %v1650_v34  ;;  %v1655_v27 = vmax.f32 %v1527_v2, 0.0  ;;  %v1529_v20 = vadd.f32 %v7794_v22, %v1394_v6  ;;  %v8029_v3 = vsel %vm1895_vm0, %v1782_v53, 0.0 }
 0x115   : > { %v1786_v14 = vmul.f32 %v7851_v33, %v1651_v35  ;;  %v1530_v56 = vadd.f32 %v7794_v22, %v1395_v23  ;;  %v1397_v0 = vmul.f32 %v7777_v10, %v7697_v38  ;;  %v8036_v9 = vsel %vm1895_vm0, %v1783_v36, 0.0 }
 0x116   : > { %v8013_v17 = vpop.permute.xlu0 %961  ;;  %v8015_v57 = vpop.permute.xlu1 %968  ;;  %v8039_v32 = vsel %vm1895_vm0, %v1784_v24, 0.0  ;;  %v1398_v34 = vmul.f32 %v7777_v10, %v7699_v41  ;;  %v1399_v7 = vmul.f32 %v7777_v10, %v7703_v46  ;;  %v1787_v6 = vmul.f32 %v7851_v33, %v1652_v11 }
 0x117   : > { %12133 = vst [vmem:[#allocation29_spill] sm:$0xff] %v8039_v32  ;;  %v1788_v38 = vmul.f32 %v7851_v33, %v1653_v12  ;;  %v1656_v5 = vmax.f32 %v1528_v47, 0.0  ;;  %v1531_v53 = vadd.f32 %v7794_v22, %v1396_v60  ;;  %v8053_v23 = vsel %vm1895_vm0, %v1785_v26, 0.0 }
 0x118   : > { %12134 = vst [vmem:[#allocation30_spill] sm:$0xff] %v8053_v23  ;;  %v1789_v36 = vmul.f32 %v7851_v33, %v1654_v29  ;;  %v1657_v41 = vmax.f32 %v1529_v20, 0.0  ;;  %v1400_v46 = vmul.f32 %v7777_v10, %v7705_v49  ;;  %v8059_v24 = vsel %vm1895_vm0, %v1786_v14, 0.0 }
 0x119   : > { %12135 = vst [vmem:[#allocation31_spill] sm:$0xff] %v8059_v24  ;;  %v1790_v32 = vmul.f32 %v7851_v33, %v1655_v27  ;;  %v1658_v11 = vmax.f32 %v1530_v56, 0.0  ;;  %v1532_v12 = vadd.f32 %v7794_v22, %v1397_v0  ;;  %v1401_v47 = vmul.f32 %v7777_v10, %v7709_v54 }
 0x11a   : > { %v8045_v2 = vpop.permute.xlu0 %975  ;;  %v8047_v35 = vpop.permute.xlu1 %982  ;;  %v1402_v60 = vmul.f32 %v7777_v10, %v7711_v55  ;;  %v1533_v29 = vadd.f32 %v7794_v22, %v1398_v34  ;;  %v1534_v26 = vadd.f32 %v7794_v22, %v1399_v7  ;;  %v8074_v14 = vsel %vm1895_vm0, %v1787_v6, 0.0 }
 0x11b   : > { %12136 = vst [vmem:[#allocation32_spill] sm:$0xff] %v8074_v14  ;;  %v8077_v27 = vsel %vm1895_vm0, %v1788_v38, 0.0  ;;  %v1659_v56 = vmax.f32 %v1531_v53, 0.0  ;;  %v1403_v54 = vmul.f32 %v7777_v10, %v7715_v62  ;;  %v8082_v55 = vsel %vm1895_vm0, %v1789_v36, 0.0 }
 0x11c   : > { %12137 = vst [vmem:[#allocation33_spill] sm:$0xff] %v8077_v27  ;;  %12138 = vst [vmem:[#allocation34_spill] sm:$0xff] %v8082_v55  ;;  %v1791_v0 = vmul.f32 %v7851_v33, %v1656_v5  ;;  %v1535_v34 = vadd.f32 %v7794_v22, %v1400_v46  ;;  %v1404_v7 = vmul.f32 %v7777_v10, %v7717_v63  ;;  %v8089_v6 = vsel %vm1895_vm0, %v1790_v32, 0.0 }
 0x11d   : > { %12139 = vst [vmem:[#allocation35_spill] sm:$0xff] %v8089_v6  ;;  %v1792_v38 = vmul.f32 %v7851_v33, %v1657_v41  ;;  %v1660_v27 = vmax.f32 %v1532_v12, 0.0  ;;  %v1536_v53 = vadd.f32 %v7794_v22, %v1401_v47  ;;  %v1537_v62 = vadd.f32 %v7794_v22, %v1402_v60 }
 0x11e   : > { %v8069_v20 = vpop.permute.xlu0 %989  ;;  %v8071_v49 = vpop.permute.xlu1 %996  ;;  %v1793_v36 = vmul.f32 %v7851_v33, %v1658_v11  ;;  %v1661_v55 = vmax.f32 %v1533_v29, 0.0  ;;  %v1662_v14 = vmax.f32 %v1534_v26, 0.0  ;;  %v1405_v5 = vmul.f32 %v7777_v10, %v7722_v15  ;;  %v12141_v29 = vld [vmem:[#allocation6_spill] sm:$0xff] }
 0x11f   : > { %v1406_v63 = vmul.f32 %v7777_v10, %v7724_v16  ;;  %v1538_v41 = vadd.f32 %v7794_v22, %v1403_v54  ;;  %v1407_v12 = vmul.f32 %v7777_v10, %v7728_v25  ;;  %v8107_v47 = vsel %vm1895_vm0, %v1791_v0, 0.0 }
 0x120   : > { %12140 = vst [vmem:[#allocation36_spill] sm:$0xff] %v8107_v47  ;;  %v1794_v11 = vmul.f32 %v7851_v33, %v1659_v56  ;;  %v1663_v60 = vmax.f32 %v1535_v34, 0.0  ;;  %v1539_v15 = vadd.f32 %v7794_v22, %v1404_v7  ;;  %v1408_v16 = vmul.f32 %v7777_v10, %v12141_v29 }
 0x121   : > { %v8114_v26 = vsel %vm1895_vm0, %v1792_v38, 0.0  ;;  %v1664_v6 = vmax.f32 %v1536_v53, 0.0  ;;  %v1665_v24 = vmax.f32 %v1537_v62, 0.0  ;;  %v8117_v54 = vsel %vm1895_vm0, %v1793_v36, 0.0  ;;  %v12144_v62 = vld [vmem:[#allocation7_spill] sm:$0xff] }
 0x122   : > { %v8099_v46 = vpop.permute.xlu0 %1003  ;;  %v8101_v32 = vpop.permute.xlu1 %1010  ;;  %12142 = vst [vmem:[#allocation6_spill] sm:$0xff] %v8114_v26  ;;  %12143 = vst [vmem:[#allocation37_spill] sm:$0xff] %v8117_v54  ;;  %v1795_v25 = vmul.f32 %v7851_v33, %v1660_v27  ;;  %v1540_v0 = vadd.f32 %v7794_v22, %v1405_v5  ;;  %v1541_v56 = vadd.f32 %v7794_v22, %v1406_v63  ;;  %v1666_v26 = vmax.f32 %v1538_v41, 0.0  ;;  %v12146_v54 = vld [vmem:[#allocation8_spill] sm:$0xff] }
 0x123   : > { %v1796_v29 = vmul.f32 %v7851_v33, %v1661_v55  ;;  %v1797_v38 = vmul.f32 %v7851_v33, %v1662_v14  ;;  %v1542_v53 = vadd.f32 %v7794_v22, %v1407_v12  ;;  %v1409_v36 = vmul.f32 %v7777_v10, %v12144_v62  ;;  %v12147_v55 = vld [vmem:[#allocation9_spill] sm:$0xff] }
 0x124   : > { %v8132_v27 = vsel %vm1895_vm0, %v1794_v11, 0.0  ;;  %v1667_v5 = vmax.f32 %v1539_v15, 0.0  ;;  %v1543_v63 = vadd.f32 %v7794_v22, %v1408_v16  ;;  %v1410_v47 = vmul.f32 %v7777_v10, %v12146_v54 }
 0x125   : > { %12145 = vst [vmem:[#allocation7_spill] sm:$0xff] %v8132_v27  ;;  %v1798_v23 = vmul.f32 %v7851_v33, %v1663_v60  ;;  %v1411_v14 = vmul.f32 %v7777_v10, %v12147_v55  ;;  %v8141_v41 = vsel %vm1895_vm0, %v1795_v25, 0.0  ;;  %v1799_v12 = vmul.f32 %v7851_v33, %v1664_v6 }
 0x126   : > { %v8122_v34 = vpop.permute.xlu0 %1017  ;;  %v8124_v7 = vpop.permute.xlu1 %1024  ;;  %12148 = vst [vmem:[#allocation8_spill] sm:$0xff] %v8141_v41  ;;  %v1800_v62 = vmul.f32 %v7851_v33, %v1665_v24  ;;  %v1668_v11 = vmax.f32 %v1540_v0, 0.0  ;;  %v1669_v27 = vmax.f32 %v1541_v56, 0.0  ;;  %v8150_v54 = vsel %vm1895_vm0, %v1796_v29, 0.0  ;;  %v12153_v41 = vld [vmem:[#allocation10_spill] sm:$0xff] }
 0x127   : > { %12151 = vst [vmem:[#allocation39_spill] sm:$0xff] %v8150_v54  ;;  %v8153_v60 = vsel %vm1895_vm0, %v1797_v38, 0.0  ;;  %v1670_v55 = vmax.f32 %v1542_v53, 0.0  ;;  %v1544_v25 = vadd.f32 %v7794_v22, %v1409_v36  ;;  %v1412_v6 = vmul.f32 %v7777_v10, %v12153_v41  ;;  %v12155_v38 = vld [vmem:[#allocation11_spill] sm:$0xff] }
 0x128   : > { %12152 = vst [vmem:[#allocation40_spill] sm:$0xff] %v8153_v60  ;;  %v1801_v24 = vmul.f32 %v7851_v33, %v1666_v26  ;;  %v1671_v0 = vmax.f32 %v1543_v63, 0.0  ;;  %v1545_v56 = vadd.f32 %v7794_v22, %v1410_v47  ;;  %v1802_v29 = vmul.f32 %v7851_v33, %v1667_v5  ;;  %v12158_v26 = vld [vmem:[#allocation12_spill] sm:$0xff]  ;;  %v12159_v47 = vld [vmem:[#allocation13_spill] sm:$0xff] }
 0x129   : > { %v1546_v54 = vadd.f32 %v7794_v22, %v1411_v14  ;;  %v1413_v53 = vmul.f32 %v7777_v10, %v12155_v38  ;;  %v8168_v36 = vsel %vm1895_vm0, %v1799_v12, 0.0  ;;  %v8171_v41 = vsel %vm1895_vm0, %v1800_v62, 0.0 }
 0x12a   : > { %v8145_v15 = vpop.permute.xlu0 %1031  ;;  %v8147_v16 = vpop.permute.xlu1 %1038  ;;  %12156 = vst [vmem:[#allocation11_spill] sm:$0xff] %v8168_v36  ;;  %12157 = vst [vmem:[#allocation41_spill] sm:$0xff] %v8171_v41  ;;  %v1414_v63 = vmul.f32 %v7777_v10, %v12158_v26  ;;  %v1803_v14 = vmul.f32 %v7851_v33, %v1668_v11  ;;  %v1804_v38 = vmul.f32 %v7851_v33, %v1669_v27  ;;  %v1672_v60 = vmax.f32 %v1544_v25, 0.0  ;;  %v12163_v36 = vld [vmem:[#allocation14_spill] sm:$0xff]  ;;  %v12165_v25 = vld [vmem:[#allocation15_spill] sm:$0xff] }
 0x12b   : > { %12149 = vst [vmem:[#allocation9_spill] sm:$0xff] %v8145_v15  ;;  %12150 = vst [vmem:[#allocation38_spill] sm:$0xff] %v8147_v16  ;;  %v8161_v15 = vsel %vm1895_vm0, %v1798_v23, 0.0  ;;  %v1415_v23 = vmul.f32 %v7777_v10, %v12159_v47  ;;  %v1547_v12 = vadd.f32 %v7794_v22, %v1412_v6  ;;  %v8185_v62 = vsel %vm1895_vm0, %v1801_v24, 0.0  ;;  %v12166_v16 = vld [vmem:[#allocation16_spill] sm:$0xff] }
 0x12c   : > { %12154 = vst [vmem:[#allocation10_spill] sm:$0xff] %v8161_v15  ;;  %12162 = vst [vmem:[#allocation42_spill] sm:$0xff] %v8185_v62  ;;  %v1805_v41 = vmul.f32 %v7851_v33, %v1670_v55  ;;  %v1673_v26 = vmax.f32 %v1545_v56, 0.0  ;;  %v1416_v47 = vmul.f32 %v7777_v10, %v12163_v36  ;;  %v1674_v11 = vmax.f32 %v1546_v54, 0.0 }
 0x12d   : > { %v1548_v27 = vadd.f32 %v7794_v22, %v1413_v53  ;;  %v1417_v6 = vmul.f32 %v7777_v10, %v12165_v25  ;;  %v1418_v24 = vmul.f32 %v7777_v10, %v12166_v16  ;;  %v1549_v55 = vadd.f32 %v7794_v22, %v1414_v63  ;;  %v12171_v53 = vld [vmem:[#allocation17_spill] sm:$0xff] }
 0x12e   : > { %v8177_v15 = vpop.permute.xlu0 %1045  ;;  %v8179_v5 = vpop.permute.xlu1 %1052  ;;  %v1550_v56 = vadd.f32 %v7794_v22, %v1415_v23  ;;  %v8209_v54 = vsel %vm1895_vm0, %v1804_v38, 0.0  ;;  %v1419_v25 = vmul.f32 %v7777_v10, %v12171_v53  ;;  %v8215_v16 = vsel %vm1895_vm0, %v1805_v41, 0.0 }
 0x12f   : > { %12160 = vst [vmem:[#allocation12_spill] sm:$0xff] %v8177_v15  ;;  %12161 = vst [vmem:[#allocation13_spill] sm:$0xff] %v8179_v5  ;;  %v8191_v15 = vsel %vm1895_vm0, %v1802_v29, 0.0  ;;  %v1806_v5 = vmul.f32 %v7851_v33, %v1671_v0  ;;  %v8206_v29 = vsel %vm1895_vm0, %v1803_v14, 0.0  ;;  %v1675_v0 = vmax.f32 %v1547_v12, 0.0 }
 0x130   : > { %12164 = vst [vmem:[#allocation14_spill] sm:$0xff] %v8191_v15  ;;  %12169 = vst [vmem:[#allocation43_spill] sm:$0xff] %v8206_v29  ;;  %v1807_v63 = vmul.f32 %v7851_v33, %v1672_v60  ;;  %v1551_v23 = vadd.f32 %v7794_v22, %v1416_v47  ;;  %v12173_v15 = vld [vmem:[#allocation18_spill] sm:$0xff]  ;;  %v1808_v38 = vmul.f32 %v7851_v33, %v1673_v26  ;;  %v1676_v12 = vmax.f32 %v1548_v27, 0.0  ;;  %v12175_v60 = vld [vmem:[#allocation19_spill] sm:$0xff] }
 0x131   : > { %12170 = vst [vmem:[#allocation44_spill] sm:$0xff] %v8209_v54  ;;  %12172 = vst [vmem:[#allocation17_spill] sm:$0xff] %v8215_v16  ;;  %v1420_v14 = vmul.f32 %v7777_v10, %v12173_v15  ;;  %v8222_v29 = vsel %vm1895_vm0, %v1806_v5, 0.0  ;;  %v1552_v53 = vadd.f32 %v7794_v22, %v1417_v6  ;;  %v1809_v41 = vmul.f32 %v7851_v33, %v1674_v11  ;;  %v12177_v27 = vld [vmem:[#allocation21_spill] sm:$0xff] }
 0x132   : > { %v8201_v62 = vpop.permute.xlu0 %1059  ;;  %v8203_v36 = vpop.permute.xlu1 %1066  ;;  %12174 = vst [vmem:[#allocation18_spill] sm:$0xff] %v8222_v29  ;;  %v1677_v16 = vmax.f32 %v1549_v55, 0.0  ;;  %v1678_v54 = vmax.f32 %v1550_v56, 0.0  ;;  %v1421_v47 = vmul.f32 %v7777_v10, %v12175_v60  ;;  %v1554_v26 = vadd.f32 %v7794_v22, %v1419_v25 }
 0x133   : > { %12167 = vst [vmem:[#allocation15_spill] sm:$0xff] %v8201_v62  ;;  %12168 = vst [vmem:[#allocation16_spill] sm:$0xff] %v8203_v36  ;;  %1897 = vadd.xlane.f32.xlu0 %v7889_v50  ;;  %v1553_v50 = vadd.f32 %v7794_v22, %v1418_v24  ;;  %v12176_v36 = vld [vmem:[#allocation20_spill] sm:$0xff]  ;;  %v1423_v6 = vmul.f32 %v7777_v10, %v12177_v27  ;;  %v8241_v11 = vsel %vm1895_vm0, %v1807_v63, 0.0  ;;  %v1679_v55 = vmax.f32 %v1551_v23, 0.0 }
 0x134   : > { %v1422_v15 = vmul.f32 %v7777_v10, %v12176_v36  ;;  %12178 = vst [vmem:[#allocation19_spill] sm:$0xff] %v8241_v11  ;;  %v1810_v24 = vmul.f32 %v7851_v33, %v1675_v0  ;;  %v1555_v56 = vadd.f32 %v7794_v22, %v1420_v14  ;;  %v12179_v36 = vld [vmem:[#allocation22_spill] sm:$0xff]  ;;  %v8249_v25 = vsel %vm1895_vm0, %v1808_v38, 0.0 }
 0x135   : > { %v1424_v60 = vmul.f32 %v7777_v10, %v12179_v36  ;;  %12180 = vst [vmem:[#allocation20_spill] sm:$0xff] %v8249_v25  ;;  %v1680_v29 = vmax.f32 %v1552_v53, 0.0  ;;  %v1681_v27 = vmax.f32 %v1553_v50, 0.0  ;;  %v1811_v63 = vmul.f32 %v7851_v33, %v1676_v12  ;;  %v12182_v50 = vld [vmem:[#allocation23_spill] sm:$0xff] }
 0x136   : > { %v8232_v62 = vpop.permute.xlu0 %1073  ;;  %v8234_v5 = vpop.permute.xlu1 %1080  ;;  %v1556_v0 = vadd.f32 %v7794_v22, %v1421_v47  ;;  %v1557_v23 = vadd.f32 %v7794_v22, %v1422_v15  ;;  %v1813_v38 = vmul.f32 %v7851_v33, %v1678_v54  ;;  %v1682_v36 = vmax.f32 %v1554_v26, 0.0 }
 0x137   : > { %1903 = vadd.xlane.f32.xlu0 %v7892_v48  ;;  %v8252_v48 = vsel %vm1895_vm0, %v1809_v41, 0.0  ;;  %v1558_v53 = vadd.f32 %v7794_v22, %v1423_v6  ;;  %v1425_v41 = vmul.f32 %v7777_v10, %v12182_v50  ;;  %v8268_v12 = vsel %vm1895_vm0, %v1810_v24, 0.0 }
 0x138   : > { %1900 = vadd.xlane.f32.xlu1 %v7906_v8  ;;  %12181 = vst [vmem:[#allocation21_spill] sm:$0xff] %v8252_v48  ;;  %v1812_v8 = vmul.f32 %v7851_v33, %v1677_v16  ;;  %12183 = vst [vmem:[#allocation22_spill] sm:$0xff] %v8268_v12  ;;  %v1683_v47 = vmax.f32 %v1555_v56, 0.0  ;;  %v1559_v15 = vadd.f32 %v7794_v22, %v1424_v60  ;;  %v12184_v48 = vld [vmem:[#allocation24_spill] sm:$0xff]  ;;  %v12185_v16 = vld [vmem:[#allocation26_spill] sm:$0xff]  ;;  %v8278_v6 = vsel %vm1895_vm0, %v1811_v63, 0.0 }
 0x139   : > { %v1426_v25 = vmul.f32 %v7777_v10, %v12184_v48  ;;  %v1814_v54 = vmul.f32 %v7851_v33, %v1679_v55  ;;  %v1427_v26 = vmul.f32 %v7777_v10, %v12185_v16  ;;  %v1816_v24 = vmul.f32 %v7851_v33, %v1681_v27  ;;  %v12186_v16 = vld [vmem:[#allocation27_spill] sm:$0xff] }
 0x13a   : > { %v8257_v14 = vpop.permute.xlu0 %1087  ;;  %v8259_v11 = vpop.permute.xlu1 %1094  ;;  %v1684_v56 = vmax.f32 %v1556_v0, 0.0  ;;  %v1685_v50 = vmax.f32 %v1557_v23, 0.0  ;;  %v8290_v55 = vsel %vm1895_vm0, %v1813_v38, 0.0  ;;  %v1686_v48 = vmax.f32 %v1558_v53, 0.0 }
 0x13b   : > { %1906 = vadd.xlane.f32.xlu0 %v7912_v43  ;;  %v1815_v43 = vmul.f32 %v7851_v33, %v1680_v29  ;;  %v1560_v63 = vadd.f32 %v7794_v22, %v1425_v41  ;;  %v1428_v29 = vmul.f32 %v7777_v10, %v12186_v16  ;;  %v1817_v27 = vmul.f32 %v7851_v33, %v1682_v36 }
 0x13c   : > { %1909 = vadd.xlane.f32.xlu1 %v7927_v58  ;;  %v8287_v58 = vsel %vm1895_vm0, %v1812_v8, 0.0  ;;  %v1687_v0 = vmax.f32 %v1559_v15, 0.0  ;;  %v1561_v23 = vadd.f32 %v7794_v22, %v1426_v25  ;;  %v8300_v8 = vsel %vm1895_vm0, %v1814_v54, 0.0 }
 0x13d   : > { %v1818_v38 = vmul.f32 %v7851_v33, %v1683_v47  ;;  %v1562_v53 = vadd.f32 %v7794_v22, %v1427_v26  ;;  %v1429_v41 = vmul.f32 %v7777_v10, %v7869_v28  ;;  %v8307_v16 = vsel %vm1895_vm0, %v1815_v43, 0.0 }
 0x13e   : > { %v8282_v60 = vpop.permute.xlu0 %1101  ;;  %v8284_v12 = vpop.permute.xlu1 %1108  ;;  %v1430_v25 = vmul.f32 %v7777_v10, %v7871_v44  ;;  %v1819_v15 = vmul.f32 %v7851_v33, %v1684_v56  ;;  %v1820_v28 = vmul.f32 %v7851_v33, %v1685_v50  ;;  %v1688_v54 = vmax.f32 %v1560_v63, 0.0 }
 0x13f   : > { %1912 = vadd.xlane.f32.xlu0 %v7930_v4  ;;  %v8310_v4 = vsel %vm1895_vm0, %v1816_v24, 0.0  ;;  %v1563_v26 = vadd.f32 %v7794_v22, %v1428_v29  ;;  %v8325_v43 = vsel %vm1895_vm0, %v1817_v27, 0.0  ;;  %v1821_v44 = vmul.f32 %v7851_v33, %v1686_v48  ;;  %v12188_v27 = vld [vmem:[#allocation28_spill] sm:$0xff] }
 0x140   : > { %1915 = vadd.xlane.f32.xlu1 %v7935_v61  ;;  %v1431_v61 = vmul.f32 %v7777_v10, %v7898_v39  ;;  %12187 = vst [vmem:[#allocation23_spill] sm:$0xff] %v8325_v43  ;;  %v1689_v24 = vmax.f32 %v1561_v23, 0.0  ;;  %v1432_v39 = vmul.f32 %v7777_v10, %v7900_v40  ;;  %v8332_v56 = vsel %vm1895_vm0, %v1818_v38, 0.0 }
 0x141   : > { %v1822_v50 = vmul.f32 %v7851_v33, %v1687_v0  ;;  %v1690_v63 = vmax.f32 %v1562_v53, 0.0  ;;  %v1564_v29 = vadd.f32 %v7794_v22, %v1429_v41  ;;  %v1434_v48 = vmul.f32 %v7777_v10, %v12188_v27 }
 0x142   : > { %v8316_v36 = vpop.permute.xlu0 %1115  ;;  %v8318_v47 = vpop.permute.xlu1 %1122  ;;  %v1565_v23 = vadd.f32 %v7794_v22, %v1430_v25  ;;  %v1566_v40 = vadd.f32 %v7794_v22, %v1431_v61  ;;  %v8348_v0 = vsel %vm1895_vm0, %v1820_v28, 0.0  ;;  %v1691_v38 = vmax.f32 %v1563_v26, 0.0 }
 0x143   : > { %1918 = vadd.xlane.f32.xlu0 %v7945_v21  ;;  %v1433_v21 = vmul.f32 %v7777_v10, %v7922_v51  ;;  %v1435_v53 = vmul.f32 %v7777_v10, %v7955_v42  ;;  %v8356_v41 = vsel %vm1895_vm0, %v1821_v44, 0.0  ;;  %v1823_v25 = vmul.f32 %v7851_v33, %v1688_v54 }
 0x144   : > { %1921 = vadd.xlane.f32.xlu1 %v7963_v45  ;;  %v8345_v45 = vsel %vm1895_vm0, %v1819_v15, 0.0  ;;  %12189 = vst [vmem:[#allocation24_spill] sm:$0xff] %v8356_v41  ;;  %v1567_v61 = vadd.f32 %v7794_v22, %v1432_v39  ;;  %v1436_v15 = vmul.f32 %v7777_v10, %v7957_v30  ;;  %v8364_v28 = vsel %vm1895_vm0, %v1822_v50, 0.0 }
 0x145   : > { %v1824_v42 = vmul.f32 %v7851_v33, %v1689_v24  ;;  %v1568_v26 = vadd.f32 %v7794_v22, %v1433_v21  ;;  %v1569_v44 = vadd.f32 %v7794_v22, %v1434_v48  ;;  %v1825_v27 = vmul.f32 %v7851_v33, %v1690_v63 }
 0x146   : > { %v8342_v43 = vpop.permute.xlu0 %1129  ;;  %v8353_v51 = vpop.permute.xlu1 %1136  ;;  %v1693_v54 = vmax.f32 %v1565_v23, 0.0  ;;  %v1694_v41 = vmax.f32 %v1566_v40, 0.0  ;;  %v1437_v39 = vmul.f32 %v7777_v10, %v7984_v13  ;;  %v1438_v30 = vmul.f32 %v7777_v10, %v7986_v59 }
 0x147   : > { %1924 = vadd.xlane.f32.xlu0 %v7976_v19  ;;  %v1692_v19 = vmax.f32 %v1564_v29, 0.0  ;;  %v1439_v24 = vmul.f32 %v7777_v10, %v8013_v17  ;;  %v8379_v50 = vsel %vm1895_vm0, %v1823_v25, 0.0  ;;  %v1826_v63 = vmul.f32 %v7851_v33, %v1691_v38 }
 0x148   : > { %1927 = vadd.xlane.f32.xlu1 %v7979_v31  ;;  %v1570_v31 = vadd.f32 %v7794_v22, %v1435_v53  ;;  %v1695_v29 = vmax.f32 %v1567_v61, 0.0  ;;  %v1571_v21 = vadd.f32 %v7794_v22, %v1436_v15  ;;  %v1440_v13 = vmul.f32 %v7777_v10, %v8015_v57 }
 0x149   : > { %v8389_v59 = vsel %vm1895_vm0, %v1824_v42, 0.0  ;;  %v1696_v17 = vmax.f32 %v1568_v26, 0.0  ;;  %v8394_v40 = vsel %vm1895_vm0, %v1825_v27, 0.0  ;;  %v1827_v38 = vmul.f32 %v7851_v33, %v1692_v19 }
 0x14a   : > { %v8385_v48 = vpop.permute.xlu0 %1143  ;;  %v8391_v23 = vpop.permute.xlu1 %1150  ;;  %v1572_v53 = vadd.f32 %v7794_v22, %v1437_v39  ;;  %v1573_v57 = vadd.f32 %v7794_v22, %v1438_v30  ;;  %v1828_v25 = vmul.f32 %v7851_v33, %v1693_v54  ;;  %v1698_v61 = vmax.f32 %v1570_v31, 0.0 }
 0x14b   : > { %1930 = vadd.xlane.f32.xlu0 %v7994_v52  ;;  %v1697_v52 = vmax.f32 %v1569_v44, 0.0  ;;  %v1574_v15 = vadd.f32 %v7794_v22, %v1439_v24  ;;  %v1441_v42 = vmul.f32 %v7777_v10, %v8045_v2  ;;  %v8406_v26 = vsel %vm1895_vm0, %v1826_v63, 0.0 }
 0x14c   : > { %1933 = vadd.xlane.f32.xlu1 %v8009_v1  ;;  %v1829_v1 = vmul.f32 %v7851_v33, %v1694_v41  ;;  %v1699_v19 = vmax.f32 %v1571_v21, 0.0  ;;  %v1575_v44 = vadd.f32 %v7794_v22, %v1440_v13  ;;  %v1442_v27 = vmul.f32 %v7777_v10, %v8047_v35 }
 0x14d   : > { %v1830_v41 = vmul.f32 %v7851_v33, %v1695_v29  ;;  %v1443_v54 = vmul.f32 %v7777_v10, %v8069_v20  ;;  %v8416_v2 = vsel %vm1895_vm0, %v1827_v38, 0.0  ;;  %v1832_v39 = vmul.f32 %v7851_v33, %v1697_v52 }
 0x14e   : > { %v1700_v30 = vmax.f32 %v1572_v53, 0.0  ;;  %v1701_v31 = vmax.f32 %v1573_v57, 0.0  ;;  %v8420_v24 = vpop.permute.xlu0 %1157  ;;  %v8423_v35 = vsel %vm1895_vm0, %v1828_v25, 0.0  ;;  %v1702_v63 = vmax.f32 %v1574_v15, 0.0  ;;  %v8431_v21 = vpop.permute.xlu1 %1164 }
 0x14f   : > { %1936 = vadd.xlane.f32.xlu0 %v8018_v18  ;;  %v1831_v18 = vmul.f32 %v7851_v33, %v1696_v17  ;;  %v1576_v20 = vadd.f32 %v7794_v22, %v1441_v42  ;;  %v1444_v29 = vmul.f32 %v7777_v10, %v8071_v49  ;;  %v1833_v13 = vmul.f32 %v7851_v33, %v1698_v61 }
 0x150   : > { %1939 = vadd.xlane.f32.xlu1 %v8021_v37  ;;  %v8426_v37 = vsel %vm1895_vm0, %v1829_v1, 0.0  ;;  %v1703_v17 = vmax.f32 %v1575_v44, 0.0  ;;  %v1577_v52 = vadd.f32 %v7794_v22, %v1442_v27  ;;  %v8438_v38 = vsel %vm1895_vm0, %v1830_v41, 0.0 }
 0x151   : > { %v1834_v53 = vmul.f32 %v7851_v33, %v1699_v19  ;;  %v1578_v57 = vadd.f32 %v7794_v22, %v1443_v54  ;;  %v1445_v49 = vmul.f32 %v7777_v10, %v8099_v46  ;;  %v8445_v25 = vsel %vm1895_vm0, %v1831_v18, 0.0  ;;  %v12191_v46 = vld [vmem:[#allocation29_spill] sm:$0xff] }
 0x152   : > { %v1446_v1 = vmul.f32 %v7777_v10, %v8101_v32  ;;  %v1835_v61 = vmul.f32 %v7851_v33, %v1700_v30  ;;  %v1836_v15 = vmul.f32 %v7851_v33, %v1701_v31  ;;  %v1704_v42 = vmax.f32 %v1576_v20, 0.0  ;;  %v8464_v54 = vpop.permute.xlu0 %1171  ;;  %v12195_v20 = vld [vmem:[#allocation9_spill] sm:$0xff] }
 0x153   : > { %1942 = vadd.xlane.f32.xlu0 %v8029_v3  ;;  %v8448_v3 = vsel %vm1895_vm0, %v1832_v39, 0.0  ;;  %v1579_v19 = vadd.f32 %v7794_v22, %v1444_v29  ;;  %v8459_v44 = vsel %vm1895_vm0, %v1833_v13, 0.0  ;;  %v1837_v27 = vmul.f32 %v7851_v33, %v1702_v63  ;;  %v12196_v63 = vld [vmem:[#allocation38_spill] sm:$0xff] }
 0x154   : > { %1945 = vadd.xlane.f32.xlu1 %v8036_v9  ;;  %12190 = vst [vmem:[#allocation26_spill] sm:$0xff] %v8448_v3  ;;  %v1447_v9 = vmul.f32 %v7777_v10, %v8122_v34  ;;  %12192 = vst [vmem:[#allocation27_spill] sm:$0xff] %v8459_v44  ;;  %v1705_v41 = vmax.f32 %v1577_v52, 0.0  ;;  %v1448_v32 = vmul.f32 %v7777_v10, %v8124_v7  ;;  %v12193_v34 = vld [vmem:[#allocation30_spill] sm:$0xff]  ;;  %v8468_v18 = vsel %vm1895_vm0, %v1834_v53, 0.0  ;;  %v8476_v52 = vpop.permute.xlu1 %1178 }
 0x155   : > { %12194 = vst [vmem:[#allocation28_spill] sm:$0xff] %v8468_v18  ;;  %v1838_v39 = vmul.f32 %v7851_v33, %v1703_v17  ;;  %v1706_v30 = vmax.f32 %v1578_v57, 0.0  ;;  %v1580_v31 = vadd.f32 %v7794_v22, %v1445_v49  ;;  %v1449_v29 = vmul.f32 %v7777_v10, %v12195_v20  ;;  %v12199_v49 = vld [vmem:[#allocation12_spill] sm:$0xff]  ;;  %v12200_v20 = vld [vmem:[#allocation31_spill] sm:$0xff] }
 0x156   : > { %v1450_v13 = vmul.f32 %v7777_v10, %v12196_v63  ;;  %v1581_v7 = vadd.f32 %v7794_v22, %v1446_v1  ;;  %v8481_v53 = vsel %vm1895_vm0, %v1835_v61, 0.0  ;;  %v8484_v17 = vsel %vm1895_vm0, %v1836_v15, 0.0  ;;  %v8508_v3 = vpop.permute.xlu0 %1185 }
 0x157   : > { %1948 = vadd.xlane.f32.xlu0 %v12191_v46  ;;  %v1582_v46 = vadd.f32 %v7794_v22, %v1447_v9  ;;  %12197 = vst [vmem:[#allocation29_spill] sm:$0xff] %v8481_v53  ;;  %12198 = vst [vmem:[#allocation30_spill] sm:$0xff] %v8484_v17  ;;  %v1707_v57 = vmax.f32 %v1579_v19, 0.0  ;;  %v8490_v63 = vsel %vm1895_vm0, %v1837_v27, 0.0  ;;  %v1839_v18 = vmul.f32 %v7851_v33, %v1704_v42  ;;  %v12202_v9 = vld [vmem:[#allocation13_spill] sm:$0xff]  ;;  %v12203_v53 = vld [vmem:[#allocation32_spill] sm:$0xff] }
 0x158   : > { %1951 = vadd.xlane.f32.xlu1 %v12193_v34  ;;  %v1451_v34 = vmul.f32 %v7777_v10, %v12199_v49  ;;  %12201 = vst [vmem:[#allocation9_spill] sm:$0xff] %v8490_v63  ;;  %v1583_v1 = vadd.f32 %v7794_v22, %v1448_v32  ;;  %v1452_v61 = vmul.f32 %v7777_v10, %v12202_v9  ;;  %v8498_v15 = vsel %vm1895_vm0, %v1838_v39, 0.0  ;;  %v12204_v32 = vld [vmem:[#allocation15_spill] sm:$0xff]  ;;  %v12205_v9 = vld [vmem:[#allocation16_spill] sm:$0xff] }
 0x159   : > { %v1840_v19 = vmul.f32 %v7851_v33, %v1705_v41  ;;  %v1708_v49 = vmax.f32 %v1580_v31, 0.0  ;;  %v1585_v27 = vadd.f32 %v7794_v22, %v1450_v13  ;;  %v1841_v63 = vmul.f32 %v7851_v33, %v1706_v30  ;;  %v8513_v31 = vpop.permute.xlu1 %1192 }
 0x15a   : > { %v1709_v42 = vmax.f32 %v1581_v7, 0.0  ;;  %v1710_v17 = vmax.f32 %v1582_v46, 0.0  ;;  %v1453_v44 = vmul.f32 %v7777_v10, %v12204_v32  ;;  %v1586_v39 = vadd.f32 %v7794_v22, %v1451_v34  ;;  %v8524_v32 = vld [vmem:[%s12070_s3] ss:$0 sm:$0xff] }
 0x15b   : > { %1954 = vadd.xlane.f32.xlu0 %v12200_v20  ;;  %v1584_v20 = vadd.f32 %v7794_v22, %v1449_v29  ;;  %v1455_v41 = vmul.f32 %v7777_v10, %v8232_v62  ;;  %v12206_v29 = vld [vmem:[#allocation33_spill] sm:$0xff]  ;;  %v8517_v30 = vsel %vm1895_vm0, %v1839_v18, 0.0  ;;  %v1842_v13 = vmul.f32 %v7851_v33, %v1707_v57  ;;  %v12207_v62 = vld [vmem:[#allocation34_spill] sm:$0xff] }
 0x15c   : > { %1957 = vadd.xlane.f32.xlu1 %v12203_v53  ;;  %v1454_v53 = vmul.f32 %v7777_v10, %v12205_v9  ;;  %v1711_v7 = vmax.f32 %v1583_v1, 0.0  ;;  %v1587_v46 = vadd.f32 %v7794_v22, %v1452_v61  ;;  %v1456_v10 = vmul.f32 %v8524_v32, %v8234_v5  ;;  %v8539_v1 = vld [vmem:[%s12071_s4] ss:$0 sm:$0xff] }
 0x15d   : > { %v8530_v34 = vsel %vm1895_vm0, %v1840_v19, 0.0  ;;  %v1712_v18 = vmax.f32 %v1584_v20, 0.0  ;;  %v1713_v9 = vmax.f32 %v1585_v27, 0.0  ;;  %v8533_v57 = vsel %vm1895_vm0, %v1841_v63, 0.0 }
 0x15e   : > { %12208 = vst [vmem:[#allocation38_spill] sm:$0xff] %v8530_v34  ;;  %12209 = vst [vmem:[#allocation12_spill] sm:$0xff] %v8533_v57  ;;  %v1843_v22 = vmul.f32 %v7851_v33, %v1708_v49  ;;  %v1588_v5 = vadd.f32 %v8539_v1, %v1453_v44  ;;  %v1589_v61 = vadd.f32 %v8539_v1, %v1454_v53  ;;  %v1714_v27 = vmax.f32 %v1586_v39, 0.0 }
 0x15f   : > { %1960 = vadd.xlane.f32.xlu0 %v12206_v29  ;;  %v1844_v19 = vmul.f32 %v7851_v33, %v1709_v42  ;;  %v1845_v20 = vmul.f32 %v7851_v33, %v1710_v17  ;;  %v1590_v63 = vadd.f32 %v8539_v1, %v1455_v41  ;;  %v1457_v49 = vmul.f32 %v8524_v32, %v8257_v14  ;;  %v12210_v29 = vld [vmem:[#allocation35_spill] sm:$0xff]  ;;  %v8555_v42 = vpop.permute.xlu0 %1199  ;;  %v12212_v17 = vld [vmem:[#allocation36_spill] sm:$0xff]  ;;  %v8567_v41 = vpop.permute.xlu1 %1206 }
 0x160   : > { %1963 = vadd.xlane.f32.xlu1 %v12207_v62  ;;  %v8550_v62 = vsel %vm1895_vm0, %v1842_v13, 0.0  ;;  %v1715_v57 = vmax.f32 %v1587_v46, 0.0  ;;  %v1591_v44 = vadd.f32 %v8539_v1, %v1456_v10  ;;  %v1458_v53 = vmul.f32 %v8524_v32, %v8259_v11 }
 0x161   : > { %12211 = vst [vmem:[#allocation31_spill] sm:$0xff] %v8550_v62  ;;  %v1846_v14 = vmul.f32 %v7851_v33, %v1711_v7  ;;  %v1459_v39 = vmul.f32 %v8524_v32, %v8282_v60  ;;  %v8570_v13 = vsel %vm1895_vm0, %v1843_v22, 0.0  ;;  %v1847_v11 = vmul.f32 %v7851_v33, %v1712_v18  ;;  %v12216_v22 = vld [vmem:[#allocation6_spill] sm:$0xff] }
 0x162   : > { %12213 = vst [vmem:[#allocation13_spill] sm:$0xff] %v8570_v13  ;;  %v1848_v46 = vmul.f32 %v7851_v33, %v1713_v9  ;;  %v1716_v10 = vmax.f32 %v1588_v5, 0.0  ;;  %v8578_v62 = vsel %vm1895_vm0, %v1845_v20, 0.0  ;;  %v1718_v7 = vmax.f32 %v1590_v63, 0.0  ;;  %v2666_v13 = vld [vmem:[%s8562_s19] sm:$0xff] }
 0x163   : > { %1966 = vadd.xlane.f32.xlu0 %v12210_v29  ;;  %v1717_v29 = vmax.f32 %v1589_v61, 0.0  ;;  %12215 = vst [vmem:[#allocation15_spill] sm:$0xff] %v8578_v62  ;;  %v1592_v60 = vadd.f32 %v8539_v1, %v1457_v49  ;;  %v1460_v34 = vmul.f32 %v8524_v32, %v8284_v12  ;;  %v1849_v18 = vmul.f32 %v7851_v33, %v1714_v27  ;;  %v12217_v61 = vld [vmem:[#allocation37_spill] sm:$0xff] }
 0x164   : > { %1969 = vadd.xlane.f32.xlu1 %v12212_v17  ;;  %v8575_v17 = vsel %vm1895_vm0, %v1844_v19, 0.0  ;;  %v1719_v9 = vmax.f32 %v1591_v44, 0.0  ;;  %v1593_v5 = vadd.f32 %v8539_v1, %v1458_v53  ;;  %v8589_v19 = vsel %vm1895_vm0, %v1846_v14, 0.0  ;;  %v8603_v53 = vpop.permute.xlu0 %1213  ;;  %v12221_v14 = vld [vmem:[#allocation25_spill] sm:$0xff] }
 0x165   : > { %12214 = vst [vmem:[#allocation32_spill] sm:$0xff] %v8575_v17  ;;  %12218 = vst [vmem:[#allocation16_spill] sm:$0xff] %v8589_v19  ;;  %v1850_v20 = vmul.f32 %v7851_v33, %v1715_v57  ;;  %v1594_v63 = vadd.f32 %v8539_v1, %v1459_v39  ;;  %v1461_v12 = vmul.f32 %v8524_v32, %v8316_v36  ;;  %v8596_v49 = vsel %vm1895_vm0, %v1847_v11, 0.0  ;;  %v8611_v57 = vld [vmem:[%s12072_s5] ss:$0 sm:$0xff] }
 0x166   : > { %12219 = vst [vmem:[#allocation33_spill] sm:$0xff] %v8596_v49  ;;  %v8599_v27 = vsel %vm1895_vm0, %v1848_v46, 0.0  ;;  %v1462_v44 = vmul.f32 %v8524_v32, %v8318_v47  ;;  %v2705_v33 = vrot.slane %v2666_v13, %v12221_v14  ;;  %v1851_v36 = vmul.f32 %v8611_v57, %v1716_v10  ;;  %v12222_v47 = vld [vmem:[#allocation7_spill] sm:$0xff]  ;;  %v12224_v19 = vld [vmem:[#allocation8_spill] sm:$0xff] }
 0x167   : > { %1972 = vadd.xlane.f32.xlu0 %v12216_v22  ;;  %12220 = vst [vmem:[#allocation34_spill] sm:$0xff] %v8599_v27  ;;  %v1852_v39 = vmul.f32 %v8611_v57, %v1717_v29  ;;  %v1720_v11 = vmax.f32 %v1592_v60, 0.0  ;;  %v1595_v46 = vadd.f32 %v8539_v1, %v1460_v34  ;;  %v8616_v22 = vpop.permute.xlu1 %1220  ;;  %v1853_v27 = vmul.f32 %v8611_v57, %v1718_v7 }
 0x168   : > { %1975 = vadd.xlane.f32.xlu1 %v12217_v61  ;;  %v8620_v61 = vsel %vm1895_vm0, %v1849_v18, 0.0  ;;  %v1721_v49 = vmax.f32 %v1593_v5, 0.0  ;;  %v2713_v62 = vcombine.high %v2705_v33, %v2705_v33  ;;  %v8625_v10 = vsel %vm1895_vm0, %v1850_v20, 0.0 }
 0x169   : > { %12223 = vst [vmem:[#allocation35_spill] sm:$0xff] %v8620_v61  ;;  %12225 = vst [vmem:[#allocation36_spill] sm:$0xff] %v8625_v10  ;;  %v1854_v29 = vmul.f32 %v8611_v57, %v1719_v9  ;;  %v1722_v60 = vmax.f32 %v1594_v63, 0.0  ;;  %v1596_v34 = vadd.f32 %v8539_v1, %v1461_v12  ;;  %v2698_v17 = vcombine.high %v2666_v13, %v2666_v13  ;;  %v12228_v63 = vld [vmem:[#allocation39_spill] sm:$0xff]  ;;  %v8648_v12 = vpop.permute.xlu0 %1227 }
 0x16a   : > { %v1597_v18 = vadd.f32 %v8539_v1, %v1462_v44  ;;  %v8633_v7 = vrot.slane %v2705_v33, %v12221_v14  ;;  %v8636_v5 = vsel %vm1895_vm0, %v1851_v36, 0.0  ;;  %v1723_v20 = vmax.f32 %v1595_v46, 0.0  ;;  %v12230_v44 = vld [vmem:[#allocation40_spill] sm:$0xff] }
 0x16b   : > { %1978 = vadd.xlane.f32.xlu0 %v12222_v47  ;;  %v1463_v47 = vmul.f32 %v8524_v32, %v8342_v43  ;;  %12226 = vst [vmem:[#allocation6_spill] sm:$0xff] %v8636_v5  ;;  %v1464_v9 = vmul.f32 %v8524_v32, %v8353_v51  ;;  %v8645_v43 = vsel %vm1895_vm0, %v1853_v27, 0.0  ;;  %v1855_v13 = vmul.f32 %v8611_v57, %v1720_v11 }
 0x16c   : > { %1981 = vadd.xlane.f32.xlu1 %v12224_v19  ;;  %v8639_v19 = vsel %vm1895_vm0, %v1852_v39, 0.0  ;;  %12229 = vst [vmem:[#allocation25_spill] sm:$0xff] %v8645_v43  ;;  %v2743_v33 = vcombine.high %v8633_v7, %v8633_v7  ;;  %v8654_v36 = vrot.slane %v2713_v62, %v12221_v14  ;;  %v8657_v51 = vsel %vm1895_vm0, %v1854_v29, 0.0 }
 0x16d   : > { %12227 = vst [vmem:[#allocation37_spill] sm:$0xff] %v8639_v19  ;;  %12232 = vst [vmem:[#allocation8_spill] sm:$0xff] %v8657_v51  ;;  %v1856_v39 = vmul.f32 %v8611_v57, %v1721_v49  ;;  %v1724_v27 = vmax.f32 %v1596_v34, 0.0  ;;  %v1598_v46 = vadd.f32 %v8539_v1, %v1463_v47  ;;  %v2712_v11 = vrot.slane %v2698_v17, %v12221_v14  ;;  %v12233_v34 = vld [vmem:[#allocation10_spill] sm:$0xff]  ;;  %v12234_v47 = vld [vmem:[#allocation4_spill] sm:$0xff]  ;;  %v8700_v10 = vpop.permute.xlu0 %1241 }
 0x16e   : > { %12231 = vst [vmem:[#allocation7_spill] sm:$0xff] %v8654_v36  ;;  %v1725_v43 = vmax.f32 %v1597_v18, 0.0  ;;  %v1465_v62 = vmul.f32 %v8524_v32, %v8385_v48  ;;  %v1466_v29 = vmul.f32 %v8524_v32, %v8391_v23  ;;  %v8670_v51 = vstv %s8605_s20  ;;  %v12236_v18 = vld [vmem:[#allocation11_spill] sm:$0xff] }
 0x16f   : > { %1984 = vadd.xlane.f32.xlu0 %v12228_v63  ;;  %v8661_v63 = vpop.permute.xlu1 %1234  ;;  %v1599_v49 = vadd.f32 %v8539_v1, %v1464_v9  ;;  %v8677_v17 = vsel %vm1895_vm0, %v1855_v13, 0.0  ;;  %v1467_v48 = vmul.f32 %v8524_v32, %v8420_v24  ;;  %v8684_v23 = vrot.slane %v2743_v33, %v12234_v47 }
 0x170   : > { %1987 = vadd.xlane.f32.xlu1 %v12230_v44  ;;  %v1857_v44 = vmul.f32 %v8611_v57, %v1722_v60  ;;  %12235 = vst [vmem:[#allocation39_spill] sm:$0xff] %v8677_v17  ;;  %v1858_v60 = vmul.f32 %v8611_v57, %v1723_v20  ;;  %v2745_v9 = vcombine.high %v8654_v36, %v8654_v36  ;;  %v8690_v5 = vsel %vm1895_vm0, %v1856_v39, 0.0 }
 0x171   : > { %12237 = vst [vmem:[#allocation40_spill] sm:$0xff] %v8690_v5  ;;  %v1726_v19 = vmax.f32 %v1598_v46, 0.0  ;;  %v2714_v13 = vcombine.high %v2712_v11, %v2712_v11  ;;  %v1859_v20 = vmul.f32 %v8611_v57, %v1724_v27  ;;  %v1600_v24 = vadd.f32 %v8539_v1, %v1465_v62  ;;  %v12239_v46 = vld [vmem:[#allocation41_spill] sm:$0xff] }
 0x172   : > { %v8693_v17 = vsel %vm1895_vm0, %v1857_v44, 0.0  ;;  %v1468_v33 = vmul.f32 %v8524_v32, %v8431_v21  ;;  %v1860_v61 = vmul.f32 %v8611_v57, %v1725_v43  ;;  %v1727_v39 = vmax.f32 %v1599_v49, 0.0 }
 0x173   : > { %1990 = vadd.xlane.f32.xlu0 %v12233_v34  ;;  %v2667_v34 = vld [vmem:[%s8562_s19 + $0x8] sm:$0xff]  ;;  %12238 = vst [vmem:[#allocation10_spill] sm:$0xff] %v8693_v17  ;;  %v8703_v5 = vpop.permute.xlu1 %1248  ;;  %v8707_v44 = vrot.slane %v2712_v11, %v12221_v14  ;;  %v8711_v62 = vsel %vm1895_vm0, %v1858_v60, 0.0  ;;  %v1469_v21 = vmul.f32 %v8524_v32, %v8464_v54  ;;  %v12242_v17 = vld [vmem:[#allocation42_spill] sm:$0xff]  ;;  %v8720_v49 = vrot.slane %v2745_v9, %v12234_v47 }
 0x174   : > { %1993 = vadd.xlane.f32.xlu1 %v12236_v18  ;;  %v1601_v18 = vadd.f32 %v8539_v1, %v1466_v29  ;;  %v2754_v27 = vrot.slane %v2667_v34, %v12221_v14  ;;  %12241 = vst [vmem:[#allocation11_spill] sm:$0xff] %v8711_v62  ;;  %v1602_v29 = vadd.f32 %v8539_v1, %v1467_v48  ;;  %v8728_v60 = vsel %vm1895_vm0, %v1859_v20, 0.0  ;;  %v12246_v9 = vld [vmem:[#allocation14_spill] sm:$0xff] }
 0x175   : > { %12240 = vst [vmem:[#allocation4_spill] sm:$0xff] %v8707_v44  ;;  %12243 = vst [vmem:[#allocation41_spill] sm:$0xff] %v8720_v49  ;;  %v1470_v11 = vmul.f32 %v8524_v32, %v8476_v52  ;;  %v1861_v48 = vmul.f32 %v8611_v57, %v1726_v19  ;;  %v1728_v54 = vmax.f32 %v1600_v24, 0.0  ;;  %v8733_v43 = vsel %vm1895_vm0, %v1860_v61, 0.0  ;;  %v8742_v24 = vpop.permute.xlu0 %1255 }
 0x176   : > { %12244 = vst [vmem:[#allocation42_spill] sm:$0xff] %v8728_v60  ;;  %v1729_v62 = vmax.f32 %v1601_v18, 0.0  ;;  %12245 = vst [vmem:[#allocation45_spill] sm:$0xff] %v8733_v43  ;;  %v2762_v49 = vcombine.high %v2754_v27, %v2754_v27  ;;  %v1862_v20 = vmul.f32 %v8611_v57, %v1727_v39  ;;  %v1730_v60 = vmax.f32 %v1602_v29, 0.0  ;;  %v12247_v18 = vld [vmem:[#allocation43_spill] sm:$0xff] }
 0x177   : > { %1996 = vadd.xlane.f32.xlu0 %v12239_v46  ;;  %v8725_v46 = vrot.slane %v2714_v13, %v12221_v14  ;;  %v2744_v13 = vcombine.high %v8707_v44, %v8707_v44  ;;  %v1604_v19 = vadd.f32 %v8539_v1, %v1469_v21  ;;  %v1471_v52 = vmul.f32 %v8524_v32, %v8508_v3  ;;  %v8750_v43 = vpop.permute.xlu1 %1262 }
 0x178   : > { %1999 = vadd.xlane.f32.xlu1 %v12242_v17  ;;  %v1603_v17 = vadd.f32 %v8539_v1, %v1468_v33  ;;  %v2747_v33 = vcombine.high %v2667_v34, %v2667_v34  ;;  %v8755_v29 = vsel %vm1895_vm0, %v1861_v48, 0.0  ;;  %v1863_v44 = vmul.f32 %v8611_v57, %v1728_v54 }
 0x179   : > { %v2746_v61 = vcombine.high %v8725_v46, %v8725_v46  ;;  %12248 = vst [vmem:[#allocation14_spill] sm:$0xff] %v8755_v29  ;;  %v1864_v34 = vmul.f32 %v8611_v57, %v1729_v62  ;;  %v8763_v3 = vrot.slane %v2744_v13, %v12234_v47  ;;  %v8766_v36 = vrot.slane %v2754_v27, %v12221_v14 }
 0x17a   : > { %v1731_v21 = vmax.f32 %v1603_v17, 0.0  ;;  %v8769_v39 = vrot.slane %v2762_v49, %v12221_v14  ;;  %v8772_v48 = vsel %vm1895_vm0, %v1862_v20, 0.0  ;;  %v1732_v17 = vmax.f32 %v1604_v19, 0.0 }
 0x17b   : > { %2002 = vadd.xlane.f32.xlu0 %v12246_v9  ;;  %v1605_v9 = vadd.f32 %v8539_v1, %v1470_v11  ;;  %v12249_v11 = vld [vmem:[#allocation44_spill] sm:$0xff]  ;;  %12250 = vst [vmem:[#allocation43_spill] sm:$0xff] %v8766_v36  ;;  %12252 = vst [vmem:[#allocation46_spill] sm:$0xff] %v8772_v48  ;;  %v8776_v54 = vrot.slane %v2746_v61, %v12234_v47  ;;  %v2761_v62 = vrot.slane %v2747_v33, %v12221_v14 }
 0x17c   : > { %2005 = vadd.xlane.f32.xlu1 %v12247_v18  ;;  %v1472_v18 = vmul.f32 %v8524_v32, %v8513_v31  ;;  %12251 = vst [vmem:[#allocation44_spill] sm:$0xff] %v8769_v39  ;;  %v12253_v31 = vld [vmem:[#allocation17_spill] sm:$0xff]  ;;  %v1865_v13 = vmul.f32 %v8611_v57, %v1730_v60  ;;  %v1606_v27 = vadd.f32 %v8539_v1, %v1471_v52  ;;  %v8789_v61 = vsel %vm1895_vm0, %v1863_v44, 0.0 }
 0x17d   : > { %12254 = vst [vmem:[#allocation17_spill] sm:$0xff] %v8776_v54  ;;  %v1473_v49 = vmul.f32 %v8524_v32, %v8555_v42  ;;  %v1474_v20 = vmul.f32 %v8524_v32, %v8567_v41  ;;  %12255 = vst [vmem:[#allocation47_spill] sm:$0xff] %v8789_v61  ;;  %v8792_v33 = vsel %vm1895_vm0, %v1864_v34, 0.0  ;;  %v1866_v60 = vmul.f32 %v8611_v57, %v1731_v21  ;;  %v8797_v42 = vpop.permute.xlu1 %1276  ;;  %v12258_v34 = vld [vmem:[#allocation19_spill] sm:$0xff] }
 0x17e   : > { %v1607_v19 = vadd.f32 %v8539_v1, %v1472_v18  ;;  %12256 = vst [vmem:[#allocation48_spill] sm:$0xff] %v8792_v33  ;;  %v1475_v52 = vmul.f32 %v8524_v32, %v8603_v53  ;;  %v2792_v44 = vcombine.high %v8766_v36, %v8766_v36  ;;  %v2794_v21 = vcombine.high %v8769_v39, %v8769_v39  ;;  %v2668_v53 = vld [vmem:[%s8562_s19 + $0x10] sm:$0xff] }
 0x17f   : > { %2008 = vadd.xlane.f32.xlu0 %v12249_v11  ;;  %v1733_v11 = vmax.f32 %v1605_v9, 0.0  ;;  %v12257_v9 = vld [vmem:[#allocation18_spill] sm:$0xff]  ;;  %v2763_v33 = vcombine.high %v2761_v62, %v2761_v62  ;;  %v8811_v61 = vsel %vm1895_vm0, %v1865_v13, 0.0  ;;  %v1734_v48 = vmax.f32 %v1606_v27, 0.0  ;;  %v12262_v27 = vld [vmem:[#allocation20_spill] sm:$0xff] }
 0x180   : > { %2011 = vadd.xlane.f32.xlu1 %v12253_v31  ;;  %v8786_v31 = vpop.permute.xlu0 %1269  ;;  %12259 = vst [vmem:[#allocation18_spill] sm:$0xff] %v8811_v61  ;;  %v1608_v41 = vadd.f32 %v8539_v1, %v1473_v49  ;;  %v1609_v18 = vadd.f32 %v8539_v1, %v1474_v20  ;;  %v1735_v36 = vmax.f32 %v1607_v19, 0.0  ;;  %v8820_v39 = vrot.slane %v2761_v62, %v12221_v14  ;;  %v12263_v20 = vld [vmem:[#allocation21_spill] sm:$0xff] }
 0x181   : > { %v1868_v29 = vmul.f32 %v8611_v57, %v1733_v11  ;;  %v8823_v54 = vsel %vm1895_vm0, %v1866_v60, 0.0  ;;  %v1610_v13 = vadd.f32 %v8539_v1, %v1475_v52  ;;  %v8830_v49 = vrot.slane %v2792_v44, %v12234_v47 }
 0x182   : > { %12260 = vst [vmem:[#allocation19_spill] sm:$0xff] %v8820_v39  ;;  %12261 = vst [vmem:[#allocation49_spill] sm:$0xff] %v8823_v54  ;;  %v2803_v11 = vrot.slane %v2668_v53, %v12221_v14  ;;  %v8839_v19 = vrot.slane %v2794_v21, %v12234_v47  ;;  %v8842_v60 = vrot.slane %v2763_v33, %v12221_v14  ;;  %v1736_v52 = vmax.f32 %v1608_v41, 0.0 }
 0x183   : > { %2014 = vadd.xlane.f32.xlu0 %v12257_v9  ;;  %v1867_v9 = vmul.f32 %v8611_v57, %v1732_v17  ;;  %v1477_v17 = vmul.f32 %v8524_v32, %v8648_v12  ;;  %v1737_v44 = vmax.f32 %v1609_v18, 0.0  ;;  %v8850_v54 = vsel %vm1895_vm0, %v1868_v29, 0.0  ;;  %v12266_v18 = vld [vmem:[#allocation22_spill] sm:$0xff] }
 0x184   : > { %2017 = vadd.xlane.f32.xlu1 %v12258_v34  ;;  %v1476_v34 = vmul.f32 %v8524_v32, %v8616_v22  ;;  %v1478_v22 = vmul.f32 %v8524_v32, %v8661_v63  ;;  %v8835_v62 = vpop.permute.xlu0 %1283  ;;  %12265 = vst [vmem:[#allocation21_spill] sm:$0xff] %v8850_v54  ;;  %v1869_v63 = vmul.f32 %v8611_v57, %v1734_v48 }
 0x185   : > { %v8845_v12 = vsel %vm1895_vm0, %v1867_v9, 0.0  ;;  %v2793_v33 = vcombine.high %v8820_v39, %v8820_v39  ;;  %v1870_v9 = vmul.f32 %v8611_v57, %v1735_v36  ;;  %v1612_v41 = vadd.f32 %v8539_v1, %v1477_v17 }
 0x186   : > { %12264 = vst [vmem:[#allocation20_spill] sm:$0xff] %v8845_v12  ;;  %v1738_v12 = vmax.f32 %v1610_v13, 0.0  ;;  %v2795_v29 = vcombine.high %v8842_v60, %v8842_v60  ;;  %v2811_v54 = vcombine.high %v2803_v11, %v2803_v11  ;;  %v1613_v48 = vadd.f32 %v8539_v1, %v1478_v22 }
 0x187   : > { %2020 = vadd.xlane.f32.xlu0 %v12262_v27  ;;  %v8847_v27 = vpop.permute.xlu1 %1290  ;;  %v2796_v36 = vcombine.high %v2668_v53, %v2668_v53  ;;  %v1480_v13 = vmul.f32 %v8524_v32, %v8703_v5  ;;  %v8872_v17 = vsel %vm1895_vm0, %v1869_v63, 0.0  ;;  %v1872_v61 = vmul.f32 %v8611_v57, %v1737_v44 }
 0x188   : > { %2023 = vadd.xlane.f32.xlu1 %v12263_v20  ;;  %v1611_v20 = vadd.f32 %v8539_v1, %v1476_v34  ;;  %v1479_v34 = vmul.f32 %v8524_v32, %v8700_v10  ;;  %v1298_v39 = vpop.permute.xlu0 %1297  ;;  %v8877_v10 = vrot.slane %v2793_v33, %v12234_v47  ;;  %v8883_v53 = vsel %vm1895_vm0, %v1870_v9, 0.0 }
 0x189   : > { %12267 = vst [vmem:[#allocation22_spill] sm:$0xff] %v8883_v53  ;;  %v1740_v21 = vmax.f32 %v1612_v41, 0.0  ;;  %v8892_v44 = vrot.slane %v2811_v54, %v12221_v14  ;;  %v1873_v63 = vmul.f32 %v8611_v57, %v1738_v12  ;;  %v1481_v33 = vmul.f32 %v8524_v32, %v8742_v24 }
 0x18a   : > { %v1739_v22 = vmax.f32 %v1611_v20, 0.0  ;;  %v1741_v20 = vmax.f32 %v1613_v48, 0.0  ;;  %v2810_v9 = vrot.slane %v2796_v36, %v12221_v14  ;;  %v1482_v41 = vmul.f32 %v8524_v32, %v8750_v43 }
 0x18b   : > { %2026 = vadd.xlane.f32.xlu0 %v12266_v18  ;;  %v1871_v18 = vmul.f32 %v8611_v57, %v1736_v52  ;;  %v8885_v5 = vpop.permute.xlu1 %1304  ;;  %v8889_v52 = vrot.slane %v2795_v29, %v12234_v47  ;;  %v8907_v12 = vsel %vm1895_vm0, %v1872_v61, 0.0  ;;  %v2843_v24 = vcombine.high %v8892_v44, %v8892_v44 }
 0x18c   : > { %2029 = vadd.xlane.f32.xlu1 %v8278_v6  ;;  %v8880_v6 = vrot.slane %v2803_v11, %v12221_v14  ;;  %v1614_v11 = vadd.f32 %v8539_v1, %v1479_v34  ;;  %12269 = vst [vmem:[#allocation51_spill] sm:$0xff] %v8907_v12  ;;  %v1874_v48 = vmul.f32 %v8611_v57, %v1739_v22  ;;  %v8922_v34 = vsel %vm1895_vm0, %v1873_v63, 0.0  ;;  %v1312_v29 = vpop.permute.xlu0 %1311  ;;  %v2669_v12 = vld [vmem:[%s8562_s19 + $0x18] sm:$0xff] }
 0x18d   : > { %v8904_v54 = vsel %vm1895_vm0, %v1871_v18, 0.0  ;;  %v1483_v43 = vmul.f32 %v8524_v32, %v8786_v31  ;;  %12270 = vst [vmem:[#allocation52_spill] sm:$0xff] %v8922_v34  ;;  %v1875_v36 = vmul.f32 %v8611_v57, %v1740_v21  ;;  %v1616_v18 = vadd.f32 %v8539_v1, %v1481_v33 }
 0x18e   : > { %12268 = vst [vmem:[#allocation50_spill] sm:$0xff] %v8904_v54  ;;  %v2812_v22 = vcombine.high %v2810_v9, %v2810_v9  ;;  %v1876_v31 = vmul.f32 %v8611_v57, %v1741_v20  ;;  %v1484_v61 = vmul.f32 %v8524_v32, %v8797_v42  ;;  %v8933_v34 = vrot.slane %v2810_v9, %v12221_v14 }
 0x18f   : > { %2032 = vadd.xlane.f32.xlu0 %v8287_v58  ;;  %v1615_v58 = vadd.f32 %v8539_v1, %v1480_v13  ;;  %v1742_v13 = vmax.f32 %v1614_v11, 0.0  ;;  %v1319_v63 = vpop.permute.xlu1 %1318  ;;  %v1485_v21 = vmul.f32 %v8524_v32, %v8835_v62  ;;  %v8944_v20 = vsel %vm1895_vm0, %v1874_v48, 0.0 }
 0x190   : > { %2035 = vadd.xlane.f32.xlu1 %v8290_v55  ;;  %v2841_v55 = vcombine.high %v8880_v6, %v8880_v6  ;;  %12271 = vst [vmem:[#allocation53_spill] sm:$0xff] %v8944_v20  ;;  %v1618_v33 = vadd.f32 %v8539_v1, %v1483_v43  ;;  %v1486_v42 = vmul.f32 %v8524_v32, %v8847_v27  ;;  %v8952_v62 = vsel %vm1895_vm0, %v1875_v36, 0.0 }
 0x191   : > { %v1743_v54 = vmax.f32 %v1615_v58, 0.0  ;;  %v2852_v9 = vrot.slane %v2669_v12, %v12221_v14  ;;  %12272 = vst [vmem:[#allocation54_spill] sm:$0xff] %v8952_v62  ;;  %v1744_v58 = vmax.f32 %v1616_v18, 0.0  ;;  %v1877_v48 = vmul.f32 %v8611_v57, %v1742_v13  ;;  %v1326_v62 = vpop.permute.xlu0 %1325 }
 0x192   : > { %v8938_v11 = vrot.slane %v2841_v55, %v12234_v47  ;;  %v8956_v55 = vrot.slane %v2812_v22, %v12221_v14  ;;  %v1619_v27 = vadd.f32 %v8539_v1, %v1484_v61  ;;  %v1620_v18 = vadd.f32 %v8539_v1, %v1485_v21 }
 0x193   : > { %2038 = vadd.xlane.f32.xlu0 %v8300_v8  ;;  %v1617_v8 = vadd.f32 %v8539_v1, %v1482_v41  ;;  %v12273_v41 = vld [vmem:[#allocation23_spill] sm:$0xff]  ;;  %v1878_v36 = vmul.f32 %v8611_v57, %v1743_v54  ;;  %v2842_v22 = vcombine.high %v8933_v34, %v8933_v34  ;;  %v1621_v13 = vadd.f32 %v8539_v1, %v1486_v42 }
 0x194   : > { %2041 = vadd.xlane.f32.xlu1 %v8307_v16  ;;  %v8941_v16 = vrot.slane %v2843_v24, %v12234_v47  ;;  %v8959_v24 = vsel %vm1895_vm0, %v1876_v31, 0.0  ;;  %v2845_v31 = vcombine.high %v2669_v12, %v2669_v12  ;;  %v2844_v61 = vcombine.high %v8956_v55, %v8956_v55 }
 0x195   : > { %12274 = vst [vmem:[#allocation23_spill] sm:$0xff] %v8959_v24  ;;  %v1745_v43 = vmax.f32 %v1617_v8, 0.0  ;;  %v1746_v24 = vmax.f32 %v1618_v33, 0.0  ;;  %v1333_v8 = vpop.permute.xlu1 %1332  ;;  %v1488_v54 = vmul.f32 %v8524_v32, %v8885_v5  ;;  %v8980_v12 = vsel %vm1895_vm0, %v1877_v48, 0.0 }
 0x196   : > { %12275 = vst [vmem:[#allocation55_spill] sm:$0xff] %v8980_v12  ;;  %v1879_v21 = vmul.f32 %v8611_v57, %v1744_v58  ;;  %v1747_v33 = vmax.f32 %v1619_v27, 0.0  ;;  %v8987_v42 = vsel %vm1895_vm0, %v1878_v36, 0.0  ;;  %v1748_v5 = vmax.f32 %v1620_v18, 0.0 }
 0x197   : > { %2044 = vadd.xlane.f32.xlu0 %v8310_v4  ;;  %v2860_v4 = vcombine.high %v2852_v9, %v2852_v9  ;;  %12276 = vst [vmem:[#allocation56_spill] sm:$0xff] %v8987_v42  ;;  %v1880_v20 = vmul.f32 %v8611_v57, %v1745_v43  ;;  %v8992_v53 = vrot.slane %v2842_v22, %v12234_v47  ;;  %v12277_v22 = vld [vmem:[#allocation24_spill] sm:$0xff] }
 0x198   : > { %2047 = vadd.xlane.f32.xlu1 %v12273_v41  ;;  %v1487_v41 = vmul.f32 %v8524_v32, %v1298_v39  ;;  %v2859_v48 = vrot.slane %v2845_v31, %v12221_v14  ;;  %v1749_v39 = vmax.f32 %v1621_v13, 0.0  ;;  %v8997_v58 = vrot.slane %v2844_v61, %v12234_v47 }
 0x199   : > { %v1881_v27 = vmul.f32 %v8611_v57, %v1746_v24  ;;  %v1623_v43 = vadd.f32 %v8539_v1, %v1488_v54  ;;  %v1489_v36 = vmul.f32 %v8524_v32, %v1312_v29  ;;  %v1490_v18 = vmul.f32 %v8524_v32, %v1319_v63 }
 0x19a   : > { %v9008_v31 = vsel %vm1895_vm0, %v1879_v21, 0.0  ;;  %v9015_v24 = vsel %vm1895_vm0, %v1880_v20, 0.0  ;;  %v1882_v29 = vmul.f32 %v8611_v57, %v1747_v33  ;;  %v2861_v54 = vcombine.high %v2859_v48, %v2859_v48 }
 0x19b   : > { %2050 = vadd.xlane.f32.xlu0 %v8332_v56  ;;  %v8984_v56 = vrot.slane %v2852_v9, %v12221_v14  ;;  %v9000_v9 = vrot.slane %v2860_v4, %v12221_v14  ;;  %12278 = vst [vmem:[#allocation24_spill] sm:$0xff] %v9008_v31  ;;  %12279 = vst [vmem:[#allocation57_spill] sm:$0xff] %v9015_v24  ;;  %v1883_v21 = vmul.f32 %v8611_v57, %v1748_v5 }
 0x19c   : > { %2053 = vadd.xlane.f32.xlu1 %v8345_v45  ;;  %v1622_v45 = vadd.f32 %v8539_v1, %v1487_v41  ;;  %v1340_v41 = vpop.permute.xlu0 %1339  ;;  %v9026_v20 = vsel %vm1895_vm0, %v1881_v27, 0.0  ;;  %v1884_v24 = vmul.f32 %v8611_v57, %v1749_v39  ;;  %v1751_v33 = vmax.f32 %v1623_v43, 0.0 }
 0x19d   : > { %v2890_v4 = vcombine.high %v8984_v56, %v8984_v56  ;;  %v2892_v61 = vcombine.high %v9000_v9, %v9000_v9  ;;  %12280 = vst [vmem:[#allocation58_spill] sm:$0xff] %v9026_v20  ;;  %v1625_v31 = vadd.f32 %v8539_v1, %v1490_v18  ;;  %v1492_v42 = vmul.f32 %v8524_v32, %v1333_v8 }
 0x19e   : > { %v1750_v63 = vmax.f32 %v1622_v45, 0.0  ;;  %v1624_v45 = vadd.f32 %v8539_v1, %v1489_v36  ;;  %v9039_v27 = vrot.slane %v2859_v48, %v12221_v14  ;;  %v9042_v39 = vsel %vm1895_vm0, %v1882_v29, 0.0 }
 0x19f   : > { %2056 = vadd.xlane.f32.xlu0 %v8348_v0  ;;  %v1347_v0 = vpop.permute.xlu1 %1346  ;;  %v9036_v5 = vrot.slane %v2890_v4, %v12234_v47  ;;  %12281 = vst [vmem:[#allocation59_spill] sm:$0xff] %v9042_v39  ;;  %v9045_v36 = vrot.slane %v2892_v61, %v12234_v47  ;;  %v9048_v8 = vrot.slane %v2861_v54, %v12221_v14  ;;  %v9059_v61 = vsel %vm1895_vm0, %v1884_v24, 0.0 }
 0x1a0   : > { %2059 = vadd.xlane.f32.xlu1 %v12277_v22  ;;  %v1491_v22 = vmul.f32 %v8524_v32, %v1326_v62  ;;  %v2670_v62 = vld [vmem:[%s8562_s19 + $0x20] sm:$0xff]  ;;  %v1354_v43 = vpop.permute.xlu0 %1353  ;;  %v1885_v18 = vmul.f32 %v8611_v57, %v1750_v63  ;;  %v1494_v48 = vmul.f32 %v8524_v32, %v1347_v0  ;;  %12283 = vst [vmem:[#allocation61_spill] sm:$0xff] %v9059_v61  ;;  %v1752_v13 = vmax.f32 %v1624_v45, 0.0 }
 0x1a1   : > { %v2901_v29 = vrot.slane %v2670_v62, %v12221_v14  ;;  %v1753_v54 = vmax.f32 %v1625_v31, 0.0  ;;  %v1627_v39 = vadd.f32 %v8539_v1, %v1492_v42  ;;  %v1886_v63 = vmul.f32 %v8611_v57, %v1751_v33 }
 0x1a2   : > { %v1495_v0 = vmul.f32 %v8524_v32, %v1354_v43  ;;  %v2891_v42 = vcombine.high %v9039_v27, %v9039_v27  ;;  %v1629_v45 = vadd.f32 %v8539_v1, %v1494_v48  ;;  %v2671_v43 = vld [vmem:[%s8562_s19 + $0x28] sm:$0xff] }
 0x1a3   : > { %2062 = vadd.xlane.f32.xlu0 %v8364_v28  ;;  %v1493_v28 = vmul.f32 %v8524_v32, %v1340_v41  ;;  %v1626_v41 = vadd.f32 %v8539_v1, %v1491_v22  ;;  %v1361_v4 = vpop.permute.xlu1 %1360  ;;  %v2894_v22 = vcombine.high %v2670_v62, %v2670_v62  ;;  %v2909_v62 = vcombine.high %v2901_v29, %v2901_v29 }
 0x1a4   : > { %2065 = vadd.xlane.f32.xlu1 %v8379_v50  ;;  %v9051_v50 = vsel %vm1895_vm0, %v1883_v21, 0.0  ;;  %v1496_v24 = vmul.f32 %v8524_v32, %v1361_v4  ;;  %v1755_v32 = vmax.f32 %v1627_v39, 0.0  ;;  %v9083_v4 = vsel %vm1895_vm0, %v1886_v63, 0.0 }
 0x1a5   : > { %12282 = vst [vmem:[#allocation60_spill] sm:$0xff] %v9051_v50  ;;  %v1628_v21 = vadd.f32 %v8539_v1, %v1493_v28  ;;  %v1754_v33 = vmax.f32 %v1626_v41, 0.0  ;;  %v2893_v28 = vcombine.high %v9048_v8, %v9048_v8  ;;  %12285 = vst [vmem:[#allocation63_spill] sm:$0xff] %v9083_v4  ;;  %v1888_v41 = vmul.f32 %v8611_v57, %v1753_v54  ;;  %v12307_v4 = vld [vmem:[#allocation29_spill] sm:$0xff] }
 0x1a6   : > { %v1630_v48 = vadd.f32 %v8539_v1, %v1495_v0  ;;  %v9091_v61 = vrot.slane %v2891_v42, %v12234_v47  ;;  %v2950_v39 = vrot.slane %v2671_v43, %v12221_v14  ;;  %v1890_v0 = vmul.f32 %v8611_v57, %v1755_v32 }
 0x1a7   : > { %2068 = vadd.xlane.f32.xlu0 %v8389_v59  ;;  %v1756_v31 = vmax.f32 %v1628_v21, 0.0  ;;  %v2943_v59 = vcombine.high %v2671_v43, %v2671_v43  ;;  %v9103_v54 = vrot.slane %v2893_v28, %v12234_v47  ;;  %v1889_v63 = vmul.f32 %v8611_v57, %v1754_v33 }
 0x1a8   : > { %2071 = vadd.xlane.f32.xlu1 %v8394_v40  ;;  %v9074_v40 = vsel %vm1895_vm0, %v1885_v18, 0.0  ;;  %v1887_v18 = vmul.f32 %v8611_v57, %v1752_v13  ;;  %v1757_v13 = vmax.f32 %v1629_v45, 0.0  ;;  %v2672_v45 = vld [vmem:[%s8562_s19 + $0x30] sm:$0xff] }
 0x1a9   : > { %12284 = vst [vmem:[#allocation62_spill] sm:$0xff] %v9074_v40  ;;  %v1631_v40 = vadd.f32 %v8539_v1, %v1496_v24  ;;  %v9106_v1 = vrot.slane %v2909_v62, %v12221_v14  ;;  %v2957_v42 = vrot.slane %v2943_v59, %v12221_v14  ;;  %v1891_v33 = vmul.f32 %v8611_v57, %v1756_v31 }
 0x1aa   : > { %v9113_v21 = vsel %vm1895_vm0, %v1887_v18, 0.0  ;;  %v2958_v62 = vcombine.high %v2950_v39, %v2950_v39  ;;  %v2992_v43 = vcombine.high %v2672_v45, %v2672_v45  ;;  %v9131_v31 = vsel %vm1895_vm0, %v1889_v63, 0.0 }
 0x1ab   : > { %2074 = vadd.xlane.f32.xlu0 %v8406_v26  ;;  %v2908_v26 = vrot.slane %v2894_v22, %v12221_v14  ;;  %12286 = vst [vmem:[#allocation64_spill] sm:$0xff] %v9113_v21  ;;  %v1758_v22 = vmax.f32 %v1630_v48, 0.0  ;;  %v1759_v28 = vmax.f32 %v1631_v40, 0.0  ;;  %v2941_v59 = vcombine.high %v9106_v1, %v9106_v1  ;;  %12288 = vst [vmem:[#allocation66_spill] sm:$0xff] %v9131_v31  ;;  %v12304_v21 = vld [vmem:[#allocation28_spill] sm:$0xff] }
 0x1ac   : > { %2077 = vadd.xlane.f32.xlu1 %v8416_v2  ;;  %v9094_v2 = vrot.slane %v2901_v29, %v12221_v14  ;;  %v1892_v40 = vmul.f32 %v8611_v57, %v1757_v13  ;;  %v9143_v48 = vsel %vm1895_vm0, %v1890_v0, 0.0  ;;  %v2959_v63 = vcombine.high %v2957_v42, %v2957_v42  ;;  %v2673_v0 = vld [vmem:[%s8562_s19 + $0x38] sm:$0xff] }
 0x1ad   : > { %v2910_v24 = vcombine.high %v2908_v26, %v2908_v26  ;;  %12291 = vst [vmem:[#allocation69_spill] sm:$0xff] %v9143_v48  ;;  %v9161_v13 = vrot.slane %v2958_v62, %v12221_v14 }
 0x1ae   : > { %v2939_v29 = vcombine.high %v9094_v2, %v9094_v2  ;;  %v9175_v62 = vsel %vm1895_vm0, %v1892_v40, 0.0  ;;  %v9188_v48 = vrot.slane %v2959_v63, %v12221_v14  ;;  %v3048_v40 = vrot.slane %v2673_v0, %v12221_v14 }
 0x1af   : > { %2080 = vadd.xlane.f32.xlu0 %v8423_v35  ;;  %v9116_v35 = vsel %vm1895_vm0, %v1888_v41, 0.0  ;;  %v9139_v41 = vrot.slane %v2908_v26, %v12221_v14  ;;  %v9146_v32 = vrot.slane %v2910_v24, %v12221_v14  ;;  %v9158_v26 = vrot.slane %v2950_v39, %v12221_v14  ;;  %12295 = vst [vmem:[#allocation73_spill] sm:$0xff] %v9161_v13 }
 0x1b0   : > { %2083 = vadd.xlane.f32.xlu1 %v8426_v37  ;;  %12287 = vst [vmem:[#allocation65_spill] sm:$0xff] %v9116_v35  ;;  %v9136_v18 = vrot.slane %v2939_v29, %v12234_v47  ;;  %v9149_v37 = vsel %vm1895_vm0, %v1891_v33, 0.0  ;;  %v3006_v29 = vrot.slane %v2992_v43, %v12221_v14  ;;  %v1894_v24 = vmul.f32 %v8611_v57, %v1759_v28 }
 0x1b1   : > { %12290 = vst [vmem:[#allocation68_spill] sm:$0xff] %v9139_v41  ;;  %12292 = vst [vmem:[#allocation70_spill] sm:$0xff] %v9146_v32  ;;  %v9168_v33 = vrot.slane %v2941_v59, %v12234_v47  ;;  %v2942_v39 = vcombine.high %v9146_v32, %v9146_v32  ;;  %v2990_v28 = vcombine.high %v9161_v13, %v9161_v13 }
 0x1b2   : > { %12289 = vst [vmem:[#allocation67_spill] sm:$0xff] %v9136_v18  ;;  %12293 = vst [vmem:[#allocation71_spill] sm:$0xff] %v9149_v37  ;;  %v12299_v37 = vld [vmem:[#allocation27_spill] sm:$0xff]  ;;  %v3008_v43 = vcombine.high %v3006_v29, %v3006_v29  ;;  %v9198_v35 = vsel %vm1895_vm0, %v1894_v24, 0.0 }
 0x1b3   : > { %2086 = vadd.xlane.f32.xlu0 %v8438_v38  ;;  %v2999_v38 = vrot.slane %v2672_v45, %v12221_v14  ;;  %12294 = vst [vmem:[#allocation72_spill] sm:$0xff] %v9158_v26  ;;  %v12296_v45 = vld [vmem:[#allocation26_spill] sm:$0xff]  ;;  %12298 = vst [vmem:[#allocation74_spill] sm:$0xff] %v9175_v62  ;;  %v3041_v62 = vcombine.high %v2673_v0, %v2673_v0  ;;  %v9205_v63 = vrot.slane %v2942_v39, %v12234_v47 }
 0x1b4   : > { %2089 = vadd.xlane.f32.xlu1 %v8445_v25  ;;  %v1893_v25 = vmul.f32 %v8611_v57, %v1758_v22  ;;  %12297 = vst [vmem:[#allocation26_spill] sm:$0xff] %v9168_v33  ;;  %v2940_v22 = vcombine.high %v9139_v41, %v9139_v41  ;;  %v2988_v57 = vcombine.high %v9158_v26, %v9158_v26  ;;  %12301 = vst [vmem:[#allocation75_spill] sm:$0xff] %v9188_v48  ;;  %v12356_v41 = vld [vmem:[#allocation36_spill] sm:$0xff]  ;;  %v2423_v33 = vld [vmem:[%s9224_s27 + $0x68] sm:$0xff] }
 0x1b5   : > { %v3007_v59 = vcombine.high %v2999_v38, %v2999_v38  ;;  %12303 = vst [vmem:[#allocation77_spill] sm:$0xff] %v9198_v35  ;;  %12306 = vst [vmem:[#allocation78_spill] sm:$0xff] %v9205_v63  ;;  %v9215_v24 = vrot.slane %v2999_v38, %v12221_v14  ;;  %v9232_v38 = vrot.slane %v2990_v28, %v12234_v47 }
 0x1b6   : > { %v9195_v31 = vsel %vm1895_vm0, %v1893_v25, 0.0  ;;  %v9229_v39 = vrot.slane %v2988_v57, %v12234_v47  ;;  %v3056_v25 = vcombine.high %v3048_v40, %v3048_v40  ;;  %v9239_v35 = vrot.slane %v3006_v29, %v12221_v14  ;;  %v2410_v29 = vld [vmem:[%s9224_s27] sm:$0xff] }
 0x1b7   : > { %2092 = vadd.xlane.f32.xlu0 %v12296_v45  ;;  %v9185_v45 = vrot.slane %v2957_v42, %v12221_v14  ;;  %12302 = vst [vmem:[#allocation76_spill] sm:$0xff] %v9195_v31  ;;  %v9202_v42 = vrot.slane %v2940_v22, %v12234_v47  ;;  %12308 = vst [vmem:[#allocation29_spill] sm:$0xff] %v9215_v24  ;;  %v3055_v22 = vrot.slane %v3041_v62, %v12221_v14 }
 0x1b8   : > { %2095 = vadd.xlane.f32.xlu1 %v12299_v37  ;;  %v2991_v37 = vcombine.high %v9188_v48, %v9188_v48  ;;  %12310 = vst [vmem:[#allocation80_spill] sm:$0xff] %v9229_v39  ;;  %12311 = vst [vmem:[#allocation81_spill] sm:$0xff] %v9232_v38  ;;  %v9242_v31 = vrot.slane %v3008_v43, %v12221_v14  ;;  %v12317_v39 = vld [vmem:[#allocation9_spill] sm:$0xff]  ;;  %v3038_v43 = vcombine.high %v9239_v35, %v9239_v35 }
 0x1b9   : > { %12300 = vst [vmem:[#allocation27_spill] sm:$0xff] %v9185_v45  ;;  %12305 = vst [vmem:[#allocation28_spill] sm:$0xff] %v9202_v42  ;;  %v2989_v0 = vcombine.high %v9185_v45, %v9185_v45  ;;  %v9262_v57 = vrot.slane %v3048_v40, %v12221_v14  ;;  %v3057_v28 = vcombine.high %v3055_v22, %v3055_v22  ;;  %v2412_v40 = vld [vmem:[%s9224_s27 + $0x10] sm:$0xff]  ;;  %v2417_v42 = vld [vmem:[%s9224_s27 + $0x38] sm:$0xff] }
 0x1ba   : > { %12312 = vst [vmem:[#allocation82_spill] sm:$0xff] %v9239_v35  ;;  %12313 = vst [vmem:[#allocation83_spill] sm:$0xff] %v9242_v31  ;;  %v9253_v50 = vrot.slane %v2991_v37, %v12234_v47  ;;  %v9293_v35 = vrot.slane %v3038_v43, %v12234_v47 }
 0x1bb   : > { %2098 = vadd.xlane.f32.xlu0 %v12304_v21  ;;  %v9218_v21 = vrot.slane %v3007_v59, %v12221_v14  ;;  %v3037_v59 = vcombine.high %v9215_v24, %v9215_v24  ;;  %v9250_v38 = vrot.slane %v2989_v0, %v12234_v47  ;;  %12318 = vst [vmem:[#allocation9_spill] sm:$0xff] %v9262_v57  ;;  %v2416_v24 = vld [vmem:[%s9224_s27 + $0x30] sm:$0xff] }
 0x1bc   : > { %2101 = vadd.xlane.f32.xlu1 %v12307_v4  ;;  %v12314_v4 = vld [vmem:[#allocation30_spill] sm:$0xff]  ;;  %12316 = vst [vmem:[#allocation84_spill] sm:$0xff] %v9253_v50  ;;  %v9270_v50 = vrot.slane %v3056_v25, %v12221_v14  ;;  %12323 = vst [vmem:[#allocation89_spill] sm:$0xff] %v9293_v35  ;;  %v2411_v35 = vld [vmem:[%s9224_s27 + $0x8] sm:$0xff] }
 0x1bd   : > { %12309 = vst [vmem:[#allocation79_spill] sm:$0xff] %v9218_v21  ;;  %v3039_v62 = vcombine.high %v9218_v21, %v9218_v21  ;;  %12315 = vst [vmem:[#allocation30_spill] sm:$0xff] %v9250_v38  ;;  %v9273_v38 = vrot.slane %v3037_v59, %v12234_v47 }
 0x1be   : > { %12319 = vst [vmem:[#allocation85_spill] sm:$0xff] %v9270_v50  ;;  %v3088_v59 = vcombine.high %v9270_v50, %v9270_v50 }
 0x1bf   : > { %2104 = vadd.xlane.f32.xlu0 %v12314_v4  ;;  %v3040_v4 = vcombine.high %v9242_v31, %v9242_v31  ;;  %12320 = vst [vmem:[#allocation86_spill] sm:$0xff] %v9273_v38  ;;  %v9276_v48 = vrot.slane %v3039_v62, %v12234_v47  ;;  %v9288_v62 = vrot.slane %v3055_v22, %v12221_v14 }
 0x1c0   : > { %2107 = vadd.xlane.f32.xlu1 %v12317_v39  ;;  %v1898_v13 = vpop.xlane.xlu0 %1897  ;;  %v9306_v22 = vrot.slane %v3057_v28, %v12221_v14  ;;  %v9331_v50 = vrot.slane %v3088_v59, %v12234_v47 }
 0x1c1   : > { %v2282_v0 = vadd.f32 %v8670_v51, %v1898_v13  ;;  %12321 = vst [vmem:[#allocation87_spill] sm:$0xff] %v9276_v48  ;;  %v3086_v13 = vcombine.high %v9262_v57, %v9262_v57  ;;  %12322 = vst [vmem:[#allocation88_spill] sm:$0xff] %v9288_v62  ;;  %v3087_v57 = vcombine.high %v9288_v62, %v9288_v62  ;;  %v2413_v48 = vld [vmem:[%s9224_s27 + $0x18] sm:$0xff] }
 0x1c2   : > { %12325 = vst [vmem:[#allocation91_spill] sm:$0xff] %v9306_v22 }
 0x1c3   : > { %v2538_v37 = vmul.f32 %v2410_v29, %v2282_v0  ;;  %2110 = vadd.xlane.f32.xlu0 %v8498_v15  ;;  %v9296_v29 = vrot.slane %v3040_v4, %v12234_v47  ;;  %v9303_v0 = vld [vmem:[%s12074_s7] ss:$0 sm:$0xff]  ;;  %v9322_v31 = vrot.slane %v3086_v13, %v12234_v47 }
 0x1c4   : > { %2113 = vadd.xlane.f32.xlu1 %v8517_v30  ;;  %v1904_v39 = vpop.xlane.xlu0 %1903  ;;  %v12326_v30 = vrot.slane %v8633_v7, %v12234_v47  ;;  %v3089_v7 = vcombine.high %v9306_v22, %v9306_v22  ;;  %v12335_v22 = vld [vmem:[#allocation31_spill] sm:$0xff] }
 0x1c5   : > { %12324 = vst [vmem:[#allocation90_spill] sm:$0xff] %v9296_v29  ;;  %v2284_v43 = vadd.f32 %v8670_v51, %v1904_v39  ;;  %v1901_v4 = vpop.xlane.xlu1 %1900  ;;  %v9318_v29 = vld [vmem:[%s8562_s19 + $0x40] sm:$0xff]  ;;  %12327 = vst [vmem:[#allocation92_spill] sm:$0xff] %v9322_v31 }
 0x1c6   : > { %v4122_v25 = vadd.f32 %v12326_v30, %v2538_v37  ;;  %v2283_v28 = vadd.f32 %v8670_v51, %v1901_v4  ;;  %v3097_v37 = vrot.slane %v9318_v29, %v12221_v14  ;;  %v12328_v30 = vld [vmem:[#allocation38_spill] sm:$0xff]  ;;  %v12330_v31 = vld [vmem:[#allocation12_spill] sm:$0xff] }
 0x1c7   : > { %v2540_v39 = vmul.f32 %v2412_v40, %v2284_v43  ;;  %2116 = vadd.xlane.f32.xlu0 %v12328_v30  ;;  %12329 = vst [vmem:[#allocation38_spill] sm:$0xff] %v9331_v50  ;;  %v2414_v30 = vld [vmem:[%s9224_s27 + $0x20] sm:$0xff] }
 0x1c8   : > { %v4257_v15 = vadd.f32 %v9303_v0, %v4122_v25  ;;  %v2539_v13 = vmul.f32 %v2411_v35, %v2283_v28  ;;  %2119 = vadd.xlane.f32.xlu1 %v12330_v31  ;;  %v1907_v38 = vpop.xlane.xlu0 %1906  ;;  %v9340_v40 = vrot.slane %v3097_v37, %v12221_v14  ;;  %v3105_v43 = vcombine.high %v3097_v37, %v3097_v37  ;;  %v9348_v35 = vld [vmem:[%s12075_s8] ss:$0 sm:$0xff]  ;;  %v12332_v28 = vld [vmem:[#allocation7_spill] sm:$0xff] }
 0x1c9   : > { %v4124_v25 = vadd.f32 %v8684_v23, %v2540_v39  ;;  %v2285_v59 = vadd.f32 %v8670_v51, %v1907_v38  ;;  %v1910_v50 = vpop.xlane.xlu1 %1909  ;;  %v9351_v31 = vrot.slane %v3087_v57, %v12234_v47  ;;  %v12333_v21 = vrot.slane %v12332_v28, %v12234_v47 }
 0x1ca   : > { %v4385_v4 = vmax.f32 %v4257_v15, 0.0  ;;  %v2286_v23 = vadd.f32 %v8670_v51, %v1910_v50  ;;  %v9358_v38 = vrot.slane %v3089_v7, %v12234_v47  ;;  %v9361_v15 = vrot.slane %v3105_v43, %v12221_v14  ;;  %v2415_v50 = vld [vmem:[%s9224_s27 + $0x28] sm:$0xff] }
 0x1cb   : > { %12331 = vst [vmem:[#allocation12_spill] sm:$0xff] %v9351_v31  ;;  %v4123_v37 = vadd.f32 %v12333_v21, %v2539_v13  ;;  %v2541_v39 = vmul.f32 %v2413_v48, %v2285_v59  ;;  %2122 = vadd.xlane.f32.xlu0 %v12335_v22  ;;  %v4259_v57 = vadd.f32 %v9303_v0, %v4124_v25  ;;  %v12336_v13 = vld [vmem:[#allocation13_spill] sm:$0xff] }
 0x1cc   : > { %12334 = vst [vmem:[#allocation7_spill] sm:$0xff] %v9358_v38  ;;  %v5956_v62 = vsel %vm1895_vm0, %v4385_v4, 0.0  ;;  %v2542_v21 = vmul.f32 %v2414_v30, %v2286_v23  ;;  %2125 = vadd.xlane.f32.xlu1 %v12336_v13  ;;  %v1913_v7 = vpop.xlane.xlu0 %1912  ;;  %v4520_v38 = vmul.f32 %v9348_v35, %v4385_v4  ;;  %v12337_v48 = vld [vmem:[#allocation41_spill] sm:$0xff]  ;;  %v12338_v23 = vld [vmem:[#allocation4_spill] sm:$0xff]  ;;  %v12341_v30 = vld [vmem:[#allocation15_spill] sm:$0xff] }
 0x1cd   : > { %v5957_v31 = vrot.slane %v5956_v62, 4  ;;  %v4258_v43 = vadd.f32 %v9303_v0, %v4123_v37  ;;  %v4125_v59 = vadd.f32 %v12337_v48, %v2541_v39  ;;  %v2287_v22 = vadd.f32 %v8670_v51, %v1913_v7  ;;  %v1916_v25 = vpop.xlane.xlu1 %1915  ;;  %v12340_v39 = vld [vmem:[#allocation32_spill] sm:$0xff] }
 0x1ce   : > { %v4387_v45 = vmax.f32 %v4259_v57, 0.0  ;;  %v12339_v13 = vrot.slane %v12338_v23, %v12234_v47  ;;  %v2288_v4 = vadd.f32 %v8670_v51, %v1916_v25 }
 0x1cf   : > { %v5958_v20 = vadd.f32 %v5957_v31, %v5956_v62  ;;  %v4386_v37 = vmax.f32 %v4258_v43, 0.0  ;;  %v2543_v26 = vmul.f32 %v2415_v50, %v2287_v22  ;;  %2128 = vadd.xlane.f32.xlu0 %v12340_v39  ;;  %v4260_v57 = vadd.f32 %v9303_v0, %v4125_v59 }
 0x1d0   : > { %v4126_v28 = vadd.f32 %v12339_v13, %v2542_v21  ;;  %v4522_v7 = vmul.f32 %v9348_v35, %v4387_v45  ;;  %v5970_v48 = vsel %vm1895_vm0, %v4387_v45, 0.0  ;;  %v2544_v63 = vmul.f32 %v2416_v24, %v2288_v4  ;;  %2131 = vadd.xlane.f32.xlu1 %v12341_v30  ;;  %v1919_v23 = vpop.xlane.xlu0 %1918  ;;  %v2418_v45 = vld [vmem:[%s9224_s27 + $0x40] sm:$0xff] }
 0x1d1   : > { %v5959_v21 = vrot.slane %v5958_v20, 2  ;;  %v4521_v25 = vmul.f32 %v9348_v35, %v4386_v37  ;;  %v5963_v62 = vsel %vm1895_vm0, %v4386_v37, 0.0  ;;  %v12342_v31 = vrot.slane %v8725_v46, %v12234_v47  ;;  %v1922_v22 = vpop.xlane.xlu1 %1921 }
 0x1d2   : > { %v2289_v43 = vadd.f32 %v8670_v51, %v1919_v23  ;;  %v9395_v24 = vsel %vm1895_vm0, %v4520_v38, 0.0  ;;  %v5964_v59 = vrot.slane %v5963_v62, 4  ;;  %v9398_v30 = vadd.f32 %v8763_v3, %v2544_v63  ;;  %v12346_v38 = vld [vmem:[#allocation33_spill] sm:$0xff] }
 0x1d3   : > { %v4127_v50 = vadd.f32 %v12342_v31, %v2543_v26  ;;  %12343 = vst [vmem:[#allocation31_spill] sm:$0xff] %v9395_v24  ;;  %v2290_v13 = vadd.f32 %v8670_v51, %v1922_v22  ;;  %v5960_v4 = vadd.f32 %v5959_v21, %v5958_v20  ;;  %v9402_v37 = vsel %vm1895_vm0, %v4522_v7, 0.0  ;;  %v12345_v26 = vld [vmem:[#allocation16_spill] sm:$0xff]  ;;  %v2419_v24 = vld [vmem:[%s9224_s27 + $0x48] sm:$0xff] }
 0x1d4   : > { %12344 = vst [vmem:[#allocation13_spill] sm:$0xff] %v9402_v37  ;;  %v2545_v46 = vmul.f32 %v2417_v42, %v2289_v43  ;;  %2134 = vadd.xlane.f32.xlu0 %v12345_v26  ;;  %v5965_v39 = vadd.f32 %v5964_v59, %v5963_v62  ;;  %v5971_v23 = vrot.slane %v5970_v48, 4  ;;  %v4388_v31 = vmax.f32 %v4260_v57, 0.0  ;;  %2137 = vadd.xlane.f32.xlu1 %v12346_v38  ;;  %v1925_v12 = vpop.xlane.xlu0 %1924  ;;  %v2420_v42 = vld [vmem:[%s9224_s27 + $0x50] sm:$0xff] }
 0x1d5   : > { %v2546_v32 = vmul.f32 %v2418_v45, %v2290_v13  ;;  %v5961_v3 = vrot.slane %v5960_v4, 1  ;;  %v9408_v63 = vsel %vm1895_vm0, %v4521_v25, 0.0  ;;  %v4261_v20 = vadd.f32 %v9303_v0, %v4126_v28  ;;  %v1928_v21 = vpop.xlane.xlu1 %1927  ;;  %v12348_v45 = vld [vmem:[#allocation17_spill] sm:$0xff]  ;;  %v12349_v26 = vld [vmem:[#allocation34_spill] sm:$0xff] }
 0x1d6   : > { %12347 = vst [vmem:[#allocation41_spill] sm:$0xff] %v9408_v63  ;;  %v2291_v7 = vadd.f32 %v8670_v51, %v1925_v12  ;;  %v5966_v43 = vrot.slane %v5965_v39, 2  ;;  %v5972_v62 = vadd.f32 %v5971_v23, %v5970_v48  ;;  %v9414_v57 = vadd.f32 %v9303_v0, %v4127_v50  ;;  %v12350_v23 = vld [vmem:[#allocation43_spill] sm:$0xff] }
 0x1d7   : > { %v9417_v22 = vadd.f32 %v12348_v45, %v2545_v46  ;;  %v2292_v59 = vadd.f32 %v8670_v51, %v1928_v21  ;;  %v5962_v25 = vadd.f32 %v5961_v3, %v5960_v4  ;;  %v4523_v13 = vmul.f32 %v9348_v35, %v4388_v31  ;;  %v12352_v45 = vld [vmem:[#allocation35_spill] sm:$0xff] }
 0x1d8   : > { %v2547_v28 = vmul.f32 %v2419_v24, %v2291_v7  ;;  %2140 = vadd.xlane.f32.xlu0 %v12349_v26  ;;  %v5967_v12 = vadd.f32 %v5966_v43, %v5965_v39  ;;  %v5973_v38 = vrot.slane %v5972_v62, 2  ;;  %v5977_v48 = vsel %vm1895_vm0, %v4388_v31, 0.0  ;;  %2143 = vadd.xlane.f32.xlu1 %v12352_v45  ;;  %v2421_v4 = vld [vmem:[%s9224_s27 + $0x58] sm:$0xff]  ;;  %v1931_v3 = vpop.xlane.xlu0 %1930  ;;  %v2422_v7 = vld [vmem:[%s9224_s27 + $0x60] sm:$0xff] }
 0x1d9   : > { %v12351_v50 = vrot.slane %v12350_v23, %v12234_v47  ;;  %v2548_v46 = vmul.f32 %v2420_v42, %v2292_v59  ;;  %v6853_v21 = vmul.f32 0.125, %v5962_v25  ;;  %v5978_v63 = vrot.slane %v5977_v48, 4  ;;  %v1934_v39 = vpop.xlane.xlu1 %1933  ;;  %v12354_v23 = vld [vmem:[#allocation44_spill] sm:$0xff] }
 0x1da   : > { %v2293_v24 = vadd.f32 %v8670_v51, %v1931_v3  ;;  %v5968_v43 = vrot.slane %v5967_v12, 1  ;;  %v5974_v26 = vadd.f32 %v5973_v38, %v5972_v62  ;;  %v9433_v31 = vsel %vm1895_vm0, %v4523_v13, 0.0 }
 0x1db   : > { %v9426_v37 = vadd.f32 %v12351_v50, %v2546_v32  ;;  %12353 = vst [vmem:[#allocation4_spill] sm:$0xff] %v9433_v31  ;;  %v12355_v32 = vrot.slane %v12354_v23, %v12234_v47  ;;  %v2294_v59 = vadd.f32 %v8670_v51, %v1934_v39  ;;  %v5979_v25 = vadd.f32 %v5978_v63, %v5977_v48  ;;  %v12357_v31 = vld [vmem:[#allocation6_spill] sm:$0xff] }
 0x1dc   : > { %v4389_v50 = vmax.f32 %v4261_v20, 0.0  ;;  %v9442_v45 = vadd.f32 %v8830_v49, %v2548_v46  ;;  %v2549_v3 = vmul.f32 %v2421_v4, %v2293_v24  ;;  %2146 = vadd.xlane.f32.xlu0 %v12356_v41  ;;  %v5969_v62 = vadd.f32 %v5968_v43, %v5967_v12  ;;  %2149 = vadd.xlane.f32.xlu1 %v12357_v31  ;;  %v1937_v23 = vpop.xlane.xlu0 %1936  ;;  %v2424_v20 = vld [vmem:[%s9224_s27 + $0x70] sm:$0xff]  ;;  %v12358_v4 = vld [vmem:[#allocation19_spill] sm:$0xff] }
 0x1dd   : > { %v9438_v42 = vadd.f32 %v12355_v32, %v2547_v28  ;;  %v5975_v38 = vrot.slane %v5974_v26, 1  ;;  %v2550_v13 = vmul.f32 %v2422_v7, %v2294_v59  ;;  %v5980_v28 = vrot.slane %v5979_v25, 2  ;;  %v1940_v49 = vpop.xlane.xlu1 %1939  ;;  %v12360_v59 = vld [vmem:[#allocation37_spill] sm:$0xff] }
 0x1de   : > { %v5984_v32 = vsel %vm1895_vm0, %v4389_v50, 0.0  ;;  %v4390_v39 = vmax.f32 %v9414_v57, 0.0  ;;  %v2295_v63 = vadd.f32 %v8670_v51, %v1937_v23  ;;  %v6854_v48 = vmul.f32 0.125, %v5969_v62  ;;  %v12361_v23 = vld [vmem:[#allocation25_spill] sm:$0xff] }
 0x1df   : > { %v5976_v46 = vadd.f32 %v5975_v38, %v5974_v26  ;;  %v4524_v41 = vmul.f32 %v9348_v35, %v4389_v50  ;;  %v9453_v12 = vadd.f32 %v8839_v19, %v2549_v3  ;;  %v12359_v24 = vrot.slane %v12358_v4, %v12234_v47  ;;  %v2425_v19 = vld [vmem:[%s9224_s27 + $0x78] sm:$0xff] }
 0x1e0   : > { %v2296_v57 = vadd.f32 %v8670_v51, %v1940_v49  ;;  %v5981_v43 = vadd.f32 %v5980_v28, %v5979_v25  ;;  %v2551_v31 = vmul.f32 %v2423_v33, %v2295_v63  ;;  %2152 = vadd.xlane.f32.xlu0 %v12360_v59  ;;  %v7109_v26 = vsel %vm5804_vm1, %v6854_v48, %v6853_v21  ;;  %v1943_v3 = vpop.xlane.xlu0 %1942  ;;  %v2426_v21 = vld [vmem:[%s9224_s27 + $0x80] sm:$0xff] }
 0x1e1   : > { %v9458_v7 = vadd.f32 %v12359_v24, %v2550_v13  ;;  %v6855_v62 = vmul.f32 0.125, %v5976_v46  ;;  %v5985_v38 = vrot.slane %v5984_v32, 4  ;;  %2155 = vadd.xlane.f32.xlu1 %v12361_v23  ;;  %v4525_v13 = vmul.f32 %v9348_v35, %v4390_v39  ;;  %v1946_v63 = vpop.xlane.xlu1 %1945 }
 0x1e2   : > { %v2552_v50 = vmul.f32 %v2424_v20, %v2296_v57  ;;  %v5982_v18 = vrot.slane %v5981_v43, 1  ;;  %v5991_v4 = vsel %vm1895_vm0, %v4390_v39, 0.0  ;;  %v12362_v25 = vrot.slane %v8842_v60, %v12234_v47  ;;  %v12363_v57 = vld [vmem:[#allocation8_spill] sm:$0xff] }
 0x1e3   : > { %v2297_v28 = vadd.f32 %v8670_v51, %v1943_v3  ;;  %v9475_v20 = vsel %vm1895_vm0, %v4524_v41, 0.0  ;;  %v5986_v49 = vadd.f32 %v5985_v38, %v5984_v32  ;;  %v2298_v46 = vadd.f32 %v8670_v51, %v1946_v63  ;;  %v12364_v32 = vld [vmem:[#allocation39_spill] sm:$0xff] }
 0x1e4   : > { %v9470_v33 = vadd.f32 %v12362_v25, %v2551_v31  ;;  %v9478_v48 = vadd.f32 %v8877_v10, %v2552_v50  ;;  %v7110_v39 = vsel %vm5806_vm2, %v6855_v62, %v7109_v26  ;;  %v5983_v60 = vadd.f32 %v5982_v18, %v5981_v43  ;;  %2158 = vadd.xlane.f32.xlu0 %v12363_v57  ;;  %v2427_v10 = vld [vmem:[%s9224_s27 + $0x88] sm:$0xff]  ;;  %v1949_v38 = vpop.xlane.xlu0 %1948  ;;  %v2428_v26 = vld [vmem:[%s9224_s27 + $0x90] sm:$0xff] }
 0x1e5   : > { %v2553_v24 = vmul.f32 %v2425_v19, %v2297_v28  ;;  %v5987_v31 = vrot.slane %v5986_v49, 2  ;;  %v5992_v59 = vrot.slane %v5991_v4, 4  ;;  %v4263_v41 = vadd.f32 %v9303_v0, %v9398_v30  ;;  %2161 = vadd.xlane.f32.xlu1 %v12364_v32  ;;  %v1952_v62 = vpop.xlane.xlu1 %1951  ;;  %v2430_v32 = vld [vmem:[%s9224_s27 + $0xa0] sm:$0xff] }
 0x1e6   : > { %v2554_v23 = vmul.f32 %v2426_v21, %v2298_v46  ;;  %v6856_v50 = vmul.f32 0.125, %v5983_v60  ;;  %v9488_v3 = vsel %vm1895_vm0, %v4525_v13, 0.0  ;;  %v4264_v18 = vadd.f32 %v9303_v0, %v9417_v22  ;;  %v12366_v60 = vld [vmem:[#allocation40_spill] sm:$0xff] }
 0x1e7   : > { %v2299_v43 = vadd.f32 %v8670_v51, %v1949_v38  ;;  %v5988_v19 = vadd.f32 %v5987_v31, %v5986_v49  ;;  %v5993_v25 = vadd.f32 %v5992_v59, %v5991_v4  ;;  %v4265_v30 = vadd.f32 %v9303_v0, %v9426_v37  ;;  %v12367_v31 = vld [vmem:[#allocation10_spill] sm:$0xff] }
 0x1e8   : > { %v9497_v28 = vadd.f32 %v8889_v52, %v2553_v24  ;;  %v12365_v13 = vrot.slane %v8880_v6, %v12234_v47  ;;  %v2300_v22 = vadd.f32 %v8670_v51, %v1952_v62  ;;  %v4391_v63 = vmax.f32 %v4263_v41, 0.0  ;;  %2164 = vadd.xlane.f32.xlu0 %v12366_v60  ;;  %v2429_v52 = vld [vmem:[%s9224_s27 + $0x98] sm:$0xff]  ;;  %v1955_v24 = vpop.xlane.xlu0 %1954 }
 0x1e9   : > { %v2555_v46 = vmul.f32 %v2427_v10, %v2299_v43  ;;  %v5989_v49 = vrot.slane %v5988_v19, 1  ;;  %v5994_v4 = vrot.slane %v5993_v25, 2  ;;  %v4392_v57 = vmax.f32 %v4264_v18, 0.0  ;;  %2167 = vadd.xlane.f32.xlu1 %v12367_v31  ;;  %v1958_v10 = vpop.xlane.xlu1 %1957 }
 0x1ea   : > { %v9502_v21 = vadd.f32 %v12365_v13, %v2554_v23  ;;  %v2556_v37 = vmul.f32 %v2428_v26, %v2300_v22  ;;  %v7111_v6 = vsel %vm5808_vm3, %v6856_v50, %v7110_v39  ;;  %v4526_v59 = vmul.f32 %v9348_v35, %v4391_v63 }
 0x1eb   : > { %v5998_v23 = vsel %vm1895_vm0, %v4391_v63, 0.0  ;;  %v2301_v41 = vadd.f32 %v8670_v51, %v1955_v24  ;;  %v5990_v38 = vadd.f32 %v5989_v49, %v5988_v19  ;;  %v5995_v43 = vadd.f32 %v5994_v4, %v5993_v25  ;;  %v12369_v63 = vld [vmem:[#allocation11_spill] sm:$0xff]  ;;  %v2432_v24 = vld [vmem:[%s9224_s27 + $0xb0] sm:$0xff] }
 0x1ec   : > { %v4393_v62 = vmax.f32 %v4265_v30, 0.0  ;;  %v12368_v18 = vrot.slane %v8892_v44, %v12234_v47  ;;  %v9519_v13 = vadd.f32 %v8938_v11, %v2556_v37  ;;  %v2302_v39 = vadd.f32 %v8670_v51, %v1958_v10  ;;  %2170 = vadd.xlane.f32.xlu0 %v12369_v63  ;;  %v12370_v30 = vld [vmem:[#allocation42_spill] sm:$0xff]  ;;  %v2431_v44 = vld [vmem:[%s9224_s27 + $0xa8] sm:$0xff] }
 0x1ed   : > { %v5999_v50 = vrot.slane %v5998_v23, 4  ;;  %v2557_v22 = vmul.f32 %v2429_v52, %v2301_v41  ;;  %v6857_v60 = vmul.f32 0.125, %v5990_v38  ;;  %v5996_v31 = vrot.slane %v5995_v43, 1  ;;  %2173 = vadd.xlane.f32.xlu1 %v12370_v30  ;;  %v1964_v41 = vpop.xlane.xlu1 %1963 }
 0x1ee   : > { %v9516_v26 = vadd.f32 %v12368_v18, %v2555_v46  ;;  %v4527_v19 = vmul.f32 %v9348_v35, %v4392_v57  ;;  %v2558_v25 = vmul.f32 %v2430_v32, %v2302_v39  ;;  %v1961_v46 = vpop.xlane.xlu0 %1960  ;;  %v9527_v49 = vsel %vm1895_vm0, %v4526_v59, 0.0  ;;  %v12372_v39 = vld [vmem:[#allocation45_spill] sm:$0xff] }
 0x1ef   : > { %v6000_v11 = vadd.f32 %v5999_v50, %v5998_v23  ;;  %v6005_v4 = vsel %vm1895_vm0, %v4392_v57, 0.0  ;;  %v9531_v37 = vadd.f32 %v8941_v16, %v2557_v22  ;;  %v2303_v52 = vadd.f32 %v8670_v51, %v1961_v46 }
 0x1f0   : > { %v5997_v10 = vadd.f32 %v5996_v31, %v5995_v43  ;;  %v4528_v32 = vmul.f32 %v9348_v35, %v4393_v62  ;;  %v12371_v38 = vrot.slane %v8933_v34, %v12234_v47  ;;  %v2304_v59 = vadd.f32 %v8670_v51, %v1964_v41  ;;  %2176 = vadd.xlane.f32.xlu0 %v12372_v39  ;;  %v12373_v31 = vld [vmem:[#allocation14_spill] sm:$0xff]  ;;  %v2433_v34 = vld [vmem:[%s9224_s27 + $0xb8] sm:$0xff] }
 0x1f1   : > { %v7112_v57 = vsel %vm5810_vm4, %v6857_v60, %v7111_v6  ;;  %v6001_v16 = vrot.slane %v6000_v11, 2  ;;  %v2559_v23 = vmul.f32 %v2431_v44, %v2303_v52  ;;  %v9545_v43 = vsel %vm1895_vm0, %v4527_v19, 0.0  ;;  %2179 = vadd.xlane.f32.xlu1 %v12373_v31  ;;  %v2434_v52 = vld [vmem:[%s9224_s27 + $0xc0] sm:$0xff]  ;;  %v2435_v31 = vld [vmem:[%s9224_s27 + $0xc8] sm:$0xff] }
 0x1f2   : > { %v9539_v18 = vadd.f32 %v12371_v38, %v2558_v25  ;;  %v6858_v50 = vmul.f32 0.125, %v5997_v10  ;;  %v6006_v22 = vrot.slane %v6005_v4, 4  ;;  %v2560_v63 = vmul.f32 %v2432_v24, %v2304_v59  ;;  %v1967_v25 = vpop.xlane.xlu0 %1966  ;;  %v1970_v24 = vpop.xlane.xlu1 %1969 }
 0x1f3   : > { %v6002_v30 = vadd.f32 %v6001_v16, %v6000_v11  ;;  %v6012_v46 = vsel %vm1895_vm0, %v4393_v62, 0.0  ;;  %v3135_v6 = vcombine.high %v9340_v40, %v9340_v40  ;;  %v12374_v60 = vrot.slane %v8956_v55, %v12234_v47 }
 0x1f4   : > { %v2305_v19 = vadd.f32 %v8670_v51, %v1967_v25  ;;  %v6007_v41 = vadd.f32 %v6006_v22, %v6005_v4  ;;  %v9560_v10 = vsel %vm1895_vm0, %v4528_v32, 0.0  ;;  %v2306_v11 = vadd.f32 %v8670_v51, %v1970_v24  ;;  %v12376_v22 = vld [vmem:[#allocation47_spill] sm:$0xff] }
 0x1f5   : > { %v9555_v44 = vadd.f32 %v12374_v60, %v2559_v23  ;;  %v7113_v62 = vsel %vm5812_vm5, %v6858_v50, %v7112_v57  ;;  %v6003_v38 = vrot.slane %v6002_v30, 1  ;;  %v6013_v59 = vrot.slane %v6012_v46, 4  ;;  %v12375_v23 = vld [vmem:[#allocation46_spill] sm:$0xff]  ;;  %2185 = vadd.xlane.f32.xlu1 %v12376_v22 }
 0x1f6   : > { %v9565_v55 = vadd.f32 %v8992_v53, %v2560_v63  ;;  %v2561_v16 = vmul.f32 %v2433_v34, %v2305_v19  ;;  %2182 = vadd.xlane.f32.xlu0 %v12375_v23  ;;  %v6008_v39 = vrot.slane %v6007_v41, 2  ;;  %v4266_v4 = vadd.f32 %v9303_v0, %v9438_v42  ;;  %v1973_v25 = vpop.xlane.xlu0 %1972  ;;  %v2436_v63 = vld [vmem:[%s9224_s27 + $0xd0] sm:$0xff]  ;;  %v1976_v34 = vpop.xlane.xlu1 %1975 }
 0x1f7   : > { %v2562_v32 = vmul.f32 %v2434_v52, %v2306_v11  ;;  %v6004_v57 = vadd.f32 %v6003_v38, %v6002_v30  ;;  %v6014_v50 = vadd.f32 %v6013_v59, %v6012_v46  ;;  %v9573_v60 = vrot.slane %v3135_v6, %v12234_v47  ;;  %v12377_v38 = vld [vmem:[#allocation48_spill] sm:$0xff] }
 0x1f8   : > { %v2307_v53 = vadd.f32 %v8670_v51, %v1973_v25  ;;  %v6009_v19 = vadd.f32 %v6008_v39, %v6007_v41  ;;  %v4394_v24 = vmax.f32 %v4266_v4, 0.0  ;;  %v4267_v42 = vadd.f32 %v9303_v0, %v9442_v45  ;;  %v2437_v4 = vld [vmem:[%s9224_s27 + $0xd8] sm:$0xff] }
 0x1f9   : > { %v9580_v52 = vadd.f32 %v8997_v58, %v2561_v16  ;;  %v2308_v11 = vadd.f32 %v8670_v51, %v1976_v34  ;;  %v6859_v30 = vmul.f32 0.125, %v6004_v57  ;;  %v6015_v46 = vrot.slane %v6014_v50, 2  ;;  %v12379_v16 = vld [vmem:[#allocation18_spill] sm:$0xff] }
 0x1fa   : > { %v2563_v6 = vmul.f32 %v2435_v31, %v2307_v53  ;;  %2188 = vadd.xlane.f32.xlu0 %v12377_v38  ;;  %v6010_v59 = vrot.slane %v6009_v19, 1  ;;  %v4529_v23 = vmul.f32 %v9348_v35, %v4394_v24  ;;  %v6019_v41 = vsel %vm1895_vm0, %v4394_v24, 0.0  ;;  %2191 = vadd.xlane.f32.xlu1 %v12379_v16  ;;  %v1979_v22 = vpop.xlane.xlu0 %1978  ;;  %v2438_v24 = vld [vmem:[%s9224_s27 + $0xe0] sm:$0xff] }
 0x1fb   : > { %v12378_v39 = vrot.slane %v8984_v56, %v12234_v47  ;;  %v2564_v58 = vmul.f32 %v2436_v63, %v2308_v11  ;;  %v6016_v25 = vadd.f32 %v6015_v46, %v6014_v50  ;;  %v6020_v31 = vrot.slane %v6019_v41, 4  ;;  %v1982_v56 = vpop.xlane.xlu1 %1981 }
 0x1fc   : > { %v12380_v57 = vrot.slane %v9000_v9, %v12234_v47  ;;  %v2309_v34 = vadd.f32 %v8670_v51, %v1979_v22  ;;  %v6011_v63 = vadd.f32 %v6010_v59, %v6009_v19  ;;  %v2310_v11 = vadd.f32 %v8670_v51, %v1982_v56  ;;  %v12382_v59 = vld [vmem:[#allocation20_spill] sm:$0xff] }
 0x1fd   : > { %v9589_v45 = vadd.f32 %v12378_v39, %v2562_v32  ;;  %v7114_v32 = vsel %vm5814_vm6, %v6859_v30, %v7113_v62  ;;  %v6017_v38 = vrot.slane %v6016_v25, 1  ;;  %v9603_v39 = vsel %vm1895_vm0, %v4529_v23, 0.0  ;;  %v2439_v23 = vld [vmem:[%s9224_s27 + $0xe8] sm:$0xff] }
 0x1fe   : > { %v9596_v53 = vadd.f32 %v12380_v57, %v2563_v6  ;;  %v6021_v50 = vadd.f32 %v6020_v31, %v6019_v41  ;;  %v9606_v9 = vadd.f32 %v9036_v5, %v2564_v58  ;;  %v2565_v46 = vmul.f32 %v2437_v4, %v2309_v34  ;;  %v12381_v6 = vld [vmem:[#allocation49_spill] sm:$0xff]  ;;  %2197 = vadd.xlane.f32.xlu1 %v12382_v59  ;;  %v1985_v16 = vpop.xlane.xlu0 %1984  ;;  %v2440_v4 = vld [vmem:[%s9224_s27 + $0xf0] sm:$0xff] }
 0x1ff   : > { %2194 = vadd.xlane.f32.xlu0 %v12381_v6  ;;  %v6860_v62 = vmul.f32 0.125, %v6011_v63  ;;  %v4395_v19 = vmax.f32 %v4267_v42, 0.0  ;;  %v2566_v30 = vmul.f32 %v2438_v24, %v2310_v11  ;;  %v6018_v41 = vadd.f32 %v6017_v38, %v6016_v25  ;;  %v1988_v31 = vpop.xlane.xlu1 %1987  ;;  %v12386_v11 = vld [vmem:[#allocation21_spill] sm:$0xff] }
 0x200   : > { %v6022_v22 = vrot.slane %v6021_v50, 2  ;;  %v3090_v5 = vcombine.high %v9318_v29, %v9318_v29  ;;  %v2311_v58 = vadd.f32 %v8670_v51, %v1985_v16  ;;  %v3137_v34 = vcombine.high %v9361_v15, %v9361_v15 }
 0x201   : > { %v7115_v57 = vsel %vm5816_vm7, %v6860_v62, %v7114_v32  ;;  %v4530_v42 = vmul.f32 %v9348_v35, %v4395_v19  ;;  %v9626_v24 = vadd.f32 %v9045_v36, %v2565_v46  ;;  %v12384_v25 = vrot.slane %v9039_v27, %v12234_v47  ;;  %v2441_v27 = vld [vmem:[%s9224_s27 + $0xf8] sm:$0xff] }
 0x202   : > { %v2312_v29 = vadd.f32 %v8670_v51, %v1988_v31  ;;  %7237 = vst.msk [vmem:[%s9613_s15] sm:$0xff] %vm1895_vm0, %v7115_v57  ;;  %v6023_v63 = vadd.f32 %v6022_v22, %v6021_v50  ;;  %v2567_v32 = vmul.f32 %v2439_v23, %v2311_v58  ;;  %v6861_v38 = vmul.f32 0.125, %v6018_v41  ;;  %2203 = vadd.xlane.f32.xlu1 %v8872_v17  ;;  %v1991_v62 = vpop.xlane.xlu0 %1990  ;;  %v2442_v23 = vld [vmem:[%s9224_s27 + $0x100] sm:$0xff] }
 0x203   : > { %12383 = vst [vmem:[#allocation32_spill] sm:$0xff] %v9626_v24  ;;  %v9631_v56 = vadd.f32 %v12384_v25, %v2566_v30  ;;  %2200 = vadd.xlane.f32.xlu0 %v12386_v11  ;;  %v9638_v6 = vsel %vm1895_vm0, %v4530_v42, 0.0  ;;  %v6026_v36 = vsel %vm1895_vm0, %v4395_v19, 0.0  ;;  %v3104_v16 = vrot.slane %v3090_v5, %v12221_v14  ;;  %v1994_v22 = vpop.xlane.xlu1 %1993  ;;  %v12389_v25 = vld [vmem:[#allocation22_spill] sm:$0xff] }
 0x204   : > { %v2568_v46 = vmul.f32 %v2440_v4, %v2312_v29  ;;  %v6024_v30 = vrot.slane %v6023_v63, 1  ;;  %v6027_v59 = vrot.slane %v6026_v36, 4  ;;  %v2313_v50 = vadd.f32 %v8670_v51, %v1991_v62 }
 0x205   : > { %12385 = vst [vmem:[#allocation15_spill] sm:$0xff] %v9631_v56  ;;  %v9647_v41 = vrot.slane %v3137_v34, %v12234_v47  ;;  %v4268_v19 = vadd.f32 %v9303_v0, %v9453_v12  ;;  %v4269_v17 = vadd.f32 %v9303_v0, %v9458_v7  ;;  %v12387_v58 = vrot.slane %v9048_v8, %v12234_v47  ;;  %v12391_v8 = vld [vmem:[#allocation50_spill] sm:$0xff] }
 0x206   : > { %v2314_v5 = vadd.f32 %v8670_v51, %v1994_v22  ;;  %v6025_v31 = vadd.f32 %v6024_v30, %v6023_v63  ;;  %v6028_v57 = vadd.f32 %v6027_v59, %v6026_v36  ;;  %v2569_v42 = vmul.f32 %v2441_v27, %v2313_v50  ;;  %2209 = vadd.xlane.f32.xlu1 %v12391_v8  ;;  %v1997_v62 = vpop.xlane.xlu0 %1996  ;;  %v12437_v56 = vld [vmem:[#allocation62_spill] sm:$0xff] }
 0x207   : > { %v9656_v4 = vadd.f32 %v12387_v58, %v2567_v32  ;;  %2206 = vadd.xlane.f32.xlu0 %v12389_v25  ;;  %v9661_v34 = vrot.slane %v3104_v16, %v12221_v14  ;;  %v4396_v12 = vmax.f32 %v4268_v19, 0.0  ;;  %v4397_v29 = vmax.f32 %v4269_v17, 0.0  ;;  %v2443_v32 = vld [vmem:[%s9224_s27 + $0x108] sm:$0xff]  ;;  %v2000_v30 = vpop.xlane.xlu1 %1999  ;;  %v2445_v25 = vld [vmem:[%s9224_s27 + $0x118] sm:$0xff] }
 0x208   : > { %v9664_v7 = vadd.f32 %v9091_v61, %v2568_v46  ;;  %v2570_v11 = vmul.f32 %v2442_v23, %v2314_v5  ;;  %v6862_v22 = vmul.f32 0.125, %v6025_v31  ;;  %v6029_v63 = vrot.slane %v6028_v57, 2  ;;  %v2444_v23 = vld [vmem:[%s9224_s27 + $0x110] sm:$0xff]  ;;  %v12395_v5 = vld [vmem:[#allocation51_spill] sm:$0xff] }
 0x209   : > { %12388 = vst [vmem:[#allocation16_spill] sm:$0xff] %v9656_v4  ;;  %v9669_v36 = vadd.f32 %v9103_v54, %v2569_v42  ;;  %v2315_v27 = vadd.f32 %v8670_v51, %v1997_v62  ;;  %v4531_v59 = vmul.f32 %v9348_v35, %v4396_v12  ;;  %v3106_v50 = vcombine.high %v3104_v16, %v3104_v16  ;;  %v12416_v4 = vld [vmem:[#allocation24_spill] sm:$0xff] }
 0x20a   : > { %12390 = vst [vmem:[#allocation33_spill] sm:$0xff] %v9664_v7  ;;  %v12393_v61 = vrot.slane %v9094_v2, %v12234_v47  ;;  %v2316_v19 = vadd.f32 %v8670_v51, %v2000_v30  ;;  %v6030_v17 = vadd.f32 %v6029_v63, %v6028_v57  ;;  %v7116_v31 = vsel %vm5804_vm1, %v6862_v22, %v6861_v38  ;;  %v12396_v2 = vld [vmem:[#allocation52_spill] sm:$0xff] }
 0x20b   : > { %12392 = vst [vmem:[#allocation17_spill] sm:$0xff] %v9669_v36  ;;  %v2571_v58 = vmul.f32 %v2443_v32, %v2315_v27  ;;  %2212 = vadd.xlane.f32.xlu0 %v12395_v5  ;;  %v6033_v16 = vsel %vm1895_vm0, %v4396_v12, 0.0  ;;  %v4532_v42 = vmul.f32 %v9348_v35, %v4397_v29  ;;  %2215 = vadd.xlane.f32.xlu1 %v12396_v2  ;;  %v9689_v57 = vsel %vm1895_vm0, %v4531_v59, 0.0  ;;  %v2446_v22 = vld [vmem:[%s9224_s27 + $0x120] sm:$0xff]  ;;  %v2006_v30 = vpop.xlane.xlu1 %2005 }
 0x20c   : > { %v9676_v46 = vadd.f32 %v12393_v61, %v2570_v11  ;;  %v2003_v11 = vpop.xlane.xlu0 %2002  ;;  %v6031_v8 = vrot.slane %v6030_v17, 1  ;;  %v6034_v62 = vrot.slane %v6033_v16, 4  ;;  %v6040_v63 = vsel %vm1895_vm0, %v4397_v29, 0.0 }
 0x20d   : > { %v12397_v32 = vrot.slane %v9106_v1, %v12234_v47  ;;  %v2572_v38 = vmul.f32 %v2444_v23, %v2316_v19  ;;  %v2317_v12 = vadd.f32 %v8670_v51, %v2003_v11  ;;  %v6041_v61 = vrot.slane %v6040_v63, 4  ;;  %v12400_v11 = vld [vmem:[#allocation54_spill] sm:$0xff] }
 0x20e   : > { %12394 = vst [vmem:[#allocation34_spill] sm:$0xff] %v9676_v46  ;;  %v2318_v5 = vadd.f32 %v8670_v51, %v2006_v30  ;;  %v6032_v2 = vadd.f32 %v6031_v8, %v6030_v17  ;;  %v6035_v59 = vadd.f32 %v6034_v62, %v6033_v16  ;;  %v9701_v54 = vsel %vm1895_vm0, %v4532_v42, 0.0  ;;  %v12399_v46 = vld [vmem:[#allocation53_spill] sm:$0xff] }
 0x20f   : > { %v9695_v27 = vadd.f32 %v12397_v32, %v2571_v58  ;;  %v2573_v29 = vmul.f32 %v2445_v25, %v2317_v12  ;;  %2218 = vadd.xlane.f32.xlu0 %v12399_v46  ;;  %v6042_v1 = vadd.f32 %v6041_v61, %v6040_v63  ;;  %v9705_v23 = vrot.slane %v3106_v50, %v12221_v14  ;;  %v2447_v32 = vld [vmem:[%s9224_s27 + $0x128] sm:$0xff]  ;;  %v12401_v25 = vld [vmem:[#allocation67_spill] sm:$0xff]  ;;  %v12403_v46 = vld [vmem:[#allocation26_spill] sm:$0xff] }
 0x210   : > { %v3136_v19 = vcombine.high %v9661_v34, %v9661_v34  ;;  %v2574_v58 = vmul.f32 %v2446_v22, %v2318_v5  ;;  %2221 = vadd.xlane.f32.xlu1 %v12400_v11  ;;  %v2009_v17 = vpop.xlane.xlu0 %2008  ;;  %v6863_v16 = vmul.f32 0.125, %v6032_v2  ;;  %v6036_v8 = vrot.slane %v6035_v59, 2  ;;  %v2448_v12 = vld [vmem:[%s9224_s27 + $0x130] sm:$0xff]  ;;  %v2012_v22 = vpop.xlane.xlu1 %2011  ;;  %v12405_v61 = vld [vmem:[#allocation68_spill] sm:$0xff] }
 0x211   : > { %12398 = vst [vmem:[#allocation43_spill] sm:$0xff] %v9695_v27  ;;  %v4270_v42 = vadd.f32 %v9303_v0, %v9470_v33  ;;  %v9714_v62 = vadd.f32 %v12401_v25, %v2572_v38  ;;  %v9717_v63 = vadd.f32 %v12403_v46, %v2573_v29  ;;  %v2319_v50 = vadd.f32 %v8670_v51, %v2009_v17  ;;  %v12408_v25 = vld [vmem:[#allocation23_spill] sm:$0xff]  ;;  %v12415_v38 = vld [vmem:[#allocation56_spill] sm:$0xff] }
 0x212   : > { %v6043_v30 = vrot.slane %v6042_v1, 2  ;;  %v12406_v5 = vrot.slane %v12405_v61, %v12234_v47  ;;  %v2320_v11 = vadd.f32 %v8670_v51, %v2012_v22  ;;  %v6037_v33 = vadd.f32 %v6036_v8, %v6035_v59  ;;  %v12409_v27 = vld [vmem:[#allocation55_spill] sm:$0xff]  ;;  %v2450_v8 = vld [vmem:[%s9224_s27 + $0x140] sm:$0xff] }
 0x213   : > { %12402 = vst [vmem:[#allocation35_spill] sm:$0xff] %v9714_v62  ;;  %12404 = vst [vmem:[#allocation44_spill] sm:$0xff] %v9717_v63  ;;  %v2575_v29 = vmul.f32 %v2447_v32, %v2319_v50  ;;  %2224 = vadd.xlane.f32.xlu0 %v12408_v25  ;;  %v7117_v17 = vsel %vm5806_vm2, %v6863_v16, %v7116_v31  ;;  %v4398_v63 = vmax.f32 %v4270_v42, 0.0  ;;  %v2449_v61 = vld [vmem:[%s9224_s27 + $0x138] sm:$0xff]  ;;  %v12410_v16 = vld [vmem:[#allocation70_spill] sm:$0xff] }
 0x214   : > { %v9724_v2 = vadd.f32 %v12406_v5, %v2574_v58  ;;  %v6044_v46 = vadd.f32 %v6043_v30, %v6042_v1  ;;  %v2576_v62 = vmul.f32 %v2448_v12, %v2320_v11  ;;  %2227 = vadd.xlane.f32.xlu1 %v12409_v27  ;;  %v2015_v58 = vpop.xlane.xlu0 %2014  ;;  %v6038_v5 = vrot.slane %v6037_v33, 1  ;;  %v2018_v50 = vpop.xlane.xlu1 %2017  ;;  %v12413_v11 = vld [vmem:[#allocation28_spill] sm:$0xff] }
 0x215   : > { %v9734_v22 = vrot.slane %v3136_v19, %v12234_v47  ;;  %v4271_v59 = vadd.f32 %v9303_v0, %v9478_v48  ;;  %v2321_v32 = vadd.f32 %v8670_v51, %v2015_v58  ;;  %v4533_v1 = vmul.f32 %v9348_v35, %v4398_v63 }
 0x216   : > { %12407 = vst [vmem:[#allocation36_spill] sm:$0xff] %v9724_v2  ;;  %v6045_v31 = vrot.slane %v6044_v46, 1  ;;  %v3138_v27 = vcombine.high %v9705_v23, %v9705_v23  ;;  %v12411_v42 = vrot.slane %v12410_v16, %v12234_v47  ;;  %v2322_v19 = vadd.f32 %v8670_v51, %v2018_v50 }
 0x217   : > { %v6039_v48 = vadd.f32 %v6038_v5, %v6037_v33  ;;  %v6047_v30 = vsel %vm1895_vm0, %v4398_v63, 0.0  ;;  %v9751_v25 = vadd.f32 %v12413_v11, %v2576_v62  ;;  %v2577_v58 = vmul.f32 %v2449_v61, %v2321_v32  ;;  %2230 = vadd.xlane.f32.xlu0 %v12415_v38  ;;  %v2452_v62 = vld [vmem:[%s9224_s27 + $0x150] sm:$0xff]  ;;  %v9765_v32 = vld [vmem:[%s8562_s19 + $0x48] sm:$0xff] }
 0x218   : > { %v9746_v12 = vadd.f32 %v12411_v42, %v2575_v29  ;;  %v6046_v2 = vadd.f32 %v6045_v31, %v6044_v46  ;;  %v6048_v36 = vrot.slane %v6047_v30, 4  ;;  %v2578_v7 = vmul.f32 %v2450_v8, %v2322_v19  ;;  %2233 = vadd.xlane.f32.xlu1 %v12416_v4  ;;  %v2451_v29 = vld [vmem:[%s9224_s27 + $0x148] sm:$0xff]  ;;  %v2021_v16 = vpop.xlane.xlu0 %2020  ;;  %v2024_v5 = vpop.xlane.xlu1 %2023  ;;  %v12417_v4 = vld [vmem:[#allocation78_spill] sm:$0xff]  ;;  %v12419_v19 = vld [vmem:[#allocation72_spill] sm:$0xff] }
 0x219   : > { %12414 = vst [vmem:[#allocation19_spill] sm:$0xff] %v9751_v25  ;;  %v6864_v42 = vmul.f32 0.125, %v6039_v48  ;;  %v9757_v50 = vsel %vm1895_vm0, %v4533_v1, 0.0  ;;  %v4399_v33 = vmax.f32 %v4271_v59, 0.0  ;;  %v2323_v63 = vadd.f32 %v8670_v51, %v2021_v16  ;;  %v12423_v16 = vld [vmem:[#allocation58_spill] sm:$0xff] }
 0x21a   : > { %12412 = vst [vmem:[#allocation6_spill] sm:$0xff] %v9746_v12  ;;  %v6865_v61 = vmul.f32 0.125, %v6046_v2  ;;  %v6049_v38 = vadd.f32 %v6048_v36, %v6047_v30  ;;  %v9762_v46 = vrot.slane %v3138_v27, %v12234_v47  ;;  %v9768_v8 = vadd.f32 %v12417_v4, %v2577_v58  ;;  %v12422_v27 = vld [vmem:[#allocation57_spill] sm:$0xff]  ;;  %v12430_v12 = vld [vmem:[#allocation60_spill] sm:$0xff] }
 0x21b   : > { %v2324_v31 = vadd.f32 %v8670_v51, %v2024_v5  ;;  %v7118_v59 = vsel %vm5808_vm3, %v6864_v42, %v7117_v17  ;;  %v4534_v1 = vmul.f32 %v9348_v35, %v4399_v33  ;;  %v12420_v48 = vrot.slane %v12419_v19, %v12234_v47  ;;  %2236 = vadd.xlane.f32.xlu0 %v12422_v27  ;;  %v2453_v5 = vld [vmem:[%s9224_s27 + $0x158] sm:$0xff]  ;;  %v2454_v19 = vld [vmem:[%s9224_s27 + $0x160] sm:$0xff] }
 0x21c   : > { %12418 = vst [vmem:[#allocation37_spill] sm:$0xff] %v9768_v8  ;;  %v2579_v36 = vmul.f32 %v2451_v29, %v2323_v63  ;;  %v6050_v30 = vrot.slane %v6049_v38, 2  ;;  %v6054_v11 = vsel %vm1895_vm0, %v4399_v33, 0.0  ;;  %2239 = vadd.xlane.f32.xlu1 %v12423_v16  ;;  %v2027_v4 = vpop.xlane.xlu0 %2026  ;;  %v7119_v17 = vsel %vm5810_vm4, %v6865_v61, %v7118_v59  ;;  %v2030_v29 = vpop.xlane.xlu1 %2029 }
 0x21d   : > { %v9776_v2 = vadd.f32 %v12420_v48, %v2578_v7  ;;  %v2580_v58 = vmul.f32 %v2452_v62, %v2324_v31  ;;  %v6055_v42 = vrot.slane %v6054_v11, 4  ;;  %v3146_v8 = vrot.slane %v9765_v32, %v12221_v14  ;;  %v12424_v62 = vld [vmem:[#allocation73_spill] sm:$0xff] }
 0x21e   : > { %v2325_v7 = vadd.f32 %v8670_v51, %v2027_v4  ;;  %v6051_v63 = vadd.f32 %v6050_v30, %v6049_v38  ;;  %v9788_v48 = vsel %vm1895_vm0, %v4534_v1, 0.0  ;;  %v4272_v33 = vadd.f32 %v9303_v0, %v9497_v28  ;;  %v12427_v4 = vld [vmem:[#allocation80_spill] sm:$0xff]  ;;  %v12429_v30 = vld [vmem:[#allocation59_spill] sm:$0xff] }
 0x21f   : > { %12421 = vst [vmem:[#allocation25_spill] sm:$0xff] %v9776_v2  ;;  %v12425_v31 = vrot.slane %v12424_v62, %v12234_v47  ;;  %v2326_v59 = vadd.f32 %v8670_v51, %v2030_v29  ;;  %v6056_v27 = vadd.f32 %v6055_v42, %v6054_v11  ;;  %v9799_v16 = vrot.slane %v3146_v8, %v12221_v14 }
 0x220   : > { %v9802_v38 = vadd.f32 %v12427_v4, %v2580_v58  ;;  %v2581_v1 = vmul.f32 %v2453_v5, %v2325_v7  ;;  %2242 = vadd.xlane.f32.xlu0 %v12429_v30  ;;  %v6052_v2 = vrot.slane %v6051_v63, 1  ;;  %v4400_v28 = vmax.f32 %v4272_v33, 0.0  ;;  %2245 = vadd.xlane.f32.xlu1 %v12430_v12  ;;  %v2033_v62 = vpop.xlane.xlu0 %2032  ;;  %v2036_v58 = vpop.xlane.xlu1 %2035  ;;  %v12431_v33 = vld [vmem:[#allocation81_spill] sm:$0xff] }
 0x221   : > { %v9795_v61 = vadd.f32 %v12425_v31, %v2579_v36  ;;  %v2582_v25 = vmul.f32 %v2454_v19, %v2326_v59  ;;  %v2455_v36 = vld [vmem:[%s9224_s27 + $0x168] sm:$0xff]  ;;  %v6057_v31 = vrot.slane %v6056_v27, 2  ;;  %v4273_v11 = vadd.f32 %v9303_v0, %v9502_v21  ;;  %v12433_v21 = vld [vmem:[#allocation27_spill] sm:$0xff] }
 0x222   : > { %12428 = vst [vmem:[#allocation39_spill] sm:$0xff] %v9802_v38  ;;  %v3154_v42 = vcombine.high %v3146_v8, %v3146_v8  ;;  %v2327_v29 = vadd.f32 %v8670_v51, %v2033_v62  ;;  %v6053_v5 = vadd.f32 %v6052_v2, %v6051_v63  ;;  %v4535_v19 = vmul.f32 %v9348_v35, %v4400_v28  ;;  %v12436_v63 = vld [vmem:[#allocation61_spill] sm:$0xff] }
 0x223   : > { %12426 = vst [vmem:[#allocation8_spill] sm:$0xff] %v9795_v61  ;;  %v2456_v61 = vld [vmem:[%s9224_s27 + $0x170] sm:$0xff]  ;;  %v9815_v12 = vadd.f32 %v12431_v33, %v2581_v1  ;;  %v2328_v59 = vadd.f32 %v8670_v51, %v2036_v58  ;;  %v6058_v4 = vadd.f32 %v6057_v31, %v6056_v27  ;;  %v6061_v0 = vsel %vm1895_vm0, %v4400_v28, 0.0  ;;  %v2457_v1 = vld [vmem:[%s9224_s27 + $0x178] sm:$0xff] }
 0x224   : > { %v12434_v8 = vrot.slane %v12433_v21, %v12234_v47  ;;  %v2583_v2 = vmul.f32 %v2455_v36, %v2327_v29  ;;  %2248 = vadd.xlane.f32.xlu0 %v12436_v63  ;;  %v6866_v62 = vmul.f32 0.125, %v6053_v5  ;;  %v6062_v7 = vrot.slane %v6061_v0, 4  ;;  %2251 = vadd.xlane.f32.xlu1 %v12437_v56  ;;  %v2039_v33 = vpop.xlane.xlu0 %2038  ;;  %v12439_v28 = vld [vmem:[#allocation75_spill] sm:$0xff]  ;;  %v2458_v29 = vld [vmem:[%s9224_s27 + $0x180] sm:$0xff]  ;;  %v2042_v5 = vpop.xlane.xlu1 %2041  ;;  %v12442_v63 = vld [vmem:[#allocation30_spill] sm:$0xff] }
 0x225   : > { %12432 = vst [vmem:[#allocation40_spill] sm:$0xff] %v9815_v12  ;;  %v2584_v38 = vmul.f32 %v2456_v61, %v2328_v59  ;;  %v6059_v58 = vrot.slane %v6058_v4, 1  ;;  %v4401_v27 = vmax.f32 %v4273_v11, 0.0  ;;  %v9828_v31 = vrot.slane %v3154_v42, %v12221_v14  ;;  %v2464_v12 = vld [vmem:[%s9224_s27 + $0x1b0] sm:$0xff] }
 0x226   : > { %v9822_v30 = vadd.f32 %v12434_v8, %v2582_v25  ;;  %v12440_v21 = vrot.slane %v12439_v28, %v12234_v47  ;;  %v2329_v36 = vadd.f32 %v8670_v51, %v2039_v33  ;;  %v9838_v61 = vsel %vm1895_vm0, %v4535_v19, 0.0  ;;  %v12444_v33 = vld [vmem:[#allocation63_spill] sm:$0xff] }
 0x227   : > { %12438 = vst [vmem:[#allocation11_spill] sm:$0xff] %v9828_v31  ;;  %v6063_v56 = vadd.f32 %v6062_v7, %v6061_v0  ;;  %v2330_v59 = vadd.f32 %v8670_v51, %v2042_v5  ;;  %v7120_v11 = vsel %vm5812_vm5, %v6866_v62, %v7119_v17  ;;  %v6060_v42 = vadd.f32 %v6059_v58, %v6058_v4  ;;  %v2459_v7 = vld [vmem:[%s9224_s27 + $0x188] sm:$0xff] }
 0x228   : > { %12435 = vst [vmem:[#allocation10_spill] sm:$0xff] %v9822_v30  ;;  %v9833_v25 = vadd.f32 %v12440_v21, %v2583_v2  ;;  %v4536_v8 = vmul.f32 %v9348_v35, %v4401_v27  ;;  %v9844_v2 = vadd.f32 %v12442_v63, %v2584_v38  ;;  %v2585_v28 = vmul.f32 %v2457_v1, %v2329_v36  ;;  %v12445_v30 = vld [vmem:[#allocation64_spill] sm:$0xff]  ;;  %v2045_v0 = vpop.xlane.xlu0 %2044  ;;  %v2460_v38 = vld [vmem:[%s9224_s27 + $0x190] sm:$0xff]  ;;  %v2048_v62 = vpop.xlane.xlu1 %2047 }
 0x229   : > { %2254 = vadd.xlane.f32.xlu0 %v12444_v33  ;;  %v6064_v21 = vrot.slane %v6063_v56, 2  ;;  %v2586_v19 = vmul.f32 %v2458_v29, %v2330_v59  ;;  %2257 = vadd.xlane.f32.xlu1 %v12445_v30  ;;  %v6867_v5 = vmul.f32 0.125, %v6060_v42  ;;  %v2331_v35 = vadd.f32 %v8670_v51, %v2045_v0  ;;  %v12446_v30 = vld [vmem:[#allocation84_spill] sm:$0xff]  ;;  %v12448_v29 = vld [vmem:[#allocation29_spill] sm:$0xff] }
 0x22a   : > { %12441 = vst [vmem:[#allocation42_spill] sm:$0xff] %v9833_v25  ;;  %12443 = vst [vmem:[#allocation45_spill] sm:$0xff] %v9844_v2  ;;  %v6068_v25 = vsel %vm1895_vm0, %v4401_v27, 0.0  ;;  %v9855_v58 = vsel %vm1895_vm0, %v4536_v8, 0.0  ;;  %v3184_v27 = vcombine.high %v9799_v16, %v9799_v16  ;;  %v9860_v36 = vadd.f32 %v12446_v30, %v2585_v28  ;;  %v9873_v28 = vld [vmem:[%s12074_s7] ss:$0 sm:$0xff] }
 0x22b   : > { %v6069_v17 = vrot.slane %v6068_v25, 4  ;;  %v6065_v1 = vadd.f32 %v6064_v21, %v6063_v56  ;;  %v12449_v59 = vrot.slane %v12448_v29, %v12234_v47  ;;  %v2332_v63 = vadd.f32 %v8670_v51, %v2048_v62  ;;  %v12451_v56 = vld [vmem:[#allocation65_spill] sm:$0xff]  ;;  %v12452_v29 = vld [vmem:[#allocation66_spill] sm:$0xff]  ;;  %v2461_v62 = vld [vmem:[%s9224_s27 + $0x198] sm:$0xff] }
 0x22c   : > { %12447 = vst [vmem:[#allocation14_spill] sm:$0xff] %v9860_v36  ;;  %v2587_v0 = vmul.f32 %v2459_v7, %v2331_v35  ;;  %v7121_v8 = vsel %vm5814_vm6, %v6867_v5, %v7120_v11  ;;  %v4274_v30 = vadd.f32 %v9873_v28, %v9516_v26  ;;  %v9880_v7 = vrot.slane %v3184_v27, %v12234_v47  ;;  %v2054_v35 = vpop.xlane.xlu1 %2053  ;;  %v12457_v2 = vld [vmem:[#allocation69_spill] sm:$0xff] }
 0x22d   : > { %v9865_v42 = vadd.f32 %v12449_v59, %v2586_v19  ;;  %v6070_v33 = vadd.f32 %v6069_v17, %v6068_v25  ;;  %2260 = vadd.xlane.f32.xlu0 %v12451_v56  ;;  %v6066_v21 = vrot.slane %v6065_v1, 1  ;;  %v2588_v19 = vmul.f32 %v2460_v38, %v2332_v63  ;;  %2263 = vadd.xlane.f32.xlu1 %v12452_v29  ;;  %v2051_v59 = vpop.xlane.xlu0 %2050  ;;  %v2462_v17 = vld [vmem:[%s9224_s27 + $0x1a0] sm:$0xff]  ;;  %v12454_v38 = vld [vmem:[#allocation79_spill] sm:$0xff] }
 0x22e   : > { %12453 = vst [vmem:[#allocation47_spill] sm:$0xff] %v9880_v7  ;;  %v4275_v11 = vadd.f32 %v9873_v28, %v9519_v13  ;;  %v2333_v5 = vadd.f32 %v8670_v51, %v2051_v59  ;;  %v4402_v4 = vmax.f32 %v4274_v30, 0.0  ;;  %v3186_v26 = vcombine.high %v9828_v31, %v9828_v31  ;;  %v12475_v7 = vld [vmem:[#allocation31_spill] sm:$0xff] }
 0x22f   : > { %12450 = vst [vmem:[#allocation46_spill] sm:$0xff] %v9865_v42  ;;  %v6071_v25 = vrot.slane %v6070_v33, 2  ;;  %v6067_v56 = vadd.f32 %v6066_v21, %v6065_v1  ;;  %v12455_v63 = vrot.slane %v12454_v38, %v12234_v47  ;;  %v2334_v27 = vadd.f32 %v8670_v51, %v2054_v35  ;;  %v9898_v1 = vld [vmem:[%s12075_s8] ss:$0 sm:$0xff]  ;;  %v12458_v38 = vld [vmem:[#allocation71_spill] sm:$0xff] }
 0x230   : > { %v4403_v36 = vmax.f32 %v4275_v11, 0.0  ;;  %v2589_v13 = vmul.f32 %v2461_v62, %v2333_v5  ;;  %v4537_v21 = vmul.f32 %v9898_v1, %v4402_v4  ;;  %v12459_v5 = vld [vmem:[#allocation86_spill] sm:$0xff] }
 0x231   : > { %v9891_v29 = vadd.f32 %v12455_v63, %v2587_v0  ;;  %v6072_v42 = vadd.f32 %v6071_v25, %v6070_v33  ;;  %2266 = vadd.xlane.f32.xlu0 %v12457_v2  ;;  %v6868_v59 = vmul.f32 0.125, %v6067_v56  ;;  %v6075_v0 = vsel %vm1895_vm0, %v4402_v4, 0.0  ;;  %2269 = vadd.xlane.f32.xlu1 %v12458_v38  ;;  %v2463_v33 = vld [vmem:[%s9224_s27 + $0x1a8] sm:$0xff]  ;;  %v2057_v25 = vpop.xlane.xlu0 %2056  ;;  %v12461_v56 = vld [vmem:[#allocation87_spill] sm:$0xff]  ;;  %v2060_v4 = vpop.xlane.xlu1 %2059 }
 0x232   : > { %v2590_v30 = vmul.f32 %v2462_v17, %v2334_v27  ;;  %v6076_v11 = vrot.slane %v6075_v0, 4  ;;  %v4538_v2 = vmul.f32 %v9898_v1, %v4403_v36  ;;  %v9906_v35 = vadd.f32 %v12459_v5, %v2588_v19  ;;  %v12463_v5 = vld [vmem:[#allocation82_spill] sm:$0xff] }
 0x233   : > { %12456 = vst [vmem:[#allocation48_spill] sm:$0xff] %v9891_v29  ;;  %v6073_v62 = vrot.slane %v6072_v42, 1  ;;  %v9909_v63 = vadd.f32 %v12461_v56, %v2589_v13  ;;  %v2335_v29 = vadd.f32 %v8670_v51, %v2057_v25  ;;  %v7122_v17 = vsel %vm5816_vm7, %v6868_v59, %v7121_v8 }
 0x234   : > { %12460 = vst [vmem:[#allocation18_spill] sm:$0xff] %v9906_v35  ;;  %v2336_v27 = vadd.f32 %v8670_v51, %v2060_v4  ;;  %7238 = vst.msk [vmem:[%s9613_s15 + $0x8] sm:$0xff] %vm1895_vm0, %v7122_v17  ;;  %v9918_v24 = vsel %vm1895_vm0, %v4537_v21, 0.0  ;;  %v6077_v19 = vadd.f32 %v6076_v11, %v6075_v0  ;;  %v12464_v13 = vrot.slane %v12463_v5, %v12234_v47  ;;  %v12474_v35 = vld [vmem:[#allocation77_spill] sm:$0xff] }
 0x235   : > { %12462 = vst [vmem:[#allocation49_spill] sm:$0xff] %v9909_v63  ;;  %v6074_v38 = vadd.f32 %v6073_v62, %v6072_v42  ;;  %v2591_v25 = vmul.f32 %v2463_v33, %v2335_v29  ;;  %v12466_v63 = vld [vmem:[#allocation74_spill] sm:$0xff]  ;;  %v9927_v8 = vsel %vm1895_vm0, %v4538_v2, 0.0  ;;  %v6082_v59 = vsel %vm1895_vm0, %v4403_v36, 0.0  ;;  %v12467_v42 = vld [vmem:[#allocation76_spill] sm:$0xff]  ;;  %v2465_v62 = vld [vmem:[%s9224_s27 + $0x1b8] sm:$0xff]  ;;  %v2063_v21 = vpop.xlane.xlu0 %2062  ;;  %v2066_v33 = vpop.xlane.xlu1 %2065 }
 0x236   : > { %v9923_v56 = vadd.f32 %v12464_v13, %v2590_v30  ;;  %2272 = vadd.xlane.f32.xlu0 %v12466_v63  ;;  %v2592_v4 = vmul.f32 %v2464_v12, %v2336_v27  ;;  %2275 = vadd.xlane.f32.xlu1 %v12467_v42  ;;  %v6078_v17 = vrot.slane %v6077_v19, 2  ;;  %v6083_v0 = vrot.slane %v6082_v59, 4  ;;  %v2466_v29 = vld [vmem:[%s9224_s27 + $0x1c0] sm:$0xff]  ;;  %v12469_v36 = vld [vmem:[#allocation83_spill] sm:$0xff] }
 0x237   : > { %v9933_v11 = vrot.slane %v3186_v26, %v12234_v47  ;;  %v2337_v30 = vadd.f32 %v8670_v51, %v2063_v21  ;;  %v6869_v63 = vmul.f32 0.125, %v6074_v38  ;;  %v3139_v2 = vcombine.high %v9765_v32, %v9765_v32  ;;  %v12472_v21 = vld [vmem:[#allocation89_spill] sm:$0xff] }
 0x238   : > { %12465 = vst [vmem:[#allocation20_spill] sm:$0xff] %v9923_v56  ;;  %v4276_v12 = vadd.f32 %v9873_v28, %v9531_v37  ;;  %v12470_v27 = vrot.slane %v12469_v36, %v12234_v47  ;;  %v2338_v26 = vadd.f32 %v8670_v51, %v2066_v33  ;;  %v6079_v13 = vadd.f32 %v6078_v17, %v6077_v19  ;;  %v2467_v36 = vld [vmem:[%s9224_s27 + $0x1c8] sm:$0xff] }
 0x239   : > { %12468 = vst [vmem:[#allocation21_spill] sm:$0xff] %v9933_v11  ;;  %v6084_v42 = vadd.f32 %v6083_v0, %v6082_v59  ;;  %v9948_v56 = vadd.f32 %v12472_v21, %v2592_v4  ;;  %v2593_v38 = vmul.f32 %v2465_v62, %v2337_v30  ;;  %v3153_v32 = vrot.slane %v3139_v2, %v12221_v14  ;;  %v2468_v4 = vld [vmem:[%s9224_s27 + $0x1d0] sm:$0xff]  ;;  %v2072_v62 = vpop.xlane.xlu1 %2071  ;;  %v12478_v2 = vld [vmem:[#allocation9_spill] sm:$0xff] }
 0x23a   : > { %v9944_v5 = vadd.f32 %v12470_v27, %v2591_v25  ;;  %2278 = vadd.xlane.f32.xlu0 %v12474_v35  ;;  %v4404_v11 = vmax.f32 %v4276_v12, 0.0  ;;  %v2594_v37 = vmul.f32 %v2466_v29, %v2338_v26  ;;  %4649 = vadd.xlane.f32.xlu1 %v12475_v7  ;;  %v2069_v25 = vpop.xlane.xlu0 %2068  ;;  %v6080_v27 = vrot.slane %v6079_v13, 1  ;;  %v12476_v0 = vld [vmem:[#allocation90_spill] sm:$0xff] }
 0x23b   : > { %12473 = vst [vmem:[#allocation50_spill] sm:$0xff] %v9948_v56  ;;  %v4277_v19 = vadd.f32 %v9873_v28, %v9539_v18  ;;  %v2339_v59 = vadd.f32 %v8670_v51, %v2069_v25  ;;  %v9959_v35 = vrot.slane %v3153_v32, %v12221_v14  ;;  %v9964_v7 = vadd.f32 %v9873_v28, %v9555_v44  ;;  %v12481_v25 = vld [vmem:[#allocation41_spill] sm:$0xff] }
 0x23c   : > { %12471 = vst [vmem:[#allocation22_spill] sm:$0xff] %v9944_v5  ;;  %v6085_v5 = vrot.slane %v6084_v42, 2  ;;  %v4539_v17 = vmul.f32 %v9898_v1, %v4404_v11  ;;  %v9967_v30 = vadd.f32 %v12476_v0, %v2593_v38  ;;  %v2340_v29 = vadd.f32 %v8670_v51, %v2072_v62  ;;  %v12482_v0 = vld [vmem:[#allocation13_spill] sm:$0xff]  ;;  %v2469_v62 = vld [vmem:[%s9224_s27 + $0x1d8] sm:$0xff] }
 0x23d   : > { %v6081_v18 = vadd.f32 %v6080_v27, %v6079_v13  ;;  %v12479_v12 = vrot.slane %v12478_v2, %v12234_v47  ;;  %v2595_v21 = vmul.f32 %v2467_v36, %v2339_v59  ;;  %v6089_v56 = vsel %vm1895_vm0, %v4404_v11, 0.0  ;;  %v2078_v36 = vpop.xlane.xlu1 %2077 }
 0x23e   : > { %12477 = vst [vmem:[#allocation51_spill] sm:$0xff] %v9967_v30  ;;  %v6086_v33 = vadd.f32 %v6085_v5, %v6084_v42  ;;  %4652 = vadd.xlane.f32.xlu0 %v12481_v25  ;;  %v2596_v38 = vmul.f32 %v2468_v4, %v2340_v29  ;;  %4655 = vadd.xlane.f32.xlu1 %v12482_v0  ;;  %v2075_v30 = vpop.xlane.xlu0 %2074  ;;  %v6090_v42 = vrot.slane %v6089_v56, 4  ;;  %v9984_v59 = vsel %vm1895_vm0, %v4539_v17, 0.0  ;;  %v12483_v25 = vld [vmem:[#allocation85_spill] sm:$0xff]  ;;  %v12485_v29 = vld [vmem:[#allocation92_spill] sm:$0xff] }
 0x23f   : > { %v9973_v26 = vadd.f32 %v12479_v12, %v2594_v37  ;;  %v6870_v13 = vmul.f32 0.125, %v6081_v18  ;;  %v2341_v27 = vadd.f32 %v8670_v51, %v2075_v30  ;;  %v2470_v37 = vld [vmem:[%s9224_s27 + $0x1e0] sm:$0xff]  ;;  %v4405_v2 = vmax.f32 %v4277_v19, 0.0 }
 0x240   : > { %v6087_v5 = vrot.slane %v6086_v33, 1  ;;  %v3155_v12 = vcombine.high %v3153_v32, %v3153_v32  ;;  %v12484_v11 = vrot.slane %v12483_v25, %v12234_v47  ;;  %v9992_v0 = vadd.f32 %v12485_v29, %v2596_v38 }
 0x241   : > { %12480 = vst [vmem:[#allocation52_spill] sm:$0xff] %v9973_v26  ;;  %v2342_v18 = vadd.f32 %v8670_v51, %v2078_v36  ;;  %v2597_v44 = vmul.f32 %v2469_v62, %v2341_v27  ;;  %v12487_v26 = vld [vmem:[#allocation4_spill] sm:$0xff]  ;;  %v6091_v31 = vadd.f32 %v6090_v42, %v6089_v56  ;;  %v4540_v17 = vmul.f32 %v9898_v1, %v4405_v2  ;;  %v12488_v36 = vld [vmem:[#allocation38_spill] sm:$0xff] }
 0x242   : > { %v9989_v4 = vadd.f32 %v12484_v11, %v2595_v21  ;;  %12486 = vst [vmem:[#allocation53_spill] sm:$0xff] %v9992_v0  ;;  %v6088_v30 = vadd.f32 %v6087_v5, %v6086_v33  ;;  %4658 = vadd.xlane.f32.xlu0 %v12487_v26  ;;  %v6096_v32 = vsel %vm1895_vm0, %v4405_v2, 0.0  ;;  %4661 = vadd.xlane.f32.xlu1 %v9475_v20  ;;  %v2471_v21 = vld [vmem:[%s9224_s27 + $0x1e8] sm:$0xff]  ;;  %v2081_v25 = vpop.xlane.xlu0 %2080  ;;  %v2472_v56 = vld [vmem:[%s9224_s27 + $0x1f0] sm:$0xff]  ;;  %v2084_v26 = vpop.xlane.xlu1 %2083  ;;  %v12489_v42 = vld [vmem:[#allocation88_spill] sm:$0xff] }
 0x243   : > { %v2598_v19 = vmul.f32 %v2470_v37, %v2342_v18  ;;  %v7123_v38 = vsel %vm5804_vm1, %v6870_v13, %v6869_v63  ;;  %v6097_v29 = vrot.slane %v6096_v32, 4  ;;  %v10002_v0 = vadd.f32 %v12488_v36, %v2597_v44 }
 0x244   : > { %v6871_v11 = vmul.f32 0.125, %v6088_v30  ;;  %v2343_v33 = vadd.f32 %v8670_v51, %v2081_v25  ;;  %v6092_v62 = vrot.slane %v6091_v31, 2  ;;  %v10007_v5 = vrot.slane %v3155_v12, %v12221_v14 }
 0x245   : > { %v12490_v20 = vrot.slane %v12489_v42, %v12234_v47  ;;  %v2344_v63 = vadd.f32 %v8670_v51, %v2084_v26  ;;  %v10016_v13 = vsel %vm1895_vm0, %v4540_v17, 0.0  ;;  %v6098_v44 = vadd.f32 %v6097_v29, %v6096_v32 }
 0x246   : > { %v2599_v37 = vmul.f32 %v2471_v21, %v2343_v33  ;;  %4664 = vadd.xlane.f32.xlu0 %v9488_v3  ;;  %v7124_v2 = vsel %vm5806_vm2, %v6871_v11, %v7123_v38  ;;  %v6093_v18 = vadd.f32 %v6092_v62, %v6091_v31  ;;  %v3185_v12 = vcombine.high %v9959_v35, %v9959_v35  ;;  %v2087_v25 = vpop.xlane.xlu0 %2086  ;;  %v12491_v21 = vld [vmem:[#allocation91_spill] sm:$0xff]  ;;  %v2474_v38 = vld [vmem:[%s9224_s27 + $0x200] sm:$0xff]  ;;  %v2090_v11 = vpop.xlane.xlu1 %2089 }
 0x247   : > { %v10012_v27 = vadd.f32 %v12490_v20, %v2598_v19  ;;  %v2600_v30 = vmul.f32 %v2472_v56, %v2344_v63  ;;  %4667 = vadd.xlane.f32.xlu1 %v9527_v49  ;;  %v2473_v19 = vld [vmem:[%s9224_s27 + $0x1f8] sm:$0xff]  ;;  %v6099_v36 = vrot.slane %v6098_v44, 2  ;;  %v4406_v17 = vmax.f32 %v9964_v7, 0.0 }
 0x248   : > { %v4279_v32 = vadd.f32 %v9873_v28, %v9565_v55  ;;  %v12492_v3 = vrot.slane %v12491_v21, %v12234_v47  ;;  %v2345_v31 = vadd.f32 %v8670_v51, %v2087_v25  ;;  %v6094_v33 = vrot.slane %v6093_v18, 1 }
 0x249   : > { %v3793_v49 = vrot.slane %v10007_v5, %v12234_v47  ;;  %v2346_v56 = vadd.f32 %v8670_v51, %v2090_v11  ;;  %v6100_v7 = vadd.f32 %v6099_v36, %v6098_v44  ;;  %v10038_v55 = vrot.slane %v3185_v12, %v12234_v47  ;;  %v2475_v44 = vld [vmem:[%s9224_s27 + $0x208] sm:$0xff] }
 0x24a   : > { %v10030_v29 = vadd.f32 %v12492_v3, %v2599_v37  ;;  %v4541_v26 = vmul.f32 %v9898_v1, %v4406_v17  ;;  %v2601_v62 = vmul.f32 %v2473_v19, %v2345_v31  ;;  %4670 = vadd.xlane.f32.xlu0 %v9545_v43  ;;  %v6095_v42 = vadd.f32 %v6094_v33, %v6093_v18  ;;  %v12493_v37 = vld [vmem:[#allocation12_spill] sm:$0xff]  ;;  %v2093_v36 = vpop.xlane.xlu0 %2092  ;;  %v2476_v19 = vld [vmem:[%s9224_s27 + $0x210] sm:$0xff]  ;;  %v2096_v31 = vpop.xlane.xlu1 %2095 }
 0x24b   : > { %v6103_v20 = vsel %vm1895_vm0, %v4406_v17, 0.0  ;;  %v4407_v63 = vmax.f32 %v4279_v32, 0.0  ;;  %v10044_v25 = vadd.f32 %v12493_v37, %v2600_v30  ;;  %v2602_v21 = vmul.f32 %v2474_v38, %v2346_v56  ;;  %4673 = vadd.xlane.f32.xlu1 %v9560_v10  ;;  %v12494_v17 = vld [vmem:[#allocation7_spill] sm:$0xff]  ;;  %v10059_v56 = vld [vmem:[%s8562_s19 + $0x50] sm:$0xff] }
 0x24c   : > { %v6101_v12 = vrot.slane %v6100_v7, 1  ;;  %v6104_v3 = vrot.slane %v6103_v20, 4  ;;  %v2347_v11 = vadd.f32 %v8670_v51, %v2093_v36  ;;  %v6872_v43 = vmul.f32 0.125, %v6095_v42 }
 0x24d   : > { %v10051_v18 = vsel %vm1895_vm0, %v4541_v26, 0.0  ;;  %v4542_v30 = vmul.f32 %v9898_v1, %v4407_v63  ;;  %v10055_v32 = vadd.f32 %v12494_v17, %v2601_v62  ;;  %v2348_v10 = vadd.f32 %v8670_v51, %v2096_v31 }
 0x24e   : > { %v6102_v38 = vadd.f32 %v6101_v12, %v6100_v7  ;;  %v6105_v33 = vadd.f32 %v6104_v3, %v6103_v20  ;;  %v12495_v37 = vrot.slane %v9340_v40, %v12234_v47  ;;  %v2603_v42 = vmul.f32 %v2475_v44, %v2347_v11  ;;  %4676 = vadd.xlane.f32.xlu0 %v9603_v39  ;;  %v2477_v7 = vld [vmem:[%s9224_s27 + $0x218] sm:$0xff]  ;;  %v2099_v20 = vpop.xlane.xlu0 %2098 }
 0x24f   : > { %v7125_v26 = vsel %vm5808_vm3, %v6872_v43, %v7124_v2  ;;  %v6110_v62 = vsel %vm1895_vm0, %v4407_v63, 0.0  ;;  %v2604_v17 = vmul.f32 %v2476_v19, %v2348_v10  ;;  %4679 = vadd.xlane.f32.xlu1 %v9638_v6  ;;  %v2349_v40 = vadd.f32 %v8670_v51, %v2099_v20  ;;  %v2478_v19 = vld [vmem:[%s9224_s27 + $0x220] sm:$0xff] }
 0x250   : > { %v10064_v36 = vadd.f32 %v12495_v37, %v2602_v21  ;;  %v6873_v12 = vmul.f32 0.125, %v6102_v38  ;;  %v6106_v3 = vrot.slane %v6105_v33, 2  ;;  %v6111_v31 = vrot.slane %v6110_v62, 4  ;;  %v2102_v21 = vpop.xlane.xlu1 %2101 }
 0x251   : > { %v10073_v44 = vsel %vm1895_vm0, %v4542_v30, 0.0  ;;  %v3187_v39 = vcombine.high %v10007_v5, %v10007_v5  ;;  %v3195_v2 = vrot.slane %v10059_v56, %v12221_v14  ;;  %v12496_v6 = vrot.slane %v9361_v15, %v12234_v47  ;;  %v2479_v15 = vld [vmem:[%s9224_s27 + $0x228] sm:$0xff] }
 0x252   : > { %v10085_v11 = vadd.f32 %v9573_v60, %v2604_v17  ;;  %v2350_v43 = vadd.f32 %v8670_v51, %v2102_v21  ;;  %v6107_v10 = vadd.f32 %v6106_v3, %v6105_v33  ;;  %v2605_v30 = vmul.f32 %v2477_v7, %v2349_v40  ;;  %4682 = vadd.xlane.f32.xlu0 %v9689_v57 }
 0x253   : > { %v10082_v63 = vadd.f32 %v12496_v6, %v2603_v42  ;;  %v7126_v38 = vsel %vm5810_vm4, %v6873_v12, %v7125_v26  ;;  %v6112_v37 = vadd.f32 %v6111_v31, %v6110_v62  ;;  %v10092_v20 = vrot.slane %v3195_v2, %v12221_v14  ;;  %4685 = vadd.xlane.f32.xlu1 %v9701_v54  ;;  %v2105_v42 = vpop.xlane.xlu0 %2104  ;;  %v2480_v54 = vld [vmem:[%s9224_s27 + $0x230] sm:$0xff] }
 0x254   : > { %v6108_v60 = vrot.slane %v6107_v10, 1  ;;  %v10097_v17 = vrot.slane %v3187_v39, %v12234_v47  ;;  %v4280_v33 = vadd.f32 %v9873_v28, %v9580_v52  ;;  %v4281_v57 = vadd.f32 %v9873_v28, %v9589_v45  ;;  %v2108_v12 = vpop.xlane.xlu1 %2107 }
 0x255   : > { %v10104_v26 = vadd.f32 %v9647_v41, %v2605_v30  ;;  %v2606_v62 = vmul.f32 %v2478_v19, %v2350_v43  ;;  %v2351_v7 = vadd.f32 %v8670_v51, %v2105_v42  ;;  %v6113_v3 = vrot.slane %v6112_v37, 2  ;;  %v2481_v43 = vld [vmem:[%s9224_s27 + $0x238] sm:$0xff] }
 0x256   : > { %v2352_v31 = vadd.f32 %v8670_v51, %v2108_v12  ;;  %v6109_v40 = vadd.f32 %v6108_v60, %v6107_v10  ;;  %v3805_v21 = vrot.slane %v10092_v20, %v12234_v47  ;;  %v4408_v52 = vmax.f32 %v4280_v33, 0.0  ;;  %4688 = vadd.xlane.f32.xlu0 %v9757_v50 }
 0x257   : > { %v2607_v39 = vmul.f32 %v2479_v15, %v2351_v7  ;;  %v6114_v45 = vadd.f32 %v6113_v3, %v6112_v37  ;;  %v4409_v41 = vmax.f32 %v4281_v57, 0.0  ;;  %v3203_v6 = vcombine.high %v3195_v2, %v3195_v2  ;;  %4691 = vadd.xlane.f32.xlu1 %v9788_v48  ;;  %v2111_v30 = vpop.xlane.xlu0 %2110  ;;  %v2482_v37 = vld [vmem:[%s9224_s27 + $0x240] sm:$0xff] }
 0x258   : > { %v2608_v19 = vmul.f32 %v2480_v54, %v2352_v31  ;;  %v6874_v42 = vmul.f32 0.125, %v6109_v40  ;;  %v4543_v12 = vmul.f32 %v9898_v1, %v4408_v52  ;;  %v6117_v10 = vsel %vm1895_vm0, %v4408_v52, 0.0  ;;  %v2114_v2 = vpop.xlane.xlu1 %2113 }
 0x259   : > { %v12497_v60 = vrot.slane %v9661_v34, %v12234_v47  ;;  %v2353_v50 = vadd.f32 %v8670_v51, %v2111_v30  ;;  %v6115_v15 = vrot.slane %v6114_v45, 1  ;;  %v6118_v57 = vrot.slane %v6117_v10, 4 }
 0x25a   : > { %v12498_v48 = vrot.slane %v9705_v23, %v12234_v47  ;;  %v10129_v54 = vadd.f32 %v9734_v22, %v2608_v19  ;;  %v2354_v34 = vadd.f32 %v8670_v51, %v2114_v2  ;;  %4694 = vadd.xlane.f32.xlu0 %v9838_v61  ;;  %v4544_v52 = vmul.f32 %v9898_v1, %v4409_v41  ;;  %v2483_v23 = vld [vmem:[%s9224_s27 + $0x248] sm:$0xff]  ;;  %v2484_v61 = vld [vmem:[%s9224_s27 + $0x250] sm:$0xff] }
 0x25b   : > { %v10119_v33 = vadd.f32 %v12497_v60, %v2606_v62  ;;  %v7127_v62 = vsel %vm5812_vm5, %v6874_v42, %v7126_v38  ;;  %v2609_v3 = vmul.f32 %v2481_v43, %v2353_v50  ;;  %v6116_v31 = vadd.f32 %v6115_v15, %v6114_v45  ;;  %4697 = vadd.xlane.f32.xlu1 %v9855_v58 }
 0x25c   : > { %v10126_v7 = vadd.f32 %v12498_v48, %v2607_v39  ;;  %v6119_v40 = vadd.f32 %v6118_v57, %v6117_v10  ;;  %v2610_v30 = vmul.f32 %v2482_v37, %v2354_v34  ;;  %v2117_v39 = vpop.xlane.xlu0 %2116  ;;  %v10138_v22 = vsel %vm1895_vm0, %v4543_v12, 0.0  ;;  %v2120_v45 = vpop.xlane.xlu1 %2119  ;;  %v2485_v48 = vld [vmem:[%s9224_s27 + $0x258] sm:$0xff] }
 0x25d   : > { %v6124_v19 = vsel %vm1895_vm0, %v4409_v41, 0.0  ;;  %v10142_v60 = vrot.slane %v3203_v6, %v12221_v14  ;;  %v2355_v38 = vadd.f32 %v8670_v51, %v2117_v39  ;;  %v6875_v43 = vmul.f32 0.125, %v6116_v31 }
 0x25e   : > { %v6120_v42 = vrot.slane %v6119_v40, 2  ;;  %v3233_v58 = vcombine.high %v10092_v20, %v10092_v20  ;;  %v10149_v10 = vadd.f32 %v9762_v46, %v2609_v3  ;;  %v12499_v12 = vrot.slane %v9799_v16, %v12234_v47  ;;  %4700 = vadd.xlane.f32.xlu0 %v9918_v24 }
 0x25f   : > { %v2356_v6 = vadd.f32 %v8670_v51, %v2120_v45  ;;  %v6125_v50 = vrot.slane %v6124_v19, 4  ;;  %v2611_v37 = vmul.f32 %v2483_v23, %v2355_v38  ;;  %v7128_v2 = vsel %vm5814_vm6, %v6875_v43, %v7127_v62  ;;  %4703 = vadd.xlane.f32.xlu1 %v9927_v8  ;;  %v12500_v23 = vld [vmem:[#allocation11_spill] sm:$0xff] }
 0x260   : > { %v10154_v41 = vadd.f32 %v12499_v12, %v2610_v30  ;;  %v6121_v15 = vadd.f32 %v6120_v42, %v6119_v40  ;;  %v10160_v57 = vsel %vm1895_vm0, %v4544_v52, 0.0  ;;  %v2123_v16 = vpop.xlane.xlu0 %2122  ;;  %v3809_v3 = vrot.slane %v10142_v60, %v12234_v47  ;;  %v2486_v30 = vld [vmem:[%s9224_s27 + $0x260] sm:$0xff]  ;;  %v2126_v62 = vpop.xlane.xlu1 %2125  ;;  %v12502_v45 = vld [vmem:[#allocation47_spill] sm:$0xff] }
 0x261   : > { %v2612_v46 = vmul.f32 %v2484_v61, %v2356_v6  ;;  %v6126_v34 = vadd.f32 %v6125_v50, %v6124_v19  ;;  %v4282_v31 = vadd.f32 %v9873_v28, %v9596_v53  ;;  %v2357_v24 = vadd.f32 %v8670_v51, %v2123_v16 }
 0x262   : > { %v6122_v40 = vrot.slane %v6121_v15, 1  ;;  %v10171_v52 = vrot.slane %v3233_v58, %v12234_v47  ;;  %v4283_v8 = vadd.f32 %v9873_v28, %v9606_v9  ;;  %v12501_v39 = vrot.slane %v12500_v23, %v12234_v47  ;;  %4706 = vadd.xlane.f32.xlu0 %v9984_v59  ;;  %v2487_v9 = vld [vmem:[%s9224_s27 + $0x268] sm:$0xff]  ;;  %v2488_v23 = vld [vmem:[%s9224_s27 + $0x270] sm:$0xff] }
 0x263   : > { %v2358_v38 = vadd.f32 %v8670_v51, %v2126_v62  ;;  %v6127_v53 = vrot.slane %v6126_v34, 2  ;;  %v4410_v61 = vmax.f32 %v4282_v31, 0.0  ;;  %v10182_v43 = vadd.f32 %v12502_v45, %v2612_v46  ;;  %4709 = vadd.xlane.f32.xlu1 %v10016_v13 }
 0x264   : > { %v10178_v19 = vadd.f32 %v12501_v39, %v2611_v37  ;;  %v2613_v42 = vmul.f32 %v2485_v48, %v2357_v24  ;;  %v6123_v58 = vadd.f32 %v6122_v40, %v6121_v15  ;;  %v4411_v12 = vmax.f32 %v4283_v8, 0.0  ;;  %v2129_v50 = vpop.xlane.xlu0 %2128  ;;  %v2132_v46 = vpop.xlane.xlu1 %2131  ;;  %v12503_v24 = vld [vmem:[#allocation21_spill] sm:$0xff] }
 0x265   : > { %v2614_v6 = vmul.f32 %v2486_v30, %v2358_v38  ;;  %v6128_v37 = vadd.f32 %v6127_v53, %v6126_v34  ;;  %v4545_v16 = vmul.f32 %v9898_v1, %v4410_v61  ;;  %v6131_v62 = vsel %vm1895_vm0, %v4410_v61, 0.0 }
 0x266   : > { %v2359_v31 = vadd.f32 %v8670_v51, %v2129_v50  ;;  %v6876_v48 = vmul.f32 0.125, %v6123_v58  ;;  %v6132_v59 = vrot.slane %v6131_v62, 4  ;;  %v3235_v15 = vcombine.high %v10142_v60, %v10142_v60  ;;  %4712 = vadd.xlane.f32.xlu0 %v10051_v18 }
 0x267   : > { %v10194_v13 = vadd.f32 %v12503_v24, %v2613_v42  ;;  %v12504_v34 = vrot.slane %v9959_v35, %v12234_v47  ;;  %v2360_v40 = vadd.f32 %v8670_v51, %v2132_v46  ;;  %v6129_v8 = vrot.slane %v6128_v37, 1  ;;  %4715 = vadd.xlane.f32.xlu1 %v10073_v44  ;;  %v2489_v42 = vld [vmem:[%s9224_s27 + $0x278] sm:$0xff] }
 0x268   : > { %v2615_v39 = vmul.f32 %v2487_v9, %v2359_v31  ;;  %v7129_v38 = vsel %vm5816_vm7, %v6876_v48, %v7128_v2  ;;  %v6133_v53 = vadd.f32 %v6132_v59, %v6131_v62  ;;  %v4546_v61 = vmul.f32 %v9898_v1, %v4411_v12  ;;  %v2135_v58 = vpop.xlane.xlu0 %2134  ;;  %v2490_v9 = vld [vmem:[%s9224_s27 + $0x280] sm:$0xff]  ;;  %v2138_v62 = vpop.xlane.xlu1 %2137 }
 0x269   : > { %v10199_v30 = vadd.f32 %v12504_v34, %v2614_v6  ;;  %v2616_v45 = vmul.f32 %v2488_v23, %v2360_v40  ;;  %7239 = vst.msk [vmem:[%s9613_s15 + $0x10] sm:$0xff] %vm1895_vm0, %v7129_v38  ;;  %v6130_v35 = vadd.f32 %v6129_v8, %v6128_v37  ;;  %v4723_v6 = vsel %vm1895_vm0, %v4545_v16, 0.0  ;;  %v12505_v48 = vld [vmem:[#allocation32_spill] sm:$0xff]  ;;  %v12506_v8 = vld [vmem:[#allocation15_spill] sm:$0xff] }
 0x26a   : > { %v6138_v50 = vsel %vm1895_vm0, %v4411_v12, 0.0  ;;  %v10214_v18 = vadd.f32 %v3793_v49, %v2615_v39  ;;  %v2361_v2 = vadd.f32 %v8670_v51, %v2135_v58  ;;  %v6134_v44 = vrot.slane %v6133_v53, 2  ;;  %4718 = vadd.xlane.f32.xlu0 %v10138_v22  ;;  %v2492_v22 = vld [vmem:[%s9224_s27 + $0x290] sm:$0xff] }
 0x26b   : > { %v10219_v31 = vrot.slane %v3235_v15, %v12234_v47  ;;  %v10222_v37 = vadd.f32 %v10038_v55, %v2616_v45  ;;  %v2362_v16 = vadd.f32 %v8670_v51, %v2138_v62  ;;  %v4726_v12 = vsel %vm1895_vm0, %v4546_v61, 0.0  ;;  %4721 = vadd.xlane.f32.xlu1 %v10160_v57  ;;  %v2491_v55 = vld [vmem:[%s9224_s27 + $0x288] sm:$0xff]  ;;  %v12507_v45 = vld [vmem:[#allocation16_spill] sm:$0xff] }
 0x26c   : > { %v6139_v5 = vrot.slane %v6138_v50, 4  ;;  %v2617_v49 = vmul.f32 %v2489_v42, %v2361_v2  ;;  %v6135_v23 = vadd.f32 %v6134_v44, %v6133_v53  ;;  %v3188_v46 = vcombine.high %v10059_v56, %v10059_v56  ;;  %v2141_v34 = vpop.xlane.xlu0 %2140  ;;  %v2144_v53 = vpop.xlane.xlu1 %2143 }
 0x26d   : > { %v4284_v59 = vadd.f32 %v9873_v28, %v12505_v48  ;;  %v2618_v15 = vmul.f32 %v2490_v9, %v2362_v16  ;;  %v6877_v24 = vmul.f32 0.125, %v6130_v35  ;;  %v4285_v39 = vadd.f32 %v9873_v28, %v12506_v8 }
 0x26e   : > { %v6140_v40 = vadd.f32 %v6139_v5, %v6138_v50  ;;  %v2363_v38 = vadd.f32 %v8670_v51, %v2141_v34  ;;  %v6136_v61 = vrot.slane %v6135_v23, 1  ;;  %v3202_v56 = vrot.slane %v3188_v46, %v12221_v14  ;;  %4724 = vadd.xlane.f32.xlu0 %v4723_v6  ;;  %v2493_v46 = vld [vmem:[%s9224_s27 + $0x298] sm:$0xff] }
 0x26f   : > { %v10240_v42 = vadd.f32 %v9873_v28, %v12507_v45  ;;  %v10243_v57 = vadd.f32 %v10097_v17, %v2617_v49  ;;  %v2364_v58 = vadd.f32 %v8670_v51, %v2144_v53  ;;  %v4412_v50 = vmax.f32 %v4284_v59, 0.0  ;;  %4727 = vadd.xlane.f32.xlu1 %v4726_v12  ;;  %v2494_v12 = vld [vmem:[%s9224_s27 + $0x2a0] sm:$0xff] }
 0x270   : > { %v6141_v35 = vrot.slane %v6140_v40, 2  ;;  %v2619_v2 = vmul.f32 %v2491_v55, %v2363_v38  ;;  %v6137_v9 = vadd.f32 %v6136_v61, %v6135_v23  ;;  %v3218_v62 = vrot.slane %v3202_v56, %v12221_v14  ;;  %v2147_v48 = vpop.xlane.xlu0 %2146  ;;  %v2150_v55 = vpop.xlane.xlu1 %2149 }
 0x271   : > { %v4413_v44 = vmax.f32 %v4285_v39, 0.0  ;;  %v2620_v16 = vmul.f32 %v2492_v22, %v2364_v58  ;;  %v4547_v34 = vmul.f32 %v9898_v1, %v4412_v50  ;;  %v6145_v17 = vsel %vm1895_vm0, %v4412_v50, 0.0 }
 0x272   : > { %v6142_v5 = vadd.f32 %v6141_v35, %v6140_v40  ;;  %v10253_v49 = vadd.f32 %v3805_v21, %v2618_v15  ;;  %v10258_v6 = vadd.f32 %v3809_v3, %v2619_v2  ;;  %v6878_v23 = vmul.f32 0.125, %v6137_v9 }
 0x273   : > { %v2365_v59 = vadd.f32 %v8670_v51, %v2147_v48  ;;  %v3821_v8 = vrot.slane %v3218_v62, %v12234_v47  ;;  %v2366_v39 = vadd.f32 %v8670_v51, %v2150_v55  ;;  %v4729_v20 = vsel %vm1895_vm0, %v4547_v34, 0.0  ;;  %v2496_v34 = vld [vmem:[%s9224_s27 + $0x2b0] sm:$0xff] }
 0x274   : > { %v6143_v40 = vrot.slane %v6142_v5, 1  ;;  %v10266_v21 = vadd.f32 %v10171_v52, %v2620_v16  ;;  %v6146_v60 = vrot.slane %v6145_v17, 4  ;;  %4730 = vadd.xlane.f32.xlu0 %v4729_v20  ;;  %v4548_v3 = vmul.f32 %v9898_v1, %v4413_v44  ;;  %v2153_v45 = vpop.xlane.xlu0 %2152  ;;  %v2495_v52 = vld [vmem:[%s9224_s27 + $0x2a8] sm:$0xff]  ;;  %v2156_v9 = vpop.xlane.xlu1 %2155 }
 0x275   : > { %v2621_v15 = vmul.f32 %v2493_v46, %v2365_v59  ;;  %v2622_v22 = vmul.f32 %v2494_v12, %v2366_v39  ;;  %v6152_v53 = vsel %vm1895_vm0, %v4413_v44, 0.0  ;;  %v3204_v61 = vcombine.high %v3202_v56, %v3202_v56 }
 0x276   : > { %v6144_v38 = vadd.f32 %v6143_v40, %v6142_v5  ;;  %v7130_v58 = vsel %vm5804_vm1, %v6878_v23, %v6877_v24  ;;  %v6147_v35 = vadd.f32 %v6146_v60, %v6145_v17  ;;  %v4732_v50 = vsel %vm1895_vm0, %v4548_v3, 0.0 }
 0x277   : > { %v6153_v2 = vrot.slane %v6152_v53, 4  ;;  %v10274_v46 = vadd.f32 %v10219_v31, %v2621_v15  ;;  %4733 = vadd.xlane.f32.xlu1 %v4732_v50  ;;  %v3232_v5 = vrot.slane %v3204_v61, %v12221_v14  ;;  %v2367_v44 = vadd.f32 %v8670_v51, %v2153_v45 }
 0x278   : > { %v6879_v16 = vmul.f32 0.125, %v6144_v38  ;;  %v6148_v48 = vrot.slane %v6147_v35, 2  ;;  %v3234_v24 = vcombine.high %v3218_v62, %v3218_v62  ;;  %v2368_v17 = vadd.f32 %v8670_v51, %v2156_v9  ;;  %v2159_v15 = vpop.xlane.xlu0 %2158 }
 0x279   : > { %v6154_v56 = vadd.f32 %v6153_v2, %v6152_v53  ;;  %v10280_v23 = vadd.f32 %v3821_v8, %v2622_v22  ;;  %v3825_v59 = vrot.slane %v3232_v5, %v12234_v47  ;;  %v2623_v12 = vmul.f32 %v2495_v52, %v2367_v44  ;;  %v12508_v8 = vld [vmem:[#allocation33_spill] sm:$0xff]  ;;  %v10291_v22 = vld [vmem:[%s8562_s19 + $0x58] sm:$0xff] }
 0x27a   : > { %v4414_v31 = vmax.f32 %v10240_v42, 0.0  ;;  %v7131_v55 = vsel %vm5806_vm2, %v6879_v16, %v7130_v58  ;;  %v6149_v40 = vadd.f32 %v6148_v48, %v6147_v35  ;;  %v3829_v20 = vrot.slane %v3234_v24, %v12234_v47  ;;  %v2497_v58 = vld [vmem:[%s9224_s27 + $0x2b8] sm:$0xff] }
 0x27b   : > { %v6155_v39 = vrot.slane %v6154_v56, 2  ;;  %v2624_v60 = vmul.f32 %v2496_v34, %v2368_v17  ;;  %v4287_v38 = vadd.f32 %v9873_v28, %v12508_v8  ;;  %v10293_v42 = vadd.f32 %v3825_v59, %v2623_v12  ;;  %v2162_v34 = vpop.xlane.xlu1 %2161 }
 0x27c   : > { %v4549_v62 = vmul.f32 %v9898_v1, %v4414_v31  ;;  %v6159_v3 = vsel %vm1895_vm0, %v4414_v31, 0.0  ;;  %v6150_v53 = vrot.slane %v6149_v40, 1  ;;  %v3236_v2 = vcombine.high %v3232_v5, %v3232_v5 }
 0x27d   : > { %v6156_v61 = vadd.f32 %v6155_v39, %v6154_v56  ;;  %12509 = vst [vmem:[#allocation54_spill] sm:$0xff] %v10293_v42  ;;  %v6160_v45 = vrot.slane %v6159_v3, 4  ;;  %v4415_v50 = vmax.f32 %v4287_v38, 0.0  ;;  %v2369_v52 = vadd.f32 %v8670_v51, %v2159_v15  ;;  %v2498_v15 = vld [vmem:[%s9224_s27 + $0x2c0] sm:$0xff]  ;;  %v12554_v42 = vld [vmem:[#allocation22_spill] sm:$0xff] }
 0x27e   : > { %v4735_v35 = vsel %vm1895_vm0, %v4549_v62, 0.0  ;;  %v6151_v9 = vadd.f32 %v6150_v53, %v6149_v40  ;;  %v3244_v48 = vrot.slane %v10291_v22, %v12221_v14  ;;  %v3833_v17 = vrot.slane %v3236_v2, %v12234_v47  ;;  %v12511_v2 = vld [vmem:[#allocation17_spill] sm:$0xff] }
 0x27f   : > { %v6157_v16 = vrot.slane %v6156_v61, 1  ;;  %v6161_v44 = vadd.f32 %v6160_v45, %v6159_v3  ;;  %4736 = vadd.xlane.f32.xlu0 %v4735_v35  ;;  %v4550_v56 = vmul.f32 %v9898_v1, %v4415_v50  ;;  %v6166_v24 = vsel %vm1895_vm0, %v4415_v50, 0.0 }
 0x280   : > { %v2625_v59 = vmul.f32 %v2497_v58, %v2369_v52  ;;  %v6880_v12 = vmul.f32 0.125, %v6151_v9  ;;  %v6167_v39 = vrot.slane %v6166_v24, 4  ;;  %v10304_v40 = vadd.f32 %v3829_v20, %v2624_v60  ;;  %v2165_v58 = vpop.xlane.xlu0 %2164  ;;  %v12512_v60 = vld [vmem:[#allocation34_spill] sm:$0xff] }
 0x281   : > { %v6158_v5 = vadd.f32 %v6157_v16, %v6156_v61  ;;  %v6162_v31 = vrot.slane %v6161_v44, 2  ;;  %v4738_v62 = vsel %vm1895_vm0, %v4550_v56, 0.0  ;;  %v3260_v3 = vrot.slane %v3244_v48, %v12221_v14 }
 0x282   : > { %12510 = vst [vmem:[#allocation67_spill] sm:$0xff] %v10304_v40  ;;  %v2370_v8 = vadd.f32 %v8670_v51, %v2162_v34  ;;  %v7132_v38 = vsel %vm5808_vm3, %v6880_v12, %v7131_v55  ;;  %v6168_v35 = vadd.f32 %v6167_v39, %v6166_v24  ;;  %4739 = vadd.xlane.f32.xlu1 %v4738_v62 }
 0x283   : > { %v6881_v53 = vmul.f32 0.125, %v6158_v5  ;;  %v6163_v45 = vadd.f32 %v6162_v31, %v6161_v44  ;;  %v3837_v61 = vrot.slane %v3260_v3, %v12234_v47  ;;  %v4288_v20 = vadd.f32 %v9873_v28, %v12511_v2 }
 0x284   : > { %v2626_v50 = vmul.f32 %v2498_v15, %v2370_v8  ;;  %v4289_v52 = vadd.f32 %v9873_v28, %v12512_v60  ;;  %v6169_v16 = vrot.slane %v6168_v35, 2  ;;  %v10315_v34 = vadd.f32 %v3833_v17, %v2625_v59  ;;  %v2499_v15 = vld [vmem:[%s9224_s27 + $0x2c8] sm:$0xff] }
 0x285   : > { %v6164_v9 = vrot.slane %v6163_v45, 1  ;;  %v3252_v55 = vcombine.high %v3244_v48, %v3244_v48  ;;  %v7133_v44 = vsel %vm5810_vm4, %v6881_v53, %v7132_v38  ;;  %v4416_v56 = vmax.f32 %v4288_v20, 0.0 }
 0x286   : > { %12513 = vst [vmem:[#allocation26_spill] sm:$0xff] %v10315_v34  ;;  %v4417_v24 = vmax.f32 %v4289_v52, 0.0  ;;  %v2371_v12 = vadd.f32 %v8670_v51, %v2165_v58  ;;  %v6170_v31 = vadd.f32 %v6169_v16, %v6168_v35  ;;  %v10319_v39 = vadd.f32 %v3837_v61, %v2626_v50  ;;  %v12516_v34 = vld [vmem:[#allocation43_spill] sm:$0xff] }
 0x287   : > { %v6165_v5 = vadd.f32 %v6164_v9, %v6163_v45  ;;  %v3274_v62 = vrot.slane %v3252_v55, %v12221_v14  ;;  %v4551_v8 = vmul.f32 %v9898_v1, %v4416_v56  ;;  %v6173_v2 = vsel %vm1895_vm0, %v4416_v56, 0.0  ;;  %v2168_v45 = vpop.xlane.xlu1 %2167  ;;  %v2171_v55 = vpop.xlane.xlu0 %2170 }
 0x288   : > { %12514 = vst [vmem:[#allocation68_spill] sm:$0xff] %v10319_v39  ;;  %v4552_v17 = vmul.f32 %v9898_v1, %v4417_v24  ;;  %v6180_v48 = vsel %vm1895_vm0, %v4417_v24, 0.0  ;;  %v6171_v38 = vrot.slane %v6170_v31, 1  ;;  %v6174_v53 = vrot.slane %v6173_v2, 4  ;;  %v12522_v39 = vld [vmem:[#allocation6_spill] sm:$0xff] }
 0x289   : > { %v6882_v59 = vmul.f32 0.125, %v6165_v5  ;;  %v6181_v58 = vrot.slane %v6180_v48, 4  ;;  %v4741_v35 = vsel %vm1895_vm0, %v4551_v8, 0.0  ;;  %v3841_v61 = vrot.slane %v3274_v62, %v12234_v47  ;;  %v2500_v5 = vld [vmem:[%s9224_s27 + $0x2d0] sm:$0xff] }
 0x28a   : > { %v2627_v50 = vmul.f32 %v2499_v15, %v2371_v12  ;;  %v3282_v20 = vcombine.high %v3260_v3, %v3260_v3  ;;  %v6172_v60 = vadd.f32 %v6171_v38, %v6170_v31  ;;  %v6175_v52 = vadd.f32 %v6174_v53, %v6173_v2  ;;  %4742 = vadd.xlane.f32.xlu0 %v4741_v35  ;;  %v12517_v2 = vld [vmem:[#allocation35_spill] sm:$0xff] }
 0x28b   : > { %v4744_v9 = vsel %vm1895_vm0, %v4552_v17, 0.0  ;;  %v6182_v16 = vadd.f32 %v6181_v58, %v6180_v48  ;;  %v7134_v56 = vsel %vm5812_vm5, %v6882_v59, %v7133_v44  ;;  %v2372_v8 = vadd.f32 %v8670_v51, %v2168_v45  ;;  %v2501_v45 = vld [vmem:[%s9224_s27 + $0x2d8] sm:$0xff] }
 0x28c   : > { %4745 = vadd.xlane.f32.xlu1 %v4744_v9  ;;  %v10331_v24 = vadd.f32 %v3841_v61, %v2627_v50  ;;  %v4290_v12 = vadd.f32 %v9873_v28, %v12516_v34  ;;  %v6883_v3 = vmul.f32 0.125, %v6172_v60  ;;  %v6176_v31 = vrot.slane %v6175_v52, 2 }
 0x28d   : > { %v6183_v15 = vrot.slane %v6182_v16, 2  ;;  %v4291_v17 = vadd.f32 %v9873_v28, %v12517_v2  ;;  %v3845_v48 = vrot.slane %v3282_v20, %v12234_v47  ;;  %v3284_v44 = vcombine.high %v3274_v62, %v3274_v62 }
 0x28e   : > { %12515 = vst [vmem:[#allocation23_spill] sm:$0xff] %v10331_v24  ;;  %v4418_v38 = vmax.f32 %v4290_v12, 0.0  ;;  %v2373_v59 = vadd.f32 %v8670_v51, %v2171_v55  ;;  %v6177_v53 = vadd.f32 %v6176_v31, %v6175_v52  ;;  %v2628_v35 = vmul.f32 %v2500_v5, %v2372_v8  ;;  %v2174_v12 = vpop.xlane.xlu1 %2173 }
 0x28f   : > { %v6184_v58 = vadd.f32 %v6183_v15, %v6182_v16  ;;  %v4419_v61 = vmax.f32 %v4291_v17, 0.0  ;;  %v7135_v50 = vsel %vm5814_vm6, %v6883_v3, %v7134_v56  ;;  %v3849_v9 = vrot.slane %v3284_v44, %v12234_v47 }
 0x290   : > { %v4553_v34 = vmul.f32 %v9898_v1, %v4418_v38  ;;  %v6187_v60 = vsel %vm1895_vm0, %v4418_v38, 0.0  ;;  %v6178_v28 = vrot.slane %v6177_v53, 1  ;;  %v2629_v55 = vmul.f32 %v2501_v45, %v2373_v59 }
 0x291   : > { %v6185_v2 = vrot.slane %v6184_v58, 1  ;;  %v6188_v20 = vrot.slane %v6187_v60, 4  ;;  %v4554_v62 = vmul.f32 %v9898_v1, %v4419_v61  ;;  %v6194_v16 = vsel %vm1895_vm0, %v4419_v61, 0.0 }
 0x292   : > { %v4747_v52 = vsel %vm1895_vm0, %v4553_v34, 0.0  ;;  %v3237_v56 = vcombine.high %v10291_v22, %v10291_v22  ;;  %v6179_v5 = vadd.f32 %v6178_v28, %v6177_v53  ;;  %v10352_v15 = vadd.f32 %v3845_v48, %v2628_v35  ;;  %v2502_v22 = vld [vmem:[%s9224_s27 + $0x2e0] sm:$0xff]  ;;  %v2177_v35 = vpop.xlane.xlu0 %2176 }
 0x293   : > { %v6186_v8 = vadd.f32 %v6185_v2, %v6184_v58  ;;  %v6189_v3 = vadd.f32 %v6188_v20, %v6187_v60  ;;  %4748 = vadd.xlane.f32.xlu0 %v4747_v52  ;;  %v4750_v31 = vsel %vm1895_vm0, %v4554_v62, 0.0  ;;  %v6195_v17 = vrot.slane %v6194_v16, 4  ;;  %v10362_v53 = vld [vmem:[%s12074_s7] ss:$0 sm:$0xff] }
 0x294   : > { %12518 = vst [vmem:[#allocation55_spill] sm:$0xff] %v10352_v15  ;;  %4751 = vadd.xlane.f32.xlu1 %v4750_v31  ;;  %v3251_v1 = vrot.slane %v3237_v56, %v12221_v14  ;;  %v2374_v38 = vadd.f32 %v8670_v51, %v2174_v12  ;;  %v6884_v44 = vmul.f32 0.125, %v6179_v5  ;;  %v10356_v61 = vadd.f32 %v3849_v9, %v2629_v55  ;;  %v12520_v58 = vld [vmem:[#allocation44_spill] sm:$0xff] }
 0x295   : > { %v6190_v59 = vrot.slane %v6189_v3, 2  ;;  %v4292_v48 = vadd.f32 %v10362_v53, %v12520_v58  ;;  %v6885_v45 = vmul.f32 0.125, %v6186_v8  ;;  %v6196_v34 = vadd.f32 %v6195_v17, %v6194_v16  ;;  %v12521_v28 = vld [vmem:[#allocation36_spill] sm:$0xff] }
 0x296   : > { %12519 = vst [vmem:[#allocation70_spill] sm:$0xff] %v10356_v61  ;;  %v3267_v60 = vrot.slane %v3251_v1, %v12221_v14  ;;  %v4293_v2 = vadd.f32 %v10362_v53, %v12521_v28  ;;  %v7136_v9 = vsel %vm5816_vm7, %v6884_v44, %v7135_v50  ;;  %v3253_v12 = vcombine.high %v3251_v1, %v3251_v1  ;;  %v10376_v16 = vld [vmem:[%s12075_s8] ss:$0 sm:$0xff]  ;;  %v2183_v40 = vpop.xlane.xlu0 %2182 }
 0x297   : > { %v6191_v20 = vadd.f32 %v6190_v59, %v6189_v3  ;;  %v4420_v62 = vmax.f32 %v4292_v48, 0.0  ;;  %7240 = vst.msk [vmem:[%s9613_s15 + $0x18] sm:$0xff] %vm1895_vm0, %v7136_v9  ;;  %v6197_v52 = vrot.slane %v6196_v34, 2  ;;  %v2630_v55 = vmul.f32 %v2502_v22, %v2374_v38  ;;  %v2503_v59 = vld [vmem:[%s9224_s27 + $0x2e8] sm:$0xff]  ;;  %v2180_v22 = vpop.xlane.xlu1 %2179 }
 0x298   : > { %v4421_v56 = vmax.f32 %v4293_v2, 0.0  ;;  %v2375_v5 = vadd.f32 %v8670_v51, %v2177_v35  ;;  %v3281_v3 = vrot.slane %v3253_v12, %v12221_v14  ;;  %v3853_v1 = vrot.slane %v3267_v60, %v12234_v47  ;;  %v2504_v12 = vld [vmem:[%s9224_s27 + $0x2f0] sm:$0xff] }
 0x299   : > { %v6192_v8 = vrot.slane %v6191_v20, 1  ;;  %v4555_v31 = vmul.f32 %v10376_v16, %v4420_v62  ;;  %v6201_v50 = vsel %vm1895_vm0, %v4420_v62, 0.0  ;;  %v6198_v17 = vadd.f32 %v6197_v52, %v6196_v34 }
 0x29a   : > { %v6202_v38 = vrot.slane %v6201_v50, 4  ;;  %v4556_v44 = vmul.f32 %v10376_v16, %v4421_v56  ;;  %v6208_v35 = vsel %vm1895_vm0, %v4421_v56, 0.0  ;;  %v3857_v28 = vrot.slane %v3281_v3, %v12234_v47 }
 0x29b   : > { %v6193_v58 = vadd.f32 %v6192_v8, %v6191_v20  ;;  %v4753_v48 = vsel %vm1895_vm0, %v4555_v31, 0.0  ;;  %v6199_v2 = vrot.slane %v6198_v17, 1  ;;  %v6209_v34 = vrot.slane %v6208_v35, 4 }
 0x29c   : > { %v6203_v9 = vadd.f32 %v6202_v38, %v6201_v50  ;;  %4754 = vadd.xlane.f32.xlu0 %v4753_v48  ;;  %v4756_v62 = vsel %vm1895_vm0, %v4556_v44, 0.0  ;;  %v2631_v61 = vmul.f32 %v2503_v59, %v2375_v5  ;;  %v3283_v15 = vcombine.high %v3267_v60, %v3267_v60  ;;  %v12525_v48 = vld [vmem:[#allocation19_spill] sm:$0xff] }
 0x29d   : > { %v6886_v52 = vmul.f32 0.125, %v6193_v58  ;;  %4757 = vadd.xlane.f32.xlu1 %v4756_v62  ;;  %v2376_v24 = vadd.f32 %v8670_v51, %v2180_v22  ;;  %v6200_v20 = vadd.f32 %v6199_v2, %v6198_v17  ;;  %v6210_v31 = vadd.f32 %v6209_v34, %v6208_v35 }
 0x29e   : > { %v6204_v8 = vrot.slane %v6203_v9, 2  ;;  %v4294_v56 = vadd.f32 %v10362_v53, %v12522_v39  ;;  %v10393_v38 = vadd.f32 %v3853_v1, %v2630_v55  ;;  %v3861_v44 = vrot.slane %v3283_v15, %v12234_v47  ;;  %v2505_v15 = vld [vmem:[%s9224_s27 + $0x2f8] sm:$0xff] }
 0x29f   : > { %v7137_v50 = vsel %vm5804_vm1, %v6886_v52, %v6885_v45  ;;  %v2632_v58 = vmul.f32 %v2504_v12, %v2376_v24  ;;  %v6887_v5 = vmul.f32 0.125, %v6200_v20  ;;  %v6211_v59 = vrot.slane %v6210_v31, 2  ;;  %v10405_v24 = vld [vmem:[%s8562_s19 + $0x60] sm:$0xff]  ;;  %v2186_v20 = vpop.xlane.xlu1 %2185 }
 0x2a0   : > { %12523 = vst [vmem:[#allocation28_spill] sm:$0xff] %v10393_v38  ;;  %v6205_v60 = vadd.f32 %v6204_v8, %v6203_v9  ;;  %v4422_v22 = vmax.f32 %v4294_v56, 0.0  ;;  %v10396_v17 = vadd.f32 %v3857_v28, %v2631_v61  ;;  %v4295_v35 = vadd.f32 %v10362_v53, %v12525_v48 }
 0x2a1   : > { %v3285_v39 = vcombine.high %v3281_v3, %v3281_v3  ;;  %v2377_v2 = vadd.f32 %v8670_v51, %v2183_v40  ;;  %v7138_v45 = vsel %vm5806_vm2, %v6887_v5, %v7137_v50  ;;  %v6212_v1 = vadd.f32 %v6211_v59, %v6210_v31 }
 0x2a2   : > { %12524 = vst [vmem:[#allocation56_spill] sm:$0xff] %v10396_v17  ;;  %v6206_v55 = vrot.slane %v6205_v60, 1  ;;  %v4557_v62 = vmul.f32 %v10376_v16, %v4422_v22  ;;  %v10407_v9 = vadd.f32 %v3861_v44, %v2632_v58  ;;  %v6215_v61 = vsel %vm1895_vm0, %v4422_v22, 0.0 }
 0x2a3   : > { %v4423_v28 = vmax.f32 %v4295_v35, 0.0  ;;  %v3865_v34 = vrot.slane %v3285_v39, %v12234_v47  ;;  %v6213_v3 = vrot.slane %v6212_v1, 1  ;;  %v6216_v52 = vrot.slane %v6215_v61, 4  ;;  %v12527_v35 = vld [vmem:[#allocation37_spill] sm:$0xff] }
 0x2a4   : > { %12526 = vst [vmem:[#allocation24_spill] sm:$0xff] %v10407_v9  ;;  %v6207_v12 = vadd.f32 %v6206_v55, %v6205_v60  ;;  %v4759_v40 = vsel %vm1895_vm0, %v4557_v62, 0.0  ;;  %v2633_v56 = vmul.f32 %v2505_v15, %v2377_v2  ;;  %v3293_v50 = vrot.slane %v10405_v24, %v12221_v14 }
 0x2a5   : > { %4760 = vadd.xlane.f32.xlu0 %v4759_v40  ;;  %v4558_v8 = vmul.f32 %v10376_v16, %v4423_v28  ;;  %v6222_v31 = vsel %vm1895_vm0, %v4423_v28, 0.0  ;;  %v6214_v58 = vadd.f32 %v6213_v3, %v6212_v1  ;;  %v6217_v5 = vadd.f32 %v6216_v52, %v6215_v61  ;;  %v2506_v28 = vld [vmem:[%s9224_s27 + $0x300] sm:$0xff]  ;;  %v12529_v3 = vld [vmem:[#allocation25_spill] sm:$0xff] }
 0x2a6   : > { %v6888_v44 = vmul.f32 0.125, %v6207_v12  ;;  %v6223_v59 = vrot.slane %v6222_v31, 4  ;;  %v3309_v22 = vrot.slane %v3293_v50, %v12221_v14  ;;  %v2378_v48 = vadd.f32 %v8670_v51, %v2186_v20 }
 0x2a7   : > { %v4762_v60 = vsel %vm1895_vm0, %v4558_v8, 0.0  ;;  %v4296_v39 = vadd.f32 %v10362_v53, %v12527_v35  ;;  %v6889_v62 = vmul.f32 0.125, %v6214_v58  ;;  %v6218_v2 = vrot.slane %v6217_v5, 2 }
 0x2a8   : > { %v7139_v55 = vsel %vm5808_vm3, %v6888_v44, %v7138_v45  ;;  %v6224_v15 = vadd.f32 %v6223_v59, %v6222_v31  ;;  %4763 = vadd.xlane.f32.xlu1 %v4762_v60  ;;  %v10423_v12 = vadd.f32 %v3865_v34, %v2633_v56  ;;  %v3869_v1 = vrot.slane %v3309_v22, %v12234_v47  ;;  %v2189_v45 = vpop.xlane.xlu0 %2188 }
 0x2a9   : > { %v4424_v61 = vmax.f32 %v4296_v39, 0.0  ;;  %v4297_v40 = vadd.f32 %v10362_v53, %v12529_v3  ;;  %v7140_v52 = vsel %vm5810_vm4, %v6889_v62, %v7139_v55  ;;  %v6219_v20 = vadd.f32 %v6218_v2, %v6217_v5 }
 0x2aa   : > { %12528 = vst [vmem:[#allocation78_spill] sm:$0xff] %v10423_v12  ;;  %v6225_v8 = vrot.slane %v6224_v15, 2  ;;  %v3301_v35 = vcombine.high %v3293_v50, %v3293_v50  ;;  %v2634_v44 = vmul.f32 %v2506_v28, %v2378_v48  ;;  %v2507_v12 = vld [vmem:[%s9224_s27 + $0x308] sm:$0xff]  ;;  %v2379_v50 = vadd.f32 %v8670_v51, %v2189_v45  ;;  %v2192_v48 = vpop.xlane.xlu1 %2191 }
 0x2ab   : > { %v4559_v31 = vmul.f32 %v10376_v16, %v4424_v61  ;;  %v6229_v58 = vsel %vm1895_vm0, %v4424_v61, 0.0  ;;  %v4425_v34 = vmax.f32 %v4297_v40, 0.0  ;;  %v6220_v56 = vrot.slane %v6219_v20, 1 }
 0x2ac   : > { %v6226_v59 = vadd.f32 %v6225_v8, %v6224_v15  ;;  %v6230_v60 = vrot.slane %v6229_v58, 4  ;;  %v3323_v39 = vrot.slane %v3301_v35, %v12221_v14  ;;  %v2635_v8 = vmul.f32 %v2507_v12, %v2379_v50 }
 0x2ad   : > { %v4765_v3 = vsel %vm1895_vm0, %v4559_v31, 0.0  ;;  %v4560_v55 = vmul.f32 %v10376_v16, %v4425_v34  ;;  %v6236_v5 = vsel %vm1895_vm0, %v4425_v34, 0.0  ;;  %v6221_v62 = vadd.f32 %v6220_v56, %v6219_v20 }
 0x2ae   : > { %v6227_v2 = vrot.slane %v6226_v59, 1  ;;  %v6231_v28 = vadd.f32 %v6230_v60, %v6229_v58  ;;  %4766 = vadd.xlane.f32.xlu0 %v4765_v3  ;;  %v6237_v61 = vrot.slane %v6236_v5, 4  ;;  %v3873_v40 = vrot.slane %v3323_v39, %v12234_v47  ;;  %v12532_v58 = vld [vmem:[#allocation8_spill] sm:$0xff]  ;;  %v2195_v60 = vpop.xlane.xlu0 %2194 }
 0x2af   : > { %v4768_v15 = vsel %vm1895_vm0, %v4560_v55, 0.0  ;;  %v3331_v35 = vcombine.high %v3309_v22, %v3309_v22  ;;  %v6890_v31 = vmul.f32 0.125, %v6221_v62  ;;  %v10439_v34 = vadd.f32 %v3869_v1, %v2634_v44  ;;  %v12533_v1 = vld [vmem:[#allocation39_spill] sm:$0xff] }
 0x2b0   : > { %v6228_v9 = vadd.f32 %v6227_v2, %v6226_v59  ;;  %v6232_v17 = vrot.slane %v6231_v28, 2  ;;  %v6238_v38 = vadd.f32 %v6237_v61, %v6236_v5  ;;  %4769 = vadd.xlane.f32.xlu1 %v4768_v15  ;;  %v10441_v45 = vadd.f32 %v3873_v40, %v2635_v8  ;;  %v2508_v59 = vld [vmem:[%s9224_s27 + $0x310] sm:$0xff]  ;;  %v2198_v2 = vpop.xlane.xlu1 %2197  ;;  %v2509_v40 = vld [vmem:[%s9224_s27 + $0x318] sm:$0xff] }
 0x2b1   : > { %12530 = vst [vmem:[#allocation72_spill] sm:$0xff] %v10439_v34  ;;  %v2380_v20 = vadd.f32 %v8670_v51, %v2192_v48  ;;  %v4298_v56 = vadd.f32 %v10362_v53, %v12532_v58  ;;  %v7141_v12 = vsel %vm5812_vm5, %v6890_v31, %v7140_v52  ;;  %v3877_v5 = vrot.slane %v3331_v35, %v12234_v47 }
 0x2b2   : > { %12531 = vst [vmem:[#allocation57_spill] sm:$0xff] %v10441_v45  ;;  %v6891_v3 = vmul.f32 0.125, %v6228_v9  ;;  %v6233_v22 = vadd.f32 %v6232_v17, %v6231_v28  ;;  %v6239_v55 = vrot.slane %v6238_v38, 2  ;;  %v4299_v44 = vadd.f32 %v10362_v53, %v12533_v1 }
 0x2b3   : > { %v4426_v50 = vmax.f32 %v4298_v56, 0.0  ;;  %v3333_v62 = vcombine.high %v3323_v39, %v3323_v39  ;;  %v2381_v8 = vadd.f32 %v8670_v51, %v2195_v60  ;;  %v2636_v52 = vmul.f32 %v2508_v59, %v2380_v20 }
 0x2b4   : > { %v7142_v48 = vsel %vm5814_vm6, %v6891_v3, %v7141_v12  ;;  %v6234_v61 = vrot.slane %v6233_v22, 1  ;;  %v6240_v15 = vadd.f32 %v6239_v55, %v6238_v38  ;;  %v4427_v28 = vmax.f32 %v4299_v44, 0.0 }
 0x2b5   : > { %v4561_v17 = vmul.f32 %v10376_v16, %v4426_v50  ;;  %v6243_v9 = vsel %vm1895_vm0, %v4426_v50, 0.0  ;;  %v3881_v56 = vrot.slane %v3333_v62, %v12234_v47  ;;  %v2637_v3 = vmul.f32 %v2509_v40, %v2381_v8  ;;  %v2201_v62 = vpop.xlane.xlu0 %2200 }
 0x2b6   : > { %v6235_v35 = vadd.f32 %v6234_v61, %v6233_v22  ;;  %v6241_v31 = vrot.slane %v6240_v15, 1  ;;  %v6244_v58 = vrot.slane %v6243_v9, 4  ;;  %v4562_v12 = vmul.f32 %v10376_v16, %v4427_v28  ;;  %v2204_v61 = vpop.xlane.xlu1 %2203 }
 0x2b7   : > { %v4771_v39 = vsel %vm1895_vm0, %v4561_v17, 0.0  ;;  %v6250_v38 = vsel %vm1895_vm0, %v4427_v28, 0.0  ;;  %v10460_v50 = vadd.f32 %v3877_v5, %v2636_v52  ;;  %v3286_v1 = vcombine.high %v10405_v24, %v10405_v24  ;;  %v2510_v5 = vld [vmem:[%s9224_s27 + $0x320] sm:$0xff] }
 0x2b8   : > { %v6892_v55 = vmul.f32 0.125, %v6235_v35  ;;  %v6242_v20 = vadd.f32 %v6241_v31, %v6240_v15  ;;  %v6245_v60 = vadd.f32 %v6244_v58, %v6243_v9  ;;  %4772 = vadd.xlane.f32.xlu0 %v4771_v39  ;;  %v6251_v59 = vrot.slane %v6250_v38, 4  ;;  %v12536_v28 = vld [vmem:[#allocation40_spill] sm:$0xff]  ;;  %v2511_v31 = vld [vmem:[%s9224_s27 + $0x328] sm:$0xff] }
 0x2b9   : > { %12534 = vst [vmem:[#allocation58_spill] sm:$0xff] %v10460_v50  ;;  %v4774_v22 = vsel %vm1895_vm0, %v4562_v12, 0.0  ;;  %v2382_v44 = vadd.f32 %v8670_v51, %v2198_v2  ;;  %v10467_v17 = vadd.f32 %v3881_v56, %v2637_v3  ;;  %v3300_v9 = vrot.slane %v3286_v1, %v12221_v14  ;;  %v12537_v2 = vld [vmem:[#allocation10_spill] sm:$0xff] }
 0x2ba   : > { %v7143_v40 = vsel %vm5816_vm7, %v6892_v55, %v7142_v48  ;;  %v6246_v15 = vrot.slane %v6245_v60, 2  ;;  %v6252_v8 = vadd.f32 %v6251_v59, %v6250_v38  ;;  %4775 = vadd.xlane.f32.xlu1 %v4774_v22  ;;  %v6893_v52 = vmul.f32 0.125, %v6242_v20  ;;  %v2512_v12 = vld [vmem:[%s9224_s27 + $0x330] sm:$0xff] }
 0x2bb   : > { %12535 = vst [vmem:[#allocation73_spill] sm:$0xff] %v10467_v17  ;;  %7241 = vst.msk [vmem:[%s9613_s15 + $0x20] sm:$0xff] %vm1895_vm0, %v7143_v40  ;;  %v4300_v24 = vadd.f32 %v10362_v53, %v12536_v28  ;;  %v4301_v35 = vadd.f32 %v10362_v53, %v12537_v2  ;;  %v2383_v39 = vadd.f32 %v8670_v51, %v2201_v62 }
 0x2bc   : > { %v6247_v58 = vadd.f32 %v6246_v15, %v6245_v60  ;;  %v6253_v48 = vrot.slane %v6252_v8, 2  ;;  %v2384_v56 = vadd.f32 %v8670_v51, %v2204_v61  ;;  %v3316_v38 = vrot.slane %v3300_v9, %v12221_v14 }
 0x2bd   : > { %v2638_v3 = vmul.f32 %v2510_v5, %v2382_v44  ;;  %v4428_v55 = vmax.f32 %v4300_v24, 0.0  ;;  %v4429_v20 = vmax.f32 %v4301_v35, 0.0  ;;  %v3302_v1 = vcombine.high %v3300_v9, %v3300_v9 }
 0x2be   : > { %v6248_v59 = vrot.slane %v6247_v58, 1  ;;  %v6254_v22 = vadd.f32 %v6253_v48, %v6252_v8  ;;  %v2639_v40 = vmul.f32 %v2511_v31, %v2383_v39  ;;  %v10485_v15 = vmul.f32 %v2512_v12, %v2384_v56  ;;  %v12538_v12 = vld [vmem:[#allocation42_spill] sm:$0xff] }
 0x2bf   : > { %v4563_v28 = vmul.f32 %v10376_v16, %v4428_v55  ;;  %v6257_v2 = vsel %vm1895_vm0, %v4428_v55, 0.0  ;;  %v4564_v60 = vmul.f32 %v10376_v16, %v4429_v20  ;;  %v6264_v50 = vsel %vm1895_vm0, %v4429_v20, 0.0  ;;  %v12539_v55 = vld [vmem:[#allocation45_spill] sm:$0xff] }
 0x2c0   : > { %v6249_v62 = vadd.f32 %v6248_v59, %v6247_v58  ;;  %v6255_v17 = vrot.slane %v6254_v22, 1  ;;  %v6258_v61 = vrot.slane %v6257_v2, 4  ;;  %v3885_v44 = vrot.slane %v3316_v38, %v12234_v47 }
 0x2c1   : > { %v4777_v5 = vsel %vm1895_vm0, %v4563_v28, 0.0  ;;  %v4780_v8 = vsel %vm1895_vm0, %v4564_v60, 0.0  ;;  %v6265_v9 = vrot.slane %v6264_v50, 4  ;;  %v3330_v48 = vrot.slane %v3302_v1, %v12221_v14 }
 0x2c2   : > { %v6894_v24 = vmul.f32 0.125, %v6249_v62  ;;  %v6256_v35 = vadd.f32 %v6255_v17, %v6254_v22  ;;  %v6259_v31 = vadd.f32 %v6258_v61, %v6257_v2  ;;  %4778 = vadd.xlane.f32.xlu0 %v4777_v5  ;;  %4781 = vadd.xlane.f32.xlu1 %v4780_v8  ;;  %v3332_v58 = vcombine.high %v3316_v38, %v3316_v38 }
 0x2c3   : > { %v6266_v39 = vadd.f32 %v6265_v9, %v6264_v50  ;;  %v4302_v56 = vadd.f32 %v10362_v53, %v12538_v12  ;;  %v4303_v20 = vadd.f32 %v10362_v53, %v12539_v55  ;;  %v3889_v62 = vrot.slane %v3330_v48, %v12234_v47 }
 0x2c4   : > { %v7144_v59 = vsel %vm5804_vm1, %v6894_v24, %v6893_v52  ;;  %v6895_v28 = vmul.f32 0.125, %v6256_v35  ;;  %v6260_v60 = vrot.slane %v6259_v31, 2  ;;  %v10498_v17 = vadd.f32 %v3885_v44, %v2638_v3  ;;  %v2207_v3 = vpop.xlane.xlu0 %2206 }
 0x2c5   : > { %v6267_v22 = vrot.slane %v6266_v39, 2  ;;  %v4430_v2 = vmax.f32 %v4302_v56, 0.0  ;;  %v4431_v1 = vmax.f32 %v4303_v20, 0.0  ;;  %v3893_v61 = vrot.slane %v3332_v58, %v12234_v47  ;;  %v2210_v58 = vpop.xlane.xlu1 %2209 }
 0x2c6   : > { %12540 = vst [vmem:[#allocation80_spill] sm:$0xff] %v10498_v17  ;;  %v7145_v50 = vsel %vm5806_vm2, %v6895_v28, %v7144_v59  ;;  %v6261_v38 = vadd.f32 %v6260_v60, %v6259_v31  ;;  %v3334_v5 = vcombine.high %v3330_v48, %v3330_v48  ;;  %v10502_v9 = vadd.f32 %v3889_v62, %v2639_v40  ;;  %v10509_v31 = vld [vmem:[%s8562_s19 + $0x68] sm:$0xff] }
 0x2c7   : > { %v6268_v8 = vadd.f32 %v6267_v22, %v6266_v39  ;;  %v4565_v52 = vmul.f32 %v10376_v16, %v4430_v2  ;;  %v6271_v24 = vsel %vm1895_vm0, %v4430_v2, 0.0  ;;  %v4566_v12 = vmul.f32 %v10376_v16, %v4431_v1  ;;  %v2513_v39 = vld [vmem:[%s9224_s27 + $0x338] sm:$0xff] }
 0x2c8   : > { %12541 = vst [vmem:[#allocation59_spill] sm:$0xff] %v10502_v9  ;;  %v6262_v44 = vrot.slane %v6261_v38, 1  ;;  %v6272_v35 = vrot.slane %v6271_v24, 4  ;;  %v6278_v56 = vsel %vm1895_vm0, %v4431_v1, 0.0  ;;  %v3897_v20 = vrot.slane %v3334_v5, %v12234_v47  ;;  %v2514_v1 = vld [vmem:[%s9224_s27 + $0x340] sm:$0xff]  ;;  %v12542_v5 = vld [vmem:[#allocation14_spill] sm:$0xff] }
 0x2c9   : > { %v6269_v55 = vrot.slane %v6268_v8, 1  ;;  %v4783_v48 = vsel %vm1895_vm0, %v4565_v52, 0.0  ;;  %v6279_v40 = vrot.slane %v6278_v56, 4  ;;  %v4786_v60 = vsel %vm1895_vm0, %v4566_v12, 0.0 }
 0x2ca   : > { %v6263_v59 = vadd.f32 %v6262_v44, %v6261_v38  ;;  %v6273_v28 = vadd.f32 %v6272_v35, %v6271_v24  ;;  %4784 = vadd.xlane.f32.xlu0 %v4783_v48  ;;  %v2385_v62 = vadd.f32 %v8670_v51, %v2207_v3  ;;  %4787 = vadd.xlane.f32.xlu1 %v4786_v60  ;;  %v2213_v60 = vpop.xlane.xlu0 %2212 }
 0x2cb   : > { %v6270_v22 = vadd.f32 %v6269_v55, %v6268_v8  ;;  %v6280_v2 = vadd.f32 %v6279_v40, %v6278_v56  ;;  %v3342_v9 = vrot.slane %v10509_v31, %v12221_v14  ;;  %v2386_v52 = vadd.f32 %v8670_v51, %v2210_v58 }
 0x2cc   : > { %v6896_v17 = vmul.f32 0.125, %v6263_v59  ;;  %v6274_v45 = vrot.slane %v6273_v28, 2  ;;  %v2641_v34 = vmul.f32 %v2513_v39, %v2385_v62  ;;  %v4304_v38 = vadd.f32 %v10362_v53, %v12542_v5  ;;  %v12545_v39 = vld [vmem:[#allocation46_spill] sm:$0xff] }
 0x2cd   : > { %v6897_v24 = vmul.f32 0.125, %v6270_v22  ;;  %v10523_v44 = vadd.f32 %v3893_v61, %v10485_v15  ;;  %v6281_v3 = vrot.slane %v6280_v2, 2  ;;  %v3358_v8 = vrot.slane %v3342_v9, %v12221_v14 }
 0x2ce   : > { %v7146_v35 = vsel %vm5808_vm3, %v6896_v17, %v7145_v50  ;;  %v6275_v12 = vadd.f32 %v6274_v45, %v6273_v28  ;;  %v2642_v56 = vmul.f32 %v2514_v1, %v2386_v52  ;;  %v4432_v55 = vmax.f32 %v4304_v38, 0.0  ;;  %v2515_v1 = vld [vmem:[%s9224_s27 + $0x348] sm:$0xff] }
 0x2cf   : > { %12543 = vst [vmem:[#allocation60_spill] sm:$0xff] %v10523_v44  ;;  %v7147_v58 = vsel %vm5810_vm4, %v6897_v24, %v7146_v35  ;;  %v6282_v48 = vadd.f32 %v6281_v3, %v6280_v2  ;;  %v10528_v40 = vadd.f32 %v3897_v20, %v2641_v34  ;;  %v4305_v59 = vadd.f32 %v10362_v53, %v12545_v39  ;;  %v2216_v3 = vpop.xlane.xlu1 %2215 }
 0x2d0   : > { %v6276_v15 = vrot.slane %v6275_v12, 1  ;;  %v4567_v61 = vmul.f32 %v10376_v16, %v4432_v55  ;;  %v6285_v62 = vsel %vm1895_vm0, %v4432_v55, 0.0  ;;  %v3350_v22 = vcombine.high %v3342_v9, %v3342_v9 }
 0x2d1   : > { %12544 = vst [vmem:[#allocation81_spill] sm:$0xff] %v10528_v40  ;;  %v6283_v17 = vrot.slane %v6282_v48, 1  ;;  %v3901_v45 = vrot.slane %v3358_v8, %v12234_v47  ;;  %v6286_v50 = vrot.slane %v6285_v62, 4  ;;  %v4433_v28 = vmax.f32 %v4305_v59, 0.0 }
 0x2d2   : > { %v6277_v52 = vadd.f32 %v6276_v15, %v6275_v12  ;;  %v4789_v34 = vsel %vm1895_vm0, %v4567_v61, 0.0  ;;  %v3372_v20 = vrot.slane %v3350_v22, %v12221_v14  ;;  %v2387_v2 = vadd.f32 %v8670_v51, %v2213_v60 }
 0x2d3   : > { %v6284_v5 = vadd.f32 %v6283_v17, %v6282_v48  ;;  %v6287_v38 = vadd.f32 %v6286_v50, %v6285_v62  ;;  %4790 = vadd.xlane.f32.xlu0 %v4789_v34  ;;  %v4568_v24 = vmul.f32 %v10376_v16, %v4433_v28  ;;  %v6292_v9 = vsel %vm1895_vm0, %v4433_v28, 0.0  ;;  %v2516_v17 = vld [vmem:[%s9224_s27 + $0x350] sm:$0xff]  ;;  %v2219_v28 = vpop.xlane.xlu0 %2218 }
 0x2d4   : > { %v6898_v35 = vmul.f32 0.125, %v6277_v52  ;;  %v6293_v55 = vrot.slane %v6292_v9, 4  ;;  %v3905_v39 = vrot.slane %v3372_v20, %v12234_v47  ;;  %v2643_v12 = vmul.f32 %v2515_v1, %v2387_v2  ;;  %v12548_v2 = vld [vmem:[#allocation48_spill] sm:$0xff] }
 0x2d5   : > { %v6899_v59 = vmul.f32 0.125, %v6284_v5  ;;  %v6288_v15 = vrot.slane %v6287_v38, 2  ;;  %v4792_v61 = vsel %vm1895_vm0, %v4568_v24, 0.0  ;;  %v3380_v60 = vcombine.high %v3358_v8, %v3358_v8 }
 0x2d6   : > { %v7148_v48 = vsel %vm5812_vm5, %v6898_v35, %v7147_v58  ;;  %v10544_v62 = vadd.f32 %v3901_v45, %v2642_v56  ;;  %v6294_v22 = vadd.f32 %v6293_v55, %v6292_v9  ;;  %4793 = vadd.xlane.f32.xlu1 %v4792_v61  ;;  %v2388_v50 = vadd.f32 %v8670_v51, %v2216_v3  ;;  %v12549_v58 = vld [vmem:[#allocation18_spill] sm:$0xff]  ;;  %v2517_v45 = vld [vmem:[%s9224_s27 + $0x358] sm:$0xff] }
 0x2d7   : > { %v7149_v52 = vsel %vm5814_vm6, %v6899_v59, %v7148_v48  ;;  %v6289_v34 = vadd.f32 %v6288_v15, %v6287_v38  ;;  %v10549_v1 = vadd.f32 %v3905_v39, %v2643_v12  ;;  %v4306_v5 = vadd.f32 %v10362_v53, %v12548_v2 }
 0x2d8   : > { %12546 = vst [vmem:[#allocation27_spill] sm:$0xff] %v10544_v62  ;;  %v6295_v24 = vrot.slane %v6294_v22, 2  ;;  %v3909_v8 = vrot.slane %v3380_v60, %v12234_v47  ;;  %v4307_v56 = vadd.f32 %v10362_v53, %v12549_v58  ;;  %v3382_v9 = vcombine.high %v3372_v20, %v3372_v20 }
 0x2d9   : > { %12547 = vst [vmem:[#allocation61_spill] sm:$0xff] %v10549_v1  ;;  %v6290_v35 = vrot.slane %v6289_v34, 1  ;;  %v2644_v55 = vmul.f32 %v2516_v17, %v2388_v50  ;;  %v4434_v3 = vmax.f32 %v4306_v5, 0.0  ;;  %v2389_v61 = vadd.f32 %v8670_v51, %v2219_v28 }
 0x2da   : > { %v6296_v59 = vadd.f32 %v6295_v24, %v6294_v22  ;;  %v4435_v38 = vmax.f32 %v4307_v56, 0.0  ;;  %v3913_v39 = vrot.slane %v3382_v9, %v12234_v47  ;;  %v3335_v12 = vcombine.high %v10509_v31, %v10509_v31  ;;  %v2222_v22 = vpop.xlane.xlu1 %2221 }
 0x2db   : > { %v6291_v15 = vadd.f32 %v6290_v35, %v6289_v34  ;;  %v4569_v60 = vmul.f32 %v10376_v16, %v4434_v3  ;;  %v6299_v48 = vsel %vm1895_vm0, %v4434_v3, 0.0  ;;  %v2645_v2 = vmul.f32 %v2517_v45, %v2389_v61  ;;  %v2518_v61 = vld [vmem:[%s9224_s27 + $0x360] sm:$0xff] }
 0x2dc   : > { %v6297_v58 = vrot.slane %v6296_v59, 1  ;;  %v6300_v20 = vrot.slane %v6299_v48, 4  ;;  %v4570_v17 = vmul.f32 %v10376_v16, %v4435_v38  ;;  %v6306_v50 = vsel %vm1895_vm0, %v4435_v38, 0.0 }
 0x2dd   : > { %v6900_v28 = vmul.f32 0.125, %v6291_v15  ;;  %v10565_v5 = vadd.f32 %v3909_v8, %v2644_v55  ;;  %v4795_v31 = vsel %vm1895_vm0, %v4569_v60, 0.0  ;;  %v6307_v34 = vrot.slane %v6306_v50, 4  ;;  %v12551_v15 = vld [vmem:[#allocation49_spill] sm:$0xff]  ;;  %v2225_v55 = vpop.xlane.xlu0 %2224 }
 0x2de   : > { %v6298_v24 = vadd.f32 %v6297_v58, %v6296_v59  ;;  %v6301_v56 = vadd.f32 %v6300_v20, %v6299_v48  ;;  %4796 = vadd.xlane.f32.xlu0 %v4795_v31  ;;  %v4798_v45 = vsel %vm1895_vm0, %v4570_v17, 0.0  ;;  %v3349_v9 = vrot.slane %v3335_v12, %v12221_v14  ;;  %v12553_v58 = vld [vmem:[#allocation20_spill] sm:$0xff] }
 0x2df   : > { %12550 = vst [vmem:[#allocation62_spill] sm:$0xff] %v10565_v5  ;;  %v7150_v35 = vsel %vm5816_vm7, %v6900_v28, %v7149_v52  ;;  %v6308_v3 = vadd.f32 %v6307_v34, %v6306_v50  ;;  %4799 = vadd.xlane.f32.xlu1 %v4798_v45  ;;  %v2390_v38 = vadd.f32 %v8670_v51, %v2222_v22  ;;  %v2228_v45 = vpop.xlane.xlu1 %2227 }
 0x2e0   : > { %v4308_v8 = vadd.f32 %v10362_v53, %v12551_v15  ;;  %7242 = vst.msk [vmem:[%s9613_s15 + $0x28] sm:$0xff] %vm1895_vm0, %v7150_v35  ;;  %v6302_v59 = vrot.slane %v6301_v56, 2  ;;  %v10577_v60 = vadd.f32 %v3913_v39, %v2645_v2  ;;  %v3365_v48 = vrot.slane %v3349_v9, %v12221_v14 }
 0x2e1   : > { %v4309_v12 = vadd.f32 %v10362_v53, %v12553_v58  ;;  %v6901_v52 = vmul.f32 0.125, %v6298_v24  ;;  %v6309_v20 = vrot.slane %v6308_v3, 2  ;;  %v3351_v50 = vcombine.high %v3349_v9, %v3349_v9  ;;  %v2231_v1 = vpop.xlane.xlu0 %2230 }
 0x2e2   : > { %12552 = vst [vmem:[#allocation75_spill] sm:$0xff] %v10577_v60  ;;  %v4436_v17 = vmax.f32 %v4308_v8, 0.0  ;;  %v6303_v22 = vadd.f32 %v6302_v59, %v6301_v56  ;;  %v2646_v28 = vmul.f32 %v2518_v61, %v2390_v38  ;;  %v2391_v34 = vadd.f32 %v8670_v51, %v2225_v55  ;;  %v2519_v56 = vld [vmem:[%s9224_s27 + $0x368] sm:$0xff] }
 0x2e3   : > { %v4437_v31 = vmax.f32 %v4309_v12, 0.0  ;;  %v6310_v35 = vadd.f32 %v6309_v20, %v6308_v3  ;;  %v3379_v15 = vrot.slane %v3351_v50, %v12221_v14  ;;  %v3917_v24 = vrot.slane %v3365_v48, %v12234_v47 }
 0x2e4   : > { %v4571_v39 = vmul.f32 %v10376_v16, %v4436_v17  ;;  %v6313_v2 = vsel %vm1895_vm0, %v4436_v17, 0.0  ;;  %v6304_v58 = vrot.slane %v6303_v22, 1  ;;  %v2520_v17 = vld [vmem:[%s9224_s27 + $0x370] sm:$0xff]  ;;  %v2647_v44 = vmul.f32 %v2519_v56, %v2391_v34 }
 0x2e5   : > { %v6314_v40 = vrot.slane %v6313_v2, 4  ;;  %v4572_v9 = vmul.f32 %v10376_v16, %v4437_v31  ;;  %v6311_v61 = vrot.slane %v6310_v35, 1  ;;  %v6320_v8 = vsel %vm1895_vm0, %v4437_v31, 0.0 }
 0x2e6   : > { %v4801_v38 = vsel %vm1895_vm0, %v4571_v39, 0.0  ;;  %v3921_v3 = vrot.slane %v3379_v15, %v12234_v47  ;;  %v6305_v55 = vadd.f32 %v6304_v58, %v6303_v22  ;;  %v6321_v20 = vrot.slane %v6320_v8, 4 }
 0x2e7   : > { %v6315_v59 = vadd.f32 %v6314_v40, %v6313_v2  ;;  %4802 = vadd.xlane.f32.xlu0 %v4801_v38  ;;  %v4804_v12 = vsel %vm1895_vm0, %v4572_v9, 0.0  ;;  %v6312_v50 = vadd.f32 %v6311_v61, %v6310_v35  ;;  %v3381_v60 = vcombine.high %v3365_v48, %v3365_v48  ;;  %v2234_v40 = vpop.xlane.xlu1 %2233 }
 0x2e8   : > { %4805 = vadd.xlane.f32.xlu1 %v4804_v12  ;;  %v2392_v5 = vadd.f32 %v8670_v51, %v2228_v45  ;;  %v6902_v62 = vmul.f32 0.125, %v6305_v55  ;;  %v6322_v31 = vadd.f32 %v6321_v20, %v6320_v8  ;;  %v4310_v22 = vadd.f32 %v10362_v53, %v12554_v42  ;;  %v12557_v8 = vld [vmem:[#allocation50_spill] sm:$0xff] }
 0x2e9   : > { %v6316_v39 = vrot.slane %v6315_v59, 2  ;;  %v6903_v2 = vmul.f32 0.125, %v6312_v50  ;;  %v10597_v58 = vadd.f32 %v3917_v24, %v2646_v28  ;;  %v3925_v9 = vrot.slane %v3381_v60, %v12234_v47  ;;  %v10607_v12 = vld [vmem:[%s8562_s19 + $0x70] sm:$0xff]  ;;  %v2521_v50 = vld [vmem:[%s9224_s27 + $0x378] sm:$0xff] }
 0x2ea   : > { %v2648_v35 = vmul.f32 %v2520_v17, %v2392_v5  ;;  %v7151_v34 = vsel %vm5804_vm1, %v6902_v62, %v6901_v52  ;;  %v6323_v56 = vrot.slane %v6322_v31, 2  ;;  %v4438_v45 = vmax.f32 %v4310_v22, 0.0 }
 0x2eb   : > { %12555 = vst [vmem:[#allocation30_spill] sm:$0xff] %v10597_v58  ;;  %v6317_v48 = vadd.f32 %v6316_v39, %v6315_v59  ;;  %v7152_v61 = vsel %vm5806_vm2, %v6903_v2, %v7151_v34  ;;  %v10602_v38 = vadd.f32 %v3921_v3, %v2647_v44  ;;  %v4311_v42 = vadd.f32 %v10362_v53, %v12557_v8  ;;  %v2237_v3 = vpop.xlane.xlu0 %2236 }
 0x2ec   : > { %v3383_v55 = vcombine.high %v3379_v15, %v3379_v15  ;;  %v6324_v24 = vadd.f32 %v6323_v56, %v6322_v31  ;;  %v4573_v5 = vmul.f32 %v10376_v16, %v4438_v45  ;;  %v6327_v62 = vsel %vm1895_vm0, %v4438_v45, 0.0  ;;  %v2240_v31 = vpop.xlane.xlu1 %2239 }
 0x2ed   : > { %12556 = vst [vmem:[#allocation63_spill] sm:$0xff] %v10602_v38  ;;  %v6318_v28 = vrot.slane %v6317_v48, 1  ;;  %v10611_v60 = vadd.f32 %v3925_v9, %v2648_v35  ;;  %v6328_v52 = vrot.slane %v6327_v62, 4  ;;  %v4439_v59 = vmax.f32 %v4311_v42, 0.0 }
 0x2ee   : > { %v2393_v44 = vadd.f32 %v8670_v51, %v2231_v1  ;;  %v6325_v17 = vrot.slane %v6324_v24, 1  ;;  %v4807_v15 = vsel %vm1895_vm0, %v4573_v5, 0.0  ;;  %v3391_v39 = vrot.slane %v10607_v12, %v12221_v14 }
 0x2ef   : > { %12558 = vst [vmem:[#allocation64_spill] sm:$0xff] %v10611_v60  ;;  %v6319_v20 = vadd.f32 %v6318_v28, %v6317_v48  ;;  %v6329_v22 = vadd.f32 %v6328_v52, %v6327_v62  ;;  %4808 = vadd.xlane.f32.xlu0 %v4807_v15  ;;  %v4574_v2 = vmul.f32 %v10376_v16, %v4439_v59  ;;  %v6334_v9 = vsel %vm1895_vm0, %v4439_v59, 0.0  ;;  %v2522_v48 = vld [vmem:[%s9224_s27 + $0x380] sm:$0xff] }
 0x2f0   : > { %v3929_v35 = vrot.slane %v3383_v55, %v12234_v47  ;;  %v6326_v34 = vadd.f32 %v6325_v17, %v6324_v24  ;;  %v6335_v56 = vrot.slane %v6334_v9, 4  ;;  %v3407_v45 = vrot.slane %v3391_v39, %v12221_v14  ;;  %v12560_v60 = vld [vmem:[#allocation52_spill] sm:$0xff] }
 0x2f1   : > { %v6904_v1 = vmul.f32 0.125, %v6319_v20  ;;  %v6330_v8 = vrot.slane %v6329_v22, 2  ;;  %v4810_v42 = vsel %vm1895_vm0, %v4574_v2, 0.0  ;;  %v2649_v28 = vmul.f32 %v2521_v50, %v2393_v44  ;;  %v12559_v20 = vld [vmem:[#allocation51_spill] sm:$0xff]  ;;  %v2243_v2 = vpop.xlane.xlu0 %2242 }
 0x2f2   : > { %v2394_v5 = vadd.f32 %v8670_v51, %v2234_v40  ;;  %v6905_v52 = vmul.f32 0.125, %v6326_v34  ;;  %v6336_v15 = vadd.f32 %v6335_v56, %v6334_v9  ;;  %4811 = vadd.xlane.f32.xlu1 %v4810_v42  ;;  %v3933_v55 = vrot.slane %v3407_v45, %v12234_v47  ;;  %v10633_v9 = vpop.xlane.xlu1 %2245 }
 0x2f3   : > { %v7153_v62 = vsel %vm5808_vm3, %v6904_v1, %v7152_v61  ;;  %v6331_v59 = vadd.f32 %v6330_v8, %v6329_v22  ;;  %v4312_v17 = vadd.f32 %v10362_v53, %v12559_v20  ;;  %v4313_v38 = vadd.f32 %v10362_v53, %v12560_v60 }
 0x2f4   : > { %v2650_v24 = vmul.f32 %v2522_v48, %v2394_v5  ;;  %v7154_v44 = vsel %vm5810_vm4, %v6905_v52, %v7153_v62  ;;  %v6337_v40 = vrot.slane %v6336_v15, 2  ;;  %v3399_v50 = vcombine.high %v3391_v39, %v3391_v39  ;;  %v2523_v48 = vld [vmem:[%s9224_s27 + $0x388] sm:$0xff] }
 0x2f5   : > { %v2395_v61 = vadd.f32 %v8670_v51, %v2237_v3  ;;  %v6332_v1 = vrot.slane %v6331_v59, 1  ;;  %v10635_v34 = vadd.f32 %v3929_v35, %v2649_v28  ;;  %v4440_v22 = vmax.f32 %v4312_v17, 0.0 }
 0x2f6   : > { %v4441_v56 = vmax.f32 %v4313_v38, 0.0  ;;  %v6338_v8 = vadd.f32 %v6337_v40, %v6336_v15  ;;  %v10638_v42 = vadd.f32 %v3933_v55, %v2650_v24  ;;  %v3421_v60 = vrot.slane %v3399_v50, %v12221_v14 }
 0x2f7   : > { %12561 = vst [vmem:[#allocation84_spill] sm:$0xff] %v10635_v34  ;;  %v3429_v5 = vcombine.high %v3407_v45, %v3407_v45  ;;  %v6333_v20 = vadd.f32 %v6332_v1, %v6331_v59  ;;  %v4575_v62 = vmul.f32 %v10376_v16, %v4440_v22  ;;  %v6341_v39 = vsel %vm1895_vm0, %v4440_v22, 0.0  ;;  %v10647_v45 = vpop.xlane.xlu0 %2248  ;;  %v2524_v1 = vld [vmem:[%s9224_s27 + $0x390] sm:$0xff]  ;;  %v10651_v22 = vpop.xlane.xlu1 %2251 }
 0x2f8   : > { %12562 = vst [vmem:[#allocation29_spill] sm:$0xff] %v10638_v42  ;;  %v4576_v3 = vmul.f32 %v10376_v16, %v4441_v56  ;;  %v6339_v52 = vrot.slane %v6338_v8, 1  ;;  %v6342_v35 = vrot.slane %v6341_v39, 4  ;;  %v6348_v28 = vsel %vm1895_vm0, %v4441_v56, 0.0 }
 0x2f9   : > { %v2651_v38 = vmul.f32 %v2523_v48, %v2395_v61  ;;  %v6906_v17 = vmul.f32 0.125, %v6333_v20  ;;  %v4813_v15 = vsel %vm1895_vm0, %v4575_v62, 0.0  ;;  %v6349_v24 = vrot.slane %v6348_v28, 4 }
 0x2fa   : > { %v4816_v55 = vsel %vm1895_vm0, %v4576_v3, 0.0  ;;  %v6340_v59 = vadd.f32 %v6339_v52, %v6338_v8  ;;  %v6343_v40 = vadd.f32 %v6342_v35, %v6341_v39  ;;  %4814 = vadd.xlane.f32.xlu0 %v4813_v15  ;;  %v3937_v50 = vrot.slane %v3421_v60, %v12234_v47  ;;  %v12563_v39 = vld [vmem:[#allocation53_spill] sm:$0xff]  ;;  %v2525_v35 = vld [vmem:[%s9224_s27 + $0x398] sm:$0xff] }
 0x2fb   : > { %4817 = vadd.xlane.f32.xlu1 %v4816_v55  ;;  %v7155_v61 = vsel %vm5812_vm5, %v6906_v17, %v7154_v44  ;;  %v6350_v56 = vadd.f32 %v6349_v24, %v6348_v28  ;;  %v3941_v48 = vrot.slane %v3429_v5, %v12234_v47  ;;  %v2396_v20 = vadd.f32 %v8670_v51, %v2240_v31  ;;  %v10666_v42 = vpop.xlane.xlu0 %2254 }
 0x2fc   : > { %v6907_v62 = vmul.f32 0.125, %v6340_v59  ;;  %v6344_v3 = vrot.slane %v6343_v40, 2  ;;  %v4314_v8 = vadd.f32 %v10362_v53, %v9989_v4  ;;  %v4315_v52 = vadd.f32 %v10362_v53, %v12563_v39 }
 0x2fd   : > { %v6351_v15 = vrot.slane %v6350_v56, 2  ;;  %v2652_v55 = vmul.f32 %v2524_v1, %v2396_v20  ;;  %v3431_v34 = vcombine.high %v3421_v60, %v3421_v60  ;;  %v2397_v58 = vadd.f32 %v8670_v51, %v2243_v2  ;;  %v10671_v1 = vpop.xlane.xlu1 %2257 }
 0x2fe   : > { %v7156_v44 = vsel %vm5814_vm6, %v6907_v62, %v7155_v61  ;;  %v6345_v28 = vadd.f32 %v6344_v3, %v6343_v40  ;;  %v4442_v5 = vmax.f32 %v4314_v8, 0.0  ;;  %v4443_v17 = vmax.f32 %v4315_v52, 0.0 }
 0x2ff   : > { %v6352_v31 = vadd.f32 %v6351_v15, %v6350_v56  ;;  %v10663_v24 = vadd.f32 %v3937_v50, %v2651_v38  ;;  %v3945_v59 = vrot.slane %v3431_v34, %v12234_v47  ;;  %v2653_v4 = vmul.f32 %v2525_v35, %v2397_v58  ;;  %v10688_v15 = vld [vmem:[%s12074_s7] ss:$0 sm:$0xff] }
 0x300   : > { %v6346_v53 = vrot.slane %v6345_v28, 1  ;;  %v4577_v39 = vmul.f32 %v10376_v16, %v4442_v5  ;;  %v6355_v60 = vsel %vm1895_vm0, %v4442_v5, 0.0  ;;  %v4578_v2 = vmul.f32 %v10376_v16, %v4443_v17  ;;  %v2526_v16 = vld [vmem:[%s9224_s27 + $0x3a0] sm:$0xff] }
 0x301   : > { %v6353_v40 = vrot.slane %v6352_v31, 1  ;;  %v10673_v61 = vadd.f32 %v3941_v48, %v2652_v55  ;;  %v6356_v38 = vrot.slane %v6355_v60, 4  ;;  %v6362_v50 = vsel %vm1895_vm0, %v4443_v17, 0.0 }
 0x302   : > { %v6347_v34 = vadd.f32 %v6346_v53, %v6345_v28  ;;  %v4819_v58 = vsel %vm1895_vm0, %v4577_v39, 0.0  ;;  %v4822_v56 = vsel %vm1895_vm0, %v4578_v2, 0.0  ;;  %v6363_v20 = vrot.slane %v6362_v50, 4 }
 0x303   : > { %12564 = vst [vmem:[#allocation65_spill] sm:$0xff] %v10673_v61  ;;  %v6357_v62 = vadd.f32 %v6356_v38, %v6355_v60  ;;  %4820 = vadd.xlane.f32.xlu0 %v4819_v58  ;;  %4823 = vadd.xlane.f32.xlu1 %v4822_v56  ;;  %v10678_v3 = vadd.f32 %v3945_v59, %v2653_v4  ;;  %v10695_v59 = vpop.xlane.xlu0 %2260  ;;  %v10698_v60 = vpop.xlane.xlu1 %2263 }
 0x304   : > { %v3384_v8 = vcombine.high %v10607_v12, %v10607_v12  ;;  %v6908_v48 = vmul.f32 0.125, %v6347_v34  ;;  %v6364_v52 = vadd.f32 %v6363_v20, %v6362_v50  ;;  %v2398_v35 = vadd.f32 %v8670_v51, %v10633_v9 }
 0x305   : > { %12565 = vst [vmem:[#allocation66_spill] sm:$0xff] %v10678_v3  ;;  %v4316_v55 = vadd.f32 %v10688_v15, %v10002_v0  ;;  %v6354_v28 = vadd.f32 %v6353_v40, %v6352_v31  ;;  %v6358_v5 = vrot.slane %v6357_v62, 2  ;;  %v4317_v12 = vadd.f32 %v10688_v15, %v10012_v27  ;;  %v10706_v27 = vld [vmem:[%s12075_s8] ss:$0 sm:$0xff] }
 0x306   : > { %v3398_v17 = vrot.slane %v3384_v8, %v12221_v14  ;;  %v7157_v4 = vsel %vm5816_vm7, %v6908_v48, %v7156_v44  ;;  %v6365_v9 = vrot.slane %v6364_v52, 2  ;;  %v2654_v53 = vmul.f32 %v2526_v16, %v2398_v35  ;;  %v2527_v16 = vld [vmem:[%s9224_s27 + $0x3a8] sm:$0xff] }
 0x307   : > { %v4444_v39 = vmax.f32 %v4316_v55, 0.0  ;;  %7243 = vst.msk [vmem:[%s9613_s15 + $0x30] sm:$0xff] %vm1895_vm0, %v7157_v4  ;;  %v6359_v0 = vadd.f32 %v6358_v5, %v6357_v62  ;;  %v4445_v2 = vmax.f32 %v4317_v12, 0.0  ;;  %v2399_v34 = vadd.f32 %v8670_v51, %v10647_v45  ;;  %v10719_v12 = vpop.xlane.xlu0 %2266 }
 0x308   : > { %v3414_v31 = vrot.slane %v3398_v17, %v12221_v14  ;;  %v3400_v40 = vcombine.high %v3398_v17, %v3398_v17  ;;  %v6366_v38 = vadd.f32 %v6365_v9, %v6364_v52  ;;  %v6909_v55 = vmul.f32 0.125, %v6354_v28 }
 0x309   : > { %v4579_v44 = vmul.f32 %v10706_v27, %v4444_v39  ;;  %v6369_v50 = vsel %vm1895_vm0, %v4444_v39, 0.0  ;;  %v6360_v58 = vrot.slane %v6359_v0, 1  ;;  %v4580_v62 = vmul.f32 %v10706_v27, %v4445_v2 }
 0x30a   : > { %v3949_v56 = vrot.slane %v3414_v31, %v12234_v47  ;;  %v6370_v20 = vrot.slane %v6369_v50, 4  ;;  %v6367_v8 = vrot.slane %v6366_v38, 1  ;;  %v6376_v52 = vsel %vm1895_vm0, %v4445_v2, 0.0 }
 0x30b   : > { %v4825_v48 = vsel %vm1895_vm0, %v4579_v44, 0.0  ;;  %v3428_v35 = vrot.slane %v3400_v40, %v12221_v14  ;;  %v6361_v5 = vadd.f32 %v6360_v58, %v6359_v0  ;;  %v4828_v45 = vsel %vm1895_vm0, %v4580_v62, 0.0  ;;  %v10722_v44 = vpop.xlane.xlu1 %2269 }
 0x30c   : > { %v6371_v17 = vadd.f32 %v6370_v20, %v6369_v50  ;;  %4826 = vadd.xlane.f32.xlu0 %v4825_v48  ;;  %v6368_v4 = vadd.f32 %v6367_v8, %v6366_v38  ;;  %v6377_v9 = vrot.slane %v6376_v52, 4  ;;  %4829 = vadd.xlane.f32.xlu1 %v4828_v45  ;;  %v2655_v3 = vmul.f32 %v2527_v16, %v2399_v34  ;;  %v2528_v20 = vld [vmem:[%s9224_s27 + $0x3b0] sm:$0xff] }
 0x30d   : > { %v3953_v39 = vrot.slane %v3428_v35, %v12234_v47  ;;  %v6910_v2 = vmul.f32 0.125, %v6361_v5  ;;  %v3430_v28 = vcombine.high %v3414_v31, %v3414_v31  ;;  %v2400_v0 = vadd.f32 %v8670_v51, %v10651_v22 }
 0x30e   : > { %v6372_v61 = vrot.slane %v6371_v17, 2  ;;  %v6911_v40 = vmul.f32 0.125, %v6368_v4  ;;  %v10726_v50 = vadd.f32 %v3949_v56, %v2654_v53  ;;  %v6378_v58 = vadd.f32 %v6377_v9, %v6376_v52  ;;  %v2529_v53 = vld [vmem:[%s9224_s27 + $0x3b8] sm:$0xff] }
 0x30f   : > { %v4318_v38 = vadd.f32 %v10688_v15, %v10030_v29  ;;  %v7158_v62 = vsel %vm5804_vm1, %v6910_v2, %v6909_v55  ;;  %v10732_v16 = vadd.f32 %v3953_v39, %v2655_v3  ;;  %v3957_v8 = vrot.slane %v3430_v28, %v12234_v47  ;;  %v10745_v9 = vpop.xlane.xlu1 %2275 }
 0x310   : > { %v6373_v34 = vadd.f32 %v6372_v61, %v6371_v17  ;;  %v7159_v31 = vsel %vm5806_vm2, %v6911_v40, %v7158_v62  ;;  %v6379_v48 = vrot.slane %v6378_v58, 2  ;;  %v4319_v22 = vadd.f32 %v10688_v15, %v10044_v25  ;;  %v10741_v61 = vpop.xlane.xlu0 %2272 }
 0x311   : > { %12566 = vst [vmem:[#allocation79_spill] sm:$0xff] %v10732_v16  ;;  %v4446_v5 = vmax.f32 %v4318_v38, 0.0  ;;  %v2656_v52 = vmul.f32 %v2528_v20, %v2400_v0  ;;  %v3432_v45 = vcombine.high %v3428_v35, %v3428_v35  ;;  %v2401_v29 = vadd.f32 %v8670_v51, %v10666_v42  ;;  %v10749_v35 = vld [vmem:[%s8562_s19 + $0x78] sm:$0xff]  ;;  %s10831_s19 = sld [smem:[#allocation3]] }
 0x312   : > { %v6374_v56 = vrot.slane %v6373_v34, 1  ;;  %v6380_v3 = vadd.f32 %v6379_v48, %v6378_v58  ;;  %v4447_v4 = vmax.f32 %v4319_v22, 0.0  ;;  %v2530_v22 = vld [vmem:[%s9224_s27 + $0x3c0] sm:$0xff] }
 0x313   : > { %v4581_v55 = vmul.f32 %v10706_v27, %v4446_v5  ;;  %v6383_v17 = vsel %vm1895_vm0, %v4446_v5, 0.0  ;;  %v3961_v2 = vrot.slane %v3432_v45, %v12234_v47  ;;  %v2657_v28 = vmul.f32 %v2529_v53, %v2401_v29 }
 0x314   : > { %v6375_v39 = vadd.f32 %v6374_v56, %v6373_v34  ;;  %v6384_v25 = vrot.slane %v6383_v17, 4  ;;  %v6381_v0 = vrot.slane %v6380_v3, 1  ;;  %v4582_v40 = vmul.f32 %v10706_v27, %v4447_v4 }
 0x315   : > { %v4831_v42 = vsel %vm1895_vm0, %v4581_v55, 0.0  ;;  %v6390_v58 = vsel %vm1895_vm0, %v4447_v4, 0.0  ;;  %v10754_v38 = vadd.f32 %v3957_v8, %v2656_v52  ;;  %v3440_v53 = vrot.slane %v10749_v35, %v12221_v14  ;;  %v10765_v52 = vpop.xlane.xlu0 %2278 }
 0x316   : > { %v6912_v20 = vmul.f32 0.125, %v6375_v39  ;;  %v6385_v62 = vadd.f32 %v6384_v25, %v6383_v17  ;;  %4832 = vadd.xlane.f32.xlu0 %v4831_v42  ;;  %v6391_v34 = vrot.slane %v6390_v58, 4  ;;  %v6382_v48 = vadd.f32 %v6381_v0, %v6380_v3 }
 0x317   : > { %12567 = vst [vmem:[#allocation69_spill] sm:$0xff] %v10754_v38  ;;  %v4834_v5 = vsel %vm1895_vm0, %v4582_v40, 0.0  ;;  %v2402_v56 = vadd.f32 %v8670_v51, %v10671_v1  ;;  %v4320_v8 = vadd.f32 %v10688_v15, %v10055_v32  ;;  %v10767_v17 = vadd.f32 %v3961_v2, %v2657_v28  ;;  %v10772_v1 = vpop.xlane.xlu1 %4649 }
 0x318   : > { %v7160_v45 = vsel %vm5808_vm3, %v6912_v20, %v7159_v31  ;;  %v6386_v29 = vrot.slane %v6385_v62, 2  ;;  %v6392_v55 = vadd.f32 %v6391_v34, %v6390_v58  ;;  %4835 = vadd.xlane.f32.xlu1 %v4834_v5  ;;  %v6913_v3 = vmul.f32 0.125, %v6382_v48 }
 0x319   : > { %12568 = vst [vmem:[#allocation71_spill] sm:$0xff] %v10767_v17  ;;  %v3456_v4 = vrot.slane %v3440_v53, %v12221_v14  ;;  %v4321_v39 = vadd.f32 %v10688_v15, %v10064_v36  ;;  %v2658_v0 = vmul.f32 %v2530_v22, %v2402_v56  ;;  %v4448_v42 = vmax.f32 %v4320_v8, 0.0  ;;  %v2531_v36 = vld [vmem:[%s9224_s27 + $0x3c8] sm:$0xff]  ;;  %v10784_v8 = vpop.xlane.xlu0 %4652 }
 0x31a   : > { %v6387_v31 = vadd.f32 %v6386_v29, %v6385_v62  ;;  %v6393_v25 = vrot.slane %v6392_v55, 2  ;;  %v7161_v40 = vsel %vm5810_vm4, %v6913_v3, %v7160_v45  ;;  %v3448_v58 = vcombine.high %v3440_v53, %v3440_v53 }
 0x31b   : > { %v4449_v32 = vmax.f32 %v4321_v39, 0.0  ;;  %v2403_v2 = vadd.f32 %v8670_v51, %v10695_v59  ;;  %v4583_v34 = vmul.f32 %v10706_v27, %v4448_v42  ;;  %v6397_v48 = vsel %vm1895_vm0, %v4448_v42, 0.0  ;;  %v10788_v42 = vpop.xlane.xlu1 %4655 }
 0x31c   : > { %v6388_v28 = vrot.slane %v6387_v31, 1  ;;  %v6394_v20 = vadd.f32 %v6393_v25, %v6392_v55  ;;  %v3965_v5 = vrot.slane %v3456_v4, %v12234_v47  ;;  %v6398_v62 = vrot.slane %v6397_v48, 4 }
 0x31d   : > { %v4584_v22 = vmul.f32 %v10706_v27, %v4449_v32  ;;  %v6404_v56 = vsel %vm1895_vm0, %v4449_v32, 0.0  ;;  %v4837_v29 = vsel %vm1895_vm0, %v4583_v34, 0.0  ;;  %v3470_v39 = vrot.slane %v3448_v58, %v12221_v14 }
 0x31e   : > { %v6389_v45 = vadd.f32 %v6388_v28, %v6387_v31  ;;  %v6395_v53 = vrot.slane %v6394_v20, 1  ;;  %v6405_v59 = vrot.slane %v6404_v56, 4  ;;  %v6399_v55 = vadd.f32 %v6398_v62, %v6397_v48  ;;  %4838 = vadd.xlane.f32.xlu0 %v4837_v29  ;;  %v2532_v31 = vld [vmem:[%s9224_s27 + $0x3d0] sm:$0xff] }
 0x31f   : > { %v4840_v3 = vsel %vm1895_vm0, %v4584_v22, 0.0  ;;  %v2659_v25 = vmul.f32 %v2531_v36, %v2403_v2  ;;  %v3478_v28 = vcombine.high %v3456_v4, %v3456_v4  ;;  %v3969_v34 = vrot.slane %v3470_v39, %v12234_v47 }
 0x320   : > { %v6914_v17 = vmul.f32 0.125, %v6389_v45  ;;  %v6396_v38 = vadd.f32 %v6395_v53, %v6394_v20  ;;  %v6406_v32 = vadd.f32 %v6405_v59, %v6404_v56  ;;  %4841 = vadd.xlane.f32.xlu1 %v4840_v3  ;;  %v6400_v16 = vrot.slane %v6399_v55, 2 }
 0x321   : > { %v2404_v48 = vadd.f32 %v8670_v51, %v10698_v60  ;;  %v4322_v62 = vadd.f32 %v10688_v15, %v10082_v63  ;;  %v3973_v22 = vrot.slane %v3478_v28, %v12234_v47  ;;  %v10798_v20 = vadd.f32 %v3965_v5, %v2658_v0  ;;  %v10805_v60 = vpop.xlane.xlu0 %4658 }
 0x322   : > { %v7162_v58 = vsel %vm5812_vm5, %v6914_v17, %v7161_v40  ;;  %v6915_v2 = vmul.f32 0.125, %v6396_v38  ;;  %v6407_v36 = vrot.slane %v6406_v32, 2  ;;  %v6401_v56 = vadd.f32 %v6400_v16, %v6399_v55  ;;  %v10809_v16 = vpop.xlane.xlu1 %4661 }
 0x323   : > { %v2660_v45 = vmul.f32 %v2532_v31, %v2404_v48  ;;  %v4450_v4 = vmax.f32 %v4322_v62, 0.0  ;;  %v10801_v59 = vadd.f32 %v3969_v34, %v2659_v25  ;;  %v4323_v63 = vadd.f32 %v10688_v15, %v10085_v11  ;;  %v2533_v11 = vld [vmem:[%s9224_s27 + $0x3d8] sm:$0xff] }
 0x324   : > { %v7163_v53 = vsel %vm5814_vm6, %v6915_v2, %v7162_v58  ;;  %v6408_v29 = vadd.f32 %v6407_v36, %v6406_v32  ;;  %v6402_v38 = vrot.slane %v6401_v56, 1  ;;  %v3480_v40 = vcombine.high %v3470_v39, %v3470_v39 }
 0x325   : > { %v4585_v17 = vmul.f32 %v10706_v27, %v4450_v4  ;;  %v6411_v0 = vsel %vm1895_vm0, %v4450_v4, 0.0  ;;  %v10811_v55 = vadd.f32 %v3973_v22, %v2660_v45  ;;  %v4451_v25 = vmax.f32 %v4323_v63, 0.0 }
 0x326   : > { %v6409_v5 = vrot.slane %v6408_v29, 1  ;;  %v6412_v3 = vrot.slane %v6411_v0, 4  ;;  %v6403_v32 = vadd.f32 %v6402_v38, %v6401_v56  ;;  %v2405_v28 = vadd.f32 %v8670_v51, %v10719_v12  ;;  %v2534_v56 = vld [vmem:[%s9224_s27 + $0x3e0] sm:$0xff] }
 0x327   : > { %v4843_v31 = vsel %vm1895_vm0, %v4585_v17, 0.0  ;;  %v3433_v34 = vcombine.high %v10749_v35, %v10749_v35  ;;  %v4586_v62 = vmul.f32 %v10706_v27, %v4451_v25  ;;  %v6418_v58 = vsel %vm1895_vm0, %v4451_v25, 0.0 }
 0x328   : > { %v6410_v48 = vadd.f32 %v6409_v5, %v6408_v29  ;;  %v6413_v39 = vadd.f32 %v6412_v3, %v6411_v0  ;;  %4844 = vadd.xlane.f32.xlu0 %v4843_v31  ;;  %v6916_v2 = vmul.f32 0.125, %v6403_v32  ;;  %v6419_v36 = vrot.slane %v6418_v58, 4  ;;  %v10827_v29 = vpop.xlane.xlu0 %4664 }
 0x329   : > { %v3977_v22 = vrot.slane %v3480_v40, %v12234_v47  ;;  %v3447_v45 = vrot.slane %v3433_v34, %v12221_v14  ;;  %v4846_v12 = vsel %vm1895_vm0, %v4586_v62, 0.0  ;;  %v2661_v63 = vmul.f32 %v2533_v11, %v2405_v28  ;;  %v10833_v40 = vpop.xlane.xlu1 %4667 }
 0x32a   : > { %v6414_v4 = vrot.slane %v6413_v39, 2  ;;  %v2406_v35 = vadd.f32 %v8670_v51, %v10722_v44  ;;  %v7164_v38 = vsel %vm5816_vm7, %v6916_v2, %v7163_v53  ;;  %v6917_v17 = vmul.f32 0.125, %v6410_v48  ;;  %4847 = vadd.xlane.f32.xlu1 %v4846_v12 }
 0x32b   : > { %v6420_v0 = vadd.f32 %v6419_v36, %v6418_v58  ;;  %v3463_v5 = vrot.slane %v3447_v45, %v12221_v14  ;;  %7244 = vst.msk [vmem:[%s9613_s15 + $0x38] sm:$0xff] %vm1895_vm0, %v7164_v38  ;;  %v4324_v44 = vadd.f32 %v10688_v15, %v10104_v26  ;;  %v4325_v53 = vadd.f32 %v10688_v15, %v10119_v33 }
 0x32c   : > { %v6415_v3 = vadd.f32 %v6414_v4, %v6413_v39  ;;  %v2662_v25 = vmul.f32 %v2534_v56, %v2406_v35  ;;  %v3449_v11 = vcombine.high %v3447_v45, %v3447_v45  ;;  %v2407_v28 = vadd.f32 %v8670_v51, %v10741_v61  ;;  %v2535_v39 = vld [vmem:[%s9224_s27 + $0x3e8] sm:$0xff]  ;;  %v10853_v61 = vpop.xlane.xlu0 %4670 }
 0x32d   : > { %v6421_v32 = vrot.slane %v6420_v0, 2  ;;  %v3981_v31 = vrot.slane %v3463_v5, %v12234_v47  ;;  %v10844_v48 = vadd.f32 %v3977_v22, %v2661_v63  ;;  %v4452_v62 = vmax.f32 %v4324_v44, 0.0 }
 0x32e   : > { %v6416_v34 = vrot.slane %v6415_v3, 1  ;;  %v4453_v58 = vmax.f32 %v4325_v53, 0.0  ;;  %v3477_v26 = vrot.slane %v3449_v11, %v12221_v14  ;;  %v3479_v56 = vcombine.high %v3463_v5, %v3463_v5 }
 0x32f   : > { %v6422_v2 = vadd.f32 %v6421_v32, %v6420_v0  ;;  %v10847_v36 = vadd.f32 %v3981_v31, %v2662_v25  ;;  %v4587_v4 = vmul.f32 %v10706_v27, %v4452_v62  ;;  %v6425_v45 = vsel %vm1895_vm0, %v4452_v62, 0.0  ;;  %v10856_v0 = vpop.xlane.xlu1 %4673  ;;  %v2536_v31 = vld [vmem:[%s9224_s27 + $0x3f0] sm:$0xff] }
 0x330   : > { %v6417_v33 = vadd.f32 %v6416_v34, %v6415_v3  ;;  %v4588_v12 = vmul.f32 %v10706_v27, %v4453_v58  ;;  %v6426_v63 = vrot.slane %v6425_v45, 4  ;;  %v6432_v35 = vsel %vm1895_vm0, %v4453_v58, 0.0 }
 0x331   : > { %v6423_v22 = vrot.slane %v6422_v2, 1  ;;  %v2663_v38 = vmul.f32 %v2535_v39, %v2407_v28  ;;  %v4849_v5 = vsel %vm1895_vm0, %v4587_v4, 0.0  ;;  %v6433_v25 = vrot.slane %v6432_v35, 4 }
 0x332   : > { %v6918_v14 = vmul.f32 0.125, %v6417_v33  ;;  %v4852_v3 = vsel %vm1895_vm0, %v4588_v12, 0.0  ;;  %v6427_v53 = vadd.f32 %v6426_v63, %v6425_v45  ;;  %4850 = vadd.xlane.f32.xlu0 %v4849_v5  ;;  %v3985_v32 = vrot.slane %v3477_v26, %v12234_v47  ;;  %v10875_v63 = vpop.xlane.xlu0 %4676  ;;  %v2537_v5 = vld [vmem:[%s9224_s27 + $0x3f8] sm:$0xff] }
 0x333   : > { %v6424_v44 = vadd.f32 %v6423_v22, %v6422_v2  ;;  %4853 = vadd.xlane.f32.xlu1 %v4852_v3  ;;  %v10863_v11 = vstv %s10831_s19  ;;  %v6434_v28 = vadd.f32 %v6433_v25, %v6432_v35  ;;  %v3989_v62 = vrot.slane %v3479_v56, %v12234_v47  ;;  %v10880_v3 = vpop.xlane.xlu1 %4679 }
 0x334   : > { %v7165_v34 = vsel %vm5804_vm1, %v6918_v14, %v6917_v17  ;;  %v2408_v58 = vadd.f32 %v8670_v51, %v10745_v9  ;;  %v6428_v33 = vrot.slane %v6427_v53, 2  ;;  %v4326_v2 = vadd.f32 %v10688_v15, %v10126_v7 }
 0x335   : > { %v6919_v39 = vmul.f32 0.125, %v6424_v44  ;;  %v4327_v4 = vadd.f32 %v10688_v15, %v10129_v54  ;;  %v6435_v45 = vrot.slane %v6434_v28, 2  ;;  %v3481_v22 = vcombine.high %v3477_v26, %v3477_v26 }
 0x336   : > { %v2664_v12 = vmul.f32 %v2536_v31, %v2408_v58  ;;  %v2409_v17 = vadd.f32 %v8670_v51, %v10765_v52  ;;  %v6429_v56 = vadd.f32 %v6428_v33, %v6427_v53  ;;  %v10877_v35 = vadd.f32 %v3985_v32, %v2663_v38 }
 0x337   : > { %v4454_v9 = vmax.f32 %v4326_v2, 0.0  ;;  %v4455_v14 = vmax.f32 %v4327_v4, 0.0  ;;  %v7166_v7 = vsel %vm5806_vm2, %v6919_v39, %v7165_v34  ;;  %v6436_v25 = vadd.f32 %v6435_v45, %v6434_v28  ;;  %v10894_v4 = vpop.xlane.xlu0 %4682 }
 0x338   : > { %v10883_v54 = vadd.f32 %v3989_v62, %v2664_v12  ;;  %v3993_v26 = vrot.slane %v3481_v22, %v12234_v47  ;;  %v6430_v44 = vrot.slane %v6429_v56, 1  ;;  %v2665_v58 = vmul.f32 %v2537_v5, %v2409_v17 }
 0x339   : > { %v4589_v51 = vmul.f32 %v10706_v27, %v4454_v9  ;;  %v6439_v52 = vsel %vm1895_vm0, %v4454_v9, 0.0  ;;  %v4590_v38 = vmul.f32 %v10706_v27, %v4455_v14  ;;  %v6437_v53 = vrot.slane %v6436_v25, 1 }
 0x33a   : > { %v6440_v32 = vrot.slane %v6439_v52, 4  ;;  %v6446_v31 = vsel %vm1895_vm0, %v4455_v14, 0.0  ;;  %v6431_v33 = vadd.f32 %v6430_v44, %v6429_v56  ;;  %v5034_v2 = vadd.f32 %v10863_v11, %v10772_v1  ;;  %v10900_v56 = vpop.xlane.xlu1 %4685  ;;  %v12569_v44 = vld [vmem:[#allocation5_spill] sm:$0xff] }
 0x33b   : > { %v4855_v34 = vsel %vm1895_vm0, %v4589_v51, 0.0  ;;  %v4858_v28 = vsel %vm1895_vm0, %v4590_v38, 0.0  ;;  %v6447_v62 = vrot.slane %v6446_v31, 4  ;;  %v6438_v39 = vadd.f32 %v6437_v53, %v6436_v25 }
 0x33c   : > { %v6441_v47 = vadd.f32 %v6440_v32, %v6439_v52  ;;  %4856 = vadd.xlane.f32.xlu0 %v4855_v34  ;;  %4859 = vadd.xlane.f32.xlu1 %v4858_v28  ;;  %v6920_v45 = vmul.f32 0.125, %v6431_v33  ;;  %v4328_v22 = vadd.f32 %v10688_v15, %v10149_v10  ;;  %v4329_v17 = vadd.f32 %v10688_v15, %v10154_v41 }
 0x33d   : > { %v6448_v12 = vadd.f32 %v6447_v62, %v6446_v31  ;;  %v6921_v9 = vmul.f32 0.125, %v6438_v39  ;;  %v10902_v5 = vadd.f32 %v3993_v26, %v2665_v58  ;;  %v5035_v25 = vadd.f32 %v10863_v11, %v10784_v8 }
 0x33e   : > { %v6442_v14 = vrot.slane %v6441_v47, 2  ;;  %v5295_v51 = vrot.slane %v5034_v2, %v12569_v44  ;;  %v4456_v52 = vmax.f32 %v4328_v22, 0.0  ;;  %v4457_v38 = vmax.f32 %v4329_v17, 0.0 }
 0x33f   : > { %v6449_v1 = vrot.slane %v6448_v12, 2  ;;  %v7167_v53 = vsel %vm5808_vm3, %v6920_v45, %v7166_v7  ;;  %v5299_v32 = vrot.slane %v5035_v25, %v12569_v44  ;;  %v5036_v41 = vadd.f32 %v10863_v11, %v10788_v42  ;;  %v10916_v7 = vpop.xlane.xlu0 %4688  ;;  %v10920_v45 = vpop.xlane.xlu1 %4691 }
 0x340   : > { %v6443_v10 = vadd.f32 %v6442_v14, %v6441_v47  ;;  %v4591_v26 = vmul.f32 %v10706_v27, %v4456_v52  ;;  %v6453_v58 = vsel %vm1895_vm0, %v4456_v52, 0.0  ;;  %v4592_v8 = vmul.f32 %v10706_v27, %v4457_v38 }
 0x341   : > { %v6450_v31 = vadd.f32 %v6449_v1, %v6448_v12  ;;  %v6454_v34 = vrot.slane %v6453_v58, 4  ;;  %v6460_v28 = vsel %vm1895_vm0, %v4457_v38, 0.0  ;;  %v5805_v62 = vsel %vm5804_vm1, %v5299_v32, %v5295_v51 }
 0x342   : > { %v6444_v33 = vrot.slane %v6443_v10, 1  ;;  %v4861_v47 = vsel %vm1895_vm0, %v4591_v26, 0.0  ;;  %v4864_v42 = vsel %vm1895_vm0, %v4592_v8, 0.0  ;;  %v6461_v2 = vrot.slane %v6460_v28, 4 }
 0x343   : > { %v6451_v39 = vrot.slane %v6450_v31, 1  ;;  %v6455_v22 = vadd.f32 %v6454_v34, %v6453_v58  ;;  %4862 = vadd.xlane.f32.xlu0 %v4861_v47  ;;  %4865 = vadd.xlane.f32.xlu1 %v4864_v42  ;;  %v5303_v17 = vrot.slane %v5036_v41, %v12569_v44  ;;  %v4330_v1 = vadd.f32 %v10688_v15, %v10178_v19 }
 0x344   : > { %v6445_v12 = vadd.f32 %v6444_v33, %v6443_v10  ;;  %v6462_v25 = vadd.f32 %v6461_v2, %v6460_v28  ;;  %v4331_v51 = vadd.f32 %v10688_v15, %v10182_v43  ;;  %v7168_v52 = vsel %vm5810_vm4, %v6921_v9, %v7167_v53  ;;  %v10934_v43 = vpop.xlane.xlu0 %4694 }
 0x345   : > { %v6452_v14 = vadd.f32 %v6451_v39, %v6450_v31  ;;  %v6456_v32 = vrot.slane %v6455_v22, 2  ;;  %v5037_v10 = vadd.f32 %v10863_v11, %v10805_v60  ;;  %v5807_v58 = vsel %vm5806_vm2, %v5303_v17, %v5805_v62  ;;  %v10939_v39 = vpop.xlane.xlu1 %4697 }
 0x346   : > { %v6922_v38 = vmul.f32 0.125, %v6445_v12  ;;  %v6463_v26 = vrot.slane %v6462_v25, 2  ;;  %v4458_v8 = vmax.f32 %v4330_v1, 0.0  ;;  %v4459_v41 = vmax.f32 %v4331_v51, 0.0 }
 0x347   : > { %v6923_v31 = vmul.f32 0.125, %v6452_v14  ;;  %v6457_v33 = vadd.f32 %v6456_v32, %v6455_v22  ;;  %v5307_v34 = vrot.slane %v5037_v10, %v12569_v44  ;;  %v5038_v19 = vadd.f32 %v10863_v11, %v10809_v16 }
 0x348   : > { %v7169_v9 = vsel %vm5812_vm5, %v6922_v38, %v7168_v52  ;;  %v6464_v53 = vadd.f32 %v6463_v26, %v6462_v25  ;;  %v4593_v28 = vmul.f32 %v10706_v27, %v4458_v8  ;;  %v6467_v60 = vsel %vm1895_vm0, %v4458_v8, 0.0 }
 0x349   : > { %v6458_v62 = vrot.slane %v6457_v33, 1  ;;  %v6468_v47 = vrot.slane %v6467_v60, 4  ;;  %v4594_v42 = vmul.f32 %v10706_v27, %v4459_v41  ;;  %v6474_v2 = vsel %vm1895_vm0, %v4459_v41, 0.0 }
 0x34a   : > { %v6465_v12 = vrot.slane %v6464_v53, 1  ;;  %v4867_v16 = vsel %vm1895_vm0, %v4593_v28, 0.0  ;;  %v6475_v22 = vrot.slane %v6474_v2, 4  ;;  %v5809_v17 = vsel %vm5808_vm3, %v5307_v34, %v5807_v58  ;;  %v10957_v28 = vpop.xlane.xlu1 %4703 }
 0x34b   : > { %v6459_v14 = vadd.f32 %v6458_v62, %v6457_v33  ;;  %v6469_v25 = vadd.f32 %v6468_v47, %v6467_v60  ;;  %4868 = vadd.xlane.f32.xlu0 %v4867_v16  ;;  %v4870_v1 = vsel %vm1895_vm0, %v4594_v42, 0.0  ;;  %v5311_v51 = vrot.slane %v5038_v19, %v12569_v44  ;;  %v10954_v33 = vpop.xlane.xlu0 %4700 }
 0x34c   : > { %v7170_v52 = vsel %vm5814_vm6, %v6923_v31, %v7169_v9  ;;  %v6476_v38 = vadd.f32 %v6475_v22, %v6474_v2  ;;  %4871 = vadd.xlane.f32.xlu1 %v4870_v1  ;;  %v4332_v32 = vadd.f32 %v10688_v15, %v10194_v13  ;;  %v4333_v10 = vadd.f32 %v10688_v15, %v10199_v30 }
 0x34d   : > { %v6924_v26 = vmul.f32 0.125, %v6459_v14  ;;  %v6466_v58 = vadd.f32 %v6465_v12, %v6464_v53  ;;  %v6470_v8 = vrot.slane %v6469_v25, 2  ;;  %v5039_v41 = vadd.f32 %v10863_v11, %v10827_v29 }
 0x34e   : > { %v6477_v34 = vrot.slane %v6476_v38, 2  ;;  %v5811_v31 = vsel %vm5810_vm4, %v5311_v51, %v5809_v17  ;;  %v4460_v19 = vmax.f32 %v4332_v32, 0.0  ;;  %v4461_v9 = vmax.f32 %v4333_v10, 0.0 }
 0x34f   : > { %v7171_v13 = vsel %vm5816_vm7, %v6924_v26, %v7170_v52  ;;  %v6471_v60 = vadd.f32 %v6470_v8, %v6469_v25  ;;  %v5315_v30 = vrot.slane %v5039_v41, %v12569_v44  ;;  %v5040_v53 = vadd.f32 %v10863_v11, %v10833_v40  ;;  %v10979_v41 = vpop.xlane.xlu1 %4709 }
 0x350   : > { %7245 = vst.msk [vmem:[%s9613_s15 + $0x40] sm:$0xff] %vm1895_vm0, %v7171_v13  ;;  %v6478_v29 = vadd.f32 %v6477_v34, %v6476_v38  ;;  %v4595_v62 = vmul.f32 %v10706_v27, %v4460_v19  ;;  %v6481_v47 = vsel %vm1895_vm0, %v4460_v19, 0.0  ;;  %v4596_v42 = vmul.f32 %v10706_v27, %v4461_v9  ;;  %v10973_v38 = vpop.xlane.xlu0 %4706 }
 0x351   : > { %v6472_v2 = vrot.slane %v6471_v60, 1  ;;  %v6482_v12 = vrot.slane %v6481_v47, 4  ;;  %v6488_v16 = vsel %vm1895_vm0, %v4461_v9, 0.0  ;;  %v5813_v22 = vsel %vm5812_vm5, %v5315_v30, %v5811_v31 }
 0x352   : > { %v6479_v17 = vrot.slane %v6478_v29, 1  ;;  %v4873_v14 = vsel %vm1895_vm0, %v4595_v62, 0.0  ;;  %v4876_v40 = vsel %vm1895_vm0, %v4596_v42, 0.0  ;;  %v6489_v25 = vrot.slane %v6488_v16, 4 }
 0x353   : > { %v6473_v1 = vadd.f32 %v6472_v2, %v6471_v60  ;;  %v6483_v51 = vadd.f32 %v6482_v12, %v6481_v47  ;;  %4874 = vadd.xlane.f32.xlu0 %v4873_v14  ;;  %4877 = vadd.xlane.f32.xlu1 %v4876_v40  ;;  %v5319_v52 = vrot.slane %v5040_v53, %v12569_v44  ;;  %v6925_v34 = vmul.f32 0.125, %v6466_v58 }
 0x354   : > { %v6480_v32 = vadd.f32 %v6479_v17, %v6478_v29  ;;  %v6490_v10 = vadd.f32 %v6489_v25, %v6488_v16  ;;  %v4334_v26 = vadd.f32 %v10688_v15, %v10214_v18  ;;  %v4335_v8 = vadd.f32 %v10688_v15, %v10222_v37  ;;  %v10998_v17 = vpop.xlane.xlu0 %4712 }
 0x355   : > { %v6926_v31 = vmul.f32 0.125, %v6473_v1  ;;  %v6484_v19 = vrot.slane %v6483_v51, 2  ;;  %v5041_v9 = vadd.f32 %v10863_v11, %v10853_v61  ;;  %v5815_v60 = vsel %vm5814_vm6, %v5319_v52, %v5813_v22 }
 0x356   : > { %v6491_v13 = vrot.slane %v6490_v10, 2  ;;  %v4462_v30 = vmax.f32 %v4334_v26, 0.0  ;;  %v4463_v53 = vmax.f32 %v4335_v8, 0.0  ;;  %v6927_v18 = vmul.f32 0.125, %v6480_v32 }
 0x357   : > { %v7172_v29 = vsel %vm5804_vm1, %v6926_v31, %v6925_v34  ;;  %v6485_v62 = vadd.f32 %v6484_v19, %v6483_v51  ;;  %v5323_v37 = vrot.slane %v5041_v9, %v12569_v44  ;;  %v5042_v61 = vadd.f32 %v10863_v11, %v10856_v0  ;;  %v11002_v51 = vpop.xlane.xlu1 %4715 }
 0x358   : > { %v6492_v47 = vadd.f32 %v6491_v13, %v6490_v10  ;;  %v4597_v42 = vmul.f32 %v10706_v27, %v4462_v30  ;;  %v6495_v58 = vsel %vm1895_vm0, %v4462_v30, 0.0  ;;  %v4598_v16 = vmul.f32 %v10706_v27, %v4463_v53 }
 0x359   : > { %v6486_v2 = vrot.slane %v6485_v62, 1  ;;  %v6496_v12 = vrot.slane %v6495_v58, 4  ;;  %v6502_v22 = vsel %vm1895_vm0, %v4463_v53, 0.0  ;;  %v5817_v1 = vsel %vm5816_vm7, %v5323_v37, %v5815_v60 }
 0x35a   : > { %v6493_v14 = vrot.slane %v6492_v47, 1  ;;  %v4879_v40 = vsel %vm1895_vm0, %v4597_v42, 0.0  ;;  %v6503_v25 = vrot.slane %v6502_v22, 4  ;;  %v7173_v52 = vsel %vm5806_vm2, %v6927_v18, %v7172_v29  ;;  %5940 = vst.msk [vmem:[%s10992_s12] sm:$0xff] %vm5939_vm8, %v5817_v1 }
 0x35b   : > { %v6487_v0 = vadd.f32 %v6486_v2, %v6485_v62  ;;  %v6497_v32 = vadd.f32 %v6496_v12, %v6495_v58  ;;  %4880 = vadd.xlane.f32.xlu0 %v4879_v40  ;;  %v4882_v10 = vsel %vm1895_vm0, %v4598_v16, 0.0  ;;  %v4336_v34 = vadd.f32 %v10688_v15, %v10243_v57  ;;  %v11024_v2 = vpop.xlane.xlu1 %4721 }
 0x35c   : > { %v6494_v26 = vadd.f32 %v6493_v14, %v6492_v47  ;;  %v6504_v8 = vadd.f32 %v6503_v25, %v6502_v22  ;;  %4883 = vadd.xlane.f32.xlu1 %v4882_v10  ;;  %v4337_v31 = vadd.f32 %v10688_v15, %v10253_v49  ;;  %v5043_v13 = vadd.f32 %v10863_v11, %v10875_v63  ;;  %v11019_v49 = vpop.xlane.xlu0 %4718 }
 0x35d   : > { %v6928_v19 = vmul.f32 0.125, %v6487_v0  ;;  %v6498_v9 = vrot.slane %v6497_v32, 2  ;;  %v5044_v60 = vadd.f32 %v10863_v11, %v10880_v3  ;;  %v4464_v29 = vmax.f32 %v4336_v34, 0.0 }
 0x35e   : > { %v6929_v30 = vmul.f32 0.125, %v6494_v26  ;;  %v6505_v53 = vrot.slane %v6504_v8, 2  ;;  %v4465_v18 = vmax.f32 %v4337_v31, 0.0  ;;  %v5327_v57 = vrot.slane %v5042_v61, %v12569_v44 }
 0x35f   : > { %v7174_v62 = vsel %vm5808_vm3, %v6928_v19, %v7173_v52  ;;  %v6499_v37 = vadd.f32 %v6498_v9, %v6497_v32  ;;  %v5331_v47 = vrot.slane %v5043_v13, %v12569_v44  ;;  %v4599_v58 = vmul.f32 %v10706_v27, %v4464_v29 }
 0x360   : > { %v6506_v42 = vadd.f32 %v6505_v53, %v6504_v8  ;;  %v6509_v63 = vsel %vm1895_vm0, %v4464_v29, 0.0  ;;  %v5335_v3 = vrot.slane %v5044_v60, %v12569_v44  ;;  %v4600_v22 = vmul.f32 %v10706_v27, %v4465_v18 }
 0x361   : > { %v6500_v12 = vrot.slane %v6499_v37, 1  ;;  %v6510_v16 = vrot.slane %v6509_v63, 4  ;;  %v6516_v14 = vsel %vm1895_vm0, %v4465_v18, 0.0  ;;  %v7175_v61 = vsel %vm5810_vm4, %v6929_v30, %v7174_v62  ;;  %v11040_v30 = vpop.xlane.xlu0 %4724 }
 0x362   : > { %v6507_v40 = vrot.slane %v6506_v42, 1  ;;  %v4885_v25 = vsel %vm1895_vm0, %v4599_v58, 0.0  ;;  %v6517_v1 = vrot.slane %v6516_v14, 4  ;;  %v4888_v32 = vsel %vm1895_vm0, %v4600_v22, 0.0 }
 0x363   : > { %v6501_v52 = vadd.f32 %v6500_v12, %v6499_v37  ;;  %v6511_v0 = vadd.f32 %v6510_v16, %v6509_v63  ;;  %4886 = vadd.xlane.f32.xlu0 %v4885_v25  ;;  %v5818_v10 = vsel %vm5804_vm1, %v5331_v47, %v5327_v57  ;;  %4889 = vadd.xlane.f32.xlu1 %v4888_v32  ;;  %v11043_v37 = vpop.xlane.xlu1 %4727 }
 0x364   : > { %v6508_v26 = vadd.f32 %v6507_v40, %v6506_v42  ;;  %v6518_v8 = vadd.f32 %v6517_v1, %v6516_v14  ;;  %v4338_v34 = vadd.f32 %v10688_v15, %v10258_v6  ;;  %v4339_v31 = vadd.f32 %v10688_v15, %v10266_v21 }
 0x365   : > { %v6930_v19 = vmul.f32 0.125, %v6501_v52  ;;  %v6512_v9 = vrot.slane %v6511_v0, 2  ;;  %v5045_v13 = vadd.f32 %v10863_v11, %v10894_v4  ;;  %v5046_v60 = vadd.f32 %v10863_v11, %v10900_v56  ;;  %v11056_v32 = vpop.xlane.xlu0 %4730 }
 0x366   : > { %v6519_v53 = vrot.slane %v6518_v8, 2  ;;  %v5819_v29 = vsel %vm5806_vm2, %v5335_v3, %v5818_v10  ;;  %v4466_v18 = vmax.f32 %v4338_v34, 0.0  ;;  %v4467_v62 = vmax.f32 %v4339_v31, 0.0 }
 0x367   : > { %v7176_v6 = vsel %vm5812_vm5, %v6930_v19, %v7175_v61  ;;  %v6931_v21 = vmul.f32 0.125, %v6508_v26  ;;  %v6513_v57 = vadd.f32 %v6512_v9, %v6511_v0  ;;  %v5339_v47 = vrot.slane %v5045_v13, %v12569_v44  ;;  %v11063_v31 = vpop.xlane.xlu1 %4733 }
 0x368   : > { %v6520_v42 = vadd.f32 %v6519_v53, %v6518_v8  ;;  %v4601_v4 = vmul.f32 %v10706_v27, %v4466_v18  ;;  %v6523_v56 = vsel %vm1895_vm0, %v4466_v18, 0.0  ;;  %v5343_v58 = vrot.slane %v5046_v60, %v12569_v44 }
 0x369   : > { %v6514_v63 = vrot.slane %v6513_v57, 1  ;;  %v6524_v12 = vrot.slane %v6523_v56, 4  ;;  %v4602_v3 = vmul.f32 %v10706_v27, %v4467_v62  ;;  %v6530_v16 = vsel %vm1895_vm0, %v4467_v62, 0.0 }
 0x36a   : > { %v6521_v22 = vrot.slane %v6520_v42, 1  ;;  %v4891_v14 = vsel %vm1895_vm0, %v4601_v4, 0.0  ;;  %v6531_v61 = vrot.slane %v6530_v16, 4  ;;  %v5820_v40 = vsel %vm5808_vm3, %v5339_v47, %v5819_v29 }
 0x36b   : > { %v7177_v25 = vsel %vm5814_vm6, %v6931_v21, %v7176_v6  ;;  %v6515_v1 = vadd.f32 %v6514_v63, %v6513_v57  ;;  %v6525_v52 = vadd.f32 %v6524_v12, %v6523_v56  ;;  %4892 = vadd.xlane.f32.xlu0 %v4891_v14  ;;  %v4894_v0 = vsel %vm1895_vm0, %v4602_v3, 0.0 }
 0x36c   : > { %v6532_v10 = vadd.f32 %v6531_v61, %v6530_v16  ;;  %4895 = vadd.xlane.f32.xlu1 %v4894_v0  ;;  %v5821_v26 = vsel %vm5810_vm4, %v5343_v58, %v5820_v40  ;;  %v4340_v8 = vadd.f32 %v10688_v15, %v10274_v46  ;;  %v4341_v34 = vadd.f32 %v10688_v15, %v10280_v23  ;;  %v11079_v58 = vpop.xlane.xlu0 %4736  ;;  %v12570_v0 = vld [vmem:[#allocation54_spill] sm:$0xff] }
 0x36d   : > { %v6932_v19 = vmul.f32 0.125, %v6515_v1  ;;  %v6526_v9 = vrot.slane %v6525_v52, 2  ;;  %v5047_v13 = vadd.f32 %v10863_v11, %v10916_v7  ;;  %v5048_v60 = vadd.f32 %v10863_v11, %v10920_v45 }
 0x36e   : > { %v6522_v53 = vadd.f32 %v6521_v22, %v6520_v42  ;;  %v6533_v29 = vrot.slane %v6532_v10, 2  ;;  %v4468_v18 = vmax.f32 %v4340_v8, 0.0  ;;  %v4469_v62 = vmax.f32 %v4341_v34, 0.0  ;;  %v11083_v22 = vpop.xlane.xlu1 %4739 }
 0x36f   : > { %v7178_v6 = vsel %vm5816_vm7, %v6932_v19, %v7177_v25  ;;  %v6527_v46 = vadd.f32 %v6526_v9, %v6525_v52  ;;  %v5347_v21 = vrot.slane %v5047_v13, %v12569_v44  ;;  %v5351_v23 = vrot.slane %v5048_v60, %v12569_v44  ;;  %v11089_v52 = vld [vmem:[%s12074_s7] ss:$0 sm:$0xff] }
 0x370   : > { %7246 = vst.msk [vmem:[%s9613_s15 + $0x48] sm:$0xff] %vm1895_vm0, %v7178_v6  ;;  %v6534_v15 = vadd.f32 %v6533_v29, %v6532_v10  ;;  %v4603_v57 = vmul.f32 %v10706_v27, %v4468_v18  ;;  %v6537_v7 = vsel %vm1895_vm0, %v4468_v18, 0.0  ;;  %v4604_v45 = vmul.f32 %v10706_v27, %v4469_v62 }
 0x371   : > { %v6528_v47 = vrot.slane %v6527_v46, 1  ;;  %v6538_v42 = vrot.slane %v6537_v7, 4  ;;  %v6544_v4 = vsel %vm1895_vm0, %v4469_v62, 0.0  ;;  %v5822_v56 = vsel %vm5812_vm5, %v5347_v21, %v5821_v26  ;;  %v12571_v26 = vld [vmem:[#allocation67_spill] sm:$0xff] }
 0x372   : > { %v6535_v63 = vrot.slane %v6534_v15, 1  ;;  %v4897_v12 = vsel %vm1895_vm0, %v4603_v57, 0.0  ;;  %v4900_v3 = vsel %vm1895_vm0, %v4604_v45, 0.0  ;;  %v6545_v16 = vrot.slane %v6544_v4, 4  ;;  %v11112_v45 = vpop.xlane.xlu1 %4745 }
 0x373   : > { %v6933_v14 = vmul.f32 0.125, %v6522_v53  ;;  %v6529_v61 = vadd.f32 %v6528_v47, %v6527_v46  ;;  %v6539_v40 = vadd.f32 %v6538_v42, %v6537_v7  ;;  %4898 = vadd.xlane.f32.xlu0 %v4897_v12  ;;  %4901 = vadd.xlane.f32.xlu1 %v4900_v3  ;;  %v5823_v27 = vsel %vm5814_vm6, %v5351_v23, %v5822_v56  ;;  %v11102_v23 = vpop.xlane.xlu0 %4742 }
 0x374   : > { %v6536_v25 = vadd.f32 %v6535_v63, %v6534_v15  ;;  %v6546_v1 = vadd.f32 %v6545_v16, %v6544_v4  ;;  %v4342_v10 = vadd.f32 %v11089_v52, %v12570_v0  ;;  %v4343_v8 = vadd.f32 %v11089_v52, %v12571_v26  ;;  %v12573_v26 = vld [vmem:[#allocation23_spill] sm:$0xff] }
 0x375   : > { %v6934_v34 = vmul.f32 0.125, %v6529_v61  ;;  %v6540_v19 = vrot.slane %v6539_v40, 2  ;;  %v5049_v9 = vadd.f32 %v10863_v11, %v10934_v43  ;;  %v5050_v13 = vadd.f32 %v10863_v11, %v10939_v39  ;;  %v11108_v43 = vld [vmem:[%s12075_s8] ss:$0 sm:$0xff] }
 0x376   : > { %v6935_v60 = vmul.f32 0.125, %v6536_v25  ;;  %v6547_v53 = vrot.slane %v6546_v1, 2  ;;  %v4470_v29 = vmax.f32 %v4342_v10, 0.0  ;;  %v4471_v18 = vmax.f32 %v4343_v8, 0.0  ;;  %v12572_v25 = vld [vmem:[#allocation68_spill] sm:$0xff] }
 0x377   : > { %v7179_v62 = vsel %vm5804_vm1, %v6934_v34, %v6933_v14  ;;  %v6541_v6 = vadd.f32 %v6540_v19, %v6539_v40  ;;  %v5355_v46 = vrot.slane %v5049_v9, %v12569_v44  ;;  %v5359_v21 = vrot.slane %v5050_v13, %v12569_v44 }
 0x378   : > { %v7180_v15 = vsel %vm5806_vm2, %v6935_v60, %v7179_v62  ;;  %v6548_v57 = vadd.f32 %v6547_v53, %v6546_v1  ;;  %v4605_v39 = vmul.f32 %v11108_v43, %v4470_v29  ;;  %v6551_v7 = vsel %vm1895_vm0, %v4470_v29, 0.0  ;;  %v11129_v60 = vpop.xlane.xlu0 %4748 }
 0x379   : > { %v6542_v47 = vrot.slane %v6541_v6, 1  ;;  %v6552_v42 = vrot.slane %v6551_v7, 4  ;;  %v4606_v4 = vmul.f32 %v11108_v43, %v4471_v18  ;;  %v6558_v56 = vsel %vm1895_vm0, %v4471_v18, 0.0 }
 0x37a   : > { %v6549_v63 = vrot.slane %v6548_v57, 1  ;;  %v4903_v12 = vsel %vm1895_vm0, %v4605_v39, 0.0  ;;  %v6559_v3 = vrot.slane %v6558_v56, 4  ;;  %v5824_v16 = vsel %vm5816_vm7, %v5355_v46, %v5823_v27 }
 0x37b   : > { %v6543_v14 = vadd.f32 %v6542_v47, %v6541_v6  ;;  %v6553_v61 = vadd.f32 %v6552_v42, %v6551_v7  ;;  %4904 = vadd.xlane.f32.xlu0 %v4903_v12  ;;  %v4906_v40 = vsel %vm1895_vm0, %v4606_v4, 0.0  ;;  %5941 = vst.msk [vmem:[%s10992_s12 + $0x8] sm:$0xff] %vm5939_vm8, %v5824_v16  ;;  %v4345_v1 = vadd.f32 %v11089_v52, %v12572_v25  ;;  %v11132_v6 = vpop.xlane.xlu1 %4751  ;;  %v12574_v25 = vld [vmem:[#allocation72_spill] sm:$0xff] }
 0x37c   : > { %v6550_v0 = vadd.f32 %v6549_v63, %v6548_v57  ;;  %v6560_v10 = vadd.f32 %v6559_v3, %v6558_v56  ;;  %4907 = vadd.xlane.f32.xlu1 %v4906_v40  ;;  %v4346_v8 = vadd.f32 %v11089_v52, %v12573_v26  ;;  %v5051_v34 = vadd.f32 %v10863_v11, %v10954_v33  ;;  %v11148_v26 = vpop.xlane.xlu0 %4754 }
 0x37d   : > { %v6936_v27 = vmul.f32 0.125, %v6543_v14  ;;  %v6554_v19 = vrot.slane %v6553_v61, 2  ;;  %v4473_v9 = vmax.f32 %v4345_v1, 0.0  ;;  %v5052_v13 = vadd.f32 %v10863_v11, %v10957_v28 }
 0x37e   : > { %v6937_v53 = vmul.f32 0.125, %v6550_v0  ;;  %v6561_v29 = vrot.slane %v6560_v10, 2  ;;  %v4474_v18 = vmax.f32 %v4346_v8, 0.0  ;;  %v5363_v62 = vrot.slane %v5051_v34, %v12569_v44  ;;  %v12575_v0 = vld [vmem:[#allocation57_spill] sm:$0xff] }
 0x37f   : > { %v7181_v46 = vsel %vm5808_vm3, %v6936_v27, %v7180_v15  ;;  %v6555_v57 = vadd.f32 %v6554_v19, %v6553_v61  ;;  %v4608_v33 = vmul.f32 %v11108_v43, %v4473_v9  ;;  %v6572_v39 = vsel %vm1895_vm0, %v4473_v9, 0.0  ;;  %v11152_v19 = vpop.xlane.xlu1 %4757 }
 0x380   : > { %v7182_v7 = vsel %vm5810_vm4, %v6937_v53, %v7181_v46  ;;  %v6562_v47 = vadd.f32 %v6561_v29, %v6560_v10  ;;  %v6573_v28 = vrot.slane %v6572_v39, 4  ;;  %v4609_v42 = vmul.f32 %v11108_v43, %v4474_v18 }
 0x381   : > { %v6556_v4 = vrot.slane %v6555_v57, 1  ;;  %v4912_v56 = vsel %vm1895_vm0, %v4608_v33, 0.0  ;;  %v6579_v63 = vsel %vm1895_vm0, %v4474_v18, 0.0  ;;  %v5825_v12 = vsel %vm5804_vm1, %v5363_v62, %v5359_v21 }
 0x382   : > { %v6563_v3 = vrot.slane %v6562_v47, 1  ;;  %v6574_v15 = vadd.f32 %v6573_v28, %v6572_v39  ;;  %4913 = vadd.xlane.f32.xlu0 %v4912_v56  ;;  %v4915_v16 = vsel %vm1895_vm0, %v4609_v42, 0.0  ;;  %v6580_v14 = vrot.slane %v6579_v63, 4 }
 0x383   : > { %v6557_v61 = vadd.f32 %v6556_v4, %v6555_v57  ;;  %4916 = vadd.xlane.f32.xlu1 %v4915_v16  ;;  %v5367_v40 = vrot.slane %v5052_v13, %v12569_v44  ;;  %v4353_v1 = vadd.f32 %v11089_v52, %v12574_v25  ;;  %v4354_v10 = vadd.f32 %v11089_v52, %v12575_v0  ;;  %v11169_v25 = vpop.xlane.xlu1 %4763  ;;  %v12576_v0 = vld [vmem:[#allocation27_spill] sm:$0xff] }
 0x384   : > { %v6564_v8 = vadd.f32 %v6563_v3, %v6562_v47  ;;  %v6575_v21 = vrot.slane %v6574_v15, 2  ;;  %v6581_v34 = vadd.f32 %v6580_v14, %v6579_v63  ;;  %v5053_v27 = vadd.f32 %v10863_v11, %v10973_v38 }
 0x385   : > { %v6938_v9 = vmul.f32 0.125, %v6557_v61  ;;  %v5826_v53 = vsel %vm5806_vm2, %v5367_v40, %v5825_v12  ;;  %v4481_v13 = vmax.f32 %v4353_v1, 0.0  ;;  %v4482_v29 = vmax.f32 %v4354_v10, 0.0 }
 0x386   : > { %v6939_v18 = vmul.f32 0.125, %v6564_v8  ;;  %v6576_v62 = vadd.f32 %v6575_v21, %v6574_v15  ;;  %v6582_v46 = vrot.slane %v6581_v34, 2  ;;  %v5371_v57 = vrot.slane %v5053_v27, %v12569_v44  ;;  %v11167_v15 = vpop.xlane.xlu0 %4760  ;;  %v12577_v8 = vld [vmem:[#allocation61_spill] sm:$0xff] }
 0x387   : > { %v7183_v33 = vsel %vm5812_vm5, %v6938_v9, %v7182_v7  ;;  %v4616_v39 = vmul.f32 %v11108_v43, %v4481_v13  ;;  %v6628_v47 = vsel %vm1895_vm0, %v4481_v13, 0.0  ;;  %v4617_v38 = vmul.f32 %v11108_v43, %v4482_v29 }
 0x388   : > { %v11161_v28 = vsel %vm5814_vm6, %v6939_v18, %v7183_v33  ;;  %v6577_v42 = vrot.slane %v6576_v62, 1  ;;  %v6583_v4 = vadd.f32 %v6582_v46, %v6581_v34  ;;  %v6629_v56 = vrot.slane %v6628_v47, 4 }
 0x389   : > { %v4936_v63 = vsel %vm1895_vm0, %v4616_v39, 0.0  ;;  %v4939_v12 = vsel %vm1895_vm0, %v4617_v38, 0.0  ;;  %v6635_v3 = vsel %vm1895_vm0, %v4482_v29, 0.0  ;;  %v5827_v7 = vsel %vm5808_vm3, %v5371_v57, %v5826_v53 }
 0x38a   : > { %v6578_v16 = vadd.f32 %v6577_v42, %v6576_v62  ;;  %v6584_v14 = vrot.slane %v6583_v4, 1  ;;  %v6630_v61 = vadd.f32 %v6629_v56, %v6628_v47  ;;  %4937 = vadd.xlane.f32.xlu0 %v4936_v63  ;;  %v6636_v40 = vrot.slane %v6635_v3, 4  ;;  %4940 = vadd.xlane.f32.xlu1 %v4939_v12 }
 0x38b   : > { %v5054_v1 = vadd.f32 %v10863_v11, %v10979_v41  ;;  %v4361_v10 = vadd.f32 %v11089_v52, %v12576_v0  ;;  %v4362_v21 = vadd.f32 %v11089_v52, %v12577_v8  ;;  %v5055_v34 = vadd.f32 %v10863_v11, %v10998_v17 }
 0x38c   : > { %v6941_v27 = vmul.f32 0.125, %v6578_v16  ;;  %v6585_v9 = vadd.f32 %v6584_v14, %v6583_v4  ;;  %v6631_v53 = vrot.slane %v6630_v61, 2  ;;  %v6637_v13 = vadd.f32 %v6636_v40, %v6635_v3  ;;  %v11187_v4 = vpop.xlane.xlu0 %4766  ;;  %v11192_v16 = vpop.xlane.xlu1 %4769 }
 0x38d   : > { %v5375_v29 = vrot.slane %v5054_v1, %v12569_v44  ;;  %v4489_v18 = vmax.f32 %v4361_v10, 0.0  ;;  %v4490_v62 = vmax.f32 %v4362_v21, 0.0  ;;  %v5379_v46 = vrot.slane %v5055_v34, %v12569_v44  ;;  %v12578_v21 = vld [vmem:[#allocation29_spill] sm:$0xff] }
 0x38e   : > { %v6942_v41 = vmul.f32 0.125, %v6585_v9  ;;  %v6632_v57 = vadd.f32 %v6631_v53, %v6630_v61  ;;  %v6638_v33 = vrot.slane %v6637_v13, 2  ;;  %v5056_v39 = vadd.f32 %v10863_v11, %v11002_v51 }
 0x38f   : > { %v5828_v47 = vsel %vm5810_vm4, %v5375_v29, %v5827_v7  ;;  %v4624_v17 = vmul.f32 %v11108_v43, %v4489_v18  ;;  %v6684_v38 = vsel %vm1895_vm0, %v4489_v18, 0.0  ;;  %v4625_v42 = vmul.f32 %v11108_v43, %v4490_v62 }
 0x390   : > { %v11190_v56 = vsel %vm5804_vm1, %v6942_v41, %v6941_v27  ;;  %v6633_v63 = vrot.slane %v6632_v57, 1  ;;  %v6639_v12 = vadd.f32 %v6638_v33, %v6637_v13  ;;  %v6685_v3 = vrot.slane %v6684_v38, 4  ;;  %v11207_v33 = vpop.xlane.xlu0 %4772 }
 0x391   : > { %v4960_v51 = vsel %vm1895_vm0, %v4624_v17, 0.0  ;;  %v4963_v7 = vsel %vm1895_vm0, %v4625_v42, 0.0  ;;  %v6691_v14 = vsel %vm1895_vm0, %v4490_v62, 0.0  ;;  %v5829_v61 = vsel %vm5812_vm5, %v5379_v46, %v5828_v47 }
 0x392   : > { %v6634_v40 = vadd.f32 %v6633_v63, %v6632_v57  ;;  %v6640_v1 = vrot.slane %v6639_v12, 1  ;;  %v6686_v0 = vadd.f32 %v6685_v3, %v6684_v38  ;;  %4961 = vadd.xlane.f32.xlu0 %v4960_v51  ;;  %v6692_v10 = vrot.slane %v6691_v14, 4  ;;  %4964 = vadd.xlane.f32.xlu1 %v4963_v7  ;;  %v11211_v38 = vpop.xlane.xlu1 %4775 }
 0x393   : > { %v5383_v8 = vrot.slane %v5056_v39, %v12569_v44  ;;  %v4369_v34 = vadd.f32 %v11089_v52, %v12578_v21  ;;  %v4370_v27 = vadd.f32 %v11089_v52, %v10663_v24  ;;  %v5057_v9 = vadd.f32 %v10863_v11, %v11019_v49 }
 0x394   : > { %v6949_v53 = vmul.f32 0.125, %v6634_v40  ;;  %v6641_v13 = vadd.f32 %v6640_v1, %v6639_v12  ;;  %v6687_v29 = vrot.slane %v6686_v0, 2  ;;  %v6693_v18 = vadd.f32 %v6692_v10, %v6691_v14 }
 0x395   : > { %v5830_v62 = vsel %vm5814_vm6, %v5383_v8, %v5829_v61  ;;  %v4497_v46 = vmax.f32 %v4369_v34, 0.0  ;;  %v4498_v41 = vmax.f32 %v4370_v27, 0.0  ;;  %v5387_v57 = vrot.slane %v5057_v9, %v12569_v44 }
 0x396   : > { %v6950_v39 = vmul.f32 0.125, %v6641_v13  ;;  %v6688_v47 = vadd.f32 %v6687_v29, %v6686_v0  ;;  %v6694_v17 = vrot.slane %v6693_v18, 2  ;;  %v5058_v24 = vadd.f32 %v10863_v11, %v11024_v2  ;;  %v11232_v13 = vpop.xlane.xlu0 %4778 }
 0x397   : > { %v4632_v49 = vmul.f32 %v11108_v43, %v4497_v46  ;;  %v6740_v42 = vsel %vm1895_vm0, %v4497_v46, 0.0  ;;  %v4633_v63 = vmul.f32 %v11108_v43, %v4498_v41  ;;  %v6747_v12 = vsel %vm1895_vm0, %v4498_v41, 0.0  ;;  %v11236_v41 = vpop.xlane.xlu1 %4781 }
 0x398   : > { %v11218_v3 = vsel %vm5804_vm1, %v6950_v39, %v6949_v53  ;;  %v6689_v51 = vrot.slane %v6688_v47, 1  ;;  %v6695_v7 = vadd.f32 %v6694_v17, %v6693_v18  ;;  %v6741_v14 = vrot.slane %v6740_v42, 4 }
 0x399   : > { %v4984_v61 = vsel %vm1895_vm0, %v4632_v49, 0.0  ;;  %v4987_v2 = vsel %vm1895_vm0, %v4633_v63, 0.0  ;;  %v6748_v40 = vrot.slane %v6747_v12, 4  ;;  %v5831_v1 = vsel %vm5816_vm7, %v5387_v57, %v5830_v62 }
 0x39a   : > { %v6690_v0 = vadd.f32 %v6689_v51, %v6688_v47  ;;  %v6696_v10 = vrot.slane %v6695_v7, 1  ;;  %v6742_v8 = vadd.f32 %v6741_v14, %v6740_v42  ;;  %4985 = vadd.xlane.f32.xlu0 %v4984_v61  ;;  %4988 = vadd.xlane.f32.xlu1 %v4987_v2  ;;  %5942 = vst.msk [vmem:[%s10992_s12 + $0x10] sm:$0xff] %vm5939_vm8, %v5831_v1 }
 0x39b   : > { %v5391_v21 = vrot.slane %v5058_v24, %v12569_v44  ;;  %v6749_v34 = vadd.f32 %v6748_v40, %v6747_v12  ;;  %v4377_v27 = vadd.f32 %v11089_v52, %v10798_v20  ;;  %v4378_v9 = vadd.f32 %v11089_v52, %v10801_v59 }
 0x39c   : > { %v5059_v53 = vadd.f32 %v10863_v11, %v11040_v30  ;;  %v6957_v29 = vmul.f32 0.125, %v6690_v0  ;;  %v6697_v18 = vadd.f32 %v6696_v10, %v6695_v7  ;;  %v6743_v62 = vrot.slane %v6742_v8, 2  ;;  %v12579_v30 = vld [vmem:[#allocation55_spill] sm:$0xff]  ;;  %v11251_v10 = vpop.xlane.xlu0 %4784 }
 0x39d   : > { %v5060_v46 = vadd.f32 %v10863_v11, %v11043_v37  ;;  %v6750_v57 = vrot.slane %v6749_v34, 2  ;;  %v4505_v39 = vmax.f32 %v4377_v27, 0.0  ;;  %v4506_v47 = vmax.f32 %v4378_v9, 0.0 }
 0x39e   : > { %v5395_v20 = vrot.slane %v5059_v53, %v12569_v44  ;;  %v6958_v17 = vmul.f32 0.125, %v6697_v18  ;;  %v6744_v59 = vadd.f32 %v6743_v62, %v6742_v8  ;;  %v4347_v49 = vadd.f32 %v11089_v52, %v12579_v30  ;;  %v11254_v53 = vpop.xlane.xlu1 %4787 }
 0x39f   : > { %v5399_v24 = vrot.slane %v5060_v46, %v12569_v44  ;;  %v6751_v42 = vadd.f32 %v6750_v57, %v6749_v34  ;;  %v4640_v63 = vmul.f32 %v11108_v43, %v4505_v39  ;;  %v6796_v12 = vsel %vm1895_vm0, %v4505_v39, 0.0  ;;  %v12580_v46 = vld [vmem:[#allocation58_spill] sm:$0xff] }
 0x3a0   : > { %v4641_v37 = vmul.f32 %v11108_v43, %v4506_v47  ;;  %v11246_v51 = vsel %vm5804_vm1, %v6958_v17, %v6957_v29  ;;  %v6745_v7 = vrot.slane %v6744_v59, 1  ;;  %v6797_v14 = vrot.slane %v6796_v12, 4 }
 0x3a1   : > { %v6803_v61 = vsel %vm1895_vm0, %v4506_v47, 0.0  ;;  %v6752_v2 = vrot.slane %v6751_v42, 1  ;;  %v5008_v40 = vsel %vm1895_vm0, %v4640_v63, 0.0  ;;  %v5832_v27 = vsel %vm5804_vm1, %v5395_v20, %v5391_v21 }
 0x3a2   : > { %v5011_v1 = vsel %vm1895_vm0, %v4641_v37, 0.0  ;;  %v6804_v0 = vrot.slane %v6803_v61, 4  ;;  %v6746_v8 = vadd.f32 %v6745_v7, %v6744_v59  ;;  %v6798_v34 = vadd.f32 %v6797_v14, %v6796_v12  ;;  %5009 = vadd.xlane.f32.xlu0 %v5008_v40 }
 0x3a3   : > { %5012 = vadd.xlane.f32.xlu1 %v5011_v1  ;;  %v4475_v9 = vmax.f32 %v4347_v49, 0.0  ;;  %v6753_v29 = vadd.f32 %v6752_v2, %v6751_v42  ;;  %v5833_v62 = vsel %vm5806_vm2, %v5399_v24, %v5832_v27  ;;  %v4355_v57 = vadd.f32 %v11089_v52, %v12580_v46  ;;  %v11270_v2 = vpop.xlane.xlu0 %4790  ;;  %v12581_v46 = vld [vmem:[#allocation62_spill] sm:$0xff] }
 0x3a4   : > { %v6805_v18 = vadd.f32 %v6804_v0, %v6803_v61  ;;  %v6965_v39 = vmul.f32 0.125, %v6746_v8  ;;  %v6799_v47 = vrot.slane %v6798_v34, 2  ;;  %v5061_v42 = vadd.f32 %v10863_v11, %v11056_v32  ;;  %v11275_v8 = vpop.xlane.xlu1 %4793 }
 0x3a5   : > { %v4610_v17 = vmul.f32 %v11108_v43, %v4475_v9  ;;  %v6586_v59 = vsel %vm1895_vm0, %v4475_v9, 0.0  ;;  %v6966_v30 = vmul.f32 0.125, %v6753_v29  ;;  %v4483_v21 = vmax.f32 %v4355_v57, 0.0 }
 0x3a6   : > { %v6806_v63 = vrot.slane %v6805_v18, 2  ;;  %v6587_v12 = vrot.slane %v6586_v59, 4  ;;  %v6800_v20 = vadd.f32 %v6799_v47, %v6798_v34  ;;  %v5062_v24 = vadd.f32 %v10863_v11, %v11063_v31 }
 0x3a7   : > { %v4918_v49 = vsel %vm1895_vm0, %v4610_v17, 0.0  ;;  %v11267_v37 = vsel %vm5804_vm1, %v6966_v30, %v6965_v39  ;;  %v4618_v61 = vmul.f32 %v11108_v43, %v4483_v21  ;;  %v6642_v1 = vsel %vm1895_vm0, %v4483_v21, 0.0  ;;  %v12582_v39 = vld [vmem:[#allocation65_spill] sm:$0xff] }
 0x3a8   : > { %v6807_v7 = vadd.f32 %v6806_v63, %v6805_v18  ;;  %v6588_v14 = vadd.f32 %v6587_v12, %v6586_v59  ;;  %4919 = vadd.xlane.f32.xlu0 %v4918_v49  ;;  %v6801_v40 = vrot.slane %v6800_v20, 1  ;;  %v5403_v0 = vrot.slane %v5061_v42, %v12569_v44 }
 0x3a9   : > { %v5407_v32 = vrot.slane %v5062_v24, %v12569_v44  ;;  %v4942_v27 = vsel %vm1895_vm0, %v4618_v61, 0.0  ;;  %v6643_v9 = vrot.slane %v6642_v1, 4  ;;  %v4363_v57 = vadd.f32 %v11089_v52, %v12581_v46 }
 0x3aa   : > { %v6808_v31 = vrot.slane %v6807_v7, 1  ;;  %v6589_v34 = vrot.slane %v6588_v14, 2  ;;  %v6802_v29 = vadd.f32 %v6801_v40, %v6800_v20  ;;  %4943 = vadd.xlane.f32.xlu1 %v4942_v27  ;;  %v5834_v18 = vsel %vm5808_vm3, %v5403_v0, %v5833_v62  ;;  %v11288_v40 = vpop.xlane.xlu0 %4796 }
 0x3ab   : > { %v4371_v47 = vadd.f32 %v11089_v52, %v12582_v39  ;;  %v6644_v30 = vadd.f32 %v6643_v9, %v6642_v1  ;;  %v5835_v63 = vsel %vm5810_vm4, %v5407_v32, %v5834_v18  ;;  %v4491_v21 = vmax.f32 %v4363_v57, 0.0  ;;  %v11294_v32 = vpop.xlane.xlu1 %4799 }
 0x3ac   : > { %v6809_v17 = vadd.f32 %v6808_v31, %v6807_v7  ;;  %v6590_v59 = vadd.f32 %v6589_v34, %v6588_v14  ;;  %v6973_v12 = vmul.f32 0.125, %v6802_v29  ;;  %v5063_v20 = vadd.f32 %v10863_v11, %v11079_v58 }
 0x3ad   : > { %v4499_v49 = vmax.f32 %v4371_v47, 0.0  ;;  %v6645_v62 = vrot.slane %v6644_v30, 2  ;;  %v5064_v61 = vadd.f32 %v10863_v11, %v11083_v22  ;;  %v4626_v7 = vmul.f32 %v11108_v43, %v4491_v21 }
 0x3ae   : > { %v6974_v42 = vmul.f32 0.125, %v6809_v17  ;;  %v6591_v24 = vrot.slane %v6590_v59, 1  ;;  %v6698_v14 = vsel %vm1895_vm0, %v4491_v21, 0.0  ;;  %v5411_v18 = vrot.slane %v5063_v20, %v12569_v44 }
 0x3af   : > { %v4634_v1 = vmul.f32 %v11108_v43, %v4499_v49  ;;  %v6754_v0 = vsel %vm1895_vm0, %v4499_v49, 0.0  ;;  %v6646_v34 = vadd.f32 %v6645_v62, %v6644_v30  ;;  %v6699_v27 = vrot.slane %v6698_v14, 4  ;;  %v12583_v30 = vld [vmem:[#allocation70_spill] sm:$0xff]  ;;  %v11313_v62 = vpop.xlane.xlu0 %4802 }
 0x3b0   : > { %v11297_v58 = vsel %vm5804_vm1, %v6974_v42, %v6973_v12  ;;  %v6592_v31 = vadd.f32 %v6591_v24, %v6590_v59  ;;  %v4966_v22 = vsel %vm1895_vm0, %v4626_v7, 0.0  ;;  %v6755_v29 = vrot.slane %v6754_v0, 4 }
 0x3b1   : > { %v4990_v9 = vsel %vm1895_vm0, %v4634_v1, 0.0  ;;  %v6647_v57 = vrot.slane %v6646_v34, 1  ;;  %v6700_v39 = vadd.f32 %v6699_v27, %v6698_v14  ;;  %4967 = vadd.xlane.f32.xlu0 %v4966_v22  ;;  %v5415_v47 = vrot.slane %v5064_v61, %v12569_v44 }
 0x3b2   : > { %v6943_v46 = vmul.f32 0.125, %v6592_v31  ;;  %4991 = vadd.xlane.f32.xlu1 %v4990_v9  ;;  %v6756_v17 = vadd.f32 %v6755_v29, %v6754_v0  ;;  %v5836_v12 = vsel %vm5812_vm5, %v5411_v18, %v5835_v63  ;;  %v4379_v59 = vadd.f32 %v11089_v52, %v10811_v55  ;;  %v11317_v55 = vpop.xlane.xlu1 %4805  ;;  %v12584_v31 = vld [vmem:[#allocation73_spill] sm:$0xff] }
 0x3b3   : > { %v4348_v21 = vadd.f32 %v11089_v52, %v12583_v30  ;;  %v6648_v20 = vadd.f32 %v6647_v57, %v6646_v34  ;;  %v6701_v42 = vrot.slane %v6700_v39, 2  ;;  %v5837_v24 = vsel %vm5814_vm6, %v5415_v47, %v5836_v12 }
 0x3b4   : > { %v11310_v49 = vsel %vm5806_vm2, %v6943_v46, %v11190_v56  ;;  %v6757_v61 = vrot.slane %v6756_v17, 2  ;;  %v4507_v7 = vmax.f32 %v4379_v59, 0.0  ;;  %v5065_v63 = vadd.f32 %v10863_v11, %v11102_v23 }
 0x3b5   : > { %v4476_v14 = vmax.f32 %v4348_v21, 0.0  ;;  %v6951_v1 = vmul.f32 0.125, %v6648_v20  ;;  %v6702_v0 = vadd.f32 %v6701_v42, %v6700_v39  ;;  %v11321_v56 = vadd.f32 %v10863_v11, %v11112_v45 }
 0x3b6   : > { %v4356_v34 = vadd.f32 %v11089_v52, %v12584_v31  ;;  %v6758_v27 = vadd.f32 %v6757_v61, %v6756_v17  ;;  %v4642_v22 = vmul.f32 %v11108_v43, %v4507_v7  ;;  %v6810_v9 = vsel %vm1895_vm0, %v4507_v7, 0.0  ;;  %v12585_v7 = vld [vmem:[#allocation75_spill] sm:$0xff] }
 0x3b7   : > { %v4611_v29 = vmul.f32 %v11108_v43, %v4476_v14  ;;  %v11330_v23 = vsel %vm5806_vm2, %v6951_v1, %v11218_v3  ;;  %v6703_v18 = vrot.slane %v6702_v0, 1  ;;  %v6811_v46 = vrot.slane %v6810_v9, 4  ;;  %v11336_v3 = vpop.xlane.xlu0 %4808  ;;  %v11342_v1 = vpop.xlane.xlu1 %4811 }
 0x3b8   : > { %v6593_v57 = vsel %vm1895_vm0, %v4476_v14, 0.0  ;;  %v6759_v45 = vrot.slane %v6758_v27, 1  ;;  %v5014_v39 = vsel %vm1895_vm0, %v4642_v22, 0.0  ;;  %v5419_v30 = vrot.slane %v5065_v63, %v12569_v44 }
 0x3b9   : > { %v4921_v47 = vsel %vm1895_vm0, %v4611_v29, 0.0  ;;  %v6594_v17 = vrot.slane %v6593_v57, 4  ;;  %v6704_v12 = vadd.f32 %v6703_v18, %v6702_v0  ;;  %v6812_v59 = vadd.f32 %v6811_v46, %v6810_v9  ;;  %5015 = vadd.xlane.f32.xlu0 %v5014_v39 }
 0x3ba   : > { %4922 = vadd.xlane.f32.xlu1 %v4921_v47  ;;  %v4484_v21 = vmax.f32 %v4356_v34, 0.0  ;;  %v6760_v20 = vadd.f32 %v6759_v45, %v6758_v27  ;;  %v5423_v61 = vrot.slane %v11321_v56, %v12569_v44  ;;  %v4364_v14 = vadd.f32 %v11089_v52, %v12585_v7 }
 0x3bb   : > { %v6595_v42 = vadd.f32 %v6594_v17, %v6593_v57  ;;  %v6959_v0 = vmul.f32 0.125, %v6704_v12  ;;  %v6813_v31 = vrot.slane %v6812_v59, 2  ;;  %v5838_v22 = vsel %vm5816_vm7, %v5419_v30, %v5837_v24 }
 0x3bc   : > { %v4619_v9 = vmul.f32 %v11108_v43, %v4484_v21  ;;  %v6967_v63 = vmul.f32 0.125, %v6760_v20  ;;  %5943 = vst.msk [vmem:[%s10992_s12 + $0x18] sm:$0xff] %vm5939_vm8, %v5838_v22  ;;  %v6649_v27 = vsel %vm1895_vm0, %v4484_v21, 0.0  ;;  %v4492_v29 = vmax.f32 %v4364_v14, 0.0  ;;  %v11369_v14 = vpop.xlane.xlu1 %4817 }
 0x3bd   : > { %v6596_v34 = vrot.slane %v6595_v42, 2  ;;  %v11351_v56 = vsel %vm5806_vm2, %v6959_v0, %v11246_v51  ;;  %v6814_v18 = vadd.f32 %v6813_v31, %v6812_v59  ;;  %v6650_v57 = vrot.slane %v6649_v27, 4  ;;  %v11362_v59 = vpop.xlane.xlu0 %4814 }
 0x3be   : > { %v4945_v46 = vsel %vm1895_vm0, %v4619_v9, 0.0  ;;  %v11356_v24 = vsel %vm5806_vm2, %v6967_v63, %v11267_v37  ;;  %v4627_v39 = vmul.f32 %v11108_v43, %v4492_v29  ;;  %v6705_v47 = vsel %vm1895_vm0, %v4492_v29, 0.0 }
 0x3bf   : > { %v6597_v45 = vadd.f32 %v6596_v34, %v6595_v42  ;;  %4946 = vadd.xlane.f32.xlu0 %v4945_v46  ;;  %v6815_v17 = vrot.slane %v6814_v18, 1  ;;  %v6651_v12 = vadd.f32 %v6650_v57, %v6649_v27  ;;  %v6706_v30 = vrot.slane %v6705_v47, 4  ;;  %v12586_v42 = vld [vmem:[#allocation66_spill] sm:$0xff] }
 0x3c0   : > { %v5067_v51 = vadd.f32 %v10863_v11, %v11129_v60  ;;  %v4969_v20 = vsel %vm1895_vm0, %v4627_v39, 0.0  ;;  %v5068_v37 = vadd.f32 %v10863_v11, %v11132_v6  ;;  %v4372_v7 = vadd.f32 %v11089_v52, %v12586_v42  ;;  %v11392_v42 = vpop.xlane.xlu1 %4823 }
 0x3c1   : > { %v6598_v21 = vrot.slane %v6597_v45, 1  ;;  %v6816_v0 = vadd.f32 %v6815_v17, %v6814_v18  ;;  %v6652_v31 = vrot.slane %v6651_v12, 2  ;;  %v6707_v22 = vadd.f32 %v6706_v30, %v6705_v47  ;;  %4970 = vadd.xlane.f32.xlu1 %v4969_v20 }
 0x3c2   : > { %v5427_v9 = vrot.slane %v5067_v51, %v12569_v44  ;;  %v5431_v63 = vrot.slane %v5068_v37, %v12569_v44  ;;  %v4500_v34 = vmax.f32 %v4372_v7, 0.0  ;;  %v4380_v27 = vadd.f32 %v11089_v52, %v10844_v48  ;;  %v11383_v48 = vpop.xlane.xlu0 %4820 }
 0x3c3   : > { %v6599_v60 = vadd.f32 %v6598_v21, %v6597_v45  ;;  %v6975_v29 = vmul.f32 0.125, %v6816_v0  ;;  %v6653_v6 = vadd.f32 %v6652_v31, %v6651_v12  ;;  %v6708_v46 = vrot.slane %v6707_v22, 2 }
 0x3c4   : > { %v5839_v57 = vsel %vm5804_vm1, %v5427_v9, %v5423_v61  ;;  %v4635_v47 = vmul.f32 %v11108_v43, %v4500_v34  ;;  %v6761_v17 = vsel %vm1895_vm0, %v4500_v34, 0.0  ;;  %v4508_v20 = vmax.f32 %v4380_v27, 0.0 }
 0x3c5   : > { %v6944_v39 = vmul.f32 0.125, %v6599_v60  ;;  %v5840_v18 = vsel %vm5806_vm2, %v5431_v63, %v5839_v57  ;;  %v11381_v45 = vsel %vm5806_vm2, %v6975_v29, %v11297_v58  ;;  %v6654_v30 = vrot.slane %v6653_v6, 1  ;;  %v12587_v60 = vld [vmem:[#allocation28_spill] sm:$0xff] }
 0x3c6   : > { %v6709_v51 = vadd.f32 %v6708_v46, %v6707_v22  ;;  %v6762_v21 = vrot.slane %v6761_v17, 4  ;;  %v4993_v61 = vsel %vm1895_vm0, %v4635_v47, 0.0  ;;  %v5069_v37 = vadd.f32 %v10863_v11, %v11148_v26 }
 0x3c7   : > { %v11387_v12 = vsel %vm5808_vm3, %v6944_v39, %v11310_v49  ;;  %v6655_v7 = vadd.f32 %v6654_v30, %v6653_v6  ;;  %4994 = vadd.xlane.f32.xlu0 %v4993_v61  ;;  %v5070_v31 = vadd.f32 %v10863_v11, %v11152_v19  ;;  %v4643_v22 = vmul.f32 %v11108_v43, %v4508_v20 }
 0x3c8   : > { %v6710_v58 = vrot.slane %v6709_v51, 1  ;;  %v6763_v0 = vadd.f32 %v6762_v21, %v6761_v17  ;;  %v6817_v49 = vsel %vm1895_vm0, %v4508_v20, 0.0  ;;  %v5435_v9 = vrot.slane %v5069_v37, %v12569_v44  ;;  %v11408_v21 = vpop.xlane.xlu0 %4826 }
 0x3c9   : > { %v4349_v63 = vadd.f32 %v11089_v52, %v12587_v60  ;;  %v6952_v34 = vmul.f32 0.125, %v6655_v7  ;;  %v6818_v29 = vrot.slane %v6817_v49, 4  ;;  %v5017_v6 = vsel %vm1895_vm0, %v4643_v22, 0.0  ;;  %v11415_v7 = vpop.xlane.xlu1 %4829 }
 0x3ca   : > { %v6711_v26 = vadd.f32 %v6710_v58, %v6709_v51  ;;  %v6764_v27 = vrot.slane %v6763_v0, 2  ;;  %v5841_v46 = vsel %vm5808_vm3, %v5435_v9, %v5840_v18  ;;  %v5439_v57 = vrot.slane %v5070_v31, %v12569_v44  ;;  %5018 = vadd.xlane.f32.xlu1 %v5017_v6  ;;  %v12588_v18 = vld [vmem:[#allocation80_spill] sm:$0xff] }
 0x3cb   : > { %v4477_v19 = vmax.f32 %v4349_v63, 0.0  ;;  %v11406_v39 = vsel %vm5808_vm3, %v6952_v34, %v11330_v23  ;;  %v6819_v30 = vadd.f32 %v6818_v29, %v6817_v49  ;;  %v4357_v37 = vadd.f32 %v11089_v52, %v12588_v18 }
 0x3cc   : > { %v6960_v47 = vmul.f32 0.125, %v6711_v26  ;;  %v6765_v17 = vadd.f32 %v6764_v27, %v6763_v0  ;;  %v5842_v51 = vsel %vm5810_vm4, %v5439_v57, %v5841_v46  ;;  %v5071_v9 = vadd.f32 %v10863_v11, %v11167_v15  ;;  %v12589_v27 = vld [vmem:[#allocation30_spill] sm:$0xff] }
 0x3cd   : > { %v4612_v61 = vmul.f32 %v11108_v43, %v4477_v19  ;;  %v6600_v20 = vsel %vm1895_vm0, %v4477_v19, 0.0  ;;  %v6820_v0 = vrot.slane %v6819_v30, 2  ;;  %v4485_v49 = vmax.f32 %v4357_v37, 0.0  ;;  %v11438_v37 = vpop.xlane.xlu1 %4835 }
 0x3ce   : > { %v11419_v23 = vsel %vm5808_vm3, %v6960_v47, %v11351_v56  ;;  %v6766_v58 = vrot.slane %v6765_v17, 1  ;;  %v6601_v31 = vrot.slane %v6600_v20, 4  ;;  %v5072_v60 = vadd.f32 %v10863_v11, %v11169_v25  ;;  %v11432_v25 = vpop.xlane.xlu0 %4832 }
 0x3cf   : > { %v4924_v22 = vsel %vm1895_vm0, %v4612_v61, 0.0  ;;  %v6821_v34 = vadd.f32 %v6820_v0, %v6819_v30  ;;  %v4365_v56 = vadd.f32 %v11089_v52, %v12589_v27  ;;  %v4620_v29 = vmul.f32 %v11108_v43, %v4485_v49 }
 0x3d0   : > { %v6767_v63 = vadd.f32 %v6766_v58, %v6765_v17  ;;  %v6602_v26 = vadd.f32 %v6601_v31, %v6600_v20  ;;  %4925 = vadd.xlane.f32.xlu0 %v4924_v22  ;;  %v6656_v6 = vsel %vm1895_vm0, %v4485_v49, 0.0  ;;  %v5443_v46 = vrot.slane %v5071_v9, %v12569_v44 }
 0x3d1   : > { %v5447_v57 = vrot.slane %v5072_v60, %v12569_v44  ;;  %v6822_v15 = vrot.slane %v6821_v34, 1  ;;  %v6657_v61 = vrot.slane %v6656_v6, 4  ;;  %v4948_v17 = vsel %vm1895_vm0, %v4620_v29, 0.0 }
 0x3d2   : > { %v6968_v19 = vmul.f32 0.125, %v6767_v63  ;;  %v6603_v47 = vrot.slane %v6602_v26, 2  ;;  %v5843_v30 = vsel %vm5812_vm5, %v5443_v46, %v5842_v51  ;;  %v4493_v20 = vmax.f32 %v4365_v56, 0.0  ;;  %4949 = vadd.xlane.f32.xlu1 %v4948_v17 }
 0x3d3   : > { %v4373_v18 = vadd.f32 %v11089_v52, %v10726_v50  ;;  %v6823_v0 = vadd.f32 %v6822_v15, %v6821_v34  ;;  %v6658_v22 = vadd.f32 %v6657_v61, %v6656_v6  ;;  %v5844_v49 = vsel %vm5814_vm6, %v5447_v57, %v5843_v30  ;;  %v11456_v15 = vpop.xlane.xlu0 %4838 }
 0x3d4   : > { %v11442_v58 = vsel %vm5808_vm3, %v6968_v19, %v11356_v24  ;;  %v6604_v31 = vadd.f32 %v6603_v47, %v6602_v26  ;;  %v4628_v9 = vmul.f32 %v11108_v43, %v4493_v20  ;;  %v6712_v51 = vsel %vm1895_vm0, %v4493_v20, 0.0 }
 0x3d5   : > { %v4501_v60 = vmax.f32 %v4373_v18, 0.0  ;;  %v6976_v63 = vmul.f32 0.125, %v6823_v0  ;;  %v6659_v50 = vrot.slane %v6658_v22, 2  ;;  %v6713_v56 = vrot.slane %v6712_v51, 4 }
 0x3d6   : > { %v6605_v27 = vrot.slane %v6604_v31, 1  ;;  %v4972_v29 = vsel %vm1895_vm0, %v4628_v9, 0.0  ;;  %v5073_v26 = vadd.f32 %v10863_v11, %v11187_v4  ;;  %v5074_v30 = vadd.f32 %v10863_v11, %v11192_v16  ;;  %v11462_v4 = vpop.xlane.xlu1 %4841 }
 0x3d7   : > { %v4636_v24 = vmul.f32 %v11108_v43, %v4501_v60  ;;  %v6768_v34 = vsel %vm1895_vm0, %v4501_v60, 0.0  ;;  %v11454_v6 = vsel %vm5808_vm3, %v6976_v63, %v11381_v45  ;;  %v6660_v57 = vadd.f32 %v6659_v50, %v6658_v22  ;;  %4973 = vadd.xlane.f32.xlu0 %v4972_v29 }
 0x3d8   : > { %v6606_v46 = vadd.f32 %v6605_v27, %v6604_v31  ;;  %v6714_v19 = vadd.f32 %v6713_v56, %v6712_v51  ;;  %v6769_v61 = vrot.slane %v6768_v34, 4  ;;  %v5451_v17 = vrot.slane %v5073_v26, %v12569_v44  ;;  %v12590_v51 = vld [vmem:[#allocation56_spill] sm:$0xff] }
 0x3d9   : > { %v4996_v47 = vsel %vm1895_vm0, %v4636_v24, 0.0  ;;  %v6661_v45 = vrot.slane %v6660_v57, 1  ;;  %v4381_v0 = vadd.f32 %v11089_v52, %v10847_v36  ;;  %v5455_v9 = vrot.slane %v5074_v30, %v12569_v44 }
 0x3da   : > { %v6945_v20 = vmul.f32 0.125, %v6606_v46  ;;  %v6715_v18 = vrot.slane %v6714_v19, 2  ;;  %4997 = vadd.xlane.f32.xlu1 %v4996_v47  ;;  %v6770_v31 = vadd.f32 %v6769_v61, %v6768_v34  ;;  %v5845_v22 = vsel %vm5816_vm7, %v5451_v17, %v5844_v49  ;;  %v11482_v46 = vpop.xlane.xlu0 %4844  ;;  %v11486_v17 = vpop.xlane.xlu1 %4847 }
 0x3db   : > { %v4350_v60 = vadd.f32 %v11089_v52, %v12590_v51  ;;  %v6662_v63 = vadd.f32 %v6661_v45, %v6660_v57  ;;  %5944 = vst.msk [vmem:[%s10992_s12 + $0x20] sm:$0xff] %vm5939_vm8, %v5845_v22  ;;  %v4509_v50 = vmax.f32 %v4381_v0, 0.0  ;;  %v5075_v36 = vadd.f32 %v10863_v11, %v11207_v33 }
 0x3dc   : > { %v11472_v16 = vsel %vm5810_vm4, %v6945_v20, %v11387_v12  ;;  %v6716_v27 = vadd.f32 %v6715_v18, %v6714_v19  ;;  %v6771_v56 = vrot.slane %v6770_v31, 2  ;;  %v5076_v49 = vadd.f32 %v10863_v11, %v11211_v38 }
 0x3dd   : > { %v4478_v29 = vmax.f32 %v4350_v60, 0.0  ;;  %v6953_v24 = vmul.f32 0.125, %v6662_v63  ;;  %v4644_v26 = vmul.f32 %v11108_v43, %v4509_v50  ;;  %v6824_v12 = vsel %vm1895_vm0, %v4509_v50, 0.0  ;;  %v12591_v63 = vld [vmem:[#allocation59_spill] sm:$0xff] }
 0x3de   : > { %v6717_v34 = vrot.slane %v6716_v27, 1  ;;  %v6772_v57 = vadd.f32 %v6771_v56, %v6770_v31  ;;  %v6825_v19 = vrot.slane %v6824_v12, 4  ;;  %v5459_v31 = vrot.slane %v5075_v36, %v12569_v44 }
 0x3df   : > { %v4613_v47 = vmul.f32 %v11108_v43, %v4478_v29  ;;  %v6607_v61 = vsel %vm1895_vm0, %v4478_v29, 0.0  ;;  %v11490_v33 = vsel %vm5810_vm4, %v6953_v24, %v11406_v39  ;;  %v5020_v30 = vsel %vm1895_vm0, %v4644_v26, 0.0  ;;  %v12592_v29 = vld [vmem:[#allocation63_spill] sm:$0xff] }
 0x3e0   : > { %v6718_v38 = vadd.f32 %v6717_v34, %v6716_v27  ;;  %v6608_v20 = vrot.slane %v6607_v61, 4  ;;  %v6773_v45 = vrot.slane %v6772_v57, 1  ;;  %v6826_v18 = vadd.f32 %v6825_v19, %v6824_v12  ;;  %5021 = vadd.xlane.f32.xlu0 %v5020_v30  ;;  %v11506_v19 = vpop.xlane.xlu0 %4850 }
 0x3e1   : > { %v4927_v0 = vsel %vm1895_vm0, %v4613_v47, 0.0  ;;  %v5463_v60 = vrot.slane %v5076_v49, %v12569_v44  ;;  %v4358_v39 = vadd.f32 %v11089_v52, %v12591_v63  ;;  %v5846_v56 = vsel %vm5804_vm1, %v5459_v31, %v5455_v9  ;;  %v11510_v9 = vpop.xlane.xlu1 %4853 }
 0x3e2   : > { %v6961_v22 = vmul.f32 0.125, %v6718_v38  ;;  %v6609_v51 = vadd.f32 %v6608_v20, %v6607_v61  ;;  %4928 = vadd.xlane.f32.xlu1 %v4927_v0  ;;  %v6774_v50 = vadd.f32 %v6773_v45, %v6772_v57  ;;  %v6827_v27 = vrot.slane %v6826_v18, 2 }
 0x3e3   : > { %v4366_v24 = vadd.f32 %v11089_v52, %v12592_v29  ;;  %v5847_v26 = vsel %vm5806_vm2, %v5463_v60, %v5846_v56  ;;  %v4486_v12 = vmax.f32 %v4358_v39, 0.0  ;;  %v5077_v57 = vadd.f32 %v10863_v11, %v11232_v13  ;;  %v12593_v56 = vld [vmem:[#allocation79_spill] sm:$0xff] }
 0x3e4   : > { %v11503_v34 = vsel %vm5810_vm4, %v6961_v22, %v11419_v23  ;;  %v6610_v36 = vrot.slane %v6609_v51, 2  ;;  %v6969_v49 = vmul.f32 0.125, %v6774_v50  ;;  %v6828_v47 = vadd.f32 %v6827_v27, %v6826_v18 }
 0x3e5   : > { %v4494_v61 = vmax.f32 %v4366_v24, 0.0  ;;  %v4621_v52 = vmul.f32 %v11108_v43, %v4486_v12  ;;  %v6663_v23 = vsel %vm1895_vm0, %v4486_v12, 0.0  ;;  %v5078_v30 = vadd.f32 %v10863_v11, %v11236_v41  ;;  %v11534_v24 = vpop.xlane.xlu0 %4856 }
 0x3e6   : > { %v6611_v38 = vadd.f32 %v6610_v36, %v6609_v51  ;;  %v11518_v20 = vsel %vm5810_vm4, %v6969_v49, %v11442_v58  ;;  %v6829_v45 = vrot.slane %v6828_v47, 1  ;;  %v6664_v18 = vrot.slane %v6663_v23, 4 }
 0x3e7   : > { %v4629_v0 = vmul.f32 %v11108_v43, %v4494_v61  ;;  %v4951_v13 = vsel %vm1895_vm0, %v4621_v52, 0.0  ;;  %v6719_v22 = vsel %vm1895_vm0, %v4494_v61, 0.0  ;;  %v5467_v51 = vrot.slane %v5077_v57, %v12569_v44  ;;  %v11530_v43 = vld [vmem:[%s12074_s7] ss:$0 sm:$0xff]  ;;  %v11538_v61 = vpop.xlane.xlu1 %4859 }
 0x3e8   : > { %v6612_v31 = vrot.slane %v6611_v38, 1  ;;  %v6830_v60 = vadd.f32 %v6829_v45, %v6828_v47  ;;  %v6665_v63 = vadd.f32 %v6664_v18, %v6663_v23  ;;  %4952 = vadd.xlane.f32.xlu0 %v4951_v13  ;;  %v6720_v39 = vrot.slane %v6719_v22, 4 }
 0x3e9   : > { %v4975_v41 = vsel %vm1895_vm0, %v4629_v0, 0.0  ;;  %v5848_v58 = vsel %vm5808_vm3, %v5467_v51, %v5847_v26  ;;  %v5471_v27 = vrot.slane %v5078_v30, %v12569_v44  ;;  %v4374_v29 = vadd.f32 %v11530_v43, %v12593_v56 }
 0x3ea   : > { %v6613_v50 = vadd.f32 %v6612_v31, %v6611_v38  ;;  %4976 = vadd.xlane.f32.xlu1 %v4975_v41  ;;  %v6977_v36 = vmul.f32 0.125, %v6830_v60  ;;  %v6666_v12 = vrot.slane %v6665_v63, 2  ;;  %v6721_v49 = vadd.f32 %v6720_v39, %v6719_v22 }
 0x3eb   : > { %v4382_v47 = vadd.f32 %v11530_v43, %v10877_v35  ;;  %v5849_v57 = vsel %vm5810_vm4, %v5471_v27, %v5848_v58  ;;  %v4502_v38 = vmax.f32 %v4374_v29, 0.0  ;;  %v5079_v52 = vadd.f32 %v10863_v11, %v11251_v10  ;;  %v11554_v35 = vld [vmem:[%s12075_s8] ss:$0 sm:$0xff] }
 0x3ec   : > { %v6946_v26 = vmul.f32 0.125, %v6613_v50  ;;  %v11545_v23 = vsel %vm5810_vm4, %v6977_v36, %v11454_v6  ;;  %v6667_v30 = vadd.f32 %v6666_v12, %v6665_v63  ;;  %v6722_v45 = vrot.slane %v6721_v49, 2  ;;  %v11565_v50 = vpop.xlane.xlu0 %4862  ;;  %v11568_v36 = vpop.xlane.xlu1 %4865 }
 0x3ed   : > { %v4510_v18 = vmax.f32 %v4382_v47, 0.0  ;;  %v4637_v31 = vmul.f32 %v11554_v35, %v4502_v38  ;;  %v6775_v10 = vsel %vm1895_vm0, %v4502_v38, 0.0  ;;  %v5475_v13 = vrot.slane %v5079_v52, %v12569_v44  ;;  %v12594_v47 = vld [vmem:[#allocation24_spill] sm:$0xff] }
 0x3ee   : > { %v11549_v0 = vsel %vm5812_vm5, %v6946_v26, %v11472_v16  ;;  %v6668_v6 = vrot.slane %v6667_v30, 1  ;;  %v6723_v22 = vadd.f32 %v6722_v45, %v6721_v49  ;;  %v6776_v51 = vrot.slane %v6775_v10, 4 }
 0x3ef   : > { %v4645_v60 = vmul.f32 %v11554_v35, %v4510_v18  ;;  %v4999_v63 = vsel %vm1895_vm0, %v4637_v31, 0.0  ;;  %v6831_v16 = vsel %vm1895_vm0, %v4510_v18, 0.0  ;;  %v5850_v41 = vsel %vm5812_vm5, %v5475_v13, %v5849_v57  ;;  %v12595_v57 = vld [vmem:[#allocation60_spill] sm:$0xff] }
 0x3f0   : > { %v5080_v39 = vadd.f32 %v10863_v11, %v11254_v53  ;;  %v6669_v58 = vadd.f32 %v6668_v6, %v6667_v30  ;;  %v6724_v27 = vrot.slane %v6723_v22, 1  ;;  %v6777_v56 = vadd.f32 %v6776_v51, %v6775_v10  ;;  %5000 = vadd.xlane.f32.xlu0 %v4999_v63 }
 0x3f1   : > { %v5023_v29 = vsel %vm1895_vm0, %v4645_v60, 0.0  ;;  %v6832_v12 = vrot.slane %v6831_v16, 4  ;;  %v4351_v26 = vadd.f32 %v11530_v43, %v12594_v47  ;;  %v4359_v53 = vadd.f32 %v11530_v43, %v12595_v57 }
 0x3f2   : > { %5024 = vadd.xlane.f32.xlu1 %v5023_v29  ;;  %v5479_v49 = vrot.slane %v5080_v39, %v12569_v44  ;;  %v6954_v38 = vmul.f32 0.125, %v6669_v58  ;;  %v6725_v52 = vadd.f32 %v6724_v27, %v6723_v22  ;;  %v6778_v30 = vrot.slane %v6777_v56, 2  ;;  %v11593_v29 = vpop.xlane.xlu1 %4871 }
 0x3f3   : > { %v5081_v45 = vadd.f32 %v10863_v11, %v11270_v2  ;;  %v6833_v18 = vadd.f32 %v6832_v12, %v6831_v16  ;;  %v4479_v10 = vmax.f32 %v4351_v26, 0.0  ;;  %v4487_v13 = vmax.f32 %v4359_v53, 0.0  ;;  %v11586_v16 = vpop.xlane.xlu0 %4868 }
 0x3f4   : > { %v5851_v31 = vsel %vm5814_vm6, %v5479_v49, %v5850_v41  ;;  %v11580_v6 = vsel %vm5812_vm5, %v6954_v38, %v11490_v33  ;;  %v6962_v51 = vmul.f32 0.125, %v6725_v52  ;;  %v6779_v60 = vadd.f32 %v6778_v30, %v6777_v56 }
 0x3f5   : > { %v5483_v63 = vrot.slane %v5081_v45, %v12569_v44  ;;  %v6834_v39 = vrot.slane %v6833_v18, 2  ;;  %v4614_v22 = vmul.f32 %v11554_v35, %v4479_v10  ;;  %v6614_v58 = vsel %vm1895_vm0, %v4479_v10, 0.0  ;;  %v12596_v45 = vld [vmem:[#allocation64_spill] sm:$0xff] }
 0x3f6   : > { %v4622_v2 = vmul.f32 %v11554_v35, %v4487_v13  ;;  %v11590_v41 = vsel %vm5812_vm5, %v6962_v51, %v11503_v34  ;;  %v6780_v33 = vrot.slane %v6779_v60, 1  ;;  %v6615_v27 = vrot.slane %v6614_v58, 4  ;;  %v12597_v51 = vld [vmem:[#allocation69_spill] sm:$0xff] }
 0x3f7   : > { %v6670_v56 = vsel %vm1895_vm0, %v4487_v13, 0.0  ;;  %v6835_v12 = vadd.f32 %v6834_v39, %v6833_v18  ;;  %v4930_v49 = vsel %vm1895_vm0, %v4614_v22, 0.0  ;;  %v5852_v34 = vsel %vm5816_vm7, %v5483_v63, %v5851_v31 }
 0x3f8   : > { %v4954_v47 = vsel %vm1895_vm0, %v4622_v2, 0.0  ;;  %v6671_v26 = vrot.slane %v6670_v56, 4  ;;  %v6781_v57 = vadd.f32 %v6780_v33, %v6779_v60  ;;  %v6616_v53 = vadd.f32 %v6615_v27, %v6614_v58  ;;  %4931 = vadd.xlane.f32.xlu0 %v4930_v49  ;;  %5945 = vst.msk [vmem:[%s10992_s12 + $0x28] sm:$0xff] %vm5939_vm8, %v5852_v34  ;;  %v11609_v2 = vpop.xlane.xlu0 %4874  ;;  %v11616_v49 = vpop.xlane.xlu1 %4877 }
 0x3f9   : > { %4955 = vadd.xlane.f32.xlu1 %v4954_v47  ;;  %v6836_v38 = vrot.slane %v6835_v12, 1  ;;  %v5082_v30 = vadd.f32 %v10863_v11, %v11275_v8  ;;  %v4367_v18 = vadd.f32 %v11530_v43, %v12596_v45  ;;  %v4375_v60 = vadd.f32 %v11530_v43, %v12597_v51 }
 0x3fa   : > { %v6672_v52 = vadd.f32 %v6671_v26, %v6670_v56  ;;  %v6970_v10 = vmul.f32 0.125, %v6781_v57  ;;  %v6617_v13 = vrot.slane %v6616_v53, 2  ;;  %v5083_v39 = vadd.f32 %v10863_v11, %v11288_v40 }
 0x3fb   : > { %v6837_v22 = vadd.f32 %v6836_v38, %v6835_v12  ;;  %v5487_v63 = vrot.slane %v5082_v30, %v12569_v44  ;;  %v4495_v58 = vmax.f32 %v4367_v18, 0.0  ;;  %v4503_v27 = vmax.f32 %v4375_v60, 0.0 }
 0x3fc   : > { %v6673_v31 = vrot.slane %v6672_v52, 2  ;;  %v11613_v8 = vsel %vm5812_vm5, %v6970_v10, %v11518_v20  ;;  %v6618_v33 = vadd.f32 %v6617_v13, %v6616_v53  ;;  %v5491_v56 = vrot.slane %v5083_v39, %v12569_v44 }
 0x3fd   : > { %v6978_v47 = vmul.f32 0.125, %v6837_v22  ;;  %v4630_v40 = vmul.f32 %v11554_v35, %v4495_v58  ;;  %v6726_v12 = vsel %vm1895_vm0, %v4495_v58, 0.0  ;;  %v4638_v38 = vmul.f32 %v11554_v35, %v4503_v27 }
 0x3fe   : > { %v6674_v26 = vadd.f32 %v6673_v31, %v6672_v52  ;;  %v6619_v57 = vrot.slane %v6618_v33, 1  ;;  %v6727_v34 = vrot.slane %v6726_v12, 4  ;;  %v6782_v30 = vsel %vm1895_vm0, %v4503_v27, 0.0  ;;  %v11633_v31 = vpop.xlane.xlu0 %4880 }
 0x3ff   : > { %v11624_v20 = vsel %vm5812_vm5, %v6978_v47, %v11545_v23  ;;  %v4978_v45 = vsel %vm1895_vm0, %v4630_v40, 0.0  ;;  %v6783_v18 = vrot.slane %v6782_v30, 4  ;;  %v5002_v13 = vsel %vm1895_vm0, %v4638_v38, 0.0 }
 0x400   : > { %v6675_v53 = vrot.slane %v6674_v26, 1  ;;  %v6620_v10 = vadd.f32 %v6619_v57, %v6618_v33  ;;  %v6728_v52 = vadd.f32 %v6727_v34, %v6726_v12  ;;  %4979 = vadd.xlane.f32.xlu0 %v4978_v45  ;;  %v5853_v51 = vsel %vm5804_vm1, %v5491_v56, %v5487_v63  ;;  %5003 = vadd.xlane.f32.xlu1 %v5002_v13  ;;  %v12598_v33 = vld [vmem:[#allocation26_spill] sm:$0xff]  ;;  %v11639_v63 = vpop.xlane.xlu1 %4883 }
 0x401   : > { %v6784_v39 = vadd.f32 %v6783_v18, %v6782_v30  ;;  %v5084_v22 = vadd.f32 %v10863_v11, %v11294_v32  ;;  %v4383_v23 = vadd.f32 %v11530_v43, %v10883_v54  ;;  %v4344_v47 = vadd.f32 %v11530_v43, %v12598_v33 }
 0x402   : > { %v6676_v60 = vadd.f32 %v6675_v53, %v6674_v26  ;;  %v6947_v58 = vmul.f32 0.125, %v6620_v10  ;;  %v6729_v27 = vrot.slane %v6728_v52, 2  ;;  %v5085_v40 = vadd.f32 %v10863_v11, %v11313_v62 }
 0x403   : > { %v6785_v26 = vrot.slane %v6784_v39, 2  ;;  %v5495_v12 = vrot.slane %v5084_v22, %v12569_v44  ;;  %v4511_v32 = vmax.f32 %v4383_v23, 0.0  ;;  %v4472_v34 = vmax.f32 %v4344_v47, 0.0 }
 0x404   : > { %v6955_v56 = vmul.f32 0.125, %v6676_v60  ;;  %v11644_v54 = vsel %vm5814_vm6, %v6947_v58, %v11549_v0  ;;  %v6730_v57 = vadd.f32 %v6729_v27, %v6728_v52  ;;  %v5499_v38 = vrot.slane %v5085_v40, %v12569_v44  ;;  %v11657_v58 = vpop.xlane.xlu0 %4886  ;;  %v11663_v33 = vpop.xlane.xlu1 %4889 }
 0x405   : > { %v6786_v62 = vadd.f32 %v6785_v26, %v6784_v39  ;;  %v5854_v53 = vsel %vm5806_vm2, %v5495_v12, %v5853_v51  ;;  %v4646_v45 = vmul.f32 %v11554_v35, %v4511_v32  ;;  %v6838_v10 = vsel %vm1895_vm0, %v4511_v32, 0.0  ;;  %v12599_v26 = vld [vmem:[#allocation78_spill] sm:$0xff] }
 0x406   : > { %v11649_v30 = vsel %vm5814_vm6, %v6955_v56, %v11580_v6  ;;  %v6731_v18 = vrot.slane %v6730_v57, 1  ;;  %v4607_v13 = vmul.f32 %v11554_v35, %v4472_v34  ;;  %v6565_v0 = vsel %vm1895_vm0, %v4472_v34, 0.0  ;;  %v12600_v34 = vld [vmem:[#allocation81_spill] sm:$0xff] }
 0x407   : > { %v6787_v52 = vrot.slane %v6786_v62, 1  ;;  %v5026_v60 = vsel %vm1895_vm0, %v4646_v45, 0.0  ;;  %v6839_v22 = vrot.slane %v6838_v10, 4  ;;  %v6566_v23 = vrot.slane %v6565_v0, 4 }
 0x408   : > { %v6732_v6 = vadd.f32 %v6731_v18, %v6730_v57  ;;  %5027 = vadd.xlane.f32.xlu0 %v5026_v60  ;;  %v4909_v51 = vsel %vm1895_vm0, %v4607_v13, 0.0  ;;  %v5855_v39 = vsel %vm5808_vm3, %v5499_v38, %v5854_v53  ;;  %v5086_v27 = vadd.f32 %v10863_v11, %v11317_v55 }
 0x409   : > { %v6788_v47 = vadd.f32 %v6787_v52, %v6786_v62  ;;  %v6840_v40 = vadd.f32 %v6839_v22, %v6838_v10  ;;  %v6567_v56 = vadd.f32 %v6566_v23, %v6565_v0  ;;  %4910 = vadd.xlane.f32.xlu1 %v4909_v51  ;;  %v4352_v12 = vadd.f32 %v11530_v43, %v12599_v26 }
 0x40a   : > { %v6963_v32 = vmul.f32 0.125, %v6732_v6  ;;  %v5503_v57 = vrot.slane %v5086_v27, %v12569_v44  ;;  %v4360_v45 = vadd.f32 %v11530_v43, %v12600_v34  ;;  %v5087_v38 = vadd.f32 %v10863_v11, %v11336_v3  ;;  %v11683_v6 = vpop.xlane.xlu0 %4892  ;;  %v12602_v34 = vld [vmem:[#allocation84_spill] sm:$0xff] }
 0x40b   : > { %v6971_v53 = vmul.f32 0.125, %v6788_v47  ;;  %v6841_v55 = vrot.slane %v6840_v40, 2  ;;  %v6568_v18 = vrot.slane %v6567_v56, 2  ;;  %v4480_v13 = vmax.f32 %v4352_v12, 0.0  ;;  %v11689_v47 = vpop.xlane.xlu1 %4895 }
 0x40c   : > { %v11674_v62 = vsel %vm5814_vm6, %v6963_v32, %v11590_v41  ;;  %v5856_v10 = vsel %vm5810_vm4, %v5503_v57, %v5855_v39  ;;  %v4488_v0 = vmax.f32 %v4360_v45, 0.0  ;;  %v5507_v52 = vrot.slane %v5087_v38, %v12569_v44  ;;  %12601 = vst [vmem:[#allocation86_spill] sm:$0xff] %v11689_v47 }
 0x40d   : > { %v11680_v60 = vsel %vm5814_vm6, %v6971_v53, %v11613_v8  ;;  %v6842_v22 = vadd.f32 %v6841_v55, %v6840_v40  ;;  %v6569_v23 = vadd.f32 %v6568_v18, %v6567_v56  ;;  %v4615_v3 = vmul.f32 %v11554_v35, %v4480_v13  ;;  %v12603_v18 = vld [vmem:[#allocation71_spill] sm:$0xff] }
 0x40e   : > { %v6621_v51 = vsel %vm1895_vm0, %v4480_v13, 0.0  ;;  %v4623_v41 = vmul.f32 %v11554_v35, %v4488_v0  ;;  %v6677_v27 = vsel %vm1895_vm0, %v4488_v0, 0.0  ;;  %v5857_v39 = vsel %vm5812_vm5, %v5507_v52, %v5856_v10 }
 0x40f   : > { %v6843_v26 = vrot.slane %v6842_v22, 1  ;;  %v6570_v12 = vrot.slane %v6569_v23, 1  ;;  %v4933_v8 = vsel %vm1895_vm0, %v4615_v3, 0.0  ;;  %v6622_v40 = vrot.slane %v6621_v51, 4 }
 0x410   : > { %4934 = vadd.xlane.f32.xlu0 %v4933_v8  ;;  %v4957_v56 = vsel %vm1895_vm0, %v4623_v41, 0.0  ;;  %v6678_v32 = vrot.slane %v6677_v27, 4  ;;  %v5088_v57 = vadd.f32 %v10863_v11, %v11342_v1  ;;  %v4368_v45 = vadd.f32 %v11530_v43, %v12602_v34  ;;  %v11702_v34 = vpop.xlane.xlu0 %4898 }
 0x411   : > { %v6844_v38 = vadd.f32 %v6843_v26, %v6842_v22  ;;  %v6571_v53 = vadd.f32 %v6570_v12, %v6569_v23  ;;  %v6623_v55 = vadd.f32 %v6622_v40, %v6621_v51  ;;  %4958 = vadd.xlane.f32.xlu1 %v4957_v56  ;;  %v4376_v13 = vadd.f32 %v11530_v43, %v12603_v18  ;;  %v11707_v26 = vpop.xlane.xlu1 %4901 }
 0x412   : > { %v6679_v10 = vadd.f32 %v6678_v32, %v6677_v27  ;;  %v5511_v0 = vrot.slane %v5088_v57, %v12569_v44  ;;  %v4496_v52 = vmax.f32 %v4368_v45, 0.0  ;;  %v5089_v3 = vadd.f32 %v10863_v11, %v11362_v59 }
 0x413   : > { %v6979_v41 = vmul.f32 0.125, %v6844_v38  ;;  %v6940_v1 = vmul.f32 0.125, %v6571_v53  ;;  %v6624_v8 = vrot.slane %v6623_v55, 2  ;;  %v4504_v47 = vmax.f32 %v4376_v13, 0.0 }
 0x414   : > { %v6680_v22 = vrot.slane %v6679_v10, 2  ;;  %v5858_v23 = vsel %vm5814_vm6, %v5511_v0, %v5857_v39  ;;  %v4631_v51 = vmul.f32 %v11554_v35, %v4496_v52  ;;  %v6733_v27 = vsel %vm1895_vm0, %v4496_v52, 0.0 }
 0x415   : > { %v11711_v12 = vsel %vm5814_vm6, %v6979_v41, %v11624_v20  ;;  %v7185_v59 = vsel %vm5816_vm7, %v6940_v1, %v11161_v28  ;;  %v6625_v40 = vadd.f32 %v6624_v8, %v6623_v55  ;;  %v6734_v56 = vrot.slane %v6733_v27, 4  ;;  %v11727_v1 = vpop.xlane.xlu0 %4904 }
 0x416   : > { %7247 = vst.msk [vmem:[%s9613_s15 + $0x50] sm:$0xff] %vm1895_vm0, %v7185_v59  ;;  %v6681_v32 = vadd.f32 %v6680_v22, %v6679_v10  ;;  %v4981_v39 = vsel %vm1895_vm0, %v4631_v51, 0.0  ;;  %v4639_v57 = vmul.f32 %v11554_v35, %v4504_v47  ;;  %v6789_v45 = vsel %vm1895_vm0, %v4504_v47, 0.0  ;;  %v11734_v51 = vpop.xlane.xlu1 %4907 }
 0x417   : > { %v6626_v38 = vrot.slane %v6625_v40, 1  ;;  %v6735_v53 = vadd.f32 %v6734_v56, %v6733_v27  ;;  %4982 = vadd.xlane.f32.xlu0 %v4981_v39  ;;  %v6790_v20 = vrot.slane %v6789_v45, 4  ;;  %v5515_v18 = vrot.slane %v5089_v3, %v12569_v44 }
 0x418   : > { %v6682_v13 = vrot.slane %v6681_v32, 1  ;;  %v5005_v28 = vsel %vm1895_vm0, %v4639_v57, 0.0  ;;  %v5090_v55 = vadd.f32 %v10863_v11, %v11369_v14  ;;  %v4384_v10 = vadd.f32 %v11530_v43, %v10902_v5 }
 0x419   : > { %v6627_v0 = vadd.f32 %v6626_v38, %v6625_v40  ;;  %v6736_v52 = vrot.slane %v6735_v53, 2  ;;  %v6791_v41 = vadd.f32 %v6790_v20, %v6789_v45  ;;  %5006 = vadd.xlane.f32.xlu1 %v5005_v28  ;;  %v5859_v47 = vsel %vm5816_vm7, %v5515_v18, %v5858_v23  ;;  %v11754_v28 = vpop.xlane.xlu0 %4913 }
 0x41a   : > { %v6683_v8 = vadd.f32 %v6682_v13, %v6681_v32  ;;  %5946 = vst.msk [vmem:[%s10992_s12 + $0x30] sm:$0xff] %vm5939_vm8, %v5859_v47  ;;  %v5519_v3 = vrot.slane %v5090_v55, %v12569_v44  ;;  %v4512_v22 = vmax.f32 %v4384_v10, 0.0  ;;  %v5091_v14 = vadd.f32 %v10863_v11, %v11383_v48 }
 0x41b   : > { %v6948_v5 = vmul.f32 0.125, %v6627_v0  ;;  %v6737_v43 = vadd.f32 %v6736_v52, %v6735_v53  ;;  %v6792_v27 = vrot.slane %v6791_v41, 2  ;;  %v5092_v23 = vadd.f32 %v10863_v11, %v11392_v42  ;;  %v11763_v52 = vpop.xlane.xlu1 %4916 }
 0x41c   : > { %v6956_v59 = vmul.f32 0.125, %v6683_v8  ;;  %v4647_v40 = vmul.f32 %v11554_v35, %v4512_v22  ;;  %v6845_v56 = vsel %vm1895_vm0, %v4512_v22, 0.0  ;;  %v5523_v32 = vrot.slane %v5091_v14, %v12569_v44 }
 0x41d   : > { %v7192_v39 = vsel %vm5816_vm7, %v6948_v5, %v11644_v54  ;;  %v6738_v48 = vrot.slane %v6737_v43, 1  ;;  %v6793_v57 = vadd.f32 %v6792_v27, %v6791_v41  ;;  %v6846_v45 = vrot.slane %v6845_v56, 4 }
 0x41e   : > { %7248 = vst.msk [vmem:[%s9613_s15 + $0x58] sm:$0xff] %vm1895_vm0, %v7192_v39  ;;  %v7199_v38 = vsel %vm5816_vm7, %v6956_v59, %v11649_v30  ;;  %v5029_v42 = vsel %vm1895_vm0, %v4647_v40, 0.0  ;;  %v5860_v53 = vsel %vm5804_vm1, %v5523_v32, %v5519_v3  ;;  %v5527_v35 = vrot.slane %v5092_v23, %v12569_v44  ;;  %v11787_v39 = vpop.xlane.xlu0 %4937 }
 0x41f   : > { %7249 = vst.msk [vmem:[%s9613_s15 + $0x60] sm:$0xff] %vm1895_vm0, %v7199_v38  ;;  %v6739_v20 = vadd.f32 %v6738_v48, %v6737_v43  ;;  %v6794_v18 = vrot.slane %v6793_v57, 1  ;;  %v6847_v13 = vadd.f32 %v6846_v45, %v6845_v56  ;;  %5030 = vadd.xlane.f32.xlu0 %v5029_v42  ;;  %v5093_v54 = vadd.f32 %v10863_v11, %v11408_v21 }
 0x420   : > { %v5861_v55 = vsel %vm5806_vm2, %v5527_v35, %v5860_v53  ;;  %v5094_v30 = vadd.f32 %v10863_v11, %v11415_v7  ;;  %v5095_v10 = vadd.f32 %v10863_v11, %v11432_v25  ;;  %v5096_v0 = vadd.f32 %v10863_v11, %v11438_v37 }
 0x421   : > { %v6964_v41 = vmul.f32 0.125, %v6739_v20  ;;  %v6795_v47 = vadd.f32 %v6794_v18, %v6793_v57  ;;  %v6848_v8 = vrot.slane %v6847_v13, 2  ;;  %v5531_v21 = vrot.slane %v5093_v54, %v12569_v44 }
 0x422   : > { %v5535_v3 = vrot.slane %v5094_v30, %v12569_v44  ;;  %v5539_v22 = vrot.slane %v5095_v10, %v12569_v44  ;;  %v5543_v7 = vrot.slane %v5096_v0, %v12569_v44  ;;  %v5097_v25 = vadd.f32 %v10863_v11, %v11456_v15 }
 0x423   : > { %v7206_v37 = vsel %vm5816_vm7, %v6964_v41, %v11674_v62  ;;  %v6972_v14 = vmul.f32 0.125, %v6795_v47  ;;  %v6849_v5 = vadd.f32 %v6848_v8, %v6847_v13  ;;  %v5862_v43 = vsel %vm5808_vm3, %v5531_v21, %v5861_v55 }
 0x424   : > { %7250 = vst.msk [vmem:[%s9613_s15 + $0x68] sm:$0xff] %vm1895_vm0, %v7206_v37  ;;  %v5863_v27 = vsel %vm5810_vm4, %v5535_v3, %v5862_v43  ;;  %v5547_v23 = vrot.slane %v5097_v25, %v12569_v44  ;;  %v5098_v59 = vadd.f32 %v10863_v11, %v11462_v4  ;;  %v5099_v40 = vadd.f32 %v10863_v11, %v11482_v46 }
 0x425   : > { %v7213_v15 = vsel %vm5816_vm7, %v6972_v14, %v11680_v60  ;;  %v6850_v62 = vrot.slane %v6849_v5, 1  ;;  %v5864_v56 = vsel %vm5812_vm5, %v5539_v22, %v5863_v27  ;;  %v5100_v32 = vadd.f32 %v10863_v11, %v11486_v17  ;;  %v11796_v60 = vpop.xlane.xlu1 %4940 }
 0x426   : > { %7251 = vst.msk [vmem:[%s9613_s15 + $0x70] sm:$0xff] %vm1895_vm0, %v7213_v15  ;;  %v5865_v48 = vsel %vm5814_vm6, %v5543_v7, %v5864_v56  ;;  %v5551_v4 = vrot.slane %v5098_v59, %v12569_v44  ;;  %v5555_v46 = vrot.slane %v5099_v40, %v12569_v44  ;;  %v5101_v57 = vadd.f32 %v10863_v11, %v11506_v19 }
 0x427   : > { %v6851_v45 = vadd.f32 %v6850_v62, %v6849_v5  ;;  %v5866_v38 = vsel %vm5816_vm7, %v5547_v23, %v5865_v48  ;;  %v5559_v17 = vrot.slane %v5100_v32, %v12569_v44  ;;  %v5102_v42 = vadd.f32 %v10863_v11, %v11510_v9  ;;  %v12604_v62 = vld [vmem:[#allocation86_spill] sm:$0xff] }
 0x428   : > { %5947 = vst.msk [vmem:[%s10992_s12 + $0x38] sm:$0xff] %vm5939_vm8, %v5866_v38  ;;  %v5867_v53 = vsel %vm5804_vm1, %v5555_v46, %v5551_v4  ;;  %v5563_v35 = vrot.slane %v5101_v57, %v12569_v44  ;;  %v5103_v19 = vadd.f32 %v10863_v11, %v11534_v24  ;;  %v5104_v20 = vadd.f32 %v10863_v11, %v11538_v61 }
 0x429   : > { %v6980_v18 = vmul.f32 0.125, %v6851_v45  ;;  %v5868_v13 = vsel %vm5806_vm2, %v5559_v17, %v5867_v53  ;;  %v5567_v54 = vrot.slane %v5102_v42, %v12569_v44  ;;  %v5105_v9 = vadd.f32 %v10863_v11, %v11565_v50  ;;  %v4962_v50 = vpop.xlane.xlu0 %4961  ;;  %v4965_v3 = vpop.xlane.xlu1 %4964 }
 0x42a   : > { %v5869_v55 = vsel %vm5808_vm3, %v5563_v35, %v5868_v13  ;;  %v5571_v30 = vrot.slane %v5103_v19, %v12569_v44  ;;  %v5575_v10 = vrot.slane %v5104_v20, %v12569_v44  ;;  %v5106_v24 = vadd.f32 %v10863_v11, %v11568_v36 }
 0x42b   : > { %v7220_v61 = vsel %vm5816_vm7, %v6980_v18, %v11711_v12  ;;  %v5870_v0 = vsel %vm5810_vm4, %v5567_v54, %v5869_v55  ;;  %v5579_v41 = vrot.slane %v5105_v9, %v12569_v44  ;;  %v5107_v47 = vadd.f32 %v10863_v11, %v11586_v16 }
 0x42c   : > { %7252 = vst.msk [vmem:[%s9613_s15 + $0x78] sm:$0xff] %vm1895_vm0, %v7220_v61  ;;  %v5871_v8 = vsel %vm5812_vm5, %v5571_v30, %v5870_v0  ;;  %v5583_v21 = vrot.slane %v5106_v24, %v12569_v44  ;;  %v5108_v36 = vadd.f32 %v10863_v11, %v11593_v29  ;;  %v5109_v12 = vadd.f32 %v10863_v11, %v11609_v2 }
 0x42d   : > { %v5872_v22 = vsel %vm5814_vm6, %v5575_v10, %v5871_v8  ;;  %v5587_v7 = vrot.slane %v5107_v47, %v12569_v44  ;;  %v5110_v16 = vadd.f32 %v10863_v11, %v11616_v49  ;;  %v5111_v25 = vadd.f32 %v10863_v11, %v11633_v31  ;;  %v11863_v32 = vpop.xlane.xlu0 %4985  ;;  %v11870_v46 = vpop.xlane.xlu1 %4988 }
 0x42e   : > { %v5873_v37 = vsel %vm5816_vm7, %v5579_v41, %v5872_v22  ;;  %v5591_v14 = vrot.slane %v5108_v36, %v12569_v44  ;;  %v5595_v29 = vrot.slane %v5109_v12, %v12569_v44  ;;  %v5112_v2 = vadd.f32 %v10863_v11, %v11639_v63 }
 0x42f   : > { %5948 = vst.msk [vmem:[%s10992_s12 + $0x40] sm:$0xff] %vm5939_vm8, %v5873_v37  ;;  %v5874_v5 = vsel %vm5804_vm1, %v5587_v7, %v5583_v21  ;;  %v5599_v43 = vrot.slane %v5110_v16, %v12569_v44  ;;  %v5603_v49 = vrot.slane %v5111_v25, %v12569_v44  ;;  %v5113_v31 = vadd.f32 %v10863_v11, %v11657_v58 }
 0x430   : > { %v5875_v27 = vsel %vm5806_vm2, %v5591_v14, %v5874_v5  ;;  %v5607_v23 = vrot.slane %v5112_v2, %v12569_v44  ;;  %v5114_v59 = vadd.f32 %v10863_v11, %v11663_v33  ;;  %v5115_v63 = vadd.f32 %v10863_v11, %v11683_v6 }
 0x431   : > { %v5876_v40 = vsel %vm5808_vm3, %v5595_v29, %v5875_v27  ;;  %v5611_v15 = vrot.slane %v5113_v31, %v12569_v44  ;;  %v5116_v56 = vadd.f32 %v10863_v11, %v12604_v62  ;;  %v5117_v58 = vadd.f32 %v10863_v11, %v11702_v34  ;;  %v5010_v30 = vpop.xlane.xlu0 %5009  ;;  %v5013_v61 = vpop.xlane.xlu1 %5012 }
 0x432   : > { %v5877_v48 = vsel %vm5810_vm4, %v5599_v43, %v5876_v40  ;;  %v5615_v4 = vrot.slane %v5114_v59, %v12569_v44  ;;  %v5619_v33 = vrot.slane %v5115_v63, %v12569_v44  ;;  %v5118_v6 = vadd.f32 %v10863_v11, %v11707_v26 }
 0x433   : > { %v5878_v57 = vsel %vm5812_vm5, %v5603_v49, %v5877_v48  ;;  %v5623_v45 = vrot.slane %v5116_v56, %v12569_v44  ;;  %v5627_v34 = vrot.slane %v5117_v58, %v12569_v44  ;;  %v5119_v38 = vadd.f32 %v10863_v11, %v11727_v1 }
 0x434   : > { %v5879_v17 = vsel %vm5814_vm6, %v5607_v23, %v5878_v57  ;;  %v5881_v42 = vsel %vm5804_vm1, %v5619_v33, %v5615_v4  ;;  %v5631_v53 = vrot.slane %v5118_v6, %v12569_v44  ;;  %v5120_v26 = vadd.f32 %v10863_v11, %v11734_v51 }
 0x435   : > { %v5880_v35 = vsel %vm5816_vm7, %v5611_v15, %v5879_v17  ;;  %v5882_v19 = vsel %vm5806_vm2, %v5623_v45, %v5881_v42  ;;  %v5635_v20 = vrot.slane %v5119_v38, %v12569_v44  ;;  %v5122_v18 = vadd.f32 %v10863_v11, %v11754_v28  ;;  %v4920_v7 = vpop.xlane.xlu0 %4919 }
 0x436   : > { %5949 = vst.msk [vmem:[%s10992_s12 + $0x48] sm:$0xff] %vm5939_vm8, %v5880_v35  ;;  %v5883_v1 = vsel %vm5808_vm3, %v5627_v34, %v5882_v19  ;;  %v5639_v13 = vrot.slane %v5120_v26, %v12569_v44  ;;  %v5123_v54 = vadd.f32 %v10863_v11, %v11763_v52  ;;  %v5138_v55 = vadd.f32 %v10863_v11, %v4962_v50 }
 0x437   : > { %v5884_v51 = vsel %vm5810_vm4, %v5631_v53, %v5883_v1  ;;  %v5647_v9 = vrot.slane %v5122_v18, %v12569_v44  ;;  %v5139_v24 = vadd.f32 %v10863_v11, %v4965_v3  ;;  %v5154_v8 = vadd.f32 %v10863_v11, %v5010_v30  ;;  %v4944_v22 = vpop.xlane.xlu1 %4943 }
 0x438   : > { %v5885_v10 = vsel %vm5812_vm5, %v5635_v20, %v5884_v51  ;;  %v5651_v28 = vrot.slane %v5123_v54, %v12569_v44  ;;  %v5711_v41 = vrot.slane %v5138_v55, %v12569_v44  ;;  %v5155_v50 = vadd.f32 %v10863_v11, %v5013_v61 }
 0x439   : > { %v11900_v0 = vsel %vm5814_vm6, %v5639_v13, %v5885_v10  ;;  %v5715_v47 = vrot.slane %v5139_v24, %v12569_v44  ;;  %v5775_v36 = vrot.slane %v5154_v8, %v12569_v44  ;;  %v5130_v4 = vadd.f32 %v10863_v11, %v11787_v39 }
 0x43a   : > { %v5888_v52 = vsel %vm5804_vm1, %v5651_v28, %v5647_v9  ;;  %v5779_v12 = vrot.slane %v5155_v50, %v12569_v44  ;;  %v5131_v33 = vadd.f32 %v10863_v11, %v11796_v60  ;;  %v11937_v38 = vadd.f32 %v10863_v11, %v11863_v32 }
 0x43b   : > { %v11908_v21 = vsel %vm5804_vm1, %v5715_v47, %v5711_v41  ;;  %v5679_v57 = vrot.slane %v5130_v4, %v12569_v44  ;;  %v5124_v17 = vadd.f32 %v10863_v11, %v4920_v7  ;;  %v5132_v42 = vadd.f32 %v10863_v11, %v4944_v22 }
 0x43c   : > { %v11913_v3 = vsel %vm5804_vm1, %v5779_v12, %v5775_v36  ;;  %v5683_v34 = vrot.slane %v5131_v33, %v12569_v44  ;;  %v5147_v60 = vadd.f32 %v10863_v11, %v11870_v46  ;;  %v5743_v35 = vrot.slane %v11937_v38, %v12569_v44 }
 0x43d   : > { %v5655_v19 = vrot.slane %v5124_v17, %v12569_v44  ;;  %v5687_v32 = vrot.slane %v5132_v42, %v12569_v44 }
 0x43e   : > { %v4968_v25 = vpop.xlane.xlu0 %4967  ;;  %v5895_v26 = vsel %vm5804_vm1, %v5683_v34, %v5679_v57  ;;  %v5747_v41 = vrot.slane %v5147_v60, %v12569_v44 }
 0x43f   : > { %v4992_v16 = vpop.xlane.xlu1 %4991  ;;  %v5140_v18 = vadd.f32 %v10863_v11, %v4968_v25  ;;  %v5889_v47 = vsel %vm5806_vm2, %v5655_v19, %v5888_v52  ;;  %v5896_v36 = vsel %vm5806_vm2, %v5687_v32, %v5895_v26 }
 0x440   : > { %v5148_v51 = vadd.f32 %v10863_v11, %v4992_v16  ;;  %v5909_v32 = vsel %vm5804_vm1, %v5747_v41, %v5743_v35 }
 0x441   : > { %v5719_v16 = vrot.slane %v5140_v18, %v12569_v44 }
 0x442   : > { %v5751_v25 = vrot.slane %v5148_v51, %v12569_v44 }
 0x446   : > { %v11915_v14 = vpop.xlane.xlu0 %5015 }
 0x447   : > { %v4923_v37 = vpop.xlane.xlu1 %4922 }
 0x448   : > { %v5125_v39 = vadd.f32 %v10863_v11, %v4923_v37 }
 0x44a   : > { %v5659_v9 = vrot.slane %v5125_v39, %v12569_v44 }
 0x44c   : > { %v4947_v2 = vpop.xlane.xlu0 %4946  ;;  %v5890_v37 = vsel %vm5808_vm3, %v5659_v9, %v5889_v47 }
 0x44d   : > { %v5133_v53 = vadd.f32 %v10863_v11, %v4947_v2 }
 0x44e   : > { %v4971_v29 = vpop.xlane.xlu1 %4970 }
 0x44f   : > { %v5691_v55 = vrot.slane %v5133_v53, %v12569_v44  ;;  %v5141_v10 = vadd.f32 %v10863_v11, %v4971_v29 }
 0x451   : > { %v5897_v29 = vsel %vm5808_vm3, %v5691_v55, %v5896_v36  ;;  %v5723_v2 = vrot.slane %v5141_v10, %v12569_v44 }
 0x454   : > { %v4995_v43 = vpop.xlane.xlu0 %4994 }
 0x455   : > { %v5149_v8 = vadd.f32 %v10863_v11, %v4995_v43 }
 0x457   : > { %v11917_v5 = vpop.xlane.xlu1 %5018 }
 0x458   : > { %v5157_v51 = vadd.f32 %v10863_v11, %v11917_v5 }
 0x45d   : > { %v4926_v31 = vpop.xlane.xlu0 %4925 }
 0x45e   : > { %v5126_v1 = vadd.f32 %v10863_v11, %v4926_v31 }
 0x45f   : > { %v4950_v49 = vpop.xlane.xlu1 %4949 }
 0x460   : > { %v5134_v13 = vadd.f32 %v10863_v11, %v4950_v49  ;;  %v5663_v12 = vrot.slane %v5126_v1, %v12569_v44  ;;  %v5910_v1 = vsel %vm5806_vm2, %v5751_v25, %v5909_v32 }
 0x462   : > { %v5695_v22 = vrot.slane %v5134_v13, %v12569_v44  ;;  %v5891_v4 = vsel %vm5810_vm4, %v5663_v12, %v5890_v37  ;;  %v5156_v13 = vadd.f32 %v10863_v11, %v11915_v14  ;;  %v5787_v12 = vrot.slane %v5157_v51, %v12569_v44 }
 0x464   : > { %v4974_v23 = vpop.xlane.xlu0 %4973  ;;  %v5898_v33 = vsel %vm5810_vm4, %v5695_v22, %v5897_v29 }
 0x467   : > { %v11919_v27 = vpop.xlane.xlu1 %4997 }
 0x468   : > { %v5150_v38 = vadd.f32 %v10863_v11, %v11919_v27 }
 0x46d   : > { %v11921_v63 = vpop.xlane.xlu0 %5021 }
 0x46e   : > { %v5158_v10 = vadd.f32 %v10863_v11, %v11921_v63 }
 0x46f   : > { %v4929_v59 = vpop.xlane.xlu1 %4928 }
 0x470   : > { %v5127_v30 = vadd.f32 %v10863_v11, %v4929_v59  ;;  %v5142_v59 = vadd.f32 %v10863_v11, %v4974_v23 }
 0x472   : > { %v5667_v52 = vrot.slane %v5127_v30, %v12569_v44  ;;  %v5727_v26 = vrot.slane %v5142_v59, %v12569_v44 }
 0x474   : > { %v5892_v17 = vsel %vm5812_vm5, %v5667_v52, %v5891_v4 }
 0x475   : > { %v4953_v15 = vpop.xlane.xlu0 %4952 }
 0x476   : > { %v5135_v28 = vadd.f32 %v10863_v11, %v4953_v15 }
 0x477   : > { %v4977_v40 = vpop.xlane.xlu1 %4976 }
 0x478   : > { %v5699_v43 = vrot.slane %v5135_v28, %v12569_v44  ;;  %v5143_v57 = vadd.f32 %v10863_v11, %v4977_v40 }
 0x47a   : > { %v5899_v39 = vsel %vm5812_vm5, %v5699_v43, %v5898_v33 }
 0x47d   : > { %v11925_v56 = vpop.xlane.xlu0 %5000 }
 0x47e   : > { %v5151_v53 = vadd.f32 %v10863_v11, %v11925_v56  ;;  %v5731_v56 = vrot.slane %v5143_v57, %v12569_v44 }
 0x47f   : > { %v11923_v62 = vpop.xlane.xlu1 %5024 }
 0x480   : > { %v5763_v9 = vrot.slane %v5151_v53, %v12569_v44  ;;  %v5159_v5 = vadd.f32 %v10863_v11, %v11923_v62 }
 0x482   : > { %v5795_v37 = vrot.slane %v5159_v5, %v12569_v44 }
 0x485   : > { %v4932_v48 = vpop.xlane.xlu0 %4931 }
 0x486   : > { %v4956_v58 = vpop.xlane.xlu1 %4955  ;;  %v5128_v24 = vadd.f32 %v10863_v11, %v4932_v48 }
 0x487   : > { %v5136_v50 = vadd.f32 %v10863_v11, %v4956_v58 }
 0x488   : > { %v5671_v49 = vrot.slane %v5128_v24, %v12569_v44 }
 0x489   : > { %v5703_v15 = vrot.slane %v5136_v50, %v12569_v44 }
 0x48a   : > { %v5893_v40 = vsel %vm5814_vm6, %v5671_v49, %v5892_v17 }
 0x48b   : > { %v5900_v27 = vsel %vm5814_vm6, %v5703_v15, %v5899_v39 }
 0x48d   : > { %v11931_v6 = vpop.xlane.xlu1 %5003  ;;  %v4980_v45 = vpop.xlane.xlu0 %4979 }
 0x48e   : > { %v5144_v23 = vadd.f32 %v10863_v11, %v4980_v45  ;;  %v5152_v19 = vadd.f32 %v10863_v11, %v11931_v6  ;;  %v5759_v6 = vrot.slane %v5150_v38, %v12569_v44 }
 0x490   : > { %v5767_v28 = vrot.slane %v5152_v19, %v12569_v44 }
 0x495   : > { %v11953_v54 = vpop.xlane.xlu0 %5027 }
 0x496   : > { %v4911_v20 = vpop.xlane.xlu1 %4910  ;;  %v5160_v36 = vadd.f32 %v10863_v11, %v11953_v54 }
 0x497   : > { %v5121_v46 = vadd.f32 %v10863_v11, %v4911_v20  ;;  %v5903_v20 = vsel %vm5806_vm2, %v5719_v16, %v11908_v21  ;;  %v5791_v16 = vrot.slane %v5158_v10, %v12569_v44 }
 0x498   : > { %v5904_v21 = vsel %vm5808_vm3, %v5723_v2, %v5903_v20  ;;  %v5799_v29 = vrot.slane %v5160_v36, %v12569_v44 }
 0x499   : > { %v5643_v61 = vrot.slane %v5121_v46, %v12569_v44  ;;  %v5735_v46 = vrot.slane %v5144_v23, %v12569_v44  ;;  %v5905_v14 = vsel %vm5810_vm4, %v5727_v26, %v5904_v21 }
 0x49b   : > { %v5887_v7 = vsel %vm5816_vm7, %v5643_v61, %v11900_v0  ;;  %v5755_v0 = vrot.slane %v5149_v8, %v12569_v44  ;;  %v5906_v61 = vsel %vm5812_vm5, %v5731_v56, %v5905_v14  ;;  %v5783_v8 = vrot.slane %v5156_v13, %v12569_v44 }
 0x49c   : > { %5950 = vst.msk [vmem:[%s10992_s12 + $0x50] sm:$0xff] %vm5939_vm8, %v5887_v7  ;;  %v5907_v63 = vsel %vm5814_vm6, %v5735_v46, %v5906_v61 }
 0x49d   : > { %v4935_v31 = vpop.xlane.xlu0 %4934  ;;  %v5911_v30 = vsel %vm5808_vm3, %v5755_v0, %v5910_v1  ;;  %v5917_v54 = vsel %vm5806_vm2, %v5783_v8, %v11913_v3 }
 0x49e   : > { %v5129_v58 = vadd.f32 %v10863_v11, %v4935_v31  ;;  %v4959_v48 = vpop.xlane.xlu1 %4958  ;;  %v5912_v50 = vsel %vm5810_vm4, %v5759_v6, %v5911_v30  ;;  %v5918_v43 = vsel %vm5808_vm3, %v5787_v12, %v5917_v54 }
 0x49f   : > { %v5137_v34 = vadd.f32 %v10863_v11, %v4959_v48  ;;  %v5913_v22 = vsel %vm5812_vm5, %v5763_v9, %v5912_v50  ;;  %v5919_v31 = vsel %vm5810_vm4, %v5791_v16, %v5918_v43 }
 0x4a0   : > { %v5675_v42 = vrot.slane %v5129_v58, %v12569_v44  ;;  %v5914_v25 = vsel %vm5814_vm6, %v5767_v28, %v5913_v22  ;;  %v5920_v0 = vsel %vm5812_vm5, %v5795_v37, %v5919_v31 }
 0x4a1   : > { %v5707_v60 = vrot.slane %v5137_v34, %v12569_v44  ;;  %v5921_v15 = vsel %vm5814_vm6, %v5799_v29, %v5920_v0 }
 0x4a2   : > { %v5894_v45 = vsel %vm5816_vm7, %v5675_v42, %v5893_v40 }
 0x4a3   : > { %5951 = vst.msk [vmem:[%s10992_s12 + $0x58] sm:$0xff] %vm5939_vm8, %v5894_v45  ;;  %v5901_v18 = vsel %vm5816_vm7, %v5707_v60, %v5900_v27 }
 0x4a4   : > { %5952 = vst.msk [vmem:[%s10992_s12 + $0x60] sm:$0xff] %vm5939_vm8, %v5901_v18  ;;  %v4983_v35 = vpop.xlane.xlu0 %4982 }
 0x4a5   : > { %v5145_v55 = vadd.f32 %v10863_v11, %v4983_v35 }
 0x4a6   : > { %v5007_v24 = vpop.xlane.xlu1 %5006 }
 0x4a7   : > { %v5739_v41 = vrot.slane %v5145_v55, %v12569_v44  ;;  %v5153_v47 = vadd.f32 %v10863_v11, %v5007_v24 }
 0x4a9   : > { %v5908_v62 = vsel %vm5816_vm7, %v5739_v41, %v5907_v63  ;;  %v5771_v7 = vrot.slane %v5153_v47, %v12569_v44 }
 0x4aa   : > { %5953 = vst.msk [vmem:[%s10992_s12 + $0x68] sm:$0xff] %vm5939_vm8, %v5908_v62 }
 0x4ab   : > { %v5915_v52 = vsel %vm5816_vm7, %v5771_v7, %v5914_v25 }
 0x4ac   : > { %5954 = vst.msk [vmem:[%s10992_s12 + $0x70] sm:$0xff] %vm5939_vm8, %v5915_v52  ;;  %v5031_v2 = vpop.xlane.xlu0 %5030 }
 0x4ad   : > { %v5161_v49 = vadd.f32 %v10863_v11, %v5031_v2 }
 0x4af   : > { %v5803_v59 = vrot.slane %v5161_v49, %v12569_v44 }
 0x4b1   : > { %v5922_v58 = vsel %vm5816_vm7, %v5803_v59, %v5921_v15 }
 0x4b2   : > { %5955 = vst.msk [vmem:[%s10992_s12 + $0x78] sm:$0xff] %vm5939_vm8, %v5922_v58 }
 0x4b3 PF: > { %s24_s21 = sadd.s32 1, %s7425_s21  }
 0x4b4   : > { %p21_p5 = scmp.ge.s32.totalorder %s24_s21, 4  }
 0x4b6   :  { %23 = sbr.rel (!%p21_p5) target bundleno = 3 (0x3), region = 108 }

</bundles_post_ra>
